<compile_context>
chip_gen: v7x
topology: tpu7x:2x2x1
jax: 0.10.0
libtpu: 0.0.40
codegen_flags: <defaults>
</compile_context>

<pallas_src>
import functools

import jax
import jax.numpy as jnp
from jax.experimental import pallas as pl
from jax.experimental.pallas import tpu as pltpu


def _round_up(x, m):
    return ((x + m - 1) // m) * m


def _pick_time_chunk(T, Bp, G, itemsize, target_bytes=2 << 20):
    """Largest divisor of T whose gates0 buffer stays under ~target_bytes."""
    cap = max(1, target_bytes // (Bp * G * itemsize))
    best = 1
    for d in range(1, T + 1):
        if T % d == 0 and d <= cap:
            best = d
    return best


def _lstm_recurrence_kernel(gates0_ref, whh0_ref, wih1_ref, whh1_ref, b1_ref,
                            out_ref,
                            h0_s, c0_s, h1_s, c1_s,
                            *, hidden_pad, time_chunk, unroll):
    """One grid step == one chunk of timesteps.

    gates0_ref: (Tc, B, 4*Hp)  precomputed x@W_ih0^T + b0 (bf16 or f32 stream)
    whh0_ref  : (Hp, 4*Hp)     layer-0 recurrent weights (gate-grouped cols)
    wih1_ref  : (Hp, 4*Hp)     layer-1 input weights
    whh1_ref  : (Hp, 4*Hp)     layer-1 recurrent weights
    b1_ref    : (B, 4*Hp)      layer-1 bias, pre-broadcast in the wrapper (f32)
    out_ref   : (B, Hp)        last-timestep top-layer hidden state
    h*/c*_s   : (B, Hp)        carried recurrent state (persists across chunks)
    """
    Hp = hidden_pad
    chunk = pl.program_id(0)

    @pl.when(chunk == 0)
    def _init():
        h0_s[...] = jnp.zeros_like(h0_s)
        c0_s[...] = jnp.zeros_like(c0_s)
        h1_s[...] = jnp.zeros_like(h1_s)
        c1_s[...] = jnp.zeros_like(c1_s)

    # Hoisted out of the time loop: weights and the pre-broadcast bias.
    wdt = whh0_ref.dtype
    whh0 = whh0_ref[...]
    wih1 = wih1_ref[...]
    whh1 = whh1_ref[...]
    b1 = b1_ref[...]

    def lstm_gates(gates, c_prev):
        # All slices are lane-aligned (Hp is a multiple of 128).
        i_g = jax.nn.sigmoid(gates[:, 0 * Hp:1 * Hp])
        f_g = jax.nn.sigmoid(gates[:, 1 * Hp:2 * Hp])
        g_g = jnp.tanh(gates[:, 2 * Hp:3 * Hp])
        o_g = jax.nn.sigmoid(gates[:, 3 * Hp:4 * Hp])
        c_new = f_g * c_prev + i_g * g_g
        h_new = o_g * jnp.tanh(c_new)
        return h_new, c_new

    def step(t, carry):
        h0, c0, h1, c1 = carry
        # Layer 1 recurrent matmul depends only on h1_prev -> independent of
        # layer 0 this step, can overlap on the MXU with the layer-0 matmul.
        g1_rec = jnp.dot(h1.astype(wdt), whh1,
                         preferred_element_type=jnp.float32)
        # Layer 0: input projection precomputed; only h @ W_hh remains.
        g0 = gates0_ref[t].astype(jnp.float32) + jnp.dot(
            h0.astype(wdt), whh0, preferred_element_type=jnp.float32)
        h0n, c0n = lstm_gates(g0, c0)
        # Layer 1: remaining (dependent) matmul + bias.
        g1 = g1_rec + jnp.dot(h0n.astype(wdt), wih1,
                              preferred_element_type=jnp.float32) + b1
        h1n, c1n = lstm_gates(g1, c1)
        return h0n, c0n, h1n, c1n

    carry0 = (h0_s[...], c0_s[...], h1_s[...], c1_s[...])
    h0f, c0f, h1f, c1f = jax.lax.fori_loop(0, time_chunk, step, carry0,
                                           unroll=unroll)

    h0_s[...] = h0f
    c0_s[...] = c0f
    h1_s[...] = h1f
    c1_s[...] = c1f

    # Lane-dense (B, Hp) output; only the last chunk's hidden state matters.
    @pl.when(chunk == pl.num_programs(0) - 1)
    def _store():
        out_ref[...] = h1f.astype(out_ref.dtype)


def _make_spec(block_shape, index_map, buffers, use_pipeline_mode):
    """BlockSpec with optional pipeline_mode=pl.Buffered(n), with fallback."""
    if use_pipeline_mode and buffers is not None and hasattr(pl, "Buffered"):
        try:
            return pl.BlockSpec(block_shape, index_map,
                                pipeline_mode=pl.Buffered(buffers))
        except TypeError:
            pass
    return pl.BlockSpec(block_shape, index_map)


def lstm_forward(x_btd, params, *, hidden_size, output_size,
                 time_chunk=None, weights_dtype=jnp.bfloat16,
                 gates_dtype=jnp.bfloat16, unroll=None):
    """x_btd: (B, T, input_size) float32, batch_first like the PyTorch module."""
    B, T, I = x_btd.shape
    H = hidden_size
    Hp = _round_up(H, 128)      # pad hidden to full 128-lane groups per gate
    G = 4 * Hp
    Bp = _round_up(B, 8)        # full sublane groups for state / DMA tiles

    gates_dtype = jnp.dtype(gates_dtype)
    if time_chunk is None:
        # Sized so 2-3 gates0 buffers stay small enough for v7x's 64 MiB VMEM.
        time_chunk = _pick_time_chunk(T, Bp, G, gates_dtype.itemsize)
    assert T % time_chunk == 0, "time_chunk must divide T"
    num_chunks = T // time_chunk
    if unroll is None:
        unroll = min(time_chunk, 8)

    # ---- weight preparation (done once, in XLA) --------------------------
    def pad_gates_w(w):  # (4H, K) -> (K, 4*Hp), columns grouped [i|f|g|o]
        K = w.shape[1]
        w4 = w.reshape(4, H, K)
        w4 = jnp.pad(w4, ((0, 0), (0, Hp - H), (0, 0)))
        return jnp.transpose(w4, (2, 0, 1)).reshape(K, G)

    def pad_gates_b(b):  # (4H,) -> (4*Hp,)  (padded gate columns stay zero)
        return jnp.pad(b.reshape(4, H), ((0, 0), (0, Hp - H))).reshape(G)

    def pad_rows(w):     # (H, G) -> (Hp, G), zero rows for padded h lanes
        return jnp.pad(w, ((0, Hp - w.shape[0]), (0, 0)))

    wih0 = pad_gates_w(params["w_ih_l0"])                          # (I, G)
    whh0 = pad_rows(pad_gates_w(params["w_hh_l0"]))                # (Hp, G)
    b0 = pad_gates_b(params["b_ih_l0"] + params["b_hh_l0"])        # (G,)
    wih1 = pad_rows(pad_gates_w(params["w_ih_l1"]))                # (Hp, G)
    whh1 = pad_rows(pad_gates_w(params["w_hh_l1"]))                # (Hp, G)
    b1 = pad_gates_b(params["b_ih_l1"] + params["b_hh_l1"])        # (G,)

    # ---- hoisted layer-0 input projection ---------------------------------
    # Pad the batch and transpose x BEFORE the big matmul so the result is
    # born in (T, B, G) layout (no HBM round-trip over the 4Hp-wide tensor).
    x_p = jnp.pad(x_btd, ((0, Bp - B), (0, 0), (0, 0)))            # (Bp, T, I)
    x_tbi = jnp.transpose(x_p, (1, 0, 2)).reshape(T * Bp, I)
    gates0 = jnp.dot(x_tbi.astype(weights_dtype), wih0.astype(weights_dtype),
                     preferred_element_type=jnp.float32) + b0
    gates0 = gates0.reshape(T, Bp, G).astype(gates_dtype)          # bf16 stream

    b1_bcast = jnp.broadcast_to(b1.reshape(1, G), (Bp, G)).astype(jnp.float32)
    whh0 = whh0.astype(weights_dtype)
    wih1 = wih1.astype(weights_dtype)
    whh1 = whh1.astype(weights_dtype)

    kernel = functools.partial(
        _lstm_recurrence_kernel,
        hidden_pad=Hp, time_chunk=time_chunk, unroll=unroll)

    # gates0: up to 3-deep when the chunks are small; 1 buffer if single-chunk.
    g_buf = 1 if num_chunks == 1 else min(3, num_chunks)

    def run(use_pipeline_mode):
        return pl.pallas_call(
            kernel,
            out_shape=jax.ShapeDtypeStruct((Bp, Hp), jnp.float32),
            grid_spec=pltpu.PrefetchScalarGridSpec(
                num_scalar_prefetch=0,
                grid=(num_chunks,),
                in_specs=[
                    _make_spec((time_chunk, Bp, G), lambda c: (c, 0, 0),
                               g_buf, use_pipeline_mode),             # gates0
                    _make_spec((Hp, G), lambda c: (0, 0), 1,
                               use_pipeline_mode),                    # whh0
                    _make_spec((Hp, G), lambda c: (0, 0), 1,
                               use_pipeline_mode),                    # wih1
                    _make_spec((Hp, G), lambda c: (0, 0), 1,
                               use_pipeline_mode),                    # whh1
                    _make_spec((Bp, G), lambda c: (0, 0), 1,
                               use_pipeline_mode),                    # b1
                ],
                out_specs=pl.BlockSpec((Bp, Hp), lambda c: (0, 0)),
                scratch_shapes=[
                    pltpu.VMEM((Bp, Hp), jnp.float32),  # h layer0
                    pltpu.VMEM((Bp, Hp), jnp.float32),  # c layer0
                    pltpu.VMEM((Bp, Hp), jnp.float32),  # h layer1
                    pltpu.VMEM((Bp, Hp), jnp.float32),  # c layer1
                ],
            ),
            compiler_params=pltpu.CompilerParams(
                # Time recurrence is sequential.
                dimension_semantics=("arbitrary",),
            ),
        )(gates0, whh0, wih1, whh1, b1_bcast)

    try:
        h_last = run(True)
    except Exception:
        # Fallback for jax builds where pipeline_mode / Buffered(1) is not
        # supported by the Mosaic lowering: plain double-buffered BlockSpecs.
        h_last = run(False)

    # Final Linear on the last timestep's top-layer hidden state (tiny GEMM,
    # left to XLA so the kernel output stays lane-dense).
    h_last = h_last[:B, :H]
    return h_last @ params["w_lin"].T + params["b_lin"]
    # TODO(synk): on v7x, shard the batch across the 2 TensorCores (leading
    # parallel grid axis of size 2 owning Bp/2 rows each) for large B;
    # negligible at these shapes so left single-core.


def init_params(key, input_size, hidden_size, output_size):
    """Deterministic uniform(-1/sqrt(H), 1/sqrt(H)) init, matching nn.LSTM."""
    H = hidden_size
    bound = 1.0 / jnp.sqrt(jnp.float32(H))
    shapes = {
        "w_ih_l0": (4 * H, input_size),
        "w_hh_l0": (4 * H, H),
        "b_ih_l0": (4 * H,),
        "b_hh_l0": (4 * H,),
        "w_ih_l1": (4 * H, H),
        "w_hh_l1": (4 * H, H),
        "b_ih_l1": (4 * H,),
        "b_hh_l1": (4 * H,),
        "w_lin": (output_size, H),
        "b_lin": (output_size,),
    }
    params = {}
    keys = jax.random.split(key, len(shapes))
    for k, (name, shape) in zip(keys, shapes.items()):
        params[name] = jax.random.uniform(
            k, shape, jnp.float32, minval=-bound, maxval=bound)
    return params


def reference_forward(x_btd, params, *, hidden_size, output_size):
    """Pure-JAX reference of the PyTorch module's forward for verification."""
    H = hidden_size
    B, T, I = x_btd.shape

    def cell(x, h, c, wih, whh, b):
        g = x @ wih.T + h @ whh.T + b
        i = jax.nn.sigmoid(g[:, 0 * H:1 * H])
        f = jax.nn.sigmoid(g[:, 1 * H:2 * H])
        gg = jnp.tanh(g[:, 2 * H:3 * H])
        o = jax.nn.sigmoid(g[:, 3 * H:4 * H])
        c_new = f * c + i * gg
        return o * jnp.tanh(c_new), c_new

    b0 = params["b_ih_l0"] + params["b_hh_l0"]
    b1 = params["b_ih_l1"] + params["b_hh_l1"]

    def step(carry, x_t):
        h0, c0, h1, c1 = carry
        h0, c0 = cell(x_t, h0, c0, params["w_ih_l0"], params["w_hh_l0"], b0)
        h1, c1 = cell(h0, h1, c1, params["w_ih_l1"], params["w_hh_l1"], b1)
        return (h0, c0, h1, c1), None

    z = jnp.zeros((B, H), jnp.float32)
    (h0, c0, h1, c1), _ = jax.lax.scan(step, (z, z, z, z),
                                       jnp.transpose(x_btd, (1, 0, 2)))
    return h1 @ params["w_lin"].T + params["b_lin"]


if __name__ == "__main__":
    # Small shapes consistent with the module's forward: (batch, seq, input_size)
    B, T, INPUT, HIDDEN, OUTPUT = 2, 8, 32, 32, 2

    key = jax.random.PRNGKey(0)
    k_x, k_p = jax.random.split(key)
    x = jax.random.normal(k_x, (B, T, INPUT), jnp.float32)
    params = init_params(k_p, INPUT, HIDDEN, OUTPUT)

    ref = reference_forward(x, params, hidden_size=HIDDEN, output_size=OUTPUT)

    # Exact path: f32 weights and f32 gates0 stream, auto-selected time_chunk.
    out_f32 = lstm_forward(x, params, hidden_size=HIDDEN, output_size=OUTPUT,
                           weights_dtype=jnp.float32, gates_dtype=jnp.float32)
    out_f32 = jax.block_until_ready(out_f32)
    assert out_f32.shape == (B, OUTPUT)
    assert jnp.allclose(out_f32, ref, atol=1e-4, rtol=1e-4)

    # Default path (bf16 weights + bf16 gates0 stream), 2 chunks of 4 steps to
    # exercise the cross-chunk state carry.  Tolerance relaxed for bf16.
    out_bf16 = lstm_forward(x, params, hidden_size=HIDDEN, output_size=OUTPUT,
                            time_chunk=4)
    out_bf16 = jax.block_until_ready(out_bf16)
    assert out_bf16.shape == (B, OUTPUT)
    assert jnp.allclose(out_bf16, ref, atol=5e-2, rtol=5e-2)

    print("KERNEL_OK")
</pallas_src>

<mosaic_0001>
module attributes {stable_mosaic.version = 11 : i64} {
  func.func @_lstm_recurrence_kernel(%arg0: i32, %arg1: memref<8x8x512xf32, #tpu.memory_space<vmem>>, %arg2: memref<128x512xf32, #tpu.memory_space<vmem>>, %arg3: memref<128x512xf32, #tpu.memory_space<vmem>>, %arg4: memref<128x512xf32, #tpu.memory_space<vmem>>, %arg5: memref<8x512xf32, #tpu.memory_space<vmem>>, %arg6: memref<8x128xf32, #tpu.memory_space<vmem>>, %arg7: memref<8x128xf32, #tpu.memory_space<vmem>>, %arg8: memref<8x128xf32, #tpu.memory_space<vmem>>, %arg9: memref<8x128xf32, #tpu.memory_space<vmem>>, %arg10: memref<8x128xf32, #tpu.memory_space<vmem>>) attributes {dimension_semantics = [#tpu.dimension_semantics<arbitrary>], iteration_bounds = array<i64: 1>, scalar_prefetch = 0 : i64, scratch_operands = 4 : i64, tpu.core_type = #tpu.core_type<tc>, window_params = [{pipeline_mode = #tpu.pipeline_mode<synchronous>, transform_indices = @transform_0, window_bounds = array<i64: 8, 8, 512>}, {pipeline_mode = #tpu.pipeline_mode<synchronous>, transform_indices = @transform_1, window_bounds = array<i64: 128, 512>}, {pipeline_mode = #tpu.pipeline_mode<synchronous>, transform_indices = @transform_2, window_bounds = array<i64: 128, 512>}, {pipeline_mode = #tpu.pipeline_mode<synchronous>, transform_indices = @transform_3, window_bounds = array<i64: 128, 512>}, {pipeline_mode = #tpu.pipeline_mode<synchronous>, transform_indices = @transform_4, window_bounds = array<i64: 8, 512>}, {pipeline_mode = #tpu.pipeline_mode<synchronous>, transform_indices = @transform_5, window_bounds = array<i64: 8, 128>}]} {
    %c0_i32 = arith.constant 0 : i32
    %0 = arith.cmpi eq, %arg0, %c0_i32 : i32
    %1 = arith.extui %0 : i1 to i32
    %c0_i32_0 = arith.constant 0 : i32
    %2 = arith.cmpi ne, %1, %c0_i32_0 : i32
    scf.if %2 {
      %cst_114 = arith.constant 0.000000e+00 : f32
      %490 = vector.broadcast %cst_114 : f32 to vector<8x128xf32>
      %c0_115 = arith.constant 0 : index
      %c0_116 = arith.constant 0 : index
      %491 = vector.load %arg7[%c0_115, %c0_116] : memref<8x128xf32, #tpu.memory_space<vmem>>, vector<8x128xf32>
      tpu.vector_store %arg7[%c0_115, %c0_116], %490 {strides = array<i32>} : memref<8x128xf32, #tpu.memory_space<vmem>>, vector<8x128xf32>,
      %cst_117 = arith.constant 0.000000e+00 : f32
      %492 = vector.broadcast %cst_117 : f32 to vector<8x128xf32>
      %c0_118 = arith.constant 0 : index
      %c0_119 = arith.constant 0 : index
      %493 = vector.load %arg8[%c0_118, %c0_119] : memref<8x128xf32, #tpu.memory_space<vmem>>, vector<8x128xf32>
      tpu.vector_store %arg8[%c0_118, %c0_119], %492 {strides = array<i32>} : memref<8x128xf32, #tpu.memory_space<vmem>>, vector<8x128xf32>,
      %cst_120 = arith.constant 0.000000e+00 : f32
      %494 = vector.broadcast %cst_120 : f32 to vector<8x128xf32>
      %c0_121 = arith.constant 0 : index
      %c0_122 = arith.constant 0 : index
      %495 = vector.load %arg9[%c0_121, %c0_122] : memref<8x128xf32, #tpu.memory_space<vmem>>, vector<8x128xf32>
      tpu.vector_store %arg9[%c0_121, %c0_122], %494 {strides = array<i32>} : memref<8x128xf32, #tpu.memory_space<vmem>>, vector<8x128xf32>,
      %cst_123 = arith.constant 0.000000e+00 : f32
      %496 = vector.broadcast %cst_123 : f32 to vector<8x128xf32>
      %c0_124 = arith.constant 0 : index
      %c0_125 = arith.constant 0 : index
      %497 = vector.load %arg10[%c0_124, %c0_125] : memref<8x128xf32, #tpu.memory_space<vmem>>, vector<8x128xf32>
      tpu.vector_store %arg10[%c0_124, %c0_125], %496 {strides = array<i32>} : memref<8x128xf32, #tpu.memory_space<vmem>>, vector<8x128xf32>,
    } else {
    }
    %c0 = arith.constant 0 : index
    %c0_1 = arith.constant 0 : index
    %3 = vector.load %arg2[%c0, %c0_1] : memref<128x512xf32, #tpu.memory_space<vmem>>, vector<128x512xf32>
    %c0_2 = arith.constant 0 : index
    %c0_3 = arith.constant 0 : index
    %4 = vector.load %arg3[%c0_2, %c0_3] : memref<128x512xf32, #tpu.memory_space<vmem>>, vector<128x512xf32>
    %c0_4 = arith.constant 0 : index
    %c0_5 = arith.constant 0 : index
    %5 = vector.load %arg4[%c0_4, %c0_5] : memref<128x512xf32, #tpu.memory_space<vmem>>, vector<128x512xf32>
    %c0_6 = arith.constant 0 : index
    %c0_7 = arith.constant 0 : index
    %6 = vector.load %arg5[%c0_6, %c0_7] : memref<8x512xf32, #tpu.memory_space<vmem>>, vector<8x512xf32>
    %c0_8 = arith.constant 0 : index
    %c0_9 = arith.constant 0 : index
    %7 = vector.load %arg7[%c0_8, %c0_9] : memref<8x128xf32, #tpu.memory_space<vmem>>, vector<8x128xf32>
    %c0_10 = arith.constant 0 : index
    %c0_11 = arith.constant 0 : index
    %8 = vector.load %arg8[%c0_10, %c0_11] : memref<8x128xf32, #tpu.memory_space<vmem>>, vector<8x128xf32>
    %c0_12 = arith.constant 0 : index
    %c0_13 = arith.constant 0 : index
    %9 = vector.load %arg9[%c0_12, %c0_13] : memref<8x128xf32, #tpu.memory_space<vmem>>, vector<8x128xf32>
    %c0_14 = arith.constant 0 : index
    %c0_15 = arith.constant 0 : index
    %10 = vector.load %arg10[%c0_14, %c0_15] : memref<8x128xf32, #tpu.memory_space<vmem>>, vector<8x128xf32>
    %c0_i32_16 = arith.constant 0 : i32
    %cst = arith.constant dense<0.000000e+00> : vector<8x512xf32>
    %11 = tpu.matmul %9, %5, %cst {dimension_numbers = #tpu.dot_dimension_numbers<[1], [0], [0], [1], [0, 0, 1, 1], [], []>} : vector<8x128xf32>, vector<128x512xf32>, vector<8x512xf32> -> vector<8x512xf32>
    %12 = arith.index_cast %c0_i32_16 : i32 to index
    %c0_17 = arith.constant 0 : index
    %c0_18 = arith.constant 0 : index
    %13 = vector.load %arg1[%12, %c0_17, %c0_18] : memref<8x8x512xf32, #tpu.memory_space<vmem>>, vector<1x8x512xf32>
    %14 = vector.shape_cast %13 : vector<1x8x512xf32> to vector<8x512xf32>
    %cst_19 = arith.constant dense<0.000000e+00> : vector<8x512xf32>
    %15 = tpu.matmul %7, %3, %cst_19 {dimension_numbers = #tpu.dot_dimension_numbers<[1], [0], [0], [1], [0, 0, 1, 1], [], []>} : vector<8x128xf32>, vector<128x512xf32>, vector<8x512xf32> -> vector<8x512xf32>
    %16 = arith.addf %14, %15 : vector<8x512xf32>
    %17 = vector.extract_strided_slice %16 {offsets = [0, 0], sizes = [8, 128], strides = [1, 1]} : vector<8x512xf32> to vector<8x128xf32>
    %18 = arith.negf %17 : vector<8x128xf32>
    %19 = math.exp %18 : vector<8x128xf32>
    %cst_20 = arith.constant 1.000000e+00 : f32
    %20 = vector.broadcast %cst_20 : f32 to vector<8x128xf32>
    %21 = arith.addf %20, %19 : vector<8x128xf32>
    %22 = arith.divf %20, %21 : vector<8x128xf32>
    %23 = vector.extract_strided_slice %16 {offsets = [0, 128], sizes = [8, 128], strides = [1, 1]} : vector<8x512xf32> to vector<8x128xf32>
    %24 = arith.negf %23 : vector<8x128xf32>
    %25 = math.exp %24 : vector<8x128xf32>
    %cst_21 = arith.constant 1.000000e+00 : f32
    %26 = vector.broadcast %cst_21 : f32 to vector<8x128xf32>
    %27 = arith.addf %26, %25 : vector<8x128xf32>
    %28 = arith.divf %26, %27 : vector<8x128xf32>
    %29 = vector.extract_strided_slice %16 {offsets = [0, 256], sizes = [8, 128], strides = [1, 1]} : vector<8x512xf32> to vector<8x128xf32>
    %30 = math.tanh %29 : vector<8x128xf32>
    %31 = vector.extract_strided_slice %16 {offsets = [0, 384], sizes = [8, 128], strides = [1, 1]} : vector<8x512xf32> to vector<8x128xf32>
    %32 = arith.negf %31 : vector<8x128xf32>
    %33 = math.exp %32 : vector<8x128xf32>
    %cst_22 = arith.constant 1.000000e+00 : f32
    %34 = vector.broadcast %cst_22 : f32 to vector<8x128xf32>
    %35 = arith.addf %34, %33 : vector<8x128xf32>
    %36 = arith.divf %34, %35 : vector<8x128xf32>
    %37 = arith.mulf %28, %8 : vector<8x128xf32>
    %38 = arith.mulf %22, %30 : vector<8x128xf32>
    %39 = arith.addf %37, %38 : vector<8x128xf32>
    %40 = math.tanh %39 : vector<8x128xf32>
    %41 = arith.mulf %36, %40 : vector<8x128xf32>
    %cst_23 = arith.constant dense<0.000000e+00> : vector<8x512xf32>
    %42 = tpu.matmul %41, %4, %cst_23 {dimension_numbers = #tpu.dot_dimension_numbers<[1], [0], [0], [1], [0, 0, 1, 1], [], []>} : vector<8x128xf32>, vector<128x512xf32>, vector<8x512xf32> -> vector<8x512xf32>
    %43 = arith.addf %11, %42 : vector<8x512xf32>
    %44 = arith.addf %43, %6 : vector<8x512xf32>
    %45 = vector.extract_strided_slice %44 {offsets = [0, 0], sizes = [8, 128], strides = [1, 1]} : vector<8x512xf32> to vector<8x128xf32>
    %46 = arith.negf %45 : vector<8x128xf32>
    %47 = math.exp %46 : vector<8x128xf32>
    %cst_24 = arith.constant 1.000000e+00 : f32
    %48 = vector.broadcast %cst_24 : f32 to vector<8x128xf32>
    %49 = arith.addf %48, %47 : vector<8x128xf32>
    %50 = arith.divf %48, %49 : vector<8x128xf32>
    %51 = vector.extract_strided_slice %44 {offsets = [0, 128], sizes = [8, 128], strides = [1, 1]} : vector<8x512xf32> to vector<8x128xf32>
    %52 = arith.negf %51 : vector<8x128xf32>
    %53 = math.exp %52 : vector<8x128xf32>
    %cst_25 = arith.constant 1.000000e+00 : f32
    %54 = vector.broadcast %cst_25 : f32 to vector<8x128xf32>
    %55 = arith.addf %54, %53 : vector<8x128xf32>
    %56 = arith.divf %54, %55 : vector<8x128xf32>
    %57 = vector.extract_strided_slice %44 {offsets = [0, 256], sizes = [8, 128], strides = [1, 1]} : vector<8x512xf32> to vector<8x128xf32>
    %58 = math.tanh %57 : vector<8x128xf32>
    %59 = vector.extract_strided_slice %44 {offsets = [0, 384], sizes = [8, 128], strides = [1, 1]} : vector<8x512xf32> to vector<8x128xf32>
    %60 = arith.negf %59 : vector<8x128xf32>
    %61 = math.exp %60 : vector<8x128xf32>
    %cst_26 = arith.constant 1.000000e+00 : f32
    %62 = vector.broadcast %cst_26 : f32 to vector<8x128xf32>
    %63 = arith.addf %62, %61 : vector<8x128xf32>
    %64 = arith.divf %62, %63 : vector<8x128xf32>
    %65 = arith.mulf %56, %10 : vector<8x128xf32>
    %66 = arith.mulf %50, %58 : vector<8x128xf32>
    %67 = arith.addf %65, %66 : vector<8x128xf32>
    %68 = math.tanh %67 : vector<8x128xf32>
    %69 = arith.mulf %64, %68 : vector<8x128xf32>
    %c1_i32 = arith.constant 1 : i32
    %cst_27 = arith.constant dense<0.000000e+00> : vector<8x512xf32>
    %70 = tpu.matmul %69, %5, %cst_27 {dimension_numbers = #tpu.dot_dimension_numbers<[1], [0], [0], [1], [0, 0, 1, 1], [], []>} : vector<8x128xf32>, vector<128x512xf32>, vector<8x512xf32> -> vector<8x512xf32>
    %71 = arith.index_cast %c1_i32 : i32 to index
    %c0_28 = arith.constant 0 : index
    %c0_29 = arith.constant 0 : index
    %72 = vector.load %arg1[%71, %c0_28, %c0_29] : memref<8x8x512xf32, #tpu.memory_space<vmem>>, vector<1x8x512xf32>
    %73 = vector.shape_cast %72 : vector<1x8x512xf32> to vector<8x512xf32>
    %cst_30 = arith.constant dense<0.000000e+00> : vector<8x512xf32>
    %74 = tpu.matmul %41, %3, %cst_30 {dimension_numbers = #tpu.dot_dimension_numbers<[1], [0], [0], [1], [0, 0, 1, 1], [], []>} : vector<8x128xf32>, vector<128x512xf32>, vector<8x512xf32> -> vector<8x512xf32>
    %75 = arith.addf %73, %74 : vector<8x512xf32>
    %76 = vector.extract_strided_slice %75 {offsets = [0, 0], sizes = [8, 128], strides = [1, 1]} : vector<8x512xf32> to vector<8x128xf32>
    %77 = arith.negf %76 : vector<8x128xf32>
    %78 = math.exp %77 : vector<8x128xf32>
    %cst_31 = arith.constant 1.000000e+00 : f32
    %79 = vector.broadcast %cst_31 : f32 to vector<8x128xf32>
    %80 = arith.addf %79, %78 : vector<8x128xf32>
    %81 = arith.divf %79, %80 : vector<8x128xf32>
    %82 = vector.extract_strided_slice %75 {offsets = [0, 128], sizes = [8, 128], strides = [1, 1]} : vector<8x512xf32> to vector<8x128xf32>
    %83 = arith.negf %82 : vector<8x128xf32>
    %84 = math.exp %83 : vector<8x128xf32>
    %cst_32 = arith.constant 1.000000e+00 : f32
    %85 = vector.broadcast %cst_32 : f32 to vector<8x128xf32>
    %86 = arith.addf %85, %84 : vector<8x128xf32>
    %87 = arith.divf %85, %86 : vector<8x128xf32>
    %88 = vector.extract_strided_slice %75 {offsets = [0, 256], sizes = [8, 128], strides = [1, 1]} : vector<8x512xf32> to vector<8x128xf32>
    %89 = math.tanh %88 : vector<8x128xf32>
    %90 = vector.extract_strided_slice %75 {offsets = [0, 384], sizes = [8, 128], strides = [1, 1]} : vector<8x512xf32> to vector<8x128xf32>
    %91 = arith.negf %90 : vector<8x128xf32>
    %92 = math.exp %91 : vector<8x128xf32>
    %cst_33 = arith.constant 1.000000e+00 : f32
    %93 = vector.broadcast %cst_33 : f32 to vector<8x128xf32>
    %94 = arith.addf %93, %92 : vector<8x128xf32>
    %95 = arith.divf %93, %94 : vector<8x128xf32>
    %96 = arith.mulf %87, %39 : vector<8x128xf32>
    %97 = arith.mulf %81, %89 : vector<8x128xf32>
    %98 = arith.addf %96, %97 : vector<8x128xf32>
    %99 = math.tanh %98 : vector<8x128xf32>
    %100 = arith.mulf %95, %99 : vector<8x128xf32>
    %cst_34 = arith.constant dense<0.000000e+00> : vector<8x512xf32>
    %101 = tpu.matmul %100, %4, %cst_34 {dimension_numbers = #tpu.dot_dimension_numbers<[1], [0], [0], [1], [0, 0, 1, 1], [], []>} : vector<8x128xf32>, vector<128x512xf32>, vector<8x512xf32> -> vector<8x512xf32>
    %102 = arith.addf %70, %101 : vector<8x512xf32>
    %103 = arith.addf %102, %6 : vector<8x512xf32>
    %104 = vector.extract_strided_slice %103 {offsets = [0, 0], sizes = [8, 128], strides = [1, 1]} : vector<8x512xf32> to vector<8x128xf32>
    %105 = arith.negf %104 : vector<8x128xf32>
    %106 = math.exp %105 : vector<8x128xf32>
    %cst_35 = arith.constant 1.000000e+00 : f32
    %107 = vector.broadcast %cst_35 : f32 to vector<8x128xf32>
    %108 = arith.addf %107, %106 : vector<8x128xf32>
    %109 = arith.divf %107, %108 : vector<8x128xf32>
    %110 = vector.extract_strided_slice %103 {offsets = [0, 128], sizes = [8, 128], strides = [1, 1]} : vector<8x512xf32> to vector<8x128xf32>
    %111 = arith.negf %110 : vector<8x128xf32>
    %112 = math.exp %111 : vector<8x128xf32>
    %cst_36 = arith.constant 1.000000e+00 : f32
    %113 = vector.broadcast %cst_36 : f32 to vector<8x128xf32>
    %114 = arith.addf %113, %112 : vector<8x128xf32>
    %115 = arith.divf %113, %114 : vector<8x128xf32>
    %116 = vector.extract_strided_slice %103 {offsets = [0, 256], sizes = [8, 128], strides = [1, 1]} : vector<8x512xf32> to vector<8x128xf32>
    %117 = math.tanh %116 : vector<8x128xf32>
    %118 = vector.extract_strided_slice %103 {offsets = [0, 384], sizes = [8, 128], strides = [1, 1]} : vector<8x512xf32> to vector<8x128xf32>
    %119 = arith.negf %118 : vector<8x128xf32>
    %120 = math.exp %119 : vector<8x128xf32>
    %cst_37 = arith.constant 1.000000e+00 : f32
    %121 = vector.broadcast %cst_37 : f32 to vector<8x128xf32>
    %122 = arith.addf %121, %120 : vector<8x128xf32>
    %123 = arith.divf %121, %122 : vector<8x128xf32>
    %124 = arith.mulf %115, %67 : vector<8x128xf32>
    %125 = arith.mulf %109, %117 : vector<8x128xf32>
    %126 = arith.addf %124, %125 : vector<8x128xf32>
    %127 = math.tanh %126 : vector<8x128xf32>
    %128 = arith.mulf %123, %127 : vector<8x128xf32>
    %c2_i32 = arith.constant 2 : i32
    %cst_38 = arith.constant dense<0.000000e+00> : vector<8x512xf32>
    %129 = tpu.matmul %128, %5, %cst_38 {dimension_numbers = #tpu.dot_dimension_numbers<[1], [0], [0], [1], [0, 0, 1, 1], [], []>} : vector<8x128xf32>, vector<128x512xf32>, vector<8x512xf32> -> vector<8x512xf32>
    %130 = arith.index_cast %c2_i32 : i32 to index
    %c0_39 = arith.constant 0 : index
    %c0_40 = arith.constant 0 : index
    %131 = vector.load %arg1[%130, %c0_39, %c0_40] : memref<8x8x512xf32, #tpu.memory_space<vmem>>, vector<1x8x512xf32>
    %132 = vector.shape_cast %131 : vector<1x8x512xf32> to vector<8x512xf32>
    %cst_41 = arith.constant dense<0.000000e+00> : vector<8x512xf32>
    %133 = tpu.matmul %100, %3, %cst_41 {dimension_numbers = #tpu.dot_dimension_numbers<[1], [0], [0], [1], [0, 0, 1, 1], [], []>} : vector<8x128xf32>, vector<128x512xf32>, vector<8x512xf32> -> vector<8x512xf32>
    %134 = arith.addf %132, %133 : vector<8x512xf32>
    %135 = vector.extract_strided_slice %134 {offsets = [0, 0], sizes = [8, 128], strides = [1, 1]} : vector<8x512xf32> to vector<8x128xf32>
    %136 = arith.negf %135 : vector<8x128xf32>
    %137 = math.exp %136 : vector<8x128xf32>
    %cst_42 = arith.constant 1.000000e+00 : f32
    %138 = vector.broadcast %cst_42 : f32 to vector<8x128xf32>
    %139 = arith.addf %138, %137 : vector<8x128xf32>
    %140 = arith.divf %138, %139 : vector<8x128xf32>
    %141 = vector.extract_strided_slice %134 {offsets = [0, 128], sizes = [8, 128], strides = [1, 1]} : vector<8x512xf32> to vector<8x128xf32>
    %142 = arith.negf %141 : vector<8x128xf32>
    %143 = math.exp %142 : vector<8x128xf32>
    %cst_43 = arith.constant 1.000000e+00 : f32
    %144 = vector.broadcast %cst_43 : f32 to vector<8x128xf32>
    %145 = arith.addf %144, %143 : vector<8x128xf32>
    %146 = arith.divf %144, %145 : vector<8x128xf32>
    %147 = vector.extract_strided_slice %134 {offsets = [0, 256], sizes = [8, 128], strides = [1, 1]} : vector<8x512xf32> to vector<8x128xf32>
    %148 = math.tanh %147 : vector<8x128xf32>
    %149 = vector.extract_strided_slice %134 {offsets = [0, 384], sizes = [8, 128], strides = [1, 1]} : vector<8x512xf32> to vector<8x128xf32>
    %150 = arith.negf %149 : vector<8x128xf32>
    %151 = math.exp %150 : vector<8x128xf32>
    %cst_44 = arith.constant 1.000000e+00 : f32
    %152 = vector.broadcast %cst_44 : f32 to vector<8x128xf32>
    %153 = arith.addf %152, %151 : vector<8x128xf32>
    %154 = arith.divf %152, %153 : vector<8x128xf32>
    %155 = arith.mulf %146, %98 : vector<8x128xf32>
    %156 = arith.mulf %140, %148 : vector<8x128xf32>
    %157 = arith.addf %155, %156 : vector<8x128xf32>
    %158 = math.tanh %157 : vector<8x128xf32>
    %159 = arith.mulf %154, %158 : vector<8x128xf32>
    %cst_45 = arith.constant dense<0.000000e+00> : vector<8x512xf32>
    %160 = tpu.matmul %159, %4, %cst_45 {dimension_numbers = #tpu.dot_dimension_numbers<[1], [0], [0], [1], [0, 0, 1, 1], [], []>} : vector<8x128xf32>, vector<128x512xf32>, vector<8x512xf32> -> vector<8x512xf32>
    %161 = arith.addf %129, %160 : vector<8x512xf32>
    %162 = arith.addf %161, %6 : vector<8x512xf32>
    %163 = vector.extract_strided_slice %162 {offsets = [0, 0], sizes = [8, 128], strides = [1, 1]} : vector<8x512xf32> to vector<8x128xf32>
    %164 = arith.negf %163 : vector<8x128xf32>
    %165 = math.exp %164 : vector<8x128xf32>
    %cst_46 = arith.constant 1.000000e+00 : f32
    %166 = vector.broadcast %cst_46 : f32 to vector<8x128xf32>
    %167 = arith.addf %166, %165 : vector<8x128xf32>
    %168 = arith.divf %166, %167 : vector<8x128xf32>
    %169 = vector.extract_strided_slice %162 {offsets = [0, 128], sizes = [8, 128], strides = [1, 1]} : vector<8x512xf32> to vector<8x128xf32>
    %170 = arith.negf %169 : vector<8x128xf32>
    %171 = math.exp %170 : vector<8x128xf32>
    %cst_47 = arith.constant 1.000000e+00 : f32
    %172 = vector.broadcast %cst_47 : f32 to vector<8x128xf32>
    %173 = arith.addf %172, %171 : vector<8x128xf32>
    %174 = arith.divf %172, %173 : vector<8x128xf32>
    %175 = vector.extract_strided_slice %162 {offsets = [0, 256], sizes = [8, 128], strides = [1, 1]} : vector<8x512xf32> to vector<8x128xf32>
    %176 = math.tanh %175 : vector<8x128xf32>
    %177 = vector.extract_strided_slice %162 {offsets = [0, 384], sizes = [8, 128], strides = [1, 1]} : vector<8x512xf32> to vector<8x128xf32>
    %178 = arith.negf %177 : vector<8x128xf32>
    %179 = math.exp %178 : vector<8x128xf32>
    %cst_48 = arith.constant 1.000000e+00 : f32
    %180 = vector.broadcast %cst_48 : f32 to vector<8x128xf32>
    %181 = arith.addf %180, %179 : vector<8x128xf32>
    %182 = arith.divf %180, %181 : vector<8x128xf32>
    %183 = arith.mulf %174, %126 : vector<8x128xf32>
    %184 = arith.mulf %168, %176 : vector<8x128xf32>
    %185 = arith.addf %183, %184 : vector<8x128xf32>
    %186 = math.tanh %185 : vector<8x128xf32>
    %187 = arith.mulf %182, %186 : vector<8x128xf32>
    %c3_i32 = arith.constant 3 : i32
    %cst_49 = arith.constant dense<0.000000e+00> : vector<8x512xf32>
    %188 = tpu.matmul %187, %5, %cst_49 {dimension_numbers = #tpu.dot_dimension_numbers<[1], [0], [0], [1], [0, 0, 1, 1], [], []>} : vector<8x128xf32>, vector<128x512xf32>, vector<8x512xf32> -> vector<8x512xf32>
    %189 = arith.index_cast %c3_i32 : i32 to index
    %c0_50 = arith.constant 0 : index
    %c0_51 = arith.constant 0 : index
    %190 = vector.load %arg1[%189, %c0_50, %c0_51] : memref<8x8x512xf32, #tpu.memory_space<vmem>>, vector<1x8x512xf32>
    %191 = vector.shape_cast %190 : vector<1x8x512xf32> to vector<8x512xf32>
    %cst_52 = arith.constant dense<0.000000e+00> : vector<8x512xf32>
    %192 = tpu.matmul %159, %3, %cst_52 {dimension_numbers = #tpu.dot_dimension_numbers<[1], [0], [0], [1], [0, 0, 1, 1], [], []>} : vector<8x128xf32>, vector<128x512xf32>, vector<8x512xf32> -> vector<8x512xf32>
    %193 = arith.addf %191, %192 : vector<8x512xf32>
    %194 = vector.extract_strided_slice %193 {offsets = [0, 0], sizes = [8, 128], strides = [1, 1]} : vector<8x512xf32> to vector<8x128xf32>
    %195 = arith.negf %194 : vector<8x128xf32>
    %196 = math.exp %195 : vector<8x128xf32>
    %cst_53 = arith.constant 1.000000e+00 : f32
    %197 = vector.broadcast %cst_53 : f32 to vector<8x128xf32>
    %198 = arith.addf %197, %196 : vector<8x128xf32>
    %199 = arith.divf %197, %198 : vector<8x128xf32>
    %200 = vector.extract_strided_slice %193 {offsets = [0, 128], sizes = [8, 128], strides = [1, 1]} : vector<8x512xf32> to vector<8x128xf32>
    %201 = arith.negf %200 : vector<8x128xf32>
    %202 = math.exp %201 : vector<8x128xf32>
    %cst_54 = arith.constant 1.000000e+00 : f32
    %203 = vector.broadcast %cst_54 : f32 to vector<8x128xf32>
    %204 = arith.addf %203, %202 : vector<8x128xf32>
    %205 = arith.divf %203, %204 : vector<8x128xf32>
    %206 = vector.extract_strided_slice %193 {offsets = [0, 256], sizes = [8, 128], strides = [1, 1]} : vector<8x512xf32> to vector<8x128xf32>
    %207 = math.tanh %206 : vector<8x128xf32>
    %208 = vector.extract_strided_slice %193 {offsets = [0, 384], sizes = [8, 128], strides = [1, 1]} : vector<8x512xf32> to vector<8x128xf32>
    %209 = arith.negf %208 : vector<8x128xf32>
    %210 = math.exp %209 : vector<8x128xf32>
    %cst_55 = arith.constant 1.000000e+00 : f32
    %211 = vector.broadcast %cst_55 : f32 to vector<8x128xf32>
    %212 = arith.addf %211, %210 : vector<8x128xf32>
    %213 = arith.divf %211, %212 : vector<8x128xf32>
    %214 = arith.mulf %205, %157 : vector<8x128xf32>
    %215 = arith.mulf %199, %207 : vector<8x128xf32>
    %216 = arith.addf %214, %215 : vector<8x128xf32>
    %217 = math.tanh %216 : vector<8x128xf32>
    %218 = arith.mulf %213, %217 : vector<8x128xf32>
    %cst_56 = arith.constant dense<0.000000e+00> : vector<8x512xf32>
    %219 = tpu.matmul %218, %4, %cst_56 {dimension_numbers = #tpu.dot_dimension_numbers<[1], [0], [0], [1], [0, 0, 1, 1], [], []>} : vector<8x128xf32>, vector<128x512xf32>, vector<8x512xf32> -> vector<8x512xf32>
    %220 = arith.addf %188, %219 : vector<8x512xf32>
    %221 = arith.addf %220, %6 : vector<8x512xf32>
    %222 = vector.extract_strided_slice %221 {offsets = [0, 0], sizes = [8, 128], strides = [1, 1]} : vector<8x512xf32> to vector<8x128xf32>
    %223 = arith.negf %222 : vector<8x128xf32>
    %224 = math.exp %223 : vector<8x128xf32>
    %cst_57 = arith.constant 1.000000e+00 : f32
    %225 = vector.broadcast %cst_57 : f32 to vector<8x128xf32>
    %226 = arith.addf %225, %224 : vector<8x128xf32>
    %227 = arith.divf %225, %226 : vector<8x128xf32>
    %228 = vector.extract_strided_slice %221 {offsets = [0, 128], sizes = [8, 128], strides = [1, 1]} : vector<8x512xf32> to vector<8x128xf32>
    %229 = arith.negf %228 : vector<8x128xf32>
    %230 = math.exp %229 : vector<8x128xf32>
    %cst_58 = arith.constant 1.000000e+00 : f32
    %231 = vector.broadcast %cst_58 : f32 to vector<8x128xf32>
    %232 = arith.addf %231, %230 : vector<8x128xf32>
    %233 = arith.divf %231, %232 : vector<8x128xf32>
    %234 = vector.extract_strided_slice %221 {offsets = [0, 256], sizes = [8, 128], strides = [1, 1]} : vector<8x512xf32> to vector<8x128xf32>
    %235 = math.tanh %234 : vector<8x128xf32>
    %236 = vector.extract_strided_slice %221 {offsets = [0, 384], sizes = [8, 128], strides = [1, 1]} : vector<8x512xf32> to vector<8x128xf32>
    %237 = arith.negf %236 : vector<8x128xf32>
    %238 = math.exp %237 : vector<8x128xf32>
    %cst_59 = arith.constant 1.000000e+00 : f32
    %239 = vector.broadcast %cst_59 : f32 to vector<8x128xf32>
    %240 = arith.addf %239, %238 : vector<8x128xf32>
    %241 = arith.divf %239, %240 : vector<8x128xf32>
    %242 = arith.mulf %233, %185 : vector<8x128xf32>
    %243 = arith.mulf %227, %235 : vector<8x128xf32>
    %244 = arith.addf %242, %243 : vector<8x128xf32>
    %245 = math.tanh %244 : vector<8x128xf32>
    %246 = arith.mulf %241, %245 : vector<8x128xf32>
    %c4_i32 = arith.constant 4 : i32
    %cst_60 = arith.constant dense<0.000000e+00> : vector<8x512xf32>
    %247 = tpu.matmul %246, %5, %cst_60 {dimension_numbers = #tpu.dot_dimension_numbers<[1], [0], [0], [1], [0, 0, 1, 1], [], []>} : vector<8x128xf32>, vector<128x512xf32>, vector<8x512xf32> -> vector<8x512xf32>
    %248 = arith.index_cast %c4_i32 : i32 to index
    %c0_61 = arith.constant 0 : index
    %c0_62 = arith.constant 0 : index
    %249 = vector.load %arg1[%248, %c0_61, %c0_62] : memref<8x8x512xf32, #tpu.memory_space<vmem>>, vector<1x8x512xf32>
    %250 = vector.shape_cast %249 : vector<1x8x512xf32> to vector<8x512xf32>
    %cst_63 = arith.constant dense<0.000000e+00> : vector<8x512xf32>
    %251 = tpu.matmul %218, %3, %cst_63 {dimension_numbers = #tpu.dot_dimension_numbers<[1], [0], [0], [1], [0, 0, 1, 1], [], []>} : vector<8x128xf32>, vector<128x512xf32>, vector<8x512xf32> -> vector<8x512xf32>
    %252 = arith.addf %250, %251 : vector<8x512xf32>
    %253 = vector.extract_strided_slice %252 {offsets = [0, 0], sizes = [8, 128], strides = [1, 1]} : vector<8x512xf32> to vector<8x128xf32>
    %254 = arith.negf %253 : vector<8x128xf32>
    %255 = math.exp %254 : vector<8x128xf32>
    %cst_64 = arith.constant 1.000000e+00 : f32
    %256 = vector.broadcast %cst_64 : f32 to vector<8x128xf32>
    %257 = arith.addf %256, %255 : vector<8x128xf32>
    %258 = arith.divf %256, %257 : vector<8x128xf32>
    %259 = vector.extract_strided_slice %252 {offsets = [0, 128], sizes = [8, 128], strides = [1, 1]} : vector<8x512xf32> to vector<8x128xf32>
    %260 = arith.negf %259 : vector<8x128xf32>
    %261 = math.exp %260 : vector<8x128xf32>
    %cst_65 = arith.constant 1.000000e+00 : f32
    %262 = vector.broadcast %cst_65 : f32 to vector<8x128xf32>
    %263 = arith.addf %262, %261 : vector<8x128xf32>
    %264 = arith.divf %262, %263 : vector<8x128xf32>
    %265 = vector.extract_strided_slice %252 {offsets = [0, 256], sizes = [8, 128], strides = [1, 1]} : vector<8x512xf32> to vector<8x128xf32>
    %266 = math.tanh %265 : vector<8x128xf32>
    %267 = vector.extract_strided_slice %252 {offsets = [0, 384], sizes = [8, 128], strides = [1, 1]} : vector<8x512xf32> to vector<8x128xf32>
    %268 = arith.negf %267 : vector<8x128xf32>
    %269 = math.exp %268 : vector<8x128xf32>
    %cst_66 = arith.constant 1.000000e+00 : f32
    %270 = vector.broadcast %cst_66 : f32 to vector<8x128xf32>
    %271 = arith.addf %270, %269 : vector<8x128xf32>
    %272 = arith.divf %270, %271 : vector<8x128xf32>
    %273 = arith.mulf %264, %216 : vector<8x128xf32>
    %274 = arith.mulf %258, %266 : vector<8x128xf32>
    %275 = arith.addf %273, %274 : vector<8x128xf32>
    %276 = math.tanh %275 : vector<8x128xf32>
    %277 = arith.mulf %272, %276 : vector<8x128xf32>
    %cst_67 = arith.constant dense<0.000000e+00> : vector<8x512xf32>
    %278 = tpu.matmul %277, %4, %cst_67 {dimension_numbers = #tpu.dot_dimension_numbers<[1], [0], [0], [1], [0, 0, 1, 1], [], []>} : vector<8x128xf32>, vector<128x512xf32>, vector<8x512xf32> -> vector<8x512xf32>
    %279 = arith.addf %247, %278 : vector<8x512xf32>
    %280 = arith.addf %279, %6 : vector<8x512xf32>
    %281 = vector.extract_strided_slice %280 {offsets = [0, 0], sizes = [8, 128], strides = [1, 1]} : vector<8x512xf32> to vector<8x128xf32>
    %282 = arith.negf %281 : vector<8x128xf32>
    %283 = math.exp %282 : vector<8x128xf32>
    %cst_68 = arith.constant 1.000000e+00 : f32
    %284 = vector.broadcast %cst_68 : f32 to vector<8x128xf32>
    %285 = arith.addf %284, %283 : vector<8x128xf32>
    %286 = arith.divf %284, %285 : vector<8x128xf32>
    %287 = vector.extract_strided_slice %280 {offsets = [0, 128], sizes = [8, 128], strides = [1, 1]} : vector<8x512xf32> to vector<8x128xf32>
    %288 = arith.negf %287 : vector<8x128xf32>
    %289 = math.exp %288 : vector<8x128xf32>
    %cst_69 = arith.constant 1.000000e+00 : f32
    %290 = vector.broadcast %cst_69 : f32 to vector<8x128xf32>
    %291 = arith.addf %290, %289 : vector<8x128xf32>
    %292 = arith.divf %290, %291 : vector<8x128xf32>
    %293 = vector.extract_strided_slice %280 {offsets = [0, 256], sizes = [8, 128], strides = [1, 1]} : vector<8x512xf32> to vector<8x128xf32>
    %294 = math.tanh %293 : vector<8x128xf32>
    %295 = vector.extract_strided_slice %280 {offsets = [0, 384], sizes = [8, 128], strides = [1, 1]} : vector<8x512xf32> to vector<8x128xf32>
    %296 = arith.negf %295 : vector<8x128xf32>
    %297 = math.exp %296 : vector<8x128xf32>
    %cst_70 = arith.constant 1.000000e+00 : f32
    %298 = vector.broadcast %cst_70 : f32 to vector<8x128xf32>
    %299 = arith.addf %298, %297 : vector<8x128xf32>
    %300 = arith.divf %298, %299 : vector<8x128xf32>
    %301 = arith.mulf %292, %244 : vector<8x128xf32>
    %302 = arith.mulf %286, %294 : vector<8x128xf32>
    %303 = arith.addf %301, %302 : vector<8x128xf32>
    %304 = math.tanh %303 : vector<8x128xf32>
    %305 = arith.mulf %300, %304 : vector<8x128xf32>
    %c5_i32 = arith.constant 5 : i32
    %cst_71 = arith.constant dense<0.000000e+00> : vector<8x512xf32>
    %306 = tpu.matmul %305, %5, %cst_71 {dimension_numbers = #tpu.dot_dimension_numbers<[1], [0], [0], [1], [0, 0, 1, 1], [], []>} : vector<8x128xf32>, vector<128x512xf32>, vector<8x512xf32> -> vector<8x512xf32>
    %307 = arith.index_cast %c5_i32 : i32 to index
    %c0_72 = arith.constant 0 : index
    %c0_73 = arith.constant 0 : index
    %308 = vector.load %arg1[%307, %c0_72, %c0_73] : memref<8x8x512xf32, #tpu.memory_space<vmem>>, vector<1x8x512xf32>
    %309 = vector.shape_cast %308 : vector<1x8x512xf32> to vector<8x512xf32>
    %cst_74 = arith.constant dense<0.000000e+00> : vector<8x512xf32>
    %310 = tpu.matmul %277, %3, %cst_74 {dimension_numbers = #tpu.dot_dimension_numbers<[1], [0], [0], [1], [0, 0, 1, 1], [], []>} : vector<8x128xf32>, vector<128x512xf32>, vector<8x512xf32> -> vector<8x512xf32>
    %311 = arith.addf %309, %310 : vector<8x512xf32>
    %312 = vector.extract_strided_slice %311 {offsets = [0, 0], sizes = [8, 128], strides = [1, 1]} : vector<8x512xf32> to vector<8x128xf32>
    %313 = arith.negf %312 : vector<8x128xf32>
    %314 = math.exp %313 : vector<8x128xf32>
    %cst_75 = arith.constant 1.000000e+00 : f32
    %315 = vector.broadcast %cst_75 : f32 to vector<8x128xf32>
    %316 = arith.addf %315, %314 : vector<8x128xf32>
    %317 = arith.divf %315, %316 : vector<8x128xf32>
    %318 = vector.extract_strided_slice %311 {offsets = [0, 128], sizes = [8, 128], strides = [1, 1]} : vector<8x512xf32> to vector<8x128xf32>
    %319 = arith.negf %318 : vector<8x128xf32>
    %320 = math.exp %319 : vector<8x128xf32>
    %cst_76 = arith.constant 1.000000e+00 : f32
    %321 = vector.broadcast %cst_76 : f32 to vector<8x128xf32>
    %322 = arith.addf %321, %320 : vector<8x128xf32>
    %323 = arith.divf %321, %322 : vector<8x128xf32>
    %324 = vector.extract_strided_slice %311 {offsets = [0, 256], sizes = [8, 128], strides = [1, 1]} : vector<8x512xf32> to vector<8x128xf32>
    %325 = math.tanh %324 : vector<8x128xf32>
    %326 = vector.extract_strided_slice %311 {offsets = [0, 384], sizes = [8, 128], strides = [1, 1]} : vector<8x512xf32> to vector<8x128xf32>
    %327 = arith.negf %326 : vector<8x128xf32>
    %328 = math.exp %327 : vector<8x128xf32>
    %cst_77 = arith.constant 1.000000e+00 : f32
    %329 = vector.broadcast %cst_77 : f32 to vector<8x128xf32>
    %330 = arith.addf %329, %328 : vector<8x128xf32>
    %331 = arith.divf %329, %330 : vector<8x128xf32>
    %332 = arith.mulf %323, %275 : vector<8x128xf32>
    %333 = arith.mulf %317, %325 : vector<8x128xf32>
    %334 = arith.addf %332, %333 : vector<8x128xf32>
    %335 = math.tanh %334 : vector<8x128xf32>
    %336 = arith.mulf %331, %335 : vector<8x128xf32>
    %cst_78 = arith.constant dense<0.000000e+00> : vector<8x512xf32>
    %337 = tpu.matmul %336, %4, %cst_78 {dimension_numbers = #tpu.dot_dimension_numbers<[1], [0], [0], [1], [0, 0, 1, 1], [], []>} : vector<8x128xf32>, vector<128x512xf32>, vector<8x512xf32> -> vector<8x512xf32>
    %338 = arith.addf %306, %337 : vector<8x512xf32>
    %339 = arith.addf %338, %6 : vector<8x512xf32>
    %340 = vector.extract_strided_slice %339 {offsets = [0, 0], sizes = [8, 128], strides = [1, 1]} : vector<8x512xf32> to vector<8x128xf32>
    %341 = arith.negf %340 : vector<8x128xf32>
    %342 = math.exp %341 : vector<8x128xf32>
    %cst_79 = arith.constant 1.000000e+00 : f32
    %343 = vector.broadcast %cst_79 : f32 to vector<8x128xf32>
    %344 = arith.addf %343, %342 : vector<8x128xf32>
    %345 = arith.divf %343, %344 : vector<8x128xf32>
    %346 = vector.extract_strided_slice %339 {offsets = [0, 128], sizes = [8, 128], strides = [1, 1]} : vector<8x512xf32> to vector<8x128xf32>
    %347 = arith.negf %346 : vector<8x128xf32>
    %348 = math.exp %347 : vector<8x128xf32>
    %cst_80 = arith.constant 1.000000e+00 : f32
    %349 = vector.broadcast %cst_80 : f32 to vector<8x128xf32>
    %350 = arith.addf %349, %348 : vector<8x128xf32>
    %351 = arith.divf %349, %350 : vector<8x128xf32>
    %352 = vector.extract_strided_slice %339 {offsets = [0, 256], sizes = [8, 128], strides = [1, 1]} : vector<8x512xf32> to vector<8x128xf32>
    %353 = math.tanh %352 : vector<8x128xf32>
    %354 = vector.extract_strided_slice %339 {offsets = [0, 384], sizes = [8, 128], strides = [1, 1]} : vector<8x512xf32> to vector<8x128xf32>
    %355 = arith.negf %354 : vector<8x128xf32>
    %356 = math.exp %355 : vector<8x128xf32>
    %cst_81 = arith.constant 1.000000e+00 : f32
    %357 = vector.broadcast %cst_81 : f32 to vector<8x128xf32>
    %358 = arith.addf %357, %356 : vector<8x128xf32>
    %359 = arith.divf %357, %358 : vector<8x128xf32>
    %360 = arith.mulf %351, %303 : vector<8x128xf32>
    %361 = arith.mulf %345, %353 : vector<8x128xf32>
    %362 = arith.addf %360, %361 : vector<8x128xf32>
    %363 = math.tanh %362 : vector<8x128xf32>
    %364 = arith.mulf %359, %363 : vector<8x128xf32>
    %c6_i32 = arith.constant 6 : i32
    %cst_82 = arith.constant dense<0.000000e+00> : vector<8x512xf32>
    %365 = tpu.matmul %364, %5, %cst_82 {dimension_numbers = #tpu.dot_dimension_numbers<[1], [0], [0], [1], [0, 0, 1, 1], [], []>} : vector<8x128xf32>, vector<128x512xf32>, vector<8x512xf32> -> vector<8x512xf32>
    %366 = arith.index_cast %c6_i32 : i32 to index
    %c0_83 = arith.constant 0 : index
    %c0_84 = arith.constant 0 : index
    %367 = vector.load %arg1[%366, %c0_83, %c0_84] : memref<8x8x512xf32, #tpu.memory_space<vmem>>, vector<1x8x512xf32>
    %368 = vector.shape_cast %367 : vector<1x8x512xf32> to vector<8x512xf32>
    %cst_85 = arith.constant dense<0.000000e+00> : vector<8x512xf32>
    %369 = tpu.matmul %336, %3, %cst_85 {dimension_numbers = #tpu.dot_dimension_numbers<[1], [0], [0], [1], [0, 0, 1, 1], [], []>} : vector<8x128xf32>, vector<128x512xf32>, vector<8x512xf32> -> vector<8x512xf32>
    %370 = arith.addf %368, %369 : vector<8x512xf32>
    %371 = vector.extract_strided_slice %370 {offsets = [0, 0], sizes = [8, 128], strides = [1, 1]} : vector<8x512xf32> to vector<8x128xf32>
    %372 = arith.negf %371 : vector<8x128xf32>
    %373 = math.exp %372 : vector<8x128xf32>
    %cst_86 = arith.constant 1.000000e+00 : f32
    %374 = vector.broadcast %cst_86 : f32 to vector<8x128xf32>
    %375 = arith.addf %374, %373 : vector<8x128xf32>
    %376 = arith.divf %374, %375 : vector<8x128xf32>
    %377 = vector.extract_strided_slice %370 {offsets = [0, 128], sizes = [8, 128], strides = [1, 1]} : vector<8x512xf32> to vector<8x128xf32>
    %378 = arith.negf %377 : vector<8x128xf32>
    %379 = math.exp %378 : vector<8x128xf32>
    %cst_87 = arith.constant 1.000000e+00 : f32
    %380 = vector.broadcast %cst_87 : f32 to vector<8x128xf32>
    %381 = arith.addf %380, %379 : vector<8x128xf32>
    %382 = arith.divf %380, %381 : vector<8x128xf32>
    %383 = vector.extract_strided_slice %370 {offsets = [0, 256], sizes = [8, 128], strides = [1, 1]} : vector<8x512xf32> to vector<8x128xf32>
    %384 = math.tanh %383 : vector<8x128xf32>
    %385 = vector.extract_strided_slice %370 {offsets = [0, 384], sizes = [8, 128], strides = [1, 1]} : vector<8x512xf32> to vector<8x128xf32>
    %386 = arith.negf %385 : vector<8x128xf32>
    %387 = math.exp %386 : vector<8x128xf32>
    %cst_88 = arith.constant 1.000000e+00 : f32
    %388 = vector.broadcast %cst_88 : f32 to vector<8x128xf32>
    %389 = arith.addf %388, %387 : vector<8x128xf32>
    %390 = arith.divf %388, %389 : vector<8x128xf32>
    %391 = arith.mulf %382, %334 : vector<8x128xf32>
    %392 = arith.mulf %376, %384 : vector<8x128xf32>
    %393 = arith.addf %391, %392 : vector<8x128xf32>
    %394 = math.tanh %393 : vector<8x128xf32>
    %395 = arith.mulf %390, %394 : vector<8x128xf32>
    %cst_89 = arith.constant dense<0.000000e+00> : vector<8x512xf32>
    %396 = tpu.matmul %395, %4, %cst_89 {dimension_numbers = #tpu.dot_dimension_numbers<[1], [0], [0], [1], [0, 0, 1, 1], [], []>} : vector<8x128xf32>, vector<128x512xf32>, vector<8x512xf32> -> vector<8x512xf32>
    %397 = arith.addf %365, %396 : vector<8x512xf32>
    %398 = arith.addf %397, %6 : vector<8x512xf32>
    %399 = vector.extract_strided_slice %398 {offsets = [0, 0], sizes = [8, 128], strides = [1, 1]} : vector<8x512xf32> to vector<8x128xf32>
    %400 = arith.negf %399 : vector<8x128xf32>
    %401 = math.exp %400 : vector<8x128xf32>
    %cst_90 = arith.constant 1.000000e+00 : f32
    %402 = vector.broadcast %cst_90 : f32 to vector<8x128xf32>
    %403 = arith.addf %402, %401 : vector<8x128xf32>
    %404 = arith.divf %402, %403 : vector<8x128xf32>
    %405 = vector.extract_strided_slice %398 {offsets = [0, 128], sizes = [8, 128], strides = [1, 1]} : vector<8x512xf32> to vector<8x128xf32>
    %406 = arith.negf %405 : vector<8x128xf32>
    %407 = math.exp %406 : vector<8x128xf32>
    %cst_91 = arith.constant 1.000000e+00 : f32
    %408 = vector.broadcast %cst_91 : f32 to vector<8x128xf32>
    %409 = arith.addf %408, %407 : vector<8x128xf32>
    %410 = arith.divf %408, %409 : vector<8x128xf32>
    %411 = vector.extract_strided_slice %398 {offsets = [0, 256], sizes = [8, 128], strides = [1, 1]} : vector<8x512xf32> to vector<8x128xf32>
    %412 = math.tanh %411 : vector<8x128xf32>
    %413 = vector.extract_strided_slice %398 {offsets = [0, 384], sizes = [8, 128], strides = [1, 1]} : vector<8x512xf32> to vector<8x128xf32>
    %414 = arith.negf %413 : vector<8x128xf32>
    %415 = math.exp %414 : vector<8x128xf32>
    %cst_92 = arith.constant 1.000000e+00 : f32
    %416 = vector.broadcast %cst_92 : f32 to vector<8x128xf32>
    %417 = arith.addf %416, %415 : vector<8x128xf32>
    %418 = arith.divf %416, %417 : vector<8x128xf32>
    %419 = arith.mulf %410, %362 : vector<8x128xf32>
    %420 = arith.mulf %404, %412 : vector<8x128xf32>
    %421 = arith.addf %419, %420 : vector<8x128xf32>
    %422 = math.tanh %421 : vector<8x128xf32>
    %423 = arith.mulf %418, %422 : vector<8x128xf32>
    %c7_i32 = arith.constant 7 : i32
    %cst_93 = arith.constant dense<0.000000e+00> : vector<8x512xf32>
    %424 = tpu.matmul %423, %5, %cst_93 {dimension_numbers = #tpu.dot_dimension_numbers<[1], [0], [0], [1], [0, 0, 1, 1], [], []>} : vector<8x128xf32>, vector<128x512xf32>, vector<8x512xf32> -> vector<8x512xf32>
    %425 = arith.index_cast %c7_i32 : i32 to index
    %c0_94 = arith.constant 0 : index
    %c0_95 = arith.constant 0 : index
    %426 = vector.load %arg1[%425, %c0_94, %c0_95] : memref<8x8x512xf32, #tpu.memory_space<vmem>>, vector<1x8x512xf32>
    %427 = vector.shape_cast %426 : vector<1x8x512xf32> to vector<8x512xf32>
    %cst_96 = arith.constant dense<0.000000e+00> : vector<8x512xf32>
    %428 = tpu.matmul %395, %3, %cst_96 {dimension_numbers = #tpu.dot_dimension_numbers<[1], [0], [0], [1], [0, 0, 1, 1], [], []>} : vector<8x128xf32>, vector<128x512xf32>, vector<8x512xf32> -> vector<8x512xf32>
    %429 = arith.addf %427, %428 : vector<8x512xf32>
    %430 = vector.extract_strided_slice %429 {offsets = [0, 0], sizes = [8, 128], strides = [1, 1]} : vector<8x512xf32> to vector<8x128xf32>
    %431 = arith.negf %430 : vector<8x128xf32>
    %432 = math.exp %431 : vector<8x128xf32>
    %cst_97 = arith.constant 1.000000e+00 : f32
    %433 = vector.broadcast %cst_97 : f32 to vector<8x128xf32>
    %434 = arith.addf %433, %432 : vector<8x128xf32>
    %435 = arith.divf %433, %434 : vector<8x128xf32>
    %436 = vector.extract_strided_slice %429 {offsets = [0, 128], sizes = [8, 128], strides = [1, 1]} : vector<8x512xf32> to vector<8x128xf32>
    %437 = arith.negf %436 : vector<8x128xf32>
    %438 = math.exp %437 : vector<8x128xf32>
    %cst_98 = arith.constant 1.000000e+00 : f32
    %439 = vector.broadcast %cst_98 : f32 to vector<8x128xf32>
    %440 = arith.addf %439, %438 : vector<8x128xf32>
    %441 = arith.divf %439, %440 : vector<8x128xf32>
    %442 = vector.extract_strided_slice %429 {offsets = [0, 256], sizes = [8, 128], strides = [1, 1]} : vector<8x512xf32> to vector<8x128xf32>
    %443 = math.tanh %442 : vector<8x128xf32>
    %444 = vector.extract_strided_slice %429 {offsets = [0, 384], sizes = [8, 128], strides = [1, 1]} : vector<8x512xf32> to vector<8x128xf32>
    %445 = arith.negf %444 : vector<8x128xf32>
    %446 = math.exp %445 : vector<8x128xf32>
    %cst_99 = arith.constant 1.000000e+00 : f32
    %447 = vector.broadcast %cst_99 : f32 to vector<8x128xf32>
    %448 = arith.addf %447, %446 : vector<8x128xf32>
    %449 = arith.divf %447, %448 : vector<8x128xf32>
    %450 = arith.mulf %441, %393 : vector<8x128xf32>
    %451 = arith.mulf %435, %443 : vector<8x128xf32>
    %452 = arith.addf %450, %451 : vector<8x128xf32>
    %453 = math.tanh %452 : vector<8x128xf32>
    %454 = arith.mulf %449, %453 : vector<8x128xf32>
    %cst_100 = arith.constant dense<0.000000e+00> : vector<8x512xf32>
    %455 = tpu.matmul %454, %4, %cst_100 {dimension_numbers = #tpu.dot_dimension_numbers<[1], [0], [0], [1], [0, 0, 1, 1], [], []>} : vector<8x128xf32>, vector<128x512xf32>, vector<8x512xf32> -> vector<8x512xf32>
    %456 = arith.addf %424, %455 : vector<8x512xf32>
    %457 = arith.addf %456, %6 : vector<8x512xf32>
    %458 = vector.extract_strided_slice %457 {offsets = [0, 0], sizes = [8, 128], strides = [1, 1]} : vector<8x512xf32> to vector<8x128xf32>
    %459 = arith.negf %458 : vector<8x128xf32>
    %460 = math.exp %459 : vector<8x128xf32>
    %cst_101 = arith.constant 1.000000e+00 : f32
    %461 = vector.broadcast %cst_101 : f32 to vector<8x128xf32>
    %462 = arith.addf %461, %460 : vector<8x128xf32>
    %463 = arith.divf %461, %462 : vector<8x128xf32>
    %464 = vector.extract_strided_slice %457 {offsets = [0, 128], sizes = [8, 128], strides = [1, 1]} : vector<8x512xf32> to vector<8x128xf32>
    %465 = arith.negf %464 : vector<8x128xf32>
    %466 = math.exp %465 : vector<8x128xf32>
    %cst_102 = arith.constant 1.000000e+00 : f32
    %467 = vector.broadcast %cst_102 : f32 to vector<8x128xf32>
    %468 = arith.addf %467, %466 : vector<8x128xf32>
    %469 = arith.divf %467, %468 : vector<8x128xf32>
    %470 = vector.extract_strided_slice %457 {offsets = [0, 256], sizes = [8, 128], strides = [1, 1]} : vector<8x512xf32> to vector<8x128xf32>
    %471 = math.tanh %470 : vector<8x128xf32>
    %472 = vector.extract_strided_slice %457 {offsets = [0, 384], sizes = [8, 128], strides = [1, 1]} : vector<8x512xf32> to vector<8x128xf32>
    %473 = arith.negf %472 : vector<8x128xf32>
    %474 = math.exp %473 : vector<8x128xf32>
    %cst_103 = arith.constant 1.000000e+00 : f32
    %475 = vector.broadcast %cst_103 : f32 to vector<8x128xf32>
    %476 = arith.addf %475, %474 : vector<8x128xf32>
    %477 = arith.divf %475, %476 : vector<8x128xf32>
    %478 = arith.mulf %469, %421 : vector<8x128xf32>
    %479 = arith.mulf %463, %471 : vector<8x128xf32>
    %480 = arith.addf %478, %479 : vector<8x128xf32>
    %481 = math.tanh %480 : vector<8x128xf32>
    %482 = arith.mulf %477, %481 : vector<8x128xf32>
    %c8_i32 = arith.constant 8 : i32
    %c0_104 = arith.constant 0 : index
    %c0_105 = arith.constant 0 : index
    %483 = vector.load %arg7[%c0_104, %c0_105] : memref<8x128xf32, #tpu.memory_space<vmem>>, vector<8x128xf32>
    tpu.vector_store %arg7[%c0_104, %c0_105], %454 {strides = array<i32>} : memref<8x128xf32, #tpu.memory_space<vmem>>, vector<8x128xf32>,
    %c0_106 = arith.constant 0 : index
    %c0_107 = arith.constant 0 : index
    %484 = vector.load %arg8[%c0_106, %c0_107] : memref<8x128xf32, #tpu.memory_space<vmem>>, vector<8x128xf32>
    tpu.vector_store %arg8[%c0_106, %c0_107], %452 {strides = array<i32>} : memref<8x128xf32, #tpu.memory_space<vmem>>, vector<8x128xf32>,
    %c0_108 = arith.constant 0 : index
    %c0_109 = arith.constant 0 : index
    %485 = vector.load %arg9[%c0_108, %c0_109] : memref<8x128xf32, #tpu.memory_space<vmem>>, vector<8x128xf32>
    tpu.vector_store %arg9[%c0_108, %c0_109], %482 {strides = array<i32>} : memref<8x128xf32, #tpu.memory_space<vmem>>, vector<8x128xf32>,
    %c0_110 = arith.constant 0 : index
    %c0_111 = arith.constant 0 : index
    %486 = vector.load %arg10[%c0_110, %c0_111] : memref<8x128xf32, #tpu.memory_space<vmem>>, vector<8x128xf32>
    tpu.vector_store %arg10[%c0_110, %c0_111], %480 {strides = array<i32>} : memref<8x128xf32, #tpu.memory_space<vmem>>, vector<8x128xf32>,
    %c0_i32_112 = arith.constant 0 : i32
    %487 = arith.cmpi eq, %arg0, %c0_i32_112 : i32
    %488 = arith.extui %487 : i1 to i32
    %c0_i32_113 = arith.constant 0 : i32
    %489 = arith.cmpi ne, %488, %c0_i32_113 : i32
    scf.if %489 {
      %c0_114 = arith.constant 0 : index
      %c0_115 = arith.constant 0 : index
      %490 = vector.load %arg6[%c0_114, %c0_115] : memref<8x128xf32, #tpu.memory_space<vmem>>, vector<8x128xf32>
      tpu.vector_store %arg6[%c0_114, %c0_115], %482 {strides = array<i32>} : memref<8x128xf32, #tpu.memory_space<vmem>>, vector<8x128xf32>,
    } else {
    }
    return
  }
  func.func @transform_0(%arg0: i32) -> (i32, i32, i32) {
    %c0_i32 = arith.constant 0 : i32
    %c0_i32_0 = arith.constant 0 : i32
    %c0_i32_1 = arith.constant 0 : i32
    return %arg0, %c0_i32, %c0_i32_0 : i32, i32, i32
  }
  func.func @transform_1(%arg0: i32) -> (i32, i32) {
    %c0_i32 = arith.constant 0 : i32
    %c0_i32_0 = arith.constant 0 : i32
    %c0_i32_1 = arith.constant 0 : i32
    return %c0_i32, %c0_i32_0 : i32, i32
  }
  func.func @transform_2(%arg0: i32) -> (i32, i32) {
    %c0_i32 = arith.constant 0 : i32
    %c0_i32_0 = arith.constant 0 : i32
    %c0_i32_1 = arith.constant 0 : i32
    return %c0_i32, %c0_i32_0 : i32, i32
  }
  func.func @transform_3(%arg0: i32) -> (i32, i32) {
    %c0_i32 = arith.constant 0 : i32
    %c0_i32_0 = arith.constant 0 : i32
    %c0_i32_1 = arith.constant 0 : i32
    return %c0_i32, %c0_i32_0 : i32, i32
  }
  func.func @transform_4(%arg0: i32) -> (i32, i32) {
    %c0_i32 = arith.constant 0 : i32
    %c0_i32_0 = arith.constant 0 : i32
    %c0_i32_1 = arith.constant 0 : i32
    return %c0_i32, %c0_i32_0 : i32, i32
  }
  func.func @transform_5(%arg0: i32) -> (i32, i32) {
    %c0_i32 = arith.constant 0 : i32
    %c0_i32_0 = arith.constant 0 : i32
    %c0_i32_1 = arith.constant 0 : i32
    return %c0_i32, %c0_i32_0 : i32, i32
  }
}

module attributes {stable_mosaic.version = 11 : i64} {
  func.func @_lstm_recurrence_kernel(%arg0: i32, %arg1: memref<8x8x512xf32, #tpu.memory_space<vmem>>, %arg2: memref<128x512xf32, #tpu.memory_space<vmem>>, %arg3: memref<128x512xf32, #tpu.memory_space<vmem>>, %arg4: memref<128x512xf32, #tpu.memory_space<vmem>>, %arg5: memref<8x512xf32, #tpu.memory_space<vmem>>, %arg6: memref<8x128xf32, #tpu.memory_space<vmem>>, %arg7: memref<8x128xf32, #tpu.memory_space<vmem>>, %arg8: memref<8x128xf32, #tpu.memory_space<vmem>>, %arg9: memref<8x128xf32, #tpu.memory_space<vmem>>, %arg10: memref<8x128xf32, #tpu.memory_space<vmem>>) attributes {dimension_semantics = [#tpu.dimension_semantics<arbitrary>], iteration_bounds = array<i64: 1>, scalar_prefetch = 0 : i64, scratch_operands = 4 : i64, tpu.core_type = #tpu.core_type<tc>, window_params = [{transform_indices = @transform_0, window_bounds = array<i64: 8, 8, 512>}, {pipeline_mode = #tpu.pipeline_mode<synchronous>, transform_indices = @transform_1, window_bounds = array<i64: 128, 512>}, {pipeline_mode = #tpu.pipeline_mode<synchronous>, transform_indices = @transform_2, window_bounds = array<i64: 128, 512>}, {pipeline_mode = #tpu.pipeline_mode<synchronous>, transform_indices = @transform_3, window_bounds = array<i64: 128, 512>}, {pipeline_mode = #tpu.pipeline_mode<synchronous>, transform_indices = @transform_4, window_bounds = array<i64: 8, 512>}, {pipeline_mode = #tpu.pipeline_mode<synchronous>, transform_indices = @transform_5, window_bounds = array<i64: 8, 128>}]} {
    %c0_i32 = arith.constant 0 : i32
    %0 = arith.cmpi eq, %arg0, %c0_i32 : i32
    %1 = arith.extui %0 : i1 to i32
    %c0_i32_0 = arith.constant 0 : i32
    %2 = arith.cmpi ne, %1, %c0_i32_0 : i32
    scf.if %2 {
      %cst_114 = arith.constant 0.000000e+00 : f32
      %490 = vector.broadcast %cst_114 : f32 to vector<8x128xf32>
      %c0_115 = arith.constant 0 : index
      %c0_116 = arith.constant 0 : index
      %491 = vector.load %arg7[%c0_115, %c0_116] : memref<8x128xf32, #tpu.memory_space<vmem>>, vector<8x128xf32>
      tpu.vector_store %arg7[%c0_115, %c0_116], %490 {strides = array<i32>} : memref<8x128xf32, #tpu.memory_space<vmem>>, vector<8x128xf32>,
      %cst_117 = arith.constant 0.000000e+00 : f32
      %492 = vector.broadcast %cst_117 : f32 to vector<8x128xf32>
      %c0_118 = arith.constant 0 : index
      %c0_119 = arith.constant 0 : index
      %493 = vector.load %arg8[%c0_118, %c0_119] : memref<8x128xf32, #tpu.memory_space<vmem>>, vector<8x128xf32>
      tpu.vector_store %arg8[%c0_118, %c0_119], %492 {strides = array<i32>} : memref<8x128xf32, #tpu.memory_space<vmem>>, vector<8x128xf32>,
      %cst_120 = arith.constant 0.000000e+00 : f32
      %494 = vector.broadcast %cst_120 : f32 to vector<8x128xf32>
      %c0_121 = arith.constant 0 : index
      %c0_122 = arith.constant 0 : index
      %495 = vector.load %arg9[%c0_121, %c0_122] : memref<8x128xf32, #tpu.memory_space<vmem>>, vector<8x128xf32>
      tpu.vector_store %arg9[%c0_121, %c0_122], %494 {strides = array<i32>} : memref<8x128xf32, #tpu.memory_space<vmem>>, vector<8x128xf32>,
      %cst_123 = arith.constant 0.000000e+00 : f32
      %496 = vector.broadcast %cst_123 : f32 to vector<8x128xf32>
      %c0_124 = arith.constant 0 : index
      %c0_125 = arith.constant 0 : index
      %497 = vector.load %arg10[%c0_124, %c0_125] : memref<8x128xf32, #tpu.memory_space<vmem>>, vector<8x128xf32>
      tpu.vector_store %arg10[%c0_124, %c0_125], %496 {strides = array<i32>} : memref<8x128xf32, #tpu.memory_space<vmem>>, vector<8x128xf32>,
    } else {
    }
    %c0 = arith.constant 0 : index
    %c0_1 = arith.constant 0 : index
    %3 = vector.load %arg2[%c0, %c0_1] : memref<128x512xf32, #tpu.memory_space<vmem>>, vector<128x512xf32>
    %c0_2 = arith.constant 0 : index
    %c0_3 = arith.constant 0 : index
    %4 = vector.load %arg3[%c0_2, %c0_3] : memref<128x512xf32, #tpu.memory_space<vmem>>, vector<128x512xf32>
    %c0_4 = arith.constant 0 : index
    %c0_5 = arith.constant 0 : index
    %5 = vector.load %arg4[%c0_4, %c0_5] : memref<128x512xf32, #tpu.memory_space<vmem>>, vector<128x512xf32>
    %c0_6 = arith.constant 0 : index
    %c0_7 = arith.constant 0 : index
    %6 = vector.load %arg5[%c0_6, %c0_7] : memref<8x512xf32, #tpu.memory_space<vmem>>, vector<8x512xf32>
    %c0_8 = arith.constant 0 : index
    %c0_9 = arith.constant 0 : index
    %7 = vector.load %arg7[%c0_8, %c0_9] : memref<8x128xf32, #tpu.memory_space<vmem>>, vector<8x128xf32>
    %c0_10 = arith.constant 0 : index
    %c0_11 = arith.constant 0 : index
    %8 = vector.load %arg8[%c0_10, %c0_11] : memref<8x128xf32, #tpu.memory_space<vmem>>, vector<8x128xf32>
    %c0_12 = arith.constant 0 : index
    %c0_13 = arith.constant 0 : index
    %9 = vector.load %arg9[%c0_12, %c0_13] : memref<8x128xf32, #tpu.memory_space<vmem>>, vector<8x128xf32>
    %c0_14 = arith.constant 0 : index
    %c0_15 = arith.constant 0 : index
    %10 = vector.load %arg10[%c0_14, %c0_15] : memref<8x128xf32, #tpu.memory_space<vmem>>, vector<8x128xf32>
    %c0_i32_16 = arith.constant 0 : i32
    %cst = arith.constant dense<0.000000e+00> : vector<8x512xf32>
    %11 = tpu.matmul %9, %5, %cst {dimension_numbers = #tpu.dot_dimension_numbers<[1], [0], [0], [1], [0, 0, 1, 1], [], []>} : vector<8x128xf32>, vector<128x512xf32>, vector<8x512xf32> -> vector<8x512xf32>
    %12 = arith.index_cast %c0_i32_16 : i32 to index
    %c0_17 = arith.constant 0 : index
    %c0_18 = arith.constant 0 : index
    %13 = vector.load %arg1[%12, %c0_17, %c0_18] : memref<8x8x512xf32, #tpu.memory_space<vmem>>, vector<1x8x512xf32>
    %14 = vector.shape_cast %13 : vector<1x8x512xf32> to vector<8x512xf32>
    %cst_19 = arith.constant dense<0.000000e+00> : vector<8x512xf32>
    %15 = tpu.matmul %7, %3, %cst_19 {dimension_numbers = #tpu.dot_dimension_numbers<[1], [0], [0], [1], [0, 0, 1, 1], [], []>} : vector<8x128xf32>, vector<128x512xf32>, vector<8x512xf32> -> vector<8x512xf32>
    %16 = arith.addf %14, %15 : vector<8x512xf32>
    %17 = vector.extract_strided_slice %16 {offsets = [0, 0], sizes = [8, 128], strides = [1, 1]} : vector<8x512xf32> to vector<8x128xf32>
    %18 = arith.negf %17 : vector<8x128xf32>
    %19 = math.exp %18 : vector<8x128xf32>
    %cst_20 = arith.constant 1.000000e+00 : f32
    %20 = vector.broadcast %cst_20 : f32 to vector<8x128xf32>
    %21 = arith.addf %20, %19 : vector<8x128xf32>
    %22 = arith.divf %20, %21 : vector<8x128xf32>
    %23 = vector.extract_strided_slice %16 {offsets = [0, 128], sizes = [8, 128], strides = [1, 1]} : vector<8x512xf32> to vector<8x128xf32>
    %24 = arith.negf %23 : vector<8x128xf32>
    %25 = math.exp %24 : vector<8x128xf32>
    %cst_21 = arith.constant 1.000000e+00 : f32
    %26 = vector.broadcast %cst_21 : f32 to vector<8x128xf32>
    %27 = arith.addf %26, %25 : vector<8x128xf32>
    %28 = arith.divf %26, %27 : vector<8x128xf32>
    %29 = vector.extract_strided_slice %16 {offsets = [0, 256], sizes = [8, 128], strides = [1, 1]} : vector<8x512xf32> to vector<8x128xf32>
    %30 = math.tanh %29 : vector<8x128xf32>
    %31 = vector.extract_strided_slice %16 {offsets = [0, 384], sizes = [8, 128], strides = [1, 1]} : vector<8x512xf32> to vector<8x128xf32>
    %32 = arith.negf %31 : vector<8x128xf32>
    %33 = math.exp %32 : vector<8x128xf32>
    %cst_22 = arith.constant 1.000000e+00 : f32
    %34 = vector.broadcast %cst_22 : f32 to vector<8x128xf32>
    %35 = arith.addf %34, %33 : vector<8x128xf32>
    %36 = arith.divf %34, %35 : vector<8x128xf32>
    %37 = arith.mulf %28, %8 : vector<8x128xf32>
    %38 = arith.mulf %22, %30 : vector<8x128xf32>
    %39 = arith.addf %37, %38 : vector<8x128xf32>
    %40 = math.tanh %39 : vector<8x128xf32>
    %41 = arith.mulf %36, %40 : vector<8x128xf32>
    %cst_23 = arith.constant dense<0.000000e+00> : vector<8x512xf32>
    %42 = tpu.matmul %41, %4, %cst_23 {dimension_numbers = #tpu.dot_dimension_numbers<[1], [0], [0], [1], [0, 0, 1, 1], [], []>} : vector<8x128xf32>, vector<128x512xf32>, vector<8x512xf32> -> vector<8x512xf32>
    %43 = arith.addf %11, %42 : vector<8x512xf32>
    %44 = arith.addf %43, %6 : vector<8x512xf32>
    %45 = vector.extract_strided_slice %44 {offsets = [0, 0], sizes = [8, 128], strides = [1, 1]} : vector<8x512xf32> to vector<8x128xf32>
    %46 = arith.negf %45 : vector<8x128xf32>
    %47 = math.exp %46 : vector<8x128xf32>
    %cst_24 = arith.constant 1.000000e+00 : f32
    %48 = vector.broadcast %cst_24 : f32 to vector<8x128xf32>
    %49 = arith.addf %48, %47 : vector<8x128xf32>
    %50 = arith.divf %48, %49 : vector<8x128xf32>
    %51 = vector.extract_strided_slice %44 {offsets = [0, 128], sizes = [8, 128], strides = [1, 1]} : vector<8x512xf32> to vector<8x128xf32>
    %52 = arith.negf %51 : vector<8x128xf32>
    %53 = math.exp %52 : vector<8x128xf32>
    %cst_25 = arith.constant 1.000000e+00 : f32
    %54 = vector.broadcast %cst_25 : f32 to vector<8x128xf32>
    %55 = arith.addf %54, %53 : vector<8x128xf32>
    %56 = arith.divf %54, %55 : vector<8x128xf32>
    %57 = vector.extract_strided_slice %44 {offsets = [0, 256], sizes = [8, 128], strides = [1, 1]} : vector<8x512xf32> to vector<8x128xf32>
    %58 = math.tanh %57 : vector<8x128xf32>
    %59 = vector.extract_strided_slice %44 {offsets = [0, 384], sizes = [8, 128], strides = [1, 1]} : vector<8x512xf32> to vector<8x128xf32>
    %60 = arith.negf %59 : vector<8x128xf32>
    %61 = math.exp %60 : vector<8x128xf32>
    %cst_26 = arith.constant 1.000000e+00 : f32
    %62 = vector.broadcast %cst_26 : f32 to vector<8x128xf32>
    %63 = arith.addf %62, %61 : vector<8x128xf32>
    %64 = arith.divf %62, %63 : vector<8x128xf32>
    %65 = arith.mulf %56, %10 : vector<8x128xf32>
    %66 = arith.mulf %50, %58 : vector<8x128xf32>
    %67 = arith.addf %65, %66 : vector<8x128xf32>
    %68 = math.tanh %67 : vector<8x128xf32>
    %69 = arith.mulf %64, %68 : vector<8x128xf32>
    %c1_i32 = arith.constant 1 : i32
    %cst_27 = arith.constant dense<0.000000e+00> : vector<8x512xf32>
    %70 = tpu.matmul %69, %5, %cst_27 {dimension_numbers = #tpu.dot_dimension_numbers<[1], [0], [0], [1], [0, 0, 1, 1], [], []>} : vector<8x128xf32>, vector<128x512xf32>, vector<8x512xf32> -> vector<8x512xf32>
    %71 = arith.index_cast %c1_i32 : i32 to index
    %c0_28 = arith.constant 0 : index
    %c0_29 = arith.constant 0 : index
    %72 = vector.load %arg1[%71, %c0_28, %c0_29] : memref<8x8x512xf32, #tpu.memory_space<vmem>>, vector<1x8x512xf32>
    %73 = vector.shape_cast %72 : vector<1x8x512xf32> to vector<8x512xf32>
    %cst_30 = arith.constant dense<0.000000e+00> : vector<8x512xf32>
    %74 = tpu.matmul %41, %3, %cst_30 {dimension_numbers = #tpu.dot_dimension_numbers<[1], [0], [0], [1], [0, 0, 1, 1], [], []>} : vector<8x128xf32>, vector<128x512xf32>, vector<8x512xf32> -> vector<8x512xf32>
    %75 = arith.addf %73, %74 : vector<8x512xf32>
    %76 = vector.extract_strided_slice %75 {offsets = [0, 0], sizes = [8, 128], strides = [1, 1]} : vector<8x512xf32> to vector<8x128xf32>
    %77 = arith.negf %76 : vector<8x128xf32>
    %78 = math.exp %77 : vector<8x128xf32>
    %cst_31 = arith.constant 1.000000e+00 : f32
    %79 = vector.broadcast %cst_31 : f32 to vector<8x128xf32>
    %80 = arith.addf %79, %78 : vector<8x128xf32>
    %81 = arith.divf %79, %80 : vector<8x128xf32>
    %82 = vector.extract_strided_slice %75 {offsets = [0, 128], sizes = [8, 128], strides = [1, 1]} : vector<8x512xf32> to vector<8x128xf32>
    %83 = arith.negf %82 : vector<8x128xf32>
    %84 = math.exp %83 : vector<8x128xf32>
    %cst_32 = arith.constant 1.000000e+00 : f32
    %85 = vector.broadcast %cst_32 : f32 to vector<8x128xf32>
    %86 = arith.addf %85, %84 : vector<8x128xf32>
    %87 = arith.divf %85, %86 : vector<8x128xf32>
    %88 = vector.extract_strided_slice %75 {offsets = [0, 256], sizes = [8, 128], strides = [1, 1]} : vector<8x512xf32> to vector<8x128xf32>
    %89 = math.tanh %88 : vector<8x128xf32>
    %90 = vector.extract_strided_slice %75 {offsets = [0, 384], sizes = [8, 128], strides = [1, 1]} : vector<8x512xf32> to vector<8x128xf32>
    %91 = arith.negf %90 : vector<8x128xf32>
    %92 = math.exp %91 : vector<8x128xf32>
    %cst_33 = arith.constant 1.000000e+00 : f32
    %93 = vector.broadcast %cst_33 : f32 to vector<8x128xf32>
    %94 = arith.addf %93, %92 : vector<8x128xf32>
    %95 = arith.divf %93, %94 : vector<8x128xf32>
    %96 = arith.mulf %87, %39 : vector<8x128xf32>
    %97 = arith.mulf %81, %89 : vector<8x128xf32>
    %98 = arith.addf %96, %97 : vector<8x128xf32>
    %99 = math.tanh %98 : vector<8x128xf32>
    %100 = arith.mulf %95, %99 : vector<8x128xf32>
    %cst_34 = arith.constant dense<0.000000e+00> : vector<8x512xf32>
    %101 = tpu.matmul %100, %4, %cst_34 {dimension_numbers = #tpu.dot_dimension_numbers<[1], [0], [0], [1], [0, 0, 1, 1], [], []>} : vector<8x128xf32>, vector<128x512xf32>, vector<8x512xf32> -> vector<8x512xf32>
    %102 = arith.addf %70, %101 : vector<8x512xf32>
    %103 = arith.addf %102, %6 : vector<8x512xf32>
    %104 = vector.extract_strided_slice %103 {offsets = [0, 0], sizes = [8, 128], strides = [1, 1]} : vector<8x512xf32> to vector<8x128xf32>
    %105 = arith.negf %104 : vector<8x128xf32>
    %106 = math.exp %105 : vector<8x128xf32>
    %cst_35 = arith.constant 1.000000e+00 : f32
    %107 = vector.broadcast %cst_35 : f32 to vector<8x128xf32>
    %108 = arith.addf %107, %106 : vector<8x128xf32>
    %109 = arith.divf %107, %108 : vector<8x128xf32>
    %110 = vector.extract_strided_slice %103 {offsets = [0, 128], sizes = [8, 128], strides = [1, 1]} : vector<8x512xf32> to vector<8x128xf32>
    %111 = arith.negf %110 : vector<8x128xf32>
    %112 = math.exp %111 : vector<8x128xf32>
    %cst_36 = arith.constant 1.000000e+00 : f32
    %113 = vector.broadcast %cst_36 : f32 to vector<8x128xf32>
    %114 = arith.addf %113, %112 : vector<8x128xf32>
    %115 = arith.divf %113, %114 : vector<8x128xf32>
    %116 = vector.extract_strided_slice %103 {offsets = [0, 256], sizes = [8, 128], strides = [1, 1]} : vector<8x512xf32> to vector<8x128xf32>
    %117 = math.tanh %116 : vector<8x128xf32>
    %118 = vector.extract_strided_slice %103 {offsets = [0, 384], sizes = [8, 128], strides = [1, 1]} : vector<8x512xf32> to vector<8x128xf32>
    %119 = arith.negf %118 : vector<8x128xf32>
    %120 = math.exp %119 : vector<8x128xf32>
    %cst_37 = arith.constant 1.000000e+00 : f32
    %121 = vector.broadcast %cst_37 : f32 to vector<8x128xf32>
    %122 = arith.addf %121, %120 : vector<8x128xf32>
    %123 = arith.divf %121, %122 : vector<8x128xf32>
    %124 = arith.mulf %115, %67 : vector<8x128xf32>
    %125 = arith.mulf %109, %117 : vector<8x128xf32>
    %126 = arith.addf %124, %125 : vector<8x128xf32>
    %127 = math.tanh %126 : vector<8x128xf32>
    %128 = arith.mulf %123, %127 : vector<8x128xf32>
    %c2_i32 = arith.constant 2 : i32
    %cst_38 = arith.constant dense<0.000000e+00> : vector<8x512xf32>
    %129 = tpu.matmul %128, %5, %cst_38 {dimension_numbers = #tpu.dot_dimension_numbers<[1], [0], [0], [1], [0, 0, 1, 1], [], []>} : vector<8x128xf32>, vector<128x512xf32>, vector<8x512xf32> -> vector<8x512xf32>
    %130 = arith.index_cast %c2_i32 : i32 to index
    %c0_39 = arith.constant 0 : index
    %c0_40 = arith.constant 0 : index
    %131 = vector.load %arg1[%130, %c0_39, %c0_40] : memref<8x8x512xf32, #tpu.memory_space<vmem>>, vector<1x8x512xf32>
    %132 = vector.shape_cast %131 : vector<1x8x512xf32> to vector<8x512xf32>
    %cst_41 = arith.constant dense<0.000000e+00> : vector<8x512xf32>
    %133 = tpu.matmul %100, %3, %cst_41 {dimension_numbers = #tpu.dot_dimension_numbers<[1], [0], [0], [1], [0, 0, 1, 1], [], []>} : vector<8x128xf32>, vector<128x512xf32>, vector<8x512xf32> -> vector<8x512xf32>
    %134 = arith.addf %132, %133 : vector<8x512xf32>
    %135 = vector.extract_strided_slice %134 {offsets = [0, 0], sizes = [8, 128], strides = [1, 1]} : vector<8x512xf32> to vector<8x128xf32>
    %136 = arith.negf %135 : vector<8x128xf32>
    %137 = math.exp %136 : vector<8x128xf32>
    %cst_42 = arith.constant 1.000000e+00 : f32
    %138 = vector.broadcast %cst_42 : f32 to vector<8x128xf32>
    %139 = arith.addf %138, %137 : vector<8x128xf32>
    %140 = arith.divf %138, %139 : vector<8x128xf32>
    %141 = vector.extract_strided_slice %134 {offsets = [0, 128], sizes = [8, 128], strides = [1, 1]} : vector<8x512xf32> to vector<8x128xf32>
    %142 = arith.negf %141 : vector<8x128xf32>
    %143 = math.exp %142 : vector<8x128xf32>
    %cst_43 = arith.constant 1.000000e+00 : f32
    %144 = vector.broadcast %cst_43 : f32 to vector<8x128xf32>
    %145 = arith.addf %144, %143 : vector<8x128xf32>
    %146 = arith.divf %144, %145 : vector<8x128xf32>
    %147 = vector.extract_strided_slice %134 {offsets = [0, 256], sizes = [8, 128], strides = [1, 1]} : vector<8x512xf32> to vector<8x128xf32>
    %148 = math.tanh %147 : vector<8x128xf32>
    %149 = vector.extract_strided_slice %134 {offsets = [0, 384], sizes = [8, 128], strides = [1, 1]} : vector<8x512xf32> to vector<8x128xf32>
    %150 = arith.negf %149 : vector<8x128xf32>
    %151 = math.exp %150 : vector<8x128xf32>
    %cst_44 = arith.constant 1.000000e+00 : f32
    %152 = vector.broadcast %cst_44 : f32 to vector<8x128xf32>
    %153 = arith.addf %152, %151 : vector<8x128xf32>
    %154 = arith.divf %152, %153 : vector<8x128xf32>
    %155 = arith.mulf %146, %98 : vector<8x128xf32>
    %156 = arith.mulf %140, %148 : vector<8x128xf32>
    %157 = arith.addf %155, %156 : vector<8x128xf32>
    %158 = math.tanh %157 : vector<8x128xf32>
    %159 = arith.mulf %154, %158 : vector<8x128xf32>
    %cst_45 = arith.constant dense<0.000000e+00> : vector<8x512xf32>
    %160 = tpu.matmul %159, %4, %cst_45 {dimension_numbers = #tpu.dot_dimension_numbers<[1], [0], [0], [1], [0, 0, 1, 1], [], []>} : vector<8x128xf32>, vector<128x512xf32>, vector<8x512xf32> -> vector<8x512xf32>
    %161 = arith.addf %129, %160 : vector<8x512xf32>
    %162 = arith.addf %161, %6 : vector<8x512xf32>
    %163 = vector.extract_strided_slice %162 {offsets = [0, 0], sizes = [8, 128], strides = [1, 1]} : vector<8x512xf32> to vector<8x128xf32>
    %164 = arith.negf %163 : vector<8x128xf32>
    %165 = math.exp %164 : vector<8x128xf32>
    %cst_46 = arith.constant 1.000000e+00 : f32
    %166 = vector.broadcast %cst_46 : f32 to vector<8x128xf32>
    %167 = arith.addf %166, %165 : vector<8x128xf32>
    %168 = arith.divf %166, %167 : vector<8x128xf32>
    %169 = vector.extract_strided_slice %162 {offsets = [0, 128], sizes = [8, 128], strides = [1, 1]} : vector<8x512xf32> to vector<8x128xf32>
    %170 = arith.negf %169 : vector<8x128xf32>
    %171 = math.exp %170 : vector<8x128xf32>
    %cst_47 = arith.constant 1.000000e+00 : f32
    %172 = vector.broadcast %cst_47 : f32 to vector<8x128xf32>
    %173 = arith.addf %172, %171 : vector<8x128xf32>
    %174 = arith.divf %172, %173 : vector<8x128xf32>
    %175 = vector.extract_strided_slice %162 {offsets = [0, 256], sizes = [8, 128], strides = [1, 1]} : vector<8x512xf32> to vector<8x128xf32>
    %176 = math.tanh %175 : vector<8x128xf32>
    %177 = vector.extract_strided_slice %162 {offsets = [0, 384], sizes = [8, 128], strides = [1, 1]} : vector<8x512xf32> to vector<8x128xf32>
    %178 = arith.negf %177 : vector<8x128xf32>
    %179 = math.exp %178 : vector<8x128xf32>
    %cst_48 = arith.constant 1.000000e+00 : f32
    %180 = vector.broadcast %cst_48 : f32 to vector<8x128xf32>
    %181 = arith.addf %180, %179 : vector<8x128xf32>
    %182 = arith.divf %180, %181 : vector<8x128xf32>
    %183 = arith.mulf %174, %126 : vector<8x128xf32>
    %184 = arith.mulf %168, %176 : vector<8x128xf32>
    %185 = arith.addf %183, %184 : vector<8x128xf32>
    %186 = math.tanh %185 : vector<8x128xf32>
    %187 = arith.mulf %182, %186 : vector<8x128xf32>
    %c3_i32 = arith.constant 3 : i32
    %cst_49 = arith.constant dense<0.000000e+00> : vector<8x512xf32>
    %188 = tpu.matmul %187, %5, %cst_49 {dimension_numbers = #tpu.dot_dimension_numbers<[1], [0], [0], [1], [0, 0, 1, 1], [], []>} : vector<8x128xf32>, vector<128x512xf32>, vector<8x512xf32> -> vector<8x512xf32>
    %189 = arith.index_cast %c3_i32 : i32 to index
    %c0_50 = arith.constant 0 : index
    %c0_51 = arith.constant 0 : index
    %190 = vector.load %arg1[%189, %c0_50, %c0_51] : memref<8x8x512xf32, #tpu.memory_space<vmem>>, vector<1x8x512xf32>
    %191 = vector.shape_cast %190 : vector<1x8x512xf32> to vector<8x512xf32>
    %cst_52 = arith.constant dense<0.000000e+00> : vector<8x512xf32>
    %192 = tpu.matmul %159, %3, %cst_52 {dimension_numbers = #tpu.dot_dimension_numbers<[1], [0], [0], [1], [0, 0, 1, 1], [], []>} : vector<8x128xf32>, vector<128x512xf32>, vector<8x512xf32> -> vector<8x512xf32>
    %193 = arith.addf %191, %192 : vector<8x512xf32>
    %194 = vector.extract_strided_slice %193 {offsets = [0, 0], sizes = [8, 128], strides = [1, 1]} : vector<8x512xf32> to vector<8x128xf32>
    %195 = arith.negf %194 : vector<8x128xf32>
    %196 = math.exp %195 : vector<8x128xf32>
    %cst_53 = arith.constant 1.000000e+00 : f32
    %197 = vector.broadcast %cst_53 : f32 to vector<8x128xf32>
    %198 = arith.addf %197, %196 : vector<8x128xf32>
    %199 = arith.divf %197, %198 : vector<8x128xf32>
    %200 = vector.extract_strided_slice %193 {offsets = [0, 128], sizes = [8, 128], strides = [1, 1]} : vector<8x512xf32> to vector<8x128xf32>
    %201 = arith.negf %200 : vector<8x128xf32>
    %202 = math.exp %201 : vector<8x128xf32>
    %cst_54 = arith.constant 1.000000e+00 : f32
    %203 = vector.broadcast %cst_54 : f32 to vector<8x128xf32>
    %204 = arith.addf %203, %202 : vector<8x128xf32>
    %205 = arith.divf %203, %204 : vector<8x128xf32>
    %206 = vector.extract_strided_slice %193 {offsets = [0, 256], sizes = [8, 128], strides = [1, 1]} : vector<8x512xf32> to vector<8x128xf32>
    %207 = math.tanh %206 : vector<8x128xf32>
    %208 = vector.extract_strided_slice %193 {offsets = [0, 384], sizes = [8, 128], strides = [1, 1]} : vector<8x512xf32> to vector<8x128xf32>
    %209 = arith.negf %208 : vector<8x128xf32>
    %210 = math.exp %209 : vector<8x128xf32>
    %cst_55 = arith.constant 1.000000e+00 : f32
    %211 = vector.broadcast %cst_55 : f32 to vector<8x128xf32>
    %212 = arith.addf %211, %210 : vector<8x128xf32>
    %213 = arith.divf %211, %212 : vector<8x128xf32>
    %214 = arith.mulf %205, %157 : vector<8x128xf32>
    %215 = arith.mulf %199, %207 : vector<8x128xf32>
    %216 = arith.addf %214, %215 : vector<8x128xf32>
    %217 = math.tanh %216 : vector<8x128xf32>
    %218 = arith.mulf %213, %217 : vector<8x128xf32>
    %cst_56 = arith.constant dense<0.000000e+00> : vector<8x512xf32>
    %219 = tpu.matmul %218, %4, %cst_56 {dimension_numbers = #tpu.dot_dimension_numbers<[1], [0], [0], [1], [0, 0, 1, 1], [], []>} : vector<8x128xf32>, vector<128x512xf32>, vector<8x512xf32> -> vector<8x512xf32>
    %220 = arith.addf %188, %219 : vector<8x512xf32>
    %221 = arith.addf %220, %6 : vector<8x512xf32>
    %222 = vector.extract_strided_slice %221 {offsets = [0, 0], sizes = [8, 128], strides = [1, 1]} : vector<8x512xf32> to vector<8x128xf32>
    %223 = arith.negf %222 : vector<8x128xf32>
    %224 = math.exp %223 : vector<8x128xf32>
    %cst_57 = arith.constant 1.000000e+00 : f32
    %225 = vector.broadcast %cst_57 : f32 to vector<8x128xf32>
    %226 = arith.addf %225, %224 : vector<8x128xf32>
    %227 = arith.divf %225, %226 : vector<8x128xf32>
    %228 = vector.extract_strided_slice %221 {offsets = [0, 128], sizes = [8, 128], strides = [1, 1]} : vector<8x512xf32> to vector<8x128xf32>
    %229 = arith.negf %228 : vector<8x128xf32>
    %230 = math.exp %229 : vector<8x128xf32>
    %cst_58 = arith.constant 1.000000e+00 : f32
    %231 = vector.broadcast %cst_58 : f32 to vector<8x128xf32>
    %232 = arith.addf %231, %230 : vector<8x128xf32>
    %233 = arith.divf %231, %232 : vector<8x128xf32>
    %234 = vector.extract_strided_slice %221 {offsets = [0, 256], sizes = [8, 128], strides = [1, 1]} : vector<8x512xf32> to vector<8x128xf32>
    %235 = math.tanh %234 : vector<8x128xf32>
    %236 = vector.extract_strided_slice %221 {offsets = [0, 384], sizes = [8, 128], strides = [1, 1]} : vector<8x512xf32> to vector<8x128xf32>
    %237 = arith.negf %236 : vector<8x128xf32>
    %238 = math.exp %237 : vector<8x128xf32>
    %cst_59 = arith.constant 1.000000e+00 : f32
    %239 = vector.broadcast %cst_59 : f32 to vector<8x128xf32>
    %240 = arith.addf %239, %238 : vector<8x128xf32>
    %241 = arith.divf %239, %240 : vector<8x128xf32>
    %242 = arith.mulf %233, %185 : vector<8x128xf32>
    %243 = arith.mulf %227, %235 : vector<8x128xf32>
    %244 = arith.addf %242, %243 : vector<8x128xf32>
    %245 = math.tanh %244 : vector<8x128xf32>
    %246 = arith.mulf %241, %245 : vector<8x128xf32>
    %c4_i32 = arith.constant 4 : i32
    %cst_60 = arith.constant dense<0.000000e+00> : vector<8x512xf32>
    %247 = tpu.matmul %246, %5, %cst_60 {dimension_numbers = #tpu.dot_dimension_numbers<[1], [0], [0], [1], [0, 0, 1, 1], [], []>} : vector<8x128xf32>, vector<128x512xf32>, vector<8x512xf32> -> vector<8x512xf32>
    %248 = arith.index_cast %c4_i32 : i32 to index
    %c0_61 = arith.constant 0 : index
    %c0_62 = arith.constant 0 : index
    %249 = vector.load %arg1[%248, %c0_61, %c0_62] : memref<8x8x512xf32, #tpu.memory_space<vmem>>, vector<1x8x512xf32>
    %250 = vector.shape_cast %249 : vector<1x8x512xf32> to vector<8x512xf32>
    %cst_63 = arith.constant dense<0.000000e+00> : vector<8x512xf32>
    %251 = tpu.matmul %218, %3, %cst_63 {dimension_numbers = #tpu.dot_dimension_numbers<[1], [0], [0], [1], [0, 0, 1, 1], [], []>} : vector<8x128xf32>, vector<128x512xf32>, vector<8x512xf32> -> vector<8x512xf32>
    %252 = arith.addf %250, %251 : vector<8x512xf32>
    %253 = vector.extract_strided_slice %252 {offsets = [0, 0], sizes = [8, 128], strides = [1, 1]} : vector<8x512xf32> to vector<8x128xf32>
    %254 = arith.negf %253 : vector<8x128xf32>
    %255 = math.exp %254 : vector<8x128xf32>
    %cst_64 = arith.constant 1.000000e+00 : f32
    %256 = vector.broadcast %cst_64 : f32 to vector<8x128xf32>
    %257 = arith.addf %256, %255 : vector<8x128xf32>
    %258 = arith.divf %256, %257 : vector<8x128xf32>
    %259 = vector.extract_strided_slice %252 {offsets = [0, 128], sizes = [8, 128], strides = [1, 1]} : vector<8x512xf32> to vector<8x128xf32>
    %260 = arith.negf %259 : vector<8x128xf32>
    %261 = math.exp %260 : vector<8x128xf32>
    %cst_65 = arith.constant 1.000000e+00 : f32
    %262 = vector.broadcast %cst_65 : f32 to vector<8x128xf32>
    %263 = arith.addf %262, %261 : vector<8x128xf32>
    %264 = arith.divf %262, %263 : vector<8x128xf32>
    %265 = vector.extract_strided_slice %252 {offsets = [0, 256], sizes = [8, 128], strides = [1, 1]} : vector<8x512xf32> to vector<8x128xf32>
    %266 = math.tanh %265 : vector<8x128xf32>
    %267 = vector.extract_strided_slice %252 {offsets = [0, 384], sizes = [8, 128], strides = [1, 1]} : vector<8x512xf32> to vector<8x128xf32>
    %268 = arith.negf %267 : vector<8x128xf32>
    %269 = math.exp %268 : vector<8x128xf32>
    %cst_66 = arith.constant 1.000000e+00 : f32
    %270 = vector.broadcast %cst_66 : f32 to vector<8x128xf32>
    %271 = arith.addf %270, %269 : vector<8x128xf32>
    %272 = arith.divf %270, %271 : vector<8x128xf32>
    %273 = arith.mulf %264, %216 : vector<8x128xf32>
    %274 = arith.mulf %258, %266 : vector<8x128xf32>
    %275 = arith.addf %273, %274 : vector<8x128xf32>
    %276 = math.tanh %275 : vector<8x128xf32>
    %277 = arith.mulf %272, %276 : vector<8x128xf32>
    %cst_67 = arith.constant dense<0.000000e+00> : vector<8x512xf32>
    %278 = tpu.matmul %277, %4, %cst_67 {dimension_numbers = #tpu.dot_dimension_numbers<[1], [0], [0], [1], [0, 0, 1, 1], [], []>} : vector<8x128xf32>, vector<128x512xf32>, vector<8x512xf32> -> vector<8x512xf32>
    %279 = arith.addf %247, %278 : vector<8x512xf32>
    %280 = arith.addf %279, %6 : vector<8x512xf32>
    %281 = vector.extract_strided_slice %280 {offsets = [0, 0], sizes = [8, 128], strides = [1, 1]} : vector<8x512xf32> to vector<8x128xf32>
    %282 = arith.negf %281 : vector<8x128xf32>
    %283 = math.exp %282 : vector<8x128xf32>
    %cst_68 = arith.constant 1.000000e+00 : f32
    %284 = vector.broadcast %cst_68 : f32 to vector<8x128xf32>
    %285 = arith.addf %284, %283 : vector<8x128xf32>
    %286 = arith.divf %284, %285 : vector<8x128xf32>
    %287 = vector.extract_strided_slice %280 {offsets = [0, 128], sizes = [8, 128], strides = [1, 1]} : vector<8x512xf32> to vector<8x128xf32>
    %288 = arith.negf %287 : vector<8x128xf32>
    %289 = math.exp %288 : vector<8x128xf32>
    %cst_69 = arith.constant 1.000000e+00 : f32
    %290 = vector.broadcast %cst_69 : f32 to vector<8x128xf32>
    %291 = arith.addf %290, %289 : vector<8x128xf32>
    %292 = arith.divf %290, %291 : vector<8x128xf32>
    %293 = vector.extract_strided_slice %280 {offsets = [0, 256], sizes = [8, 128], strides = [1, 1]} : vector<8x512xf32> to vector<8x128xf32>
    %294 = math.tanh %293 : vector<8x128xf32>
    %295 = vector.extract_strided_slice %280 {offsets = [0, 384], sizes = [8, 128], strides = [1, 1]} : vector<8x512xf32> to vector<8x128xf32>
    %296 = arith.negf %295 : vector<8x128xf32>
    %297 = math.exp %296 : vector<8x128xf32>
    %cst_70 = arith.constant 1.000000e+00 : f32
    %298 = vector.broadcast %cst_70 : f32 to vector<8x128xf32>
    %299 = arith.addf %298, %297 : vector<8x128xf32>
    %300 = arith.divf %298, %299 : vector<8x128xf32>
    %301 = arith.mulf %292, %244 : vector<8x128xf32>
    %302 = arith.mulf %286, %294 : vector<8x128xf32>
    %303 = arith.addf %301, %302 : vector<8x128xf32>
    %304 = math.tanh %303 : vector<8x128xf32>
    %305 = arith.mulf %300, %304 : vector<8x128xf32>
    %c5_i32 = arith.constant 5 : i32
    %cst_71 = arith.constant dense<0.000000e+00> : vector<8x512xf32>
    %306 = tpu.matmul %305, %5, %cst_71 {dimension_numbers = #tpu.dot_dimension_numbers<[1], [0], [0], [1], [0, 0, 1, 1], [], []>} : vector<8x128xf32>, vector<128x512xf32>, vector<8x512xf32> -> vector<8x512xf32>
    %307 = arith.index_cast %c5_i32 : i32 to index
    %c0_72 = arith.constant 0 : index
    %c0_73 = arith.constant 0 : index
    %308 = vector.load %arg1[%307, %c0_72, %c0_73] : memref<8x8x512xf32, #tpu.memory_space<vmem>>, vector<1x8x512xf32>
    %309 = vector.shape_cast %308 : vector<1x8x512xf32> to vector<8x512xf32>
    %cst_74 = arith.constant dense<0.000000e+00> : vector<8x512xf32>
    %310 = tpu.matmul %277, %3, %cst_74 {dimension_numbers = #tpu.dot_dimension_numbers<[1], [0], [0], [1], [0, 0, 1, 1], [], []>} : vector<8x128xf32>, vector<128x512xf32>, vector<8x512xf32> -> vector<8x512xf32>
    %311 = arith.addf %309, %310 : vector<8x512xf32>
    %312 = vector.extract_strided_slice %311 {offsets = [0, 0], sizes = [8, 128], strides = [1, 1]} : vector<8x512xf32> to vector<8x128xf32>
    %313 = arith.negf %312 : vector<8x128xf32>
    %314 = math.exp %313 : vector<8x128xf32>
    %cst_75 = arith.constant 1.000000e+00 : f32
    %315 = vector.broadcast %cst_75 : f32 to vector<8x128xf32>
    %316 = arith.addf %315, %314 : vector<8x128xf32>
    %317 = arith.divf %315, %316 : vector<8x128xf32>
    %318 = vector.extract_strided_slice %311 {offsets = [0, 128], sizes = [8, 128], strides = [1, 1]} : vector<8x512xf32> to vector<8x128xf32>
    %319 = arith.negf %318 : vector<8x128xf32>
    %320 = math.exp %319 : vector<8x128xf32>
    %cst_76 = arith.constant 1.000000e+00 : f32
    %321 = vector.broadcast %cst_76 : f32 to vector<8x128xf32>
    %322 = arith.addf %321, %320 : vector<8x128xf32>
    %323 = arith.divf %321, %322 : vector<8x128xf32>
    %324 = vector.extract_strided_slice %311 {offsets = [0, 256], sizes = [8, 128], strides = [1, 1]} : vector<8x512xf32> to vector<8x128xf32>
    %325 = math.tanh %324 : vector<8x128xf32>
    %326 = vector.extract_strided_slice %311 {offsets = [0, 384], sizes = [8, 128], strides = [1, 1]} : vector<8x512xf32> to vector<8x128xf32>
    %327 = arith.negf %326 : vector<8x128xf32>
    %328 = math.exp %327 : vector<8x128xf32>
    %cst_77 = arith.constant 1.000000e+00 : f32
    %329 = vector.broadcast %cst_77 : f32 to vector<8x128xf32>
    %330 = arith.addf %329, %328 : vector<8x128xf32>
    %331 = arith.divf %329, %330 : vector<8x128xf32>
    %332 = arith.mulf %323, %275 : vector<8x128xf32>
    %333 = arith.mulf %317, %325 : vector<8x128xf32>
    %334 = arith.addf %332, %333 : vector<8x128xf32>
    %335 = math.tanh %334 : vector<8x128xf32>
    %336 = arith.mulf %331, %335 : vector<8x128xf32>
    %cst_78 = arith.constant dense<0.000000e+00> : vector<8x512xf32>
    %337 = tpu.matmul %336, %4, %cst_78 {dimension_numbers = #tpu.dot_dimension_numbers<[1], [0], [0], [1], [0, 0, 1, 1], [], []>} : vector<8x128xf32>, vector<128x512xf32>, vector<8x512xf32> -> vector<8x512xf32>
    %338 = arith.addf %306, %337 : vector<8x512xf32>
    %339 = arith.addf %338, %6 : vector<8x512xf32>
    %340 = vector.extract_strided_slice %339 {offsets = [0, 0], sizes = [8, 128], strides = [1, 1]} : vector<8x512xf32> to vector<8x128xf32>
    %341 = arith.negf %340 : vector<8x128xf32>
    %342 = math.exp %341 : vector<8x128xf32>
    %cst_79 = arith.constant 1.000000e+00 : f32
    %343 = vector.broadcast %cst_79 : f32 to vector<8x128xf32>
    %344 = arith.addf %343, %342 : vector<8x128xf32>
    %345 = arith.divf %343, %344 : vector<8x128xf32>
    %346 = vector.extract_strided_slice %339 {offsets = [0, 128], sizes = [8, 128], strides = [1, 1]} : vector<8x512xf32> to vector<8x128xf32>
    %347 = arith.negf %346 : vector<8x128xf32>
    %348 = math.exp %347 : vector<8x128xf32>
    %cst_80 = arith.constant 1.000000e+00 : f32
    %349 = vector.broadcast %cst_80 : f32 to vector<8x128xf32>
    %350 = arith.addf %349, %348 : vector<8x128xf32>
    %351 = arith.divf %349, %350 : vector<8x128xf32>
    %352 = vector.extract_strided_slice %339 {offsets = [0, 256], sizes = [8, 128], strides = [1, 1]} : vector<8x512xf32> to vector<8x128xf32>
    %353 = math.tanh %352 : vector<8x128xf32>
    %354 = vector.extract_strided_slice %339 {offsets = [0, 384], sizes = [8, 128], strides = [1, 1]} : vector<8x512xf32> to vector<8x128xf32>
    %355 = arith.negf %354 : vector<8x128xf32>
    %356 = math.exp %355 : vector<8x128xf32>
    %cst_81 = arith.constant 1.000000e+00 : f32
    %357 = vector.broadcast %cst_81 : f32 to vector<8x128xf32>
    %358 = arith.addf %357, %356 : vector<8x128xf32>
    %359 = arith.divf %357, %358 : vector<8x128xf32>
    %360 = arith.mulf %351, %303 : vector<8x128xf32>
    %361 = arith.mulf %345, %353 : vector<8x128xf32>
    %362 = arith.addf %360, %361 : vector<8x128xf32>
    %363 = math.tanh %362 : vector<8x128xf32>
    %364 = arith.mulf %359, %363 : vector<8x128xf32>
    %c6_i32 = arith.constant 6 : i32
    %cst_82 = arith.constant dense<0.000000e+00> : vector<8x512xf32>
    %365 = tpu.matmul %364, %5, %cst_82 {dimension_numbers = #tpu.dot_dimension_numbers<[1], [0], [0], [1], [0, 0, 1, 1], [], []>} : vector<8x128xf32>, vector<128x512xf32>, vector<8x512xf32> -> vector<8x512xf32>
    %366 = arith.index_cast %c6_i32 : i32 to index
    %c0_83 = arith.constant 0 : index
    %c0_84 = arith.constant 0 : index
    %367 = vector.load %arg1[%366, %c0_83, %c0_84] : memref<8x8x512xf32, #tpu.memory_space<vmem>>, vector<1x8x512xf32>
    %368 = vector.shape_cast %367 : vector<1x8x512xf32> to vector<8x512xf32>
    %cst_85 = arith.constant dense<0.000000e+00> : vector<8x512xf32>
    %369 = tpu.matmul %336, %3, %cst_85 {dimension_numbers = #tpu.dot_dimension_numbers<[1], [0], [0], [1], [0, 0, 1, 1], [], []>} : vector<8x128xf32>, vector<128x512xf32>, vector<8x512xf32> -> vector<8x512xf32>
    %370 = arith.addf %368, %369 : vector<8x512xf32>
    %371 = vector.extract_strided_slice %370 {offsets = [0, 0], sizes = [8, 128], strides = [1, 1]} : vector<8x512xf32> to vector<8x128xf32>
    %372 = arith.negf %371 : vector<8x128xf32>
    %373 = math.exp %372 : vector<8x128xf32>
    %cst_86 = arith.constant 1.000000e+00 : f32
    %374 = vector.broadcast %cst_86 : f32 to vector<8x128xf32>
    %375 = arith.addf %374, %373 : vector<8x128xf32>
    %376 = arith.divf %374, %375 : vector<8x128xf32>
    %377 = vector.extract_strided_slice %370 {offsets = [0, 128], sizes = [8, 128], strides = [1, 1]} : vector<8x512xf32> to vector<8x128xf32>
    %378 = arith.negf %377 : vector<8x128xf32>
    %379 = math.exp %378 : vector<8x128xf32>
    %cst_87 = arith.constant 1.000000e+00 : f32
    %380 = vector.broadcast %cst_87 : f32 to vector<8x128xf32>
    %381 = arith.addf %380, %379 : vector<8x128xf32>
    %382 = arith.divf %380, %381 : vector<8x128xf32>
    %383 = vector.extract_strided_slice %370 {offsets = [0, 256], sizes = [8, 128], strides = [1, 1]} : vector<8x512xf32> to vector<8x128xf32>
    %384 = math.tanh %383 : vector<8x128xf32>
    %385 = vector.extract_strided_slice %370 {offsets = [0, 384], sizes = [8, 128], strides = [1, 1]} : vector<8x512xf32> to vector<8x128xf32>
    %386 = arith.negf %385 : vector<8x128xf32>
    %387 = math.exp %386 : vector<8x128xf32>
    %cst_88 = arith.constant 1.000000e+00 : f32
    %388 = vector.broadcast %cst_88 : f32 to vector<8x128xf32>
    %389 = arith.addf %388, %387 : vector<8x128xf32>
    %390 = arith.divf %388, %389 : vector<8x128xf32>
    %391 = arith.mulf %382, %334 : vector<8x128xf32>
    %392 = arith.mulf %376, %384 : vector<8x128xf32>
    %393 = arith.addf %391, %392 : vector<8x128xf32>
    %394 = math.tanh %393 : vector<8x128xf32>
    %395 = arith.mulf %390, %394 : vector<8x128xf32>
    %cst_89 = arith.constant dense<0.000000e+00> : vector<8x512xf32>
    %396 = tpu.matmul %395, %4, %cst_89 {dimension_numbers = #tpu.dot_dimension_numbers<[1], [0], [0], [1], [0, 0, 1, 1], [], []>} : vector<8x128xf32>, vector<128x512xf32>, vector<8x512xf32> -> vector<8x512xf32>
    %397 = arith.addf %365, %396 : vector<8x512xf32>
    %398 = arith.addf %397, %6 : vector<8x512xf32>
    %399 = vector.extract_strided_slice %398 {offsets = [0, 0], sizes = [8, 128], strides = [1, 1]} : vector<8x512xf32> to vector<8x128xf32>
    %400 = arith.negf %399 : vector<8x128xf32>
    %401 = math.exp %400 : vector<8x128xf32>
    %cst_90 = arith.constant 1.000000e+00 : f32
    %402 = vector.broadcast %cst_90 : f32 to vector<8x128xf32>
    %403 = arith.addf %402, %401 : vector<8x128xf32>
    %404 = arith.divf %402, %403 : vector<8x128xf32>
    %405 = vector.extract_strided_slice %398 {offsets = [0, 128], sizes = [8, 128], strides = [1, 1]} : vector<8x512xf32> to vector<8x128xf32>
    %406 = arith.negf %405 : vector<8x128xf32>
    %407 = math.exp %406 : vector<8x128xf32>
    %cst_91 = arith.constant 1.000000e+00 : f32
    %408 = vector.broadcast %cst_91 : f32 to vector<8x128xf32>
    %409 = arith.addf %408, %407 : vector<8x128xf32>
    %410 = arith.divf %408, %409 : vector<8x128xf32>
    %411 = vector.extract_strided_slice %398 {offsets = [0, 256], sizes = [8, 128], strides = [1, 1]} : vector<8x512xf32> to vector<8x128xf32>
    %412 = math.tanh %411 : vector<8x128xf32>
    %413 = vector.extract_strided_slice %398 {offsets = [0, 384], sizes = [8, 128], strides = [1, 1]} : vector<8x512xf32> to vector<8x128xf32>
    %414 = arith.negf %413 : vector<8x128xf32>
    %415 = math.exp %414 : vector<8x128xf32>
    %cst_92 = arith.constant 1.000000e+00 : f32
    %416 = vector.broadcast %cst_92 : f32 to vector<8x128xf32>
    %417 = arith.addf %416, %415 : vector<8x128xf32>
    %418 = arith.divf %416, %417 : vector<8x128xf32>
    %419 = arith.mulf %410, %362 : vector<8x128xf32>
    %420 = arith.mulf %404, %412 : vector<8x128xf32>
    %421 = arith.addf %419, %420 : vector<8x128xf32>
    %422 = math.tanh %421 : vector<8x128xf32>
    %423 = arith.mulf %418, %422 : vector<8x128xf32>
    %c7_i32 = arith.constant 7 : i32
    %cst_93 = arith.constant dense<0.000000e+00> : vector<8x512xf32>
    %424 = tpu.matmul %423, %5, %cst_93 {dimension_numbers = #tpu.dot_dimension_numbers<[1], [0], [0], [1], [0, 0, 1, 1], [], []>} : vector<8x128xf32>, vector<128x512xf32>, vector<8x512xf32> -> vector<8x512xf32>
    %425 = arith.index_cast %c7_i32 : i32 to index
    %c0_94 = arith.constant 0 : index
    %c0_95 = arith.constant 0 : index
    %426 = vector.load %arg1[%425, %c0_94, %c0_95] : memref<8x8x512xf32, #tpu.memory_space<vmem>>, vector<1x8x512xf32>
    %427 = vector.shape_cast %426 : vector<1x8x512xf32> to vector<8x512xf32>
    %cst_96 = arith.constant dense<0.000000e+00> : vector<8x512xf32>
    %428 = tpu.matmul %395, %3, %cst_96 {dimension_numbers = #tpu.dot_dimension_numbers<[1], [0], [0], [1], [0, 0, 1, 1], [], []>} : vector<8x128xf32>, vector<128x512xf32>, vector<8x512xf32> -> vector<8x512xf32>
    %429 = arith.addf %427, %428 : vector<8x512xf32>
    %430 = vector.extract_strided_slice %429 {offsets = [0, 0], sizes = [8, 128], strides = [1, 1]} : vector<8x512xf32> to vector<8x128xf32>
    %431 = arith.negf %430 : vector<8x128xf32>
    %432 = math.exp %431 : vector<8x128xf32>
    %cst_97 = arith.constant 1.000000e+00 : f32
    %433 = vector.broadcast %cst_97 : f32 to vector<8x128xf32>
    %434 = arith.addf %433, %432 : vector<8x128xf32>
    %435 = arith.divf %433, %434 : vector<8x128xf32>
    %436 = vector.extract_strided_slice %429 {offsets = [0, 128], sizes = [8, 128], strides = [1, 1]} : vector<8x512xf32> to vector<8x128xf32>
    %437 = arith.negf %436 : vector<8x128xf32>
    %438 = math.exp %437 : vector<8x128xf32>
    %cst_98 = arith.constant 1.000000e+00 : f32
    %439 = vector.broadcast %cst_98 : f32 to vector<8x128xf32>
    %440 = arith.addf %439, %438 : vector<8x128xf32>
    %441 = arith.divf %439, %440 : vector<8x128xf32>
    %442 = vector.extract_strided_slice %429 {offsets = [0, 256], sizes = [8, 128], strides = [1, 1]} : vector<8x512xf32> to vector<8x128xf32>
    %443 = math.tanh %442 : vector<8x128xf32>
    %444 = vector.extract_strided_slice %429 {offsets = [0, 384], sizes = [8, 128], strides = [1, 1]} : vector<8x512xf32> to vector<8x128xf32>
    %445 = arith.negf %444 : vector<8x128xf32>
    %446 = math.exp %445 : vector<8x128xf32>
    %cst_99 = arith.constant 1.000000e+00 : f32
    %447 = vector.broadcast %cst_99 : f32 to vector<8x128xf32>
    %448 = arith.addf %447, %446 : vector<8x128xf32>
    %449 = arith.divf %447, %448 : vector<8x128xf32>
    %450 = arith.mulf %441, %393 : vector<8x128xf32>
    %451 = arith.mulf %435, %443 : vector<8x128xf32>
    %452 = arith.addf %450, %451 : vector<8x128xf32>
    %453 = math.tanh %452 : vector<8x128xf32>
    %454 = arith.mulf %449, %453 : vector<8x128xf32>
    %cst_100 = arith.constant dense<0.000000e+00> : vector<8x512xf32>
    %455 = tpu.matmul %454, %4, %cst_100 {dimension_numbers = #tpu.dot_dimension_numbers<[1], [0], [0], [1], [0, 0, 1, 1], [], []>} : vector<8x128xf32>, vector<128x512xf32>, vector<8x512xf32> -> vector<8x512xf32>
    %456 = arith.addf %424, %455 : vector<8x512xf32>
    %457 = arith.addf %456, %6 : vector<8x512xf32>
    %458 = vector.extract_strided_slice %457 {offsets = [0, 0], sizes = [8, 128], strides = [1, 1]} : vector<8x512xf32> to vector<8x128xf32>
    %459 = arith.negf %458 : vector<8x128xf32>
    %460 = math.exp %459 : vector<8x128xf32>
    %cst_101 = arith.constant 1.000000e+00 : f32
    %461 = vector.broadcast %cst_101 : f32 to vector<8x128xf32>
    %462 = arith.addf %461, %460 : vector<8x128xf32>
    %463 = arith.divf %461, %462 : vector<8x128xf32>
    %464 = vector.extract_strided_slice %457 {offsets = [0, 128], sizes = [8, 128], strides = [1, 1]} : vector<8x512xf32> to vector<8x128xf32>
    %465 = arith.negf %464 : vector<8x128xf32>
    %466 = math.exp %465 : vector<8x128xf32>
    %cst_102 = arith.constant 1.000000e+00 : f32
    %467 = vector.broadcast %cst_102 : f32 to vector<8x128xf32>
    %468 = arith.addf %467, %466 : vector<8x128xf32>
    %469 = arith.divf %467, %468 : vector<8x128xf32>
    %470 = vector.extract_strided_slice %457 {offsets = [0, 256], sizes = [8, 128], strides = [1, 1]} : vector<8x512xf32> to vector<8x128xf32>
    %471 = math.tanh %470 : vector<8x128xf32>
    %472 = vector.extract_strided_slice %457 {offsets = [0, 384], sizes = [8, 128], strides = [1, 1]} : vector<8x512xf32> to vector<8x128xf32>
    %473 = arith.negf %472 : vector<8x128xf32>
    %474 = math.exp %473 : vector<8x128xf32>
    %cst_103 = arith.constant 1.000000e+00 : f32
    %475 = vector.broadcast %cst_103 : f32 to vector<8x128xf32>
    %476 = arith.addf %475, %474 : vector<8x128xf32>
    %477 = arith.divf %475, %476 : vector<8x128xf32>
    %478 = arith.mulf %469, %421 : vector<8x128xf32>
    %479 = arith.mulf %463, %471 : vector<8x128xf32>
    %480 = arith.addf %478, %479 : vector<8x128xf32>
    %481 = math.tanh %480 : vector<8x128xf32>
    %482 = arith.mulf %477, %481 : vector<8x128xf32>
    %c8_i32 = arith.constant 8 : i32
    %c0_104 = arith.constant 0 : index
    %c0_105 = arith.constant 0 : index
    %483 = vector.load %arg7[%c0_104, %c0_105] : memref<8x128xf32, #tpu.memory_space<vmem>>, vector<8x128xf32>
    tpu.vector_store %arg7[%c0_104, %c0_105], %454 {strides = array<i32>} : memref<8x128xf32, #tpu.memory_space<vmem>>, vector<8x128xf32>,
    %c0_106 = arith.constant 0 : index
    %c0_107 = arith.constant 0 : index
    %484 = vector.load %arg8[%c0_106, %c0_107] : memref<8x128xf32, #tpu.memory_space<vmem>>, vector<8x128xf32>
    tpu.vector_store %arg8[%c0_106, %c0_107], %452 {strides = array<i32>} : memref<8x128xf32, #tpu.memory_space<vmem>>, vector<8x128xf32>,
    %c0_108 = arith.constant 0 : index
    %c0_109 = arith.constant 0 : index
    %485 = vector.load %arg9[%c0_108, %c0_109] : memref<8x128xf32, #tpu.memory_space<vmem>>, vector<8x128xf32>
    tpu.vector_store %arg9[%c0_108, %c0_109], %482 {strides = array<i32>} : memref<8x128xf32, #tpu.memory_space<vmem>>, vector<8x128xf32>,
    %c0_110 = arith.constant 0 : index
    %c0_111 = arith.constant 0 : index
    %486 = vector.load %arg10[%c0_110, %c0_111] : memref<8x128xf32, #tpu.memory_space<vmem>>, vector<8x128xf32>
    tpu.vector_store %arg10[%c0_110, %c0_111], %480 {strides = array<i32>} : memref<8x128xf32, #tpu.memory_space<vmem>>, vector<8x128xf32>,
    %c0_i32_112 = arith.constant 0 : i32
    %487 = arith.cmpi eq, %arg0, %c0_i32_112 : i32
    %488 = arith.extui %487 : i1 to i32
    %c0_i32_113 = arith.constant 0 : i32
    %489 = arith.cmpi ne, %488, %c0_i32_113 : i32
    scf.if %489 {
      %c0_114 = arith.constant 0 : index
      %c0_115 = arith.constant 0 : index
      %490 = vector.load %arg6[%c0_114, %c0_115] : memref<8x128xf32, #tpu.memory_space<vmem>>, vector<8x128xf32>
      tpu.vector_store %arg6[%c0_114, %c0_115], %482 {strides = array<i32>} : memref<8x128xf32, #tpu.memory_space<vmem>>, vector<8x128xf32>,
    } else {
    }
    return
  }
  func.func @transform_0(%arg0: i32) -> (i32, i32, i32) {
    %c0_i32 = arith.constant 0 : i32
    %c0_i32_0 = arith.constant 0 : i32
    %c0_i32_1 = arith.constant 0 : i32
    return %arg0, %c0_i32, %c0_i32_0 : i32, i32, i32
  }
  func.func @transform_1(%arg0: i32) -> (i32, i32) {
    %c0_i32 = arith.constant 0 : i32
    %c0_i32_0 = arith.constant 0 : i32
    %c0_i32_1 = arith.constant 0 : i32
    return %c0_i32, %c0_i32_0 : i32, i32
  }
  func.func @transform_2(%arg0: i32) -> (i32, i32) {
    %c0_i32 = arith.constant 0 : i32
    %c0_i32_0 = arith.constant 0 : i32
    %c0_i32_1 = arith.constant 0 : i32
    return %c0_i32, %c0_i32_0 : i32, i32
  }
  func.func @transform_3(%arg0: i32) -> (i32, i32) {
    %c0_i32 = arith.constant 0 : i32
    %c0_i32_0 = arith.constant 0 : i32
    %c0_i32_1 = arith.constant 0 : i32
    return %c0_i32, %c0_i32_0 : i32, i32
  }
  func.func @transform_4(%arg0: i32) -> (i32, i32) {
    %c0_i32 = arith.constant 0 : i32
    %c0_i32_0 = arith.constant 0 : i32
    %c0_i32_1 = arith.constant 0 : i32
    return %c0_i32, %c0_i32_0 : i32, i32
  }
  func.func @transform_5(%arg0: i32) -> (i32, i32) {
    %c0_i32 = arith.constant 0 : i32
    %c0_i32_0 = arith.constant 0 : i32
    %c0_i32_1 = arith.constant 0 : i32
    return %c0_i32, %c0_i32_0 : i32, i32
  }
}

</mosaic_0001>

<bundles_post_ra>
// kernel: tpu_custom_call.1
= control target key start
LH: loop header
LB: loop body
LE: loop exit
PB: predicated region body
PF: predicated region fallthrough
CT: control target
= control target key end

     0   :  { %10 = vsyncpa [#allocation7], 0  ;;  %s7543_s0 = inlined_call_operand.hbm [shape: f32[8,8,512], index: 0, kind: input, shape index: {}]   ;;  %s7544_s1 = inlined_call_operand.hbm [shape: f32[128,512], index: 1, kind: input, shape index: {}]   ;;  %s7545_s2 = inlined_call_operand.hbm [shape: f32[128,512], index: 2, kind: input, shape index: {}]   ;;  %s7546_s3 = inlined_call_operand.hbm [shape: f32[128,512], index: 3, kind: input, shape index: {}]   ;;  %s7547_s4 = inlined_call_operand.hbm [shape: f32[8,512], index: 4, kind: input, shape index: {}]   ;;  %s7548_s5 = inlined_call_operand.hbm [shape: f32[8,128], index: 5, kind: output, shape index: {}]  }
   0x1   :  { %11 = vsyncpa [#allocation10], 0 }
   0x2   :  { %12 = vsyncpa [#allocation13], 0 }
   0x3   :  { %13 = vsyncpa [#allocation8], 0  ;;  %s6244_s18 = smov [#allocation9]   ;;  %s6245_s20 = smov [#allocation12]  }
   0x4   :  { %s31_s19 = sshll.u32 %s6244_s18, 4  ;;  %s55_s21 = sshll.u32 %s6245_s20, 4  ;;  %s32_s19 = int_to_ptr.vmem [resolvable:$true] %s31_s19  ;;  %s6283_s21 = int_to_ptr.vmem [resolvable:$true] %s55_s21 }
   0x5   :  { %s6104_s24 = scalar_lea.hbm %s7544_s1, 8192 }
   0x6   :  { %p6105_p0 = scmp.ne.s32.totalorder %s7544_s1, %s6104_s24  ;;  %p6108_p1 = scmp.lt.u32.totalorder %s6104_s24, %s7544_s1 }
   0x8   :  { %p6110_p2 = pnand %p6108_p1, %p6105_p0 }
   0xa   :  { %6113 = shalt.err (!%p6110_p2)
}
   0xb   :  { %s6114_s29 = scalar_lea.vmem %s32_s19, 8192  ;;  %p6119_p4 = scmp.lt.s32.totalorder %s32_s19, %s32_s19 }
   0xc   :  { %p6115_p3 = scmp.ne.s32.totalorder %s32_s19, %s6114_s29  ;;  %p6120_p5 = scmp.lt.s32.totalorder %s6114_s29, %s6114_s29 }
   0xe   :  { %p6121_p6 = por %p6120_p5, %p6119_p4 }
  0x10   :  { %p6122_p7 = pnand %p6121_p6, %p6115_p3 }
  0x12   :  { %6125 = shalt.err (!%p6122_p7)
}
  0x13   :  { %s6246_s30 = smov 512   ;;  %s6247_s6 = smov 32  }
  0x14   :  { %37 = dma.hbm_to_vmem [thread:$0]  %s7544_s1, 8192, %s32_s19, [#allocation10], %s6246_s30, %s6246_s30, %s6247_s6  }
  0x15   :  { %s6126_s11 = scalar_lea.hbm %s7546_s3, 8192 }
  0x16   :  { %p6127_p8 = scmp.ne.s32.totalorder %s7546_s3, %s6126_s11  ;;  %p6130_p9 = scmp.lt.u32.totalorder %s6126_s11, %s7546_s3 }
  0x18   :  { %p6132_p10 = pnand %p6130_p9, %p6127_p8 }
  0x1a   :  { %6135 = shalt.err (!%p6132_p10)
}
  0x1b   :  { %s6136_s16 = scalar_lea.vmem %s6283_s21, 8192  ;;  %p6141_p12 = scmp.lt.s32.totalorder %s6283_s21, %s6283_s21 }
  0x1c   :  { %p6137_p11 = scmp.ne.s32.totalorder %s6283_s21, %s6136_s16  ;;  %p6142_p13 = scmp.lt.s32.totalorder %s6136_s16, %s6136_s16 }
  0x1e   :  { %p6143_p0 = por %p6142_p13, %p6141_p12 }
  0x20   :  { %p6144_p1 = pnand %p6143_p0, %p6137_p11 }
  0x22   :  { %6147 = shalt.err (!%p6144_p1)
}
  0x23   :  { %61 = dma.hbm_to_vmem [thread:$0]  %s7546_s3, 8192, %s6283_s21, [#allocation13], %s6246_s30, %s6246_s30, %s6247_s6  }
  0x24   :  { %s6248_s18 = smov [#allocation6]   ;;  %s6249_s20 = smov [#allocation11]  }
  0x25   :  { %s19_s19 = sshll.u32 %s6248_s18, 4  ;;  %s43_s22 = sshll.u32 %s6249_s20, 4  ;;  %s20_s19 = int_to_ptr.vmem [resolvable:$true] %s19_s19  ;;  %s6320_s22 = int_to_ptr.vmem [resolvable:$true] %s43_s22 }
  0x26   :  { %s6148_s25 = scalar_lea.hbm %s7543_s0, 4096 }
  0x27   :  { %p6149_p2 = scmp.ne.s32.totalorder %s7543_s0, %s6148_s25  ;;  %p6152_p3 = scmp.lt.u32.totalorder %s6148_s25, %s7543_s0 }
  0x29   :  { %p6154_p4 = pnand %p6152_p3, %p6149_p2 }
  0x2b   :  { %6157 = shalt.err (!%p6154_p4)
}
  0x2c   :  { %s6158_s3 = scalar_lea.vmem %s20_s19, 4096  ;;  %p6163_p6 = scmp.lt.s32.totalorder %s20_s19, %s20_s19 }
  0x2d   :  { %p6159_p5 = scmp.ne.s32.totalorder %s20_s19, %s6158_s3  ;;  %p6164_p7 = scmp.lt.s32.totalorder %s6158_s3, %s6158_s3 }
  0x2f   :  { %p6165_p8 = por %p6164_p7, %p6163_p6 }
  0x31   :  { %p6166_p9 = pnand %p6165_p8, %p6159_p5 }
  0x33   :  { %6169 = shalt.err (!%p6166_p9)
}
  0x34   :  { %25 = dma.hbm_to_vmem [thread:$0]  %s7543_s0, 4096, %s20_s19, [#allocation7], %s6246_s30, %s6246_s30, %s6247_s6  }
  0x35   :  { %s6170_s10 = scalar_lea.hbm %s7545_s2, 8192 }
  0x36   :  { %p6171_p10 = scmp.ne.s32.totalorder %s7545_s2, %s6170_s10  ;;  %p6174_p11 = scmp.lt.u32.totalorder %s6170_s10, %s7545_s2 }
  0x38   :  { %p6176_p12 = pnand %p6174_p11, %p6171_p10 }
  0x3a   :  { %6179 = shalt.err (!%p6176_p12)
}
  0x3b   :  { %s6180_s15 = scalar_lea.vmem %s6320_s22, 8192  ;;  %p6185_p0 = scmp.lt.s32.totalorder %s6320_s22, %s6320_s22 }
  0x3c   :  { %p6181_p13 = scmp.ne.s32.totalorder %s6320_s22, %s6180_s15  ;;  %p6186_p1 = scmp.lt.s32.totalorder %s6180_s15, %s6180_s15 }
  0x3e   :  { %p6187_p2 = por %p6186_p1, %p6185_p0 }
  0x40   :  { %p6188_p3 = pnand %p6187_p2, %p6181_p13 }
  0x42   :  { %6191 = shalt.err (!%p6188_p3)
}
  0x43   :  { %49 = dma.hbm_to_vmem [thread:$0]  %s7545_s2, 8192, %s6320_s22, [#allocation10], %s6246_s30, %s6246_s30, %s6247_s6  }
  0x44   :  { %s6250_s1 = smov [#allocation14]   ;;  %s6192_s20 = scalar_lea.hbm %s7547_s4, 512 }
  0x45   :  { %s68_s17 = sshll.u32 %s6250_s1, 4  ;;  %p6193_p4 = scmp.ne.s32.totalorder %s7547_s4, %s6192_s20  ;;  %s69_s17 = int_to_ptr.vmem [resolvable:$true] %s68_s17 }
  0x46   :  { %p6196_p5 = scmp.lt.u32.totalorder %s6192_s20, %s7547_s4 }
  0x48   :  { %p6198_p6 = pnand %p6196_p5, %p6193_p4 }
  0x4a   :  { %6201 = shalt.err (!%p6198_p6)
}
  0x4b   :  { %s6202_s27 = scalar_lea.vmem %s69_s17, 512  ;;  %p6207_p8 = scmp.lt.s32.totalorder %s69_s17, %s69_s17 }
  0x4c   :  { %p6203_p7 = scmp.ne.s32.totalorder %s69_s17, %s6202_s27  ;;  %p6208_p9 = scmp.lt.s32.totalorder %s6202_s27, %s6202_s27 }
  0x4e   :  { %p6209_p10 = por %p6208_p9, %p6207_p8 }
  0x50   :  { %p6210_p11 = pnand %p6209_p10, %p6203_p7 }
  0x52   :  { %6213 = shalt.err (!%p6210_p11)
}
  0x53   :  { %71 = dma.hbm_to_vmem [thread:$0]  %s7547_s4, 512, %s69_s17, [#allocation13]  }
  0x54   :  { %6236 = dma.done.wait [#allocation7], 4096  }
  0x55   :  { %6237 = vsyncadd [#allocation7], 4294963200 }
  0x56   :  { %6238 = dma.done.wait [#allocation10], 16384  }
  0x57   :  { %6239 = vsyncadd [#allocation10], 4294950912 }
  0x58   :  { %6240 = dma.done.wait [#allocation13], 8704  }
  0x59   :  { %6241 = vsyncadd [#allocation13], 4294958592  ;;  %v7549_v0 = vmov 0.0   ;;  %v96_v1 = vld [vmem:[#allocation9 + $0x8] sm:$0xff]  ;;  %v95_v3 = vld [vmem:[#allocation9] sm:$0xff]  ;;  %s6252_s4 = smov [#allocation15]  }
  0x5a   :  { %363 = vmatprep.mubr.f32.mxu0 %v7549_v0  ;;  %434 = vmatprep.mubr.f32.mxu1 %v7549_v0  ;;  %v100_v2 = vld [vmem:[#allocation9 + $0x28] sm:$0xff]  ;;  %v99_v5 = vld [vmem:[#allocation9 + $0x20] sm:$0xff]  ;;  %v98_v19 = vld [vmem:[#allocation9 + $0x18] sm:$0xff]  ;;  %s4204_s6 = sshll.u32 %s6252_s4, 4  ;;  %s4205_s6 = int_to_ptr.vmem [resolvable:$true] %s4204_s6 }
  0x5b   :  { %v6371_v4 = vpack.c.bf16 %v100_v2, %v96_v1  ;;  %v104_v6 = vld [vmem:[#allocation9 + $0x48] sm:$0xff]  ;;  %v6373_v8 = vpack.c.bf16 %v99_v5, %v95_v3  ;;  %v103_v10 = vld [vmem:[#allocation9 + $0x40] sm:$0xff]  ;;  %v102_v20 = vld [vmem:[#allocation9 + $0x38] sm:$0xff]  ;;  %s6214_s22 = scalar_lea.vmem %s4205_s6, 128  ;;  %p6219_p13 = scmp.lt.s32.totalorder %s4205_s6, %s4205_s6 }
  0x5c   :  { %v108_v7 = vld [vmem:[#allocation9 + $0x68] sm:$0xff]  ;;  %v107_v11 = vld [vmem:[#allocation9 + $0x60] sm:$0xff]  ;;  %v6384_v22 = vpack.c.bf16 %v102_v20, %v98_v19  ;;  %v97_v23 = vld [vmem:[#allocation9 + $0x10] sm:$0xff]  ;;  %p6215_p12 = scmp.ne.s32.totalorder %s4205_s6, %s6214_s22  ;;  %p6220_p0 = scmp.lt.s32.totalorder %s6214_s22, %s6214_s22 }
  0x5d   :  { %v6375_v9 = vpack.c.bf16 %v108_v7, %v104_v6  ;;  %v112_v12 = vld [vmem:[#allocation9 + $0x88] sm:$0xff]  ;;  %4264 = vmatprep.subr.bf16.mxu0 %v6371_v4  ;;  %v6379_v14 = vpack.c.bf16 %v107_v11, %v103_v10  ;;  %v111_v15 = vld [vmem:[#allocation9 + $0x80] sm:$0xff]  ;;  %v101_v24 = vld [vmem:[#allocation9 + $0x30] sm:$0xff] }
  0x5e   :  { %v116_v13 = vld [vmem:[#allocation9 + $0xa8] sm:$0xff]  ;;  %4266 = vmatpush1.bf16.msra.mxu0 %v6373_v8  ;;  %v115_v16 = vld [vmem:[#allocation9 + $0xa0] sm:$0xff]  ;;  %v6386_v25 = vpack.c.bf16 %v101_v24, %v97_v23  ;;  %4296 = vmatprep.subr.bf16.mxu1 %v6384_v22  ;;  %v106_v27 = vld [vmem:[#allocation9 + $0x58] sm:$0xff]  ;;  %p6221_p1 = por %p6220_p0, %p6219_p13 }
  0x5f   :  { %4268 = vmatprep.subr.bf16.mxu0 %v6375_v9  ;;  %v6382_v17 = vpack.c.bf16 %v116_v13, %v112_v12  ;;  %v120_v18 = vld [vmem:[#allocation9 + $0xc8] sm:$0xff]  ;;  %v6389_v26 = vpack.c.bf16 %v115_v16, %v111_v15  ;;  %v110_v28 = vld [vmem:[#allocation9 + $0x78] sm:$0xff]  ;;  %v105_v29 = vld [vmem:[#allocation9 + $0x50] sm:$0xff] }
  0x60   :  { %v124_v21 = vld [vmem:[#allocation9 + $0xe8] sm:$0xff]  ;;  %v119_v31 = vld [vmem:[#allocation9 + $0xc0] sm:$0xff]  ;;  %4298 = vmatpush1.bf16.msra.mxu1 %v6386_v25  ;;  %v6396_v33 = vpack.c.bf16 %v110_v28, %v106_v27  ;;  %v109_v34 = vld [vmem:[#allocation9 + $0x70] sm:$0xff]  ;;  %p6222_p2 = pnand %p6221_p1, %p6215_p12 }
  0x61   :  { %7717 = vst [vmem:[#allocation20_spill] sm:$0xff] %v6389_v26  ;;  %v6393_v30 = vpack.c.bf16 %v124_v21, %v120_v18  ;;  %v123_v32 = vld [vmem:[#allocation9 + $0xe0] sm:$0xff]  ;;  %v128_v35 = vld [vmem:[#allocation9 + $0x108] sm:$0xff]  ;;  %v6398_v37 = vpack.c.bf16 %v109_v34, %v105_v29  ;;  %v114_v38 = vld [vmem:[#allocation9 + $0x98] sm:$0xff] }
  0x62   :  { %4270 = vmatpush1.bf16.msra.mxu0 %v6379_v14  ;;  %v132_v36 = vld [vmem:[#allocation9 + $0x128] sm:$0xff]  ;;  %4300 = vmatprep.subr.bf16.mxu1 %v6396_v33  ;;  %v118_v39 = vld [vmem:[#allocation9 + $0xb8] sm:$0xff]  ;;  %v113_v40 = vld [vmem:[#allocation9 + $0x90] sm:$0xff]  ;;  %v6402_v42 = vpack.c.bf16 %v123_v32, %v119_v31 }
  0x63   :  { %4272 = vmatprep.subr.bf16.mxu0 %v6382_v17  ;;  %7718 = vst [vmem:[#allocation21_spill] sm:$0xff] %v6393_v30  ;;  %v117_v41 = vld [vmem:[#allocation9 + $0xb0] sm:$0xff]  ;;  %v127_v43 = vld [vmem:[#allocation9 + $0x100] sm:$0xff]  ;;  %v6404_v45 = vpack.c.bf16 %v118_v39, %v114_v38  ;;  %v6407_v46 = vpack.c.bf16 %v132_v36, %v128_v35  ;;  %v136_v47 = vld [vmem:[#allocation9 + $0x148] sm:$0xff] }
  0x64   :  { %7719 = vst [vmem:[#allocation22_spill] sm:$0xff] %v6402_v42  ;;  %v131_v44 = vld [vmem:[#allocation9 + $0x120] sm:$0xff]  ;;  %4302 = vmatpush1.bf16.msra.mxu1 %v6398_v37  ;;  %v6410_v48 = vpack.c.bf16 %v117_v41, %v113_v40  ;;  %v122_v49 = vld [vmem:[#allocation9 + $0xd8] sm:$0xff]  ;;  %v140_v51 = vld [vmem:[#allocation9 + $0x168] sm:$0xff] }
  0x65   :  { %7720 = vst [vmem:[#allocation23_spill] sm:$0xff] %v6404_v45  ;;  %7721 = vst [vmem:[#allocation24_spill] sm:$0xff] %v6407_v46  ;;  %v126_v50 = vld [vmem:[#allocation9 + $0xf8] sm:$0xff]  ;;  %4304 = vmatprep.subr.bf16.mxu1 %v6404_v45  ;;  %v121_v53 = vld [vmem:[#allocation9 + $0xd0] sm:$0xff]  ;;  %v6416_v55 = vpack.c.bf16 %v131_v44, %v127_v43  ;;  %v6419_v58 = vpack.c.bf16 %v140_v51, %v136_v47 }
  0x66   :  { %4274 = vmatpush1.bf16.msra.mxu0 %v6389_v26  ;;  %7722 = vst [vmem:[#allocation25_spill] sm:$0xff] %v6410_v48  ;;  %v6413_v52 = vpack.c.bf16 %v126_v50, %v122_v49  ;;  %v125_v54 = vld [vmem:[#allocation9 + $0xf0] sm:$0xff]  ;;  %v130_v56 = vld [vmem:[#allocation9 + $0x118] sm:$0xff]  ;;  %v135_v59 = vld [vmem:[#allocation9 + $0x140] sm:$0xff] }
  0x67   :  { %4276 = vmatprep.subr.bf16.mxu0 %v6393_v30  ;;  %7724 = vst [vmem:[#allocation27_spill] sm:$0xff] %v6416_v55  ;;  %v134_v57 = vld [vmem:[#allocation9 + $0x138] sm:$0xff]  ;;  %7725 = vst [vmem:[#allocation28_spill] sm:$0xff] %v6419_v58  ;;  %v139_v60 = vld [vmem:[#allocation9 + $0x160] sm:$0xff]  ;;  %v6422_v62 = vpack.c.bf16 %v125_v54, %v121_v53 }
  0x68   :  { %7723 = vst [vmem:[#allocation26_spill] sm:$0xff] %v6413_v52  ;;  %4306 = vmatpush1.bf16.msra.mxu1 %v6410_v48  ;;  %v144_v61 = vld [vmem:[#allocation9 + $0x188] sm:$0xff]  ;;  %v6425_v1 = vpack.c.bf16 %v134_v57, %v130_v56  ;;  %v129_v2 = vld [vmem:[#allocation9 + $0x110] sm:$0xff]  ;;  %v138_v5 = vld [vmem:[#allocation9 + $0x158] sm:$0xff]  ;;  %v6428_v7 = vpack.c.bf16 %v139_v60, %v135_v59 }
  0x69   :  { %7726 = vst [vmem:[#allocation29_spill] sm:$0xff] %v6422_v62  ;;  %v148_v63 = vld [vmem:[#allocation9 + $0x1a8] sm:$0xff]  ;;  %4308 = vmatprep.subr.bf16.mxu1 %v6413_v52  ;;  %v133_v3 = vld [vmem:[#allocation9 + $0x130] sm:$0xff]  ;;  %v142_v6 = vld [vmem:[#allocation9 + $0x178] sm:$0xff] }
  0x6a   :  { %4278 = vmatpush1.bf16.msra.mxu0 %v6402_v42  ;;  %7727 = vst [vmem:[#allocation30_spill] sm:$0xff] %v6425_v1  ;;  %7728 = vst [vmem:[#allocation31_spill] sm:$0xff] %v6428_v7  ;;  %v6431_v10 = vpack.c.bf16 %v148_v63, %v144_v61  ;;  %v143_v11 = vld [vmem:[#allocation9 + $0x180] sm:$0xff]  ;;  %v152_v13 = vld [vmem:[#allocation9 + $0x1c8] sm:$0xff]  ;;  %v6434_v15 = vpack.c.bf16 %v133_v3, %v129_v2  ;;  %v6437_v18 = vpack.c.bf16 %v142_v6, %v138_v5 }
  0x6b   :  { %4280 = vmatprep.subr.bf16.mxu0 %v6407_v46  ;;  %v147_v12 = vld [vmem:[#allocation9 + $0x1a0] sm:$0xff]  ;;  %v156_v16 = vld [vmem:[#allocation9 + $0x1e8] sm:$0xff]  ;;  %v137_v19 = vld [vmem:[#allocation9 + $0x150] sm:$0xff] }
  0x6c   :  { %7729 = vst [vmem:[#allocation32_spill] sm:$0xff] %v6431_v10  ;;  %4310 = vmatpush1.bf16.msra.mxu1 %v6422_v62  ;;  %7730 = vst [vmem:[#allocation33_spill] sm:$0xff] %v6434_v15  ;;  %v141_v20 = vld [vmem:[#allocation9 + $0x170] sm:$0xff]  ;;  %v146_v21 = vld [vmem:[#allocation9 + $0x198] sm:$0xff]  ;;  %v6440_v24 = vpack.c.bf16 %v147_v12, %v143_v11  ;;  %v6443_v27 = vpack.c.bf16 %v156_v16, %v152_v13 }
  0x6d   :  { %4312 = vmatprep.subr.bf16.mxu1 %v6425_v1  ;;  %7731 = vst [vmem:[#allocation34_spill] sm:$0xff] %v6437_v18  ;;  %v150_v23 = vld [vmem:[#allocation9 + $0x1b8] sm:$0xff]  ;;  %v151_v28 = vld [vmem:[#allocation9 + $0x1c0] sm:$0xff]  ;;  %v6446_v31 = vpack.c.bf16 %v141_v20, %v137_v19  ;;  %v145_v34 = vld [vmem:[#allocation9 + $0x190] sm:$0xff] }
  0x6e   :  { %4282 = vmatpush1.bf16.msra.mxu0 %v6416_v55  ;;  %7732 = vst [vmem:[#allocation35_spill] sm:$0xff] %v6440_v24  ;;  %7733 = vst [vmem:[#allocation36_spill] sm:$0xff] %v6443_v27  ;;  %v155_v29 = vld [vmem:[#allocation9 + $0x1e0] sm:$0xff]  ;;  %v6449_v32 = vpack.c.bf16 %v150_v23, %v146_v21  ;;  %v149_v35 = vld [vmem:[#allocation9 + $0x1b0] sm:$0xff] }
  0x6f   :  { %4284 = vmatprep.subr.bf16.mxu0 %v6419_v58  ;;  %7734 = vst [vmem:[#allocation37_spill] sm:$0xff] %v6446_v31  ;;  %v154_v36 = vld [vmem:[#allocation9 + $0x1d8] sm:$0xff]  ;;  %v6452_v39 = vpack.c.bf16 %v155_v29, %v151_v28  ;;  %v6456_v40 = vpack.c.bf16 %v149_v35, %v145_v34  ;;  %v153_v43 = vld [vmem:[#allocation9 + $0x1d0] sm:$0xff]  ;;  %v160_v49 = vld [vmem:[#allocation11 + $0x8] sm:$0xff] }
  0x70   :  { %4314 = vmatpush1.bf16.msra.mxu1 %v6434_v15  ;;  %7735 = vst [vmem:[#allocation38_spill] sm:$0xff] %v6449_v32  ;;  %v158_v38 = vld [vmem:[#allocation9 + $0x1f8] sm:$0xff]  ;;  %v157_v44 = vld [vmem:[#allocation9 + $0x1f0] sm:$0xff]  ;;  %v164_v50 = vld [vmem:[#allocation11 + $0x28] sm:$0xff] }
  0x71   :  { %4316 = vmatprep.subr.bf16.mxu1 %v6437_v18  ;;  %7736 = vst [vmem:[#allocation39_spill] sm:$0xff] %v6452_v39  ;;  %7737 = vst [vmem:[#allocation40_spill] sm:$0xff] %v6456_v40  ;;  %v6459_v41 = vpack.c.bf16 %v158_v38, %v154_v36  ;;  %v6463_v47 = vpack.c.bf16 %v157_v44, %v153_v43  ;;  %v162_v51 = vld [vmem:[#allocation11 + $0x18] sm:$0xff]  ;;  %v6471_v53 = vpack.c.bf16 %v164_v50, %v160_v49  ;;  %v159_v56 = vld [vmem:[#allocation11] sm:$0xff] }
  0x72   :  { %4286 = vmatpush1.bf16.msra.mxu0 %v6428_v7  ;;  %v166_v54 = vld [vmem:[#allocation11 + $0x38] sm:$0xff]  ;;  %v163_v57 = vld [vmem:[#allocation11 + $0x20] sm:$0xff]  ;;  %v161_v61 = vld [vmem:[#allocation11 + $0x10] sm:$0xff] }
  0x73   :  { %4288 = vmatprep.subr.bf16.mxu0 %v6431_v10  ;;  %7738 = vst [vmem:[#allocation41_spill] sm:$0xff] %v6459_v41  ;;  %7739 = vst [vmem:[#allocation42_spill] sm:$0xff] %v6463_v47  ;;  %v6473_v59 = vpack.c.bf16 %v166_v54, %v162_v51  ;;  %v6475_v60 = vpack.c.bf16 %v163_v57, %v159_v56  ;;  %v165_v63 = vld [vmem:[#allocation11 + $0x30] sm:$0xff]  ;;  %v168_v3 = vld [vmem:[#allocation11 + $0x48] sm:$0xff] }
  0x74   :  { %4318 = vmatpush1.bf16.msra.mxu1 %v6446_v31  ;;  %7740 = vst [vmem:[#allocation43_spill] sm:$0xff] %v6471_v53  ;;  %v6478_v2 = vpack.c.bf16 %v165_v63, %v161_v61  ;;  %v172_v5 = vld [vmem:[#allocation11 + $0x68] sm:$0xff]  ;;  %v170_v6 = vld [vmem:[#allocation11 + $0x58] sm:$0xff]  ;;  %v167_v16 = vld [vmem:[#allocation11 + $0x40] sm:$0xff] }
  0x75   :  { %4320 = vmatprep.subr.bf16.mxu1 %v6449_v32  ;;  %7741 = vst [vmem:[#allocation44_spill] sm:$0xff] %v6473_v59  ;;  %7742 = vst [vmem:[#allocation45_spill] sm:$0xff] %v6475_v60  ;;  %v174_v11 = vld [vmem:[#allocation11 + $0x78] sm:$0xff]  ;;  %v6483_v12 = vpack.c.bf16 %v172_v5, %v168_v3  ;;  %v171_v19 = vld [vmem:[#allocation11 + $0x60] sm:$0xff] }
  0x76   :  { %4290 = vmatpush1.bf16.msra.mxu0 %v6440_v24  ;;  %7743 = vst [vmem:[#allocation46_spill] sm:$0xff] %v6478_v2  ;;  %v6485_v13 = vpack.c.bf16 %v174_v11, %v170_v6  ;;  %v169_v20 = vld [vmem:[#allocation11 + $0x50] sm:$0xff]  ;;  %v6487_v21 = vpack.c.bf16 %v171_v19, %v167_v16  ;;  %v176_v29 = vld [vmem:[#allocation11 + $0x88] sm:$0xff]  ;;  %v178_v35 = vld [vmem:[#allocation11 + $0x98] sm:$0xff] }
  0x77   :  { %4292 = vmatprep.subr.bf16.mxu0 %v6443_v27  ;;  %7744 = vst [vmem:[#allocation47_spill] sm:$0xff] %v6483_v12  ;;  %v173_v23 = vld [vmem:[#allocation11 + $0x70] sm:$0xff]  ;;  %v180_v34 = vld [vmem:[#allocation11 + $0xa8] sm:$0xff]  ;;  %v182_v38 = vld [vmem:[#allocation11 + $0xb8] sm:$0xff] }
  0x78   :  { %4322 = vmatpush1.bf16.msra.mxu1 %v6456_v40  ;;  %7745 = vst [vmem:[#allocation48_spill] sm:$0xff] %v6485_v13  ;;  %7746 = vst [vmem:[#allocation49_spill] sm:$0xff] %v6487_v21  ;;  %v6491_v28 = vpack.c.bf16 %v173_v23, %v169_v20  ;;  %v6494_v36 = vpack.c.bf16 %v180_v34, %v176_v29  ;;  %v175_v43 = vld [vmem:[#allocation11 + $0x80] sm:$0xff]  ;;  %v6497_v49 = vpack.c.bf16 %v182_v38, %v178_v35  ;;  %v177_v51 = vld [vmem:[#allocation11 + $0x90] sm:$0xff] }
  0x79   :  { %4324 = vmatprep.subr.bf16.mxu1 %v6459_v41  ;;  %v179_v44 = vld [vmem:[#allocation11 + $0xa0] sm:$0xff]  ;;  %v181_v54 = vld [vmem:[#allocation11 + $0xb0] sm:$0xff]  ;;  %v184_v57 = vld [vmem:[#allocation11 + $0xc8] sm:$0xff] }
  0x7a   :  { %4294 = vmatpush1.bf16.msra.mxu0 %v6452_v39  ;;  %7747 = vst [vmem:[#allocation50_spill] sm:$0xff] %v6491_v28  ;;  %7748 = vst [vmem:[#allocation51_spill] sm:$0xff] %v6494_v36  ;;  %v6499_v50 = vpack.c.bf16 %v179_v44, %v175_v43  ;;  %v6502_v56 = vpack.c.bf16 %v181_v54, %v177_v51  ;;  %v188_v61 = vld [vmem:[#allocation11 + $0xe8] sm:$0xff]  ;;  %v186_v63 = vld [vmem:[#allocation11 + $0xd8] sm:$0xff] }
  0x7b   :  { %4328 = vmatprep.subr.bf16.mxu0 %v6471_v53  ;;  %7749 = vst [vmem:[#allocation52_spill] sm:$0xff] %v6497_v49  ;;  %v6506_v3 = vpack.c.bf16 %v188_v61, %v184_v57  ;;  %v190_v5 = vld [vmem:[#allocation11 + $0xf8] sm:$0xff]  ;;  %v183_v6 = vld [vmem:[#allocation11 + $0xc0] sm:$0xff]  ;;  %v185_v20 = vld [vmem:[#allocation11 + $0xd0] sm:$0xff] }
  0x7c   :  { %4326 = vmatpush1.bf16.msra.mxu1 %v6463_v47  ;;  %7750 = vst [vmem:[#allocation53_spill] sm:$0xff] %v6499_v50  ;;  %7751 = vst [vmem:[#allocation54_spill] sm:$0xff] %v6502_v56  ;;  %v187_v11 = vld [vmem:[#allocation11 + $0xe0] sm:$0xff]  ;;  %v6509_v16 = vpack.c.bf16 %v190_v5, %v186_v63  ;;  %v189_v23 = vld [vmem:[#allocation11 + $0xf0] sm:$0xff] }
  0x7d   :  { %364 = vmatmul.mubr.f32.vlgmr.msra.gmra.mrb[0].mxu0 %v7549_v0  ;;  %4360 = vmatprep.subr.bf16.mxu1 %v6473_v59  ;;  %7752 = vst [vmem:[#allocation55_spill] sm:$0xff] %v6506_v3  ;;  %v6511_v19 = vpack.c.bf16 %v187_v11, %v183_v6  ;;  %v6514_v29 = vpack.c.bf16 %v189_v23, %v185_v20  ;;  %v192_v34 = vld [vmem:[#allocation11 + $0x108] sm:$0xff]  ;;  %v194_v38 = vld [vmem:[#allocation11 + $0x118] sm:$0xff]  ;;  %v191_v51 = vld [vmem:[#allocation11 + $0x100] sm:$0xff] }
  0x7e   :  { %533 = vmatprep.mubr.f32.mxu0 %v7549_v0  ;;  %4330 = vmatpush1.bf16.msra.mxu0 %v6475_v60  ;;  %7753 = vst [vmem:[#allocation56_spill] sm:$0xff] %v6509_v16  ;;  %v196_v35 = vld [vmem:[#allocation11 + $0x128] sm:$0xff]  ;;  %v198_v44 = vld [vmem:[#allocation11 + $0x138] sm:$0xff]  ;;  %v195_v54 = vld [vmem:[#allocation11 + $0x120] sm:$0xff] }
  0x7f   :  { %435 = vmatmul.mubr.f32.vlgmr.msra.gmra.mrb[0].mxu1 %v7549_v0  ;;  %4332 = vmatprep.subr.bf16.mxu0 %v6483_v12  ;;  %7754 = vst [vmem:[#allocation57_spill] sm:$0xff] %v6511_v19  ;;  %7755 = vst [vmem:[#allocation58_spill] sm:$0xff] %v6514_v29  ;;  %v6518_v43 = vpack.c.bf16 %v196_v35, %v192_v34  ;;  %v6521_v57 = vpack.c.bf16 %v198_v44, %v194_v38  ;;  %v193_v63 = vld [vmem:[#allocation11 + $0x110] sm:$0xff]  ;;  %v200_v11 = vld [vmem:[#allocation11 + $0x148] sm:$0xff] }
  0x80   :  { %604 = vmatprep.mubr.f32.mxu1 %v7549_v0  ;;  %4362 = vmatpush1.bf16.msra.mxu1 %v6478_v2  ;;  %v6523_v61 = vpack.c.bf16 %v195_v54, %v191_v51  ;;  %v197_v5 = vld [vmem:[#allocation11 + $0x130] sm:$0xff]  ;;  %v204_v20 = vld [vmem:[#allocation11 + $0x168] sm:$0xff]  ;;  %v202_v23 = vld [vmem:[#allocation11 + $0x158] sm:$0xff] }
  0x81   :  { %4364 = vmatprep.subr.bf16.mxu1 %v6485_v13  ;;  %7756 = vst [vmem:[#allocation59_spill] sm:$0xff] %v6518_v43  ;;  %7757 = vst [vmem:[#allocation60_spill] sm:$0xff] %v6521_v57  ;;  %v6526_v6 = vpack.c.bf16 %v197_v5, %v193_v63  ;;  %v6530_v34 = vpack.c.bf16 %v204_v20, %v200_v11  ;;  %v206_v35 = vld [vmem:[#allocation11 + $0x178] sm:$0xff]  ;;  %v199_v38 = vld [vmem:[#allocation11 + $0x140] sm:$0xff] }
  0x82   :  { %4334 = vmatpush1.bf16.msra.mxu0 %v6487_v21  ;;  %7758 = vst [vmem:[#allocation61_spill] sm:$0xff] %v6523_v61  ;;  %v203_v44 = vld [vmem:[#allocation11 + $0x160] sm:$0xff]  ;;  %v6533_v51 = vpack.c.bf16 %v206_v35, %v202_v23  ;;  %v201_v63 = vld [vmem:[#allocation11 + $0x150] sm:$0xff]  ;;  %v214_v20 = vld [vmem:[#allocation11 + $0x1b8] sm:$0xff] }
  0x83   :  { %4336 = vmatprep.subr.bf16.mxu0 %v6494_v36  ;;  %7759 = vst [vmem:[#allocation62_spill] sm:$0xff] %v6526_v6  ;;  %7760 = vst [vmem:[#allocation63_spill] sm:$0xff] %v6530_v34  ;;  %v6535_v54 = vpack.c.bf16 %v203_v44, %v199_v38  ;;  %v205_v5 = vld [vmem:[#allocation11 + $0x170] sm:$0xff]  ;;  %v258_v36 = vld [vmem:[#allocation12 + $0x118] sm:$0xff] }
  0x84   :  { %4366 = vmatpush1.bf16.msra.mxu1 %v6491_v28  ;;  %7761 = vst [vmem:[#allocation64_spill] sm:$0xff] %v6533_v51  ;;  %v6538_v0 = vpack.c.bf16 %v205_v5, %v201_v63  ;;  %v209_v38 = vld [vmem:[#allocation11 + $0x190] sm:$0xff]  ;;  %v216_v63 = vld [vmem:[#allocation11 + $0x1c8] sm:$0xff] }
  0x85   :  { %4368 = vmatprep.subr.bf16.mxu1 %v6497_v49  ;;  %7762 = vst [vmem:[#allocation65_spill] sm:$0xff] %v6535_v54  ;;  %v213_v44 = vld [vmem:[#allocation11 + $0x1b0] sm:$0xff]  ;;  %v246_v49 = vld [vmem:[#allocation12 + $0xb8] sm:$0xff] }
  0x86   :  { %4338 = vmatpush1.bf16.msra.mxu0 %v6499_v50  ;;  %7763 = vst [vmem:[#allocation66_spill] sm:$0xff] %v6538_v0  ;;  %v6550_v5 = vpack.c.bf16 %v213_v44, %v209_v38  ;;  %v226_v38 = vld [vmem:[#allocation12 + $0x18] sm:$0xff] }
  0x87   :  { %4340 = vmatprep.subr.bf16.mxu0 %v6506_v3  ;;  %v230_v44 = vld [vmem:[#allocation12 + $0x38] sm:$0xff]  ;;  %v240_v3 = vld [vmem:[#allocation12 + $0x88] sm:$0xff] }
  0x88   :  { %4370 = vmatpush1.bf16.msra.mxu1 %v6502_v56  ;;  %7767 = vst [vmem:[#allocation70_spill] sm:$0xff] %v6550_v5  ;;  %v244_v56 = vld [vmem:[#allocation12 + $0xa8] sm:$0xff]  ;;  %v242_v50 = vld [vmem:[#allocation12 + $0x98] sm:$0xff] }
  0x89   :  { %4372 = vmatprep.subr.bf16.mxu1 %v6509_v16  ;;  %v228_v16 = vld [vmem:[#allocation12 + $0x28] sm:$0xff] }
  0x8a   :  { %4342 = vmatpush1.bf16.msra.mxu0 %v6511_v19  ;;  %v224_v19 = vld [vmem:[#allocation12 + $0x8] sm:$0xff] }
  0x8b   :  { %4344 = vmatprep.subr.bf16.mxu0 %v6518_v43  ;;  %v212_v43 = vld [vmem:[#allocation11 + $0x1a8] sm:$0xff] }
  0x8c   :  { %4374 = vmatpush1.bf16.msra.mxu1 %v6514_v29  ;;  %v207_v29 = vld [vmem:[#allocation11 + $0x180] sm:$0xff] }
  0x8d   :  { %4376 = vmatprep.subr.bf16.mxu1 %v6521_v57  ;;  %v208_v57 = vld [vmem:[#allocation11 + $0x188] sm:$0xff] }
  0x8e   :  { %4346 = vmatpush1.bf16.msra.mxu0 %v6523_v61  ;;  %v210_v61 = vld [vmem:[#allocation11 + $0x198] sm:$0xff]  ;;  %v6541_v11 = vpack.c.bf16 %v212_v43, %v208_v57  ;;  %v220_v43 = vld [vmem:[#allocation11 + $0x1e8] sm:$0xff] }
  0x8f   :  { %4348 = vmatprep.subr.bf16.mxu0 %v6530_v34  ;;  %v6544_v23 = vpack.c.bf16 %v214_v20, %v210_v61  ;;  %v218_v57 = vld [vmem:[#allocation11 + $0x1d8] sm:$0xff]  ;;  %v6553_v34 = vpack.c.bf16 %v220_v43, %v216_v63  ;;  %v217_v20 = vld [vmem:[#allocation11 + $0x1d0] sm:$0xff]  ;;  %v6567_v43 = vpack.c.bf16 %v230_v44, %v226_v38 }
  0x90   :  { %4378 = vmatpush1.bf16.msra.mxu1 %v6526_v6  ;;  %7764 = vst [vmem:[#allocation67_spill] sm:$0xff] %v6541_v11  ;;  %v211_v6 = vld [vmem:[#allocation11 + $0x1a0] sm:$0xff] }
  0x91   :  { %4380 = vmatprep.subr.bf16.mxu1 %v6533_v51  ;;  %7765 = vst [vmem:[#allocation68_spill] sm:$0xff] %v6544_v23  ;;  %v6546_v35 = vpack.c.bf16 %v211_v6, %v207_v29  ;;  %v222_v51 = vld [vmem:[#allocation11 + $0x1f8] sm:$0xff]  ;;  %7768 = vst [vmem:[#allocation71_spill] sm:$0xff] %v6553_v34  ;;  %v215_v29 = vld [vmem:[#allocation11 + $0x1c0] sm:$0xff] }
  0x92   :  { %4350 = vmatpush1.bf16.msra.mxu0 %v6535_v54  ;;  %v6555_v61 = vpack.c.bf16 %v222_v51, %v218_v57  ;;  %v219_v6 = vld [vmem:[#allocation11 + $0x1e0] sm:$0xff]  ;;  %v221_v54 = vld [vmem:[#allocation11 + $0x1f0] sm:$0xff]  ;;  %v6564_v51 = vpack.c.bf16 %v228_v16, %v224_v19  ;;  %7773 = vst [vmem:[#allocation76_spill] sm:$0xff] %v6567_v43 }
  0x93   :  { %7766 = vst [vmem:[#allocation69_spill] sm:$0xff] %v6546_v35  ;;  %4352 = vmatprep.subr.bf16.mxu0 %v6541_v11  ;;  %v6558_v11 = vpack.c.bf16 %v219_v6, %v215_v29  ;;  %v6562_v63 = vpack.c.bf16 %v221_v54, %v217_v20  ;;  %v295_v57 = vld [vmem:[#allocation6] sm:$0xff]  ;;  %v296_v29 = vld [vmem:[#allocation6 + $0x8] sm:$0xff] }
  0x94   :  { %4382 = vmatpush1.bf16.msra.mxu1 %v6538_v0  ;;  %7769 = vst [vmem:[#allocation72_spill] sm:$0xff] %v6555_v61  ;;  %7772 = vst [vmem:[#allocation75_spill] sm:$0xff] %v6564_v51 }
  0x95   :  { %4384 = vmatprep.subr.bf16.mxu1 %v6544_v23  ;;  %7770 = vst [vmem:[#allocation73_spill] sm:$0xff] %v6558_v11  ;;  %7771 = vst [vmem:[#allocation74_spill] sm:$0xff] %v6562_v63 }
  0x96   :  { %4354 = vmatpush1.bf16.msra.mxu0 %v6546_v35 }
  0x97   :  { %4356 = vmatprep.subr.bf16.mxu0 %v6553_v34 }
  0x98   :  { %4386 = vmatpush1.bf16.msra.mxu1 %v6550_v5  ;;  %v298_v5 = vld [vmem:[#allocation6 + $0x18] sm:$0xff] }
  0x99   :  { %4388 = vmatprep.subr.bf16.mxu1 %v6555_v61  ;;  %v297_v61 = vld [vmem:[#allocation6 + $0x10] sm:$0xff] }
  0x9a   :  { %4358 = vmatpush1.bf16.msra.mxu0 %v6558_v11 }
  0x9b   :  { %4392 = vmatprep.subr.bf16.mxu0 %v6564_v51 }
  0x9c   :  { %4390 = vmatpush1.bf16.msra.mxu1 %v6562_v63 }
  0x9d   :  { %4424 = vmatprep.subr.bf16.mxu1 %v6567_v43 }
 0x150   :  { %v365_v6 = vpop.f32.mrb[0].mxu0 }
 0x151   :  { %v441_v34 = vadd.f32 %v365_v6, %v295_v57  ;;  %v367_v54 = vpop.f32.mrb[1].mxu0 }
 0x152   :  { %v442_v20 = vadd.f32 %v367_v54, %v296_v29  ;;  %v436_v38 = vpop.f32.mrb[0].mxu1 }
 0x153   :  { %v4215_v16 = vmul.f32 -1.442695, %v441_v34  ;;  %v438_v44 = vpop.f32.mrb[1].mxu1  ;;  %v443_v35 = vadd.f32 %v436_v38, %v297_v61  ;;  %v225_v61 = vld [vmem:[#allocation12 + $0x10] sm:$0xff] }
 0x154   :  { %v4216_v19 = vmul.f32 -1.442695, %v442_v20  ;;  %v444_v11 = vadd.f32 %v438_v44, %v298_v5  ;;  %v227_v5 = vld [vmem:[#allocation12 + $0x20] sm:$0xff] }
 0x155   :  { %5840 = vpow2.f32 %v4215_v16 }
 0x156   :  { %5842 = vpow2.f32 %v4216_v19  ;;  %v4217_v63 = vmul.f32 -1.442695, %v444_v11  ;;  %v223_v11 = vld [vmem:[#allocation12] sm:$0xff] }
 0x157   :  { %v6576_v44 = vpack.c.bf16 %v227_v5, %v223_v11 }
 0x158   :  { %5844 = vpow2.f32 %v4217_v63  ;;  %v229_v63 = vld [vmem:[#allocation12 + $0x30] sm:$0xff] }
 0x159   :  { %5846 = vtanh.f32 %v443_v35  ;;  %v232_v35 = vld [vmem:[#allocation12 + $0x48] sm:$0xff]  ;;  %7775 = vst [vmem:[#allocation78_spill] sm:$0xff] %v6576_v44 }
 0x15f   :  { %v5841_v51 = vpop.eup %5840 }
 0x160   :  { %v5843_v43 = vpop.eup %5842  ;;  %v448_v23 = vadd.f32 1.0, %v5841_v51 }
 0x161   :  { %v454_v0 = vadd.f32 1.0, %v5843_v43  ;;  %v238_v43 = vld [vmem:[#allocation12 + $0x78] sm:$0xff] }
 0x162   :  { %5848 = vrcp.f32 %v448_v23  ;;  %v5845_v57 = vpop.eup %5844  ;;  %v236_v23 = vld [vmem:[#allocation12 + $0x68] sm:$0xff] }
 0x163   :  { %5850 = vrcp.f32 %v454_v0  ;;  %v5847_v34 = vpop.eup %5846  ;;  %v461_v6 = vadd.f32 1.0, %v5845_v57  ;;  %v234_v0 = vld [vmem:[#allocation12 + $0x58] sm:$0xff]  ;;  %v6578_v57 = vpack.c.bf16 %v229_v63, %v225_v61  ;;  %v239_v61 = vld [vmem:[#allocation12 + $0x80] sm:$0xff] }
 0x164   :  { %v243_v63 = vld [vmem:[#allocation12 + $0xa0] sm:$0xff] }
 0x165   :  { %5852 = vrcp.f32 %v461_v6  ;;  %7776 = vst [vmem:[#allocation79_spill] sm:$0xff] %v6578_v57  ;;  %v6582_v6 = vpack.c.bf16 %v236_v23, %v232_v35  ;;  %v6596_v35 = vpack.c.bf16 %v244_v56, %v240_v3  ;;  %v241_v23 = vld [vmem:[#allocation12 + $0x90] sm:$0xff] }
 0x167   :  { %7777 = vst [vmem:[#allocation80_spill] sm:$0xff] %v6582_v6  ;;  %7781 = vst [vmem:[#allocation84_spill] sm:$0xff] %v6596_v35 }
 0x16c   :  { %v5849_v29 = vpop.eup %5848 }
 0x16d   :  { %v5851_v54 = vpop.eup %5850  ;;  %v465_v20 = vmul.f32 %v5849_v29, %v5847_v34  ;;  %v231_v34 = vld [vmem:[#allocation12 + $0x40] sm:$0xff] }
 0x16e   :  { %v464_v16 = vmul.f32 0.0, %v5851_v54  ;;  %v235_v29 = vld [vmem:[#allocation12 + $0x60] sm:$0xff] }
 0x16f   :  { %v5853_v51 = vpop.eup %5852  ;;  %v6590_v11 = vpack.c.bf16 %v235_v29, %v231_v34  ;;  %v7783_v34 = vmov 0.0  }
 0x170   :  { %v6573_v19 = vadd.f32 %v465_v20, %v464_v16  ;;  %v6584_v20 = vpack.c.bf16 %v238_v43, %v234_v0  ;;  %v233_v16 = vld [vmem:[#allocation12 + $0x50] sm:$0xff]  ;;  %v248_v43 = vld [vmem:[#allocation12 + $0xc8] sm:$0xff] }
 0x171   :  { %7779 = vst [vmem:[#allocation82_spill] sm:$0xff] %v6590_v11  ;;  %v245_v0 = vld [vmem:[#allocation12 + $0xb0] sm:$0xff] }
 0x172   :  { %7774 = vst [vmem:[#allocation77_spill] sm:$0xff] %v6573_v19  ;;  %5854 = vtanh.f32 %v6573_v19  ;;  %7778 = vst [vmem:[#allocation81_spill] sm:$0xff] %v6584_v20  ;;  %v237_v19 = vld [vmem:[#allocation12 + $0x70] sm:$0xff]  ;;  %v6606_v56 = vpack.c.bf16 %v245_v0, %v241_v23  ;;  %v255_v23 = vld [vmem:[#allocation12 + $0x100] sm:$0xff] }
 0x173   :  { %v6592_v5 = vpack.c.bf16 %v237_v19, %v233_v16  ;;  %v6604_v19 = vpack.c.bf16 %v243_v63, %v239_v61  ;;  %v249_v16 = vld [vmem:[#allocation12 + $0xd0] sm:$0xff]  ;;  %v259_v0 = vld [vmem:[#allocation12 + $0x120] sm:$0xff] }
 0x174   :  { %7785 = vst [vmem:[#allocation87_spill] sm:$0xff] %v6606_v56 }
 0x175   :  { %7780 = vst [vmem:[#allocation83_spill] sm:$0xff] %v6592_v5  ;;  %7784 = vst [vmem:[#allocation86_spill] sm:$0xff] %v6604_v19 }
 0x17c   :  { %v5855_v38 = vpop.eup %5854 }
 0x17d   :  { %v6580_v54 = vmul.f32 %v5855_v38, %v5853_v51  ;;  %v6598_v51 = vpack.c.bf16 %v246_v49, %v242_v50  ;;  %v252_v38 = vld [vmem:[#allocation12 + $0xe8] sm:$0xff]  ;;  %v247_v49 = vld [vmem:[#allocation12 + $0xc0] sm:$0xff] }
 0x17e   :  { %v251_v50 = vld [vmem:[#allocation12 + $0xe0] sm:$0xff]  ;;  %v6610_v3 = vpack.c.bf16 %v252_v38, %v248_v43  ;;  %v257_v43 = vld [vmem:[#allocation12 + $0x110] sm:$0xff] }
 0x17f   :  { %534 = vmatmul.mubr.f32.vlgmr.msra.gmra.mrb[2].mxu0 %v6580_v54  ;;  %605 = vmatmul.mubr.f32.vlgmr.msra.gmra.mrb[2].mxu1 %v6580_v54  ;;  %7782 = vst [vmem:[#allocation85_spill] sm:$0xff] %v6598_v51  ;;  %v6616_v61 = vpack.c.bf16 %v251_v50, %v247_v49  ;;  %v261_v38 = vld [vmem:[#allocation12 + $0x130] sm:$0xff]  ;;  %v263_v50 = vld [vmem:[#allocation12 + $0x140] sm:$0xff] }
 0x180   :  { %4394 = vmatpush1.bf16.msra.mxu0 %v6576_v44  ;;  %4426 = vmatpush1.bf16.msra.mxu1 %v6578_v57  ;;  %v250_v44 = vld [vmem:[#allocation12 + $0xd8] sm:$0xff]  ;;  %7786 = vst [vmem:[#allocation88_spill] sm:$0xff] %v6610_v3  ;;  %v6630_v49 = vpack.c.bf16 %v261_v38, %v257_v43  ;;  %v271_v43 = vld [vmem:[#allocation12 + $0x180] sm:$0xff] }
 0x181   :  { %4396 = vmatprep.subr.bf16.mxu0 %v6582_v6  ;;  %4428 = vmatprep.subr.bf16.mxu1 %v6584_v20  ;;  %v254_v57 = vld [vmem:[#allocation12 + $0xf8] sm:$0xff]  ;;  %v253_v20 = vld [vmem:[#allocation12 + $0xf0] sm:$0xff]  ;;  %v256_v6 = vld [vmem:[#allocation12 + $0x108] sm:$0xff]  ;;  %7788 = vst [vmem:[#allocation90_spill] sm:$0xff] %v6616_v61 }
 0x182   :  { %675 = vmatprep.mubr.f32.mxu0 %v7783_v34  ;;  %746 = vmatprep.mubr.f32.mxu1 %v7783_v34  ;;  %v6612_v29 = vpack.c.bf16 %v254_v57, %v250_v44  ;;  %v6618_v63 = vpack.c.bf16 %v253_v20, %v249_v16  ;;  %v6628_v20 = vpack.c.bf16 %v259_v0, %v255_v23  ;;  %v267_v16 = vld [vmem:[#allocation12 + $0x160] sm:$0xff] }
 0x183   :  { %7793 = vst [vmem:[#allocation95_spill] sm:$0xff] %v6630_v49  ;;  %v6640_v23 = vpack.c.bf16 %v267_v16, %v263_v50  ;;  %v275_v38 = vld [vmem:[#allocation12 + $0x1a0] sm:$0xff] }
 0x184   :  { %4398 = vmatpush1.bf16.msra.mxu0 %v6590_v11  ;;  %4430 = vmatpush1.bf16.msra.mxu1 %v6592_v5  ;;  %7787 = vst [vmem:[#allocation89_spill] sm:$0xff] %v6612_v29  ;;  %v260_v11 = vld [vmem:[#allocation12 + $0x128] sm:$0xff]  ;;  %v262_v5 = vld [vmem:[#allocation12 + $0x138] sm:$0xff]  ;;  %7789 = vst [vmem:[#allocation91_spill] sm:$0xff] %v6618_v63  ;;  %v6652_v50 = vpack.c.bf16 %v275_v38, %v271_v43 }
 0x185   :  { %4400 = vmatprep.subr.bf16.mxu0 %v6596_v35  ;;  %4432 = vmatprep.subr.bf16.mxu1 %v6598_v51  ;;  %v6622_v44 = vpack.c.bf16 %v260_v11, %v256_v6  ;;  %v6624_v57 = vpack.c.bf16 %v262_v5, %v258_v36  ;;  %v264_v51 = vld [vmem:[#allocation12 + $0x148] sm:$0xff]  ;;  %v266_v35 = vld [vmem:[#allocation12 + $0x158] sm:$0xff]  ;;  %7792 = vst [vmem:[#allocation94_spill] sm:$0xff] %v6628_v20  ;;  %v265_v11 = vld [vmem:[#allocation12 + $0x150] sm:$0xff] }
 0x186   :  { %v269_v5 = vld [vmem:[#allocation12 + $0x170] sm:$0xff] }
 0x187   :  { %7790 = vst [vmem:[#allocation92_spill] sm:$0xff] %v6622_v44  ;;  %7791 = vst [vmem:[#allocation93_spill] sm:$0xff] %v6624_v57  ;;  %v6642_v0 = vpack.c.bf16 %v269_v5, %v265_v11  ;;  %v279_v11 = vld [vmem:[#allocation12 + $0x1c0] sm:$0xff]  ;;  %v285_v5 = vld [vmem:[#allocation12 + $0x1f0] sm:$0xff] }
 0x188   :  { %4402 = vmatpush1.bf16.msra.mxu0 %v6604_v19  ;;  %4434 = vmatpush1.bf16.msra.mxu1 %v6606_v56  ;;  %v268_v19 = vld [vmem:[#allocation12 + $0x168] sm:$0xff]  ;;  %v270_v56 = vld [vmem:[#allocation12 + $0x178] sm:$0xff] }
 0x189   :  { %4404 = vmatprep.subr.bf16.mxu0 %v6610_v3  ;;  %4436 = vmatprep.subr.bf16.mxu1 %v6612_v29  ;;  %v6634_v36 = vpack.c.bf16 %v268_v19, %v264_v51  ;;  %v6636_v6 = vpack.c.bf16 %v270_v56, %v266_v35  ;;  %v272_v29 = vld [vmem:[#allocation12 + $0x188] sm:$0xff]  ;;  %v274_v3 = vld [vmem:[#allocation12 + $0x198] sm:$0xff]  ;;  %v273_v19 = vld [vmem:[#allocation12 + $0x190] sm:$0xff] }
 0x18a   :  { %v277_v56 = vld [vmem:[#allocation12 + $0x1b0] sm:$0xff] }
 0x18b   :  { %7794 = vst [vmem:[#allocation96_spill] sm:$0xff] %v6634_v36  ;;  %v6654_v16 = vpack.c.bf16 %v277_v56, %v273_v19  ;;  %v7800_v19 = vld [vmem:[#allocation56_spill] sm:$0xff]  ;;  %v7801_v56 = vld [vmem:[#allocation57_spill] sm:$0xff] }
 0x18c   :  { %4406 = vmatpush1.bf16.msra.mxu0 %v6616_v61  ;;  %4438 = vmatpush1.bf16.msra.mxu1 %v6618_v63  ;;  %v276_v61 = vld [vmem:[#allocation12 + $0x1a8] sm:$0xff]  ;;  %v278_v63 = vld [vmem:[#allocation12 + $0x1b8] sm:$0xff] }
 0x18d   :  { %4408 = vmatprep.subr.bf16.mxu0 %v6622_v44  ;;  %4440 = vmatprep.subr.bf16.mxu1 %v6624_v57  ;;  %v6646_v35 = vpack.c.bf16 %v276_v61, %v272_v29  ;;  %v6648_v51 = vpack.c.bf16 %v278_v63, %v274_v3  ;;  %v280_v57 = vld [vmem:[#allocation12 + $0x1c8] sm:$0xff]  ;;  %v282_v44 = vld [vmem:[#allocation12 + $0x1d8] sm:$0xff]  ;;  %v283_v61 = vld [vmem:[#allocation12 + $0x1e0] sm:$0xff] }
 0x18e   :  { %v281_v63 = vld [vmem:[#allocation12 + $0x1d0] sm:$0xff]  ;;  %v6664_v43 = vpack.c.bf16 %v283_v61, %v279_v11  ;;  %v7802_v11 = vld [vmem:[#allocation58_spill] sm:$0xff]  ;;  %v7803_v61 = vld [vmem:[#allocation59_spill] sm:$0xff] }
 0x18f   :  { %v6666_v38 = vpack.c.bf16 %v285_v5, %v281_v63  ;;  %v7804_v63 = vld [vmem:[#allocation60_spill] sm:$0xff]  ;;  %v7805_v5 = vld [vmem:[#allocation61_spill] sm:$0xff] }
 0x190   :  { %4410 = vmatpush1.bf16.msra.mxu0 %v6628_v20  ;;  %4442 = vmatpush1.bf16.msra.mxu1 %v6630_v49  ;;  %v284_v20 = vld [vmem:[#allocation12 + $0x1e8] sm:$0xff]  ;;  %v286_v49 = vld [vmem:[#allocation12 + $0x1f8] sm:$0xff] }
 0x191   :  { %4412 = vmatprep.subr.bf16.mxu0 %v6634_v36  ;;  %4444 = vmatprep.subr.bf16.mxu1 %v6636_v6  ;;  %v6658_v3 = vpack.c.bf16 %v284_v20, %v280_v57  ;;  %v6660_v29 = vpack.c.bf16 %v286_v49, %v282_v44  ;;  %v7795_v44 = vld [vmem:[#allocation51_spill] sm:$0xff]  ;;  %v7796_v57 = vld [vmem:[#allocation52_spill] sm:$0xff]  ;;  %v7798_v20 = vld [vmem:[#allocation54_spill] sm:$0xff] }
 0x192   :  { %v7799_v49 = vld [vmem:[#allocation55_spill] sm:$0xff] }
 0x194   :  { %4414 = vmatpush1.bf16.msra.mxu0 %v6640_v23  ;;  %4446 = vmatpush1.bf16.msra.mxu1 %v6642_v0 }
 0x195   :  { %4416 = vmatprep.subr.bf16.mxu0 %v6646_v35  ;;  %4448 = vmatprep.subr.bf16.mxu1 %v6648_v51 }
 0x198   :  { %4418 = vmatpush1.bf16.msra.mxu0 %v6652_v50  ;;  %4450 = vmatpush1.bf16.msra.mxu1 %v6654_v16 }
 0x199   :  { %4420 = vmatprep.subr.bf16.mxu0 %v6658_v3  ;;  %4452 = vmatprep.subr.bf16.mxu1 %v6660_v29 }
 0x19c   :  { %4422 = vmatpush1.bf16.msra.mxu0 %v6664_v43  ;;  %4454 = vmatpush1.bf16.msra.mxu1 %v6666_v38 }
 0x19d   :  { %4456 = vmatprep.subr.bf16.mxu0 %v6371_v4  ;;  %4488 = vmatprep.subr.bf16.mxu1 %v6384_v22 }
 0x19f   :  { %676 = vmatmul.mubr.f32.vlgmr.msra.gmra.mrb[2].mxu0 %v7783_v34  ;;  %747 = vmatmul.mubr.f32.vlgmr.msra.gmra.mrb[2].mxu1 %v7783_v34 }
 0x1a0   :  { %4458 = vmatpush1.bf16.msra.mxu0 %v6373_v8  ;;  %4490 = vmatpush1.bf16.msra.mxu1 %v6386_v25 }
 0x1a1   :  { %4460 = vmatprep.subr.bf16.mxu0 %v6375_v9  ;;  %4492 = vmatprep.subr.bf16.mxu1 %v6396_v33 }
 0x1a2   :  { %850 = vmatprep.mubr.f32.mxu0 %v7783_v34  ;;  %921 = vmatprep.mubr.f32.mxu1 %v7783_v34 }
 0x1a4   :  { %4462 = vmatpush1.bf16.msra.mxu0 %v6379_v14  ;;  %4494 = vmatpush1.bf16.msra.mxu1 %v6398_v37 }
 0x1a5   :  { %4464 = vmatprep.subr.bf16.mxu0 %v6382_v17  ;;  %4496 = vmatprep.subr.bf16.mxu1 %v6404_v45 }
 0x1a8   :  { %4466 = vmatpush1.bf16.msra.mxu0 %v6389_v26  ;;  %4498 = vmatpush1.bf16.msra.mxu1 %v6410_v48 }
 0x1a9   :  { %4468 = vmatprep.subr.bf16.mxu0 %v6393_v30  ;;  %4500 = vmatprep.subr.bf16.mxu1 %v6413_v52 }
 0x1ac   :  { %4470 = vmatpush1.bf16.msra.mxu0 %v6402_v42  ;;  %4502 = vmatpush1.bf16.msra.mxu1 %v6422_v62 }
 0x1ad   :  { %4472 = vmatprep.subr.bf16.mxu0 %v6407_v46  ;;  %4504 = vmatprep.subr.bf16.mxu1 %v6425_v1 }
 0x1b0   :  { %4474 = vmatpush1.bf16.msra.mxu0 %v6416_v55  ;;  %4506 = vmatpush1.bf16.msra.mxu1 %v6434_v15 }
 0x1b1   :  { %4476 = vmatprep.subr.bf16.mxu0 %v6419_v58  ;;  %4508 = vmatprep.subr.bf16.mxu1 %v6437_v18 }
 0x1b4   :  { %4478 = vmatpush1.bf16.msra.mxu0 %v6428_v7  ;;  %4510 = vmatpush1.bf16.msra.mxu1 %v6446_v31 }
 0x1b5   :  { %4480 = vmatprep.subr.bf16.mxu0 %v6431_v10  ;;  %4512 = vmatprep.subr.bf16.mxu1 %v6449_v32 }
 0x1b8   :  { %4482 = vmatpush1.bf16.msra.mxu0 %v6440_v24  ;;  %4514 = vmatpush1.bf16.msra.mxu1 %v6456_v40 }
 0x1b9   :  { %4484 = vmatprep.subr.bf16.mxu0 %v6443_v27  ;;  %4516 = vmatprep.subr.bf16.mxu1 %v6459_v41 }
 0x1bc   :  { %4486 = vmatpush1.bf16.msra.mxu0 %v6452_v39  ;;  %4518 = vmatpush1.bf16.msra.mxu1 %v6463_v47 }
 0x1bd   :  { %4520 = vmatprep.subr.bf16.mxu0 %v6471_v53  ;;  %4552 = vmatprep.subr.bf16.mxu1 %v6473_v59 }
 0x1bf   :  { %851 = vmatmul.mubr.f32.vlgmr.msra.gmra.mrb[4].mxu0 %v6580_v54  ;;  %922 = vmatmul.mubr.f32.vlgmr.msra.gmra.mrb[4].mxu1 %v6580_v54  ;;  %v7797_v54 = vld [vmem:[#allocation53_spill] sm:$0xff] }
 0x1c0   :  { %4522 = vmatpush1.bf16.msra.mxu0 %v6475_v60  ;;  %4554 = vmatpush1.bf16.msra.mxu1 %v6478_v2 }
 0x1c1   :  { %4524 = vmatprep.subr.bf16.mxu0 %v6483_v12  ;;  %4556 = vmatprep.subr.bf16.mxu1 %v6485_v13 }
 0x1c2   :  { %1020 = vmatprep.mubr.f32.mxu0 %v7783_v34  ;;  %1091 = vmatprep.mubr.f32.mxu1 %v7783_v34 }
 0x1c4   :  { %4526 = vmatpush1.bf16.msra.mxu0 %v6487_v21  ;;  %4558 = vmatpush1.bf16.msra.mxu1 %v6491_v28 }
 0x1c5   :  { %4528 = vmatprep.subr.bf16.mxu0 %v7795_v44  ;;  %4560 = vmatprep.subr.bf16.mxu1 %v7796_v57  ;;  %v7806_v44 = vld [vmem:[#allocation62_spill] sm:$0xff]  ;;  %v7807_v57 = vld [vmem:[#allocation63_spill] sm:$0xff] }
 0x1c8   :  { %4530 = vmatpush1.bf16.msra.mxu0 %v7797_v54  ;;  %4562 = vmatpush1.bf16.msra.mxu1 %v7798_v20  ;;  %v7808_v54 = vld [vmem:[#allocation64_spill] sm:$0xff]  ;;  %v7809_v20 = vld [vmem:[#allocation65_spill] sm:$0xff] }
 0x1c9   :  { %4532 = vmatprep.subr.bf16.mxu0 %v7799_v49  ;;  %4564 = vmatprep.subr.bf16.mxu1 %v7800_v19  ;;  %v7810_v49 = vld [vmem:[#allocation66_spill] sm:$0xff]  ;;  %v7811_v19 = vld [vmem:[#allocation67_spill] sm:$0xff] }
 0x1cc   :  { %4534 = vmatpush1.bf16.msra.mxu0 %v7801_v56  ;;  %4566 = vmatpush1.bf16.msra.mxu1 %v7802_v11  ;;  %v7812_v56 = vld [vmem:[#allocation68_spill] sm:$0xff]  ;;  %v7813_v11 = vld [vmem:[#allocation69_spill] sm:$0xff] }
 0x1cd   :  { %4536 = vmatprep.subr.bf16.mxu0 %v7803_v61  ;;  %4568 = vmatprep.subr.bf16.mxu1 %v7804_v63  ;;  %v7814_v61 = vld [vmem:[#allocation70_spill] sm:$0xff]  ;;  %v7815_v63 = vld [vmem:[#allocation71_spill] sm:$0xff] }
 0x1d0   :  { %4538 = vmatpush1.bf16.msra.mxu0 %v7805_v5  ;;  %4570 = vmatpush1.bf16.msra.mxu1 %v7806_v44  ;;  %v7816_v5 = vld [vmem:[#allocation72_spill] sm:$0xff]  ;;  %v7817_v44 = vld [vmem:[#allocation73_spill] sm:$0xff] }
 0x1d1   :  { %4540 = vmatprep.subr.bf16.mxu0 %v7807_v57  ;;  %4572 = vmatprep.subr.bf16.mxu1 %v7808_v54  ;;  %v7818_v57 = vld [vmem:[#allocation74_spill] sm:$0xff]  ;;  %v7819_v54 = vld [vmem:[#allocation75_spill] sm:$0xff] }
 0x1d4   :  { %4542 = vmatpush1.bf16.msra.mxu0 %v7809_v20  ;;  %4574 = vmatpush1.bf16.msra.mxu1 %v7810_v49  ;;  %v7820_v20 = vld [vmem:[#allocation76_spill] sm:$0xff]  ;;  %v6746_v49 = vld [vmem:[#allocation14] sm:$0xff] }
 0x1d5   :  { %4544 = vmatprep.subr.bf16.mxu0 %v7811_v19  ;;  %4576 = vmatprep.subr.bf16.mxu1 %v7812_v56  ;;  %7821 = vst [vmem:[#allocation97_spill] sm:$0xff] %v6746_v49  ;;  %v6748_v19 = vld [vmem:[#allocation14 + $0x8] sm:$0xff] }
 0x1d6   :  { %7822 = vst [vmem:[#allocation98_spill] sm:$0xff] %v6748_v19 }
 0x1d8   :  { %4546 = vmatpush1.bf16.msra.mxu0 %v7813_v11  ;;  %4578 = vmatpush1.bf16.msra.mxu1 %v7814_v61 }
 0x1d9   :  { %4548 = vmatprep.subr.bf16.mxu0 %v7815_v63  ;;  %4580 = vmatprep.subr.bf16.mxu1 %v7816_v5 }
 0x1dc   :  { %4550 = vmatpush1.bf16.msra.mxu0 %v7817_v44  ;;  %4582 = vmatpush1.bf16.msra.mxu1 %v7818_v57  ;;  %v6752_v57 = vld [vmem:[#allocation14 + $0x10] sm:$0xff] }
 0x1dd   :  { %4584 = vmatprep.subr.bf16.mxu0 %v7819_v54  ;;  %4616 = vmatprep.subr.bf16.mxu1 %v7820_v20  ;;  %7823 = vst [vmem:[#allocation99_spill] sm:$0xff] %v6752_v57 }
 0x272   :  { %v677_v56 = vpop.f32.mrb[2].mxu0  ;;  %v748_v11 = vpop.f32.mrb[2].mxu1 }
 0x273   :  { %v753_v61 = vadd.f32 %v677_v56, %v6746_v49  ;;  %v679_v28 = vpop.f32.mrb[3].mxu0  ;;  %v750_v63 = vpop.f32.mrb[3].mxu1  ;;  %v755_v20 = vadd.f32 %v748_v11, %v6752_v57 }
 0x274   :  { %v754_v5 = vadd.f32 %v679_v28, %v6748_v19 }
 0x275   :  { %v4218_v21 = vmul.f32 -1.442695, %v753_v61  ;;  %v782_v61 = vld [vmem:[#allocation6 + $0x20] sm:$0xff] }
 0x276   :  { %v4219_v44 = vmul.f32 -1.442695, %v754_v5  ;;  %v783_v5 = vld [vmem:[#allocation6 + $0x28] sm:$0xff] }
 0x277   :  { %5856 = vpow2.f32 %v4218_v21 }
 0x278   :  { %5858 = vpow2.f32 %v4219_v44 }
 0x279   :  { %5860 = vtanh.f32 %v755_v20 }
 0x281   :  { %v5857_v54 = vpop.eup %5856 }
 0x282   :  { %v5859_v13 = vpop.eup %5858  ;;  %v760_v12 = vadd.f32 1.0, %v5857_v54 }
 0x283   :  { %v766_v2 = vadd.f32 1.0, %v5859_v13  ;;  %v5861_v56 = vpop.eup %5860  ;;  %v784_v13 = vld [vmem:[#allocation6 + $0x30] sm:$0xff] }
 0x284   :  { %5862 = vrcp.f32 %v760_v12  ;;  %v785_v12 = vld [vmem:[#allocation6 + $0x38] sm:$0xff] }
 0x285   :  { %5864 = vrcp.f32 %v766_v2 }
 0x28e   :  { %v5863_v49 = vpop.eup %5862 }
 0x28f   :  { %v5865_v60 = vpop.eup %5864  ;;  %v777_v59 = vmul.f32 %v5863_v49, %v5861_v56 }
 0x290   :  { %v776_v28 = vmul.f32 0.0, %v5865_v60 }
 0x292   :  { %v6755_v21 = vadd.f32 %v777_v59, %v776_v28  ;;  %v852_v44 = vpop.f32.mrb[4].mxu0  ;;  %v923_v19 = vpop.f32.mrb[4].mxu1 }
 0x293   :  { %v928_v53 = vadd.f32 %v852_v44, %v782_v61  ;;  %v854_v11 = vpop.f32.mrb[5].mxu0  ;;  %v925_v57 = vpop.f32.mrb[5].mxu1  ;;  %v930_v49 = vadd.f32 %v923_v19, %v784_v13  ;;  %v6761_v19 = vld [vmem:[#allocation14 + $0x18] sm:$0xff] }
 0x294   :  { %v929_v47 = vadd.f32 %v854_v11, %v783_v5  ;;  %v931_v2 = vadd.f32 %v925_v57, %v785_v12  ;;  %v7824_v11 = vld [vmem:[#allocation77_spill] sm:$0xff]  ;;  %v7825_v13 = vld [vmem:[#allocation78_spill] sm:$0xff] }
 0x295   :  { %v4221_v54 = vmul.f32 -1.442695, %v928_v53 }
 0x296   :  { %v4222_v20 = vmul.f32 -1.442695, %v929_v47  ;;  %v4223_v39 = vmul.f32 -1.442695, %v931_v2 }
 0x297   :  { %5866 = vpow2.f32 %v4221_v54 }
 0x298   :  { %5868 = vpow2.f32 %v4222_v20 }
 0x299   :  { %5870 = vpow2.f32 %v4223_v39  ;;  %v756_v39 = vadd.f32 %v750_v63, %v6761_v19  ;;  %v7829_v63 = vld [vmem:[#allocation82_spill] sm:$0xff] }
 0x29a   :  { %5872 = vtanh.f32 %v930_v49  ;;  %v7826_v49 = vld [vmem:[#allocation79_spill] sm:$0xff] }
 0x29b   :  { %v4220_v12 = vmul.f32 -1.442695, %v756_v39  ;;  %v7838_v39 = vld [vmem:[#allocation91_spill] sm:$0xff] }
 0x2a1   :  { %v5867_v60 = vpop.eup %5866 }
 0x2a2   :  { %v5869_v56 = vpop.eup %5868  ;;  %v935_v41 = vadd.f32 1.0, %v5867_v60  ;;  %v7827_v60 = vld [vmem:[#allocation80_spill] sm:$0xff] }
 0x2a3   :  { %v941_v59 = vadd.f32 1.0, %v5869_v56  ;;  %v5871_v28 = vpop.eup %5870  ;;  %v7828_v56 = vld [vmem:[#allocation81_spill] sm:$0xff] }
 0x2a4   :  { %5874 = vrcp.f32 %v935_v41  ;;  %v5873_v61 = vpop.eup %5872  ;;  %v948_v44 = vadd.f32 1.0, %v5871_v28  ;;  %v7831_v28 = vld [vmem:[#allocation84_spill] sm:$0xff] }
 0x2a5   :  { %5876 = vrcp.f32 %v941_v59  ;;  %v7830_v59 = vld [vmem:[#allocation83_spill] sm:$0xff] }
 0x2a6   :  { %5878 = vrcp.f32 %v948_v44  ;;  %v7836_v44 = vld [vmem:[#allocation89_spill] sm:$0xff] }
 0x2ae   :  { %v5875_v5 = vpop.eup %5874 }
 0x2af   :  { %v5877_v53 = vpop.eup %5876  ;;  %v952_v47 = vmul.f32 %v5875_v5, %v5873_v61  ;;  %v7832_v61 = vld [vmem:[#allocation85_spill] sm:$0xff]  ;;  %v7833_v5 = vld [vmem:[#allocation86_spill] sm:$0xff] }
 0x2b0   :  { %v951_v54 = vmul.f32 %v5877_v53, %v7824_v11  ;;  %v5879_v20 = vpop.eup %5878  ;;  %v7834_v53 = vld [vmem:[#allocation87_spill] sm:$0xff] }
 0x2b2   :  { %v6758_v57 = vadd.f32 %v952_v47, %v951_v54  ;;  %v7835_v47 = vld [vmem:[#allocation88_spill] sm:$0xff]  ;;  %v7837_v54 = vld [vmem:[#allocation90_spill] sm:$0xff] }
 0x2b4   :  { %5880 = vtanh.f32 %v6758_v57 }
 0x2b5   :  { %5882 = vpow2.f32 %v4220_v12 }
 0x2b6   :  { %5884 = vtanh.f32 %v6755_v21 }
 0x2be   :  { %v5881_v41 = vpop.eup %5880 }
 0x2bf   :  { %v6764_v2 = vmul.f32 %v5881_v41, %v5879_v20  ;;  %v5883_v11 = vpop.eup %5882  ;;  %v7839_v20 = vld [vmem:[#allocation92_spill] sm:$0xff]  ;;  %v7840_v41 = vld [vmem:[#allocation93_spill] sm:$0xff] }
 0x2c0   :  { %v773_v12 = vadd.f32 1.0, %v5883_v11  ;;  %v5885_v11 = vpop.eup %5884 }
 0x2c1   :  { %1021 = vmatmul.mubr.f32.vlgmr.msra.gmra.mrb[6].mxu0 %v6764_v2  ;;  %1092 = vmatmul.mubr.f32.vlgmr.msra.gmra.mrb[6].mxu1 %v6764_v2 }
 0x2c2   :  { %4586 = vmatpush1.bf16.msra.mxu0 %v7825_v13  ;;  %4618 = vmatpush1.bf16.msra.mxu1 %v7826_v49  ;;  %5886 = vrcp.f32 %v773_v12 }
 0x2c3   :  { %4588 = vmatprep.subr.bf16.mxu0 %v7827_v60  ;;  %4620 = vmatprep.subr.bf16.mxu1 %v7828_v56 }
 0x2c4   :  { %1162 = vmatprep.mubr.f32.mxu0 %v7783_v34  ;;  %1233 = vmatprep.mubr.f32.mxu1 %v7783_v34 }
 0x2c6   :  { %4590 = vmatpush1.bf16.msra.mxu0 %v7829_v63  ;;  %4622 = vmatpush1.bf16.msra.mxu1 %v7830_v59 }
 0x2c7   :  { %4592 = vmatprep.subr.bf16.mxu0 %v7831_v28  ;;  %4624 = vmatprep.subr.bf16.mxu1 %v7832_v61  ;;  %v7841_v61 = vld [vmem:[#allocation94_spill] sm:$0xff] }
 0x2ca   :  { %4594 = vmatpush1.bf16.msra.mxu0 %v7833_v5  ;;  %4626 = vmatpush1.bf16.msra.mxu1 %v7834_v53  ;;  %v7842_v5 = vld [vmem:[#allocation95_spill] sm:$0xff] }
 0x2cb   :  { %4596 = vmatprep.subr.bf16.mxu0 %v7835_v47  ;;  %4628 = vmatprep.subr.bf16.mxu1 %v7836_v44 }
 0x2ce   :  { %4598 = vmatpush1.bf16.msra.mxu0 %v7837_v54  ;;  %4630 = vmatpush1.bf16.msra.mxu1 %v7838_v39 }
 0x2cf   :  { %4600 = vmatprep.subr.bf16.mxu0 %v7839_v20  ;;  %4632 = vmatprep.subr.bf16.mxu1 %v7840_v41 }
 0x2d2   :  { %4602 = vmatpush1.bf16.msra.mxu0 %v7841_v61  ;;  %4634 = vmatpush1.bf16.msra.mxu1 %v7842_v5 }
 0x2d3   :  { %4604 = vmatprep.subr.bf16.mxu0 %v6634_v36  ;;  %4636 = vmatprep.subr.bf16.mxu1 %v6636_v6  ;;  %v5887_v36 = vpop.eup %5886 }
 0x2d4   :  { %v780_v12 = vmul.f32 %v5887_v36, %v5885_v11  ;;  %v7843_v36 = vld [vmem:[#allocation41_spill] sm:$0xff]  ;;  %v7844_v11 = vld [vmem:[#allocation39_spill] sm:$0xff] }
 0x2d6   :  { %4606 = vmatpush1.bf16.msra.mxu0 %v6640_v23  ;;  %4638 = vmatpush1.bf16.msra.mxu1 %v6642_v0 }
 0x2d7   :  { %4608 = vmatprep.subr.bf16.mxu0 %v6646_v35  ;;  %4640 = vmatprep.subr.bf16.mxu1 %v6648_v51 }
 0x2da   :  { %4610 = vmatpush1.bf16.msra.mxu0 %v6652_v50  ;;  %4642 = vmatpush1.bf16.msra.mxu1 %v6654_v16 }
 0x2db   :  { %4612 = vmatprep.subr.bf16.mxu0 %v6658_v3  ;;  %4644 = vmatprep.subr.bf16.mxu1 %v6660_v29 }
 0x2de   :  { %4614 = vmatpush1.bf16.msra.mxu0 %v6664_v43  ;;  %4646 = vmatpush1.bf16.msra.mxu1 %v6666_v38 }
 0x2df   :  { %4648 = vmatprep.subr.bf16.mxu0 %v6371_v4  ;;  %4680 = vmatprep.subr.bf16.mxu1 %v6384_v22 }
 0x2e1   :  { %1163 = vmatmul.mubr.f32.vlgmr.msra.gmra.mrb[6].mxu0 %v780_v12  ;;  %1234 = vmatmul.mubr.f32.vlgmr.msra.gmra.mrb[6].mxu1 %v780_v12  ;;  %v7845_v12 = vld [vmem:[#allocation42_spill] sm:$0xff] }
 0x2e2   :  { %4650 = vmatpush1.bf16.msra.mxu0 %v6373_v8  ;;  %4682 = vmatpush1.bf16.msra.mxu1 %v6386_v25 }
 0x2e3   :  { %4652 = vmatprep.subr.bf16.mxu0 %v6375_v9  ;;  %4684 = vmatprep.subr.bf16.mxu1 %v6396_v33 }
 0x2e4   :  { %1337 = vmatprep.mubr.f32.mxu0 %v7783_v34  ;;  %1408 = vmatprep.mubr.f32.mxu1 %v7783_v34 }
 0x2e6   :  { %4654 = vmatpush1.bf16.msra.mxu0 %v6379_v14  ;;  %4686 = vmatpush1.bf16.msra.mxu1 %v6398_v37 }
 0x2e7   :  { %4656 = vmatprep.subr.bf16.mxu0 %v6382_v17  ;;  %4688 = vmatprep.subr.bf16.mxu1 %v6404_v45 }
 0x2ea   :  { %4658 = vmatpush1.bf16.msra.mxu0 %v6389_v26  ;;  %4690 = vmatpush1.bf16.msra.mxu1 %v6410_v48 }
 0x2eb   :  { %4660 = vmatprep.subr.bf16.mxu0 %v6393_v30  ;;  %4692 = vmatprep.subr.bf16.mxu1 %v6413_v52  ;;  %v1271_v52 = vld [vmem:[#allocation6 + $0x50] sm:$0xff] }
 0x2ee   :  { %4662 = vmatpush1.bf16.msra.mxu0 %v6402_v42  ;;  %4694 = vmatpush1.bf16.msra.mxu1 %v6422_v62 }
 0x2ef   :  { %4664 = vmatprep.subr.bf16.mxu0 %v6407_v46  ;;  %4696 = vmatprep.subr.bf16.mxu1 %v6425_v1 }
 0x2f2   :  { %4666 = vmatpush1.bf16.msra.mxu0 %v6416_v55  ;;  %4698 = vmatpush1.bf16.msra.mxu1 %v6434_v15  ;;  %v7881_v15 = vld [vmem:[#allocation98_spill] sm:$0xff] }
 0x2f3   :  { %4668 = vmatprep.subr.bf16.mxu0 %v6419_v58  ;;  %4700 = vmatprep.subr.bf16.mxu1 %v6437_v18  ;;  %v7846_v18 = vld [vmem:[#allocation43_spill] sm:$0xff] }
 0x2f6   :  { %4670 = vmatpush1.bf16.msra.mxu0 %v6428_v7  ;;  %4702 = vmatpush1.bf16.msra.mxu1 %v6446_v31  ;;  %v7847_v7 = vld [vmem:[#allocation44_spill] sm:$0xff]  ;;  %v7880_v31 = vld [vmem:[#allocation97_spill] sm:$0xff] }
 0x2f7   :  { %4672 = vmatprep.subr.bf16.mxu0 %v6431_v10  ;;  %4704 = vmatprep.subr.bf16.mxu1 %v6449_v32  ;;  %v7848_v32 = vld [vmem:[#allocation45_spill] sm:$0xff]  ;;  %v7862_v10 = vld [vmem:[#allocation59_spill] sm:$0xff] }
 0x2fa   :  { %4674 = vmatpush1.bf16.msra.mxu0 %v6440_v24  ;;  %4706 = vmatpush1.bf16.msra.mxu1 %v6456_v40  ;;  %v7849_v24 = vld [vmem:[#allocation46_spill] sm:$0xff]  ;;  %v7850_v40 = vld [vmem:[#allocation47_spill] sm:$0xff] }
 0x2fb   :  { %4676 = vmatprep.subr.bf16.mxu0 %v6443_v27  ;;  %4708 = vmatprep.subr.bf16.mxu1 %v7843_v36  ;;  %v7851_v27 = vld [vmem:[#allocation48_spill] sm:$0xff]  ;;  %v7861_v36 = vld [vmem:[#allocation58_spill] sm:$0xff] }
 0x2fe   :  { %4678 = vmatpush1.bf16.msra.mxu0 %v7844_v11  ;;  %4710 = vmatpush1.bf16.msra.mxu1 %v7845_v12  ;;  %v7852_v12 = vld [vmem:[#allocation49_spill] sm:$0xff]  ;;  %v7855_v11 = vld [vmem:[#allocation52_spill] sm:$0xff] }
 0x2ff   :  { %4712 = vmatprep.subr.bf16.mxu0 %v7846_v18  ;;  %4744 = vmatprep.subr.bf16.mxu1 %v7847_v7  ;;  %v7853_v18 = vld [vmem:[#allocation50_spill] sm:$0xff]  ;;  %v7854_v7 = vld [vmem:[#allocation51_spill] sm:$0xff] }
 0x301   :  { %1338 = vmatmul.mubr.f32.vlgmr.msra.gmra.mrb[8].mxu0 %v6764_v2  ;;  %1409 = vmatmul.mubr.f32.vlgmr.msra.gmra.mrb[8].mxu1 %v6764_v2  ;;  %v7856_v2 = vld [vmem:[#allocation53_spill] sm:$0xff] }
 0x302   :  { %4714 = vmatpush1.bf16.msra.mxu0 %v7848_v32  ;;  %4746 = vmatpush1.bf16.msra.mxu1 %v7849_v24  ;;  %v7857_v32 = vld [vmem:[#allocation54_spill] sm:$0xff]  ;;  %v7858_v24 = vld [vmem:[#allocation55_spill] sm:$0xff] }
 0x303   :  { %4716 = vmatprep.subr.bf16.mxu0 %v7850_v40  ;;  %4748 = vmatprep.subr.bf16.mxu1 %v7851_v27  ;;  %v7859_v40 = vld [vmem:[#allocation56_spill] sm:$0xff]  ;;  %v7860_v27 = vld [vmem:[#allocation57_spill] sm:$0xff] }
 0x304   :  { %1507 = vmatprep.mubr.f32.mxu0 %v7783_v34  ;;  %1578 = vmatprep.mubr.f32.mxu1 %v7783_v34 }
 0x306   :  { %4718 = vmatpush1.bf16.msra.mxu0 %v7852_v12  ;;  %4750 = vmatpush1.bf16.msra.mxu1 %v7853_v18  ;;  %v7863_v12 = vld [vmem:[#allocation60_spill] sm:$0xff]  ;;  %v7864_v18 = vld [vmem:[#allocation61_spill] sm:$0xff] }
 0x307   :  { %4720 = vmatprep.subr.bf16.mxu0 %v7854_v7  ;;  %4752 = vmatprep.subr.bf16.mxu1 %v7855_v11  ;;  %v7865_v7 = vld [vmem:[#allocation62_spill] sm:$0xff]  ;;  %v7866_v11 = vld [vmem:[#allocation63_spill] sm:$0xff] }
 0x30a   :  { %4722 = vmatpush1.bf16.msra.mxu0 %v7856_v2  ;;  %4754 = vmatpush1.bf16.msra.mxu1 %v7857_v32  ;;  %v7867_v2 = vld [vmem:[#allocation64_spill] sm:$0xff]  ;;  %v7868_v32 = vld [vmem:[#allocation65_spill] sm:$0xff] }
 0x30b   :  { %4724 = vmatprep.subr.bf16.mxu0 %v7858_v24  ;;  %4756 = vmatprep.subr.bf16.mxu1 %v7859_v40  ;;  %v7869_v24 = vld [vmem:[#allocation66_spill] sm:$0xff]  ;;  %v7870_v40 = vld [vmem:[#allocation67_spill] sm:$0xff] }
 0x30e   :  { %4726 = vmatpush1.bf16.msra.mxu0 %v7860_v27  ;;  %4758 = vmatpush1.bf16.msra.mxu1 %v7861_v36  ;;  %v7871_v27 = vld [vmem:[#allocation68_spill] sm:$0xff]  ;;  %v7872_v36 = vld [vmem:[#allocation69_spill] sm:$0xff] }
 0x30f   :  { %4728 = vmatprep.subr.bf16.mxu0 %v7862_v10  ;;  %4760 = vmatprep.subr.bf16.mxu1 %v7863_v12  ;;  %v7873_v10 = vld [vmem:[#allocation70_spill] sm:$0xff]  ;;  %v7874_v12 = vld [vmem:[#allocation71_spill] sm:$0xff] }
 0x312   :  { %4730 = vmatpush1.bf16.msra.mxu0 %v7864_v18  ;;  %4762 = vmatpush1.bf16.msra.mxu1 %v7865_v7  ;;  %v7875_v18 = vld [vmem:[#allocation72_spill] sm:$0xff]  ;;  %v7876_v7 = vld [vmem:[#allocation73_spill] sm:$0xff] }
 0x313   :  { %4732 = vmatprep.subr.bf16.mxu0 %v7866_v11  ;;  %4764 = vmatprep.subr.bf16.mxu1 %v7867_v2  ;;  %v7877_v11 = vld [vmem:[#allocation74_spill] sm:$0xff]  ;;  %v7878_v2 = vld [vmem:[#allocation75_spill] sm:$0xff] }
 0x316   :  { %4734 = vmatpush1.bf16.msra.mxu0 %v7868_v32  ;;  %4766 = vmatpush1.bf16.msra.mxu1 %v7869_v24  ;;  %v7879_v32 = vld [vmem:[#allocation76_spill] sm:$0xff] }
 0x317   :  { %4736 = vmatprep.subr.bf16.mxu0 %v7870_v40  ;;  %4768 = vmatprep.subr.bf16.mxu1 %v7871_v27 }
 0x31a   :  { %4738 = vmatpush1.bf16.msra.mxu0 %v7872_v36  ;;  %4770 = vmatpush1.bf16.msra.mxu1 %v7873_v10 }
 0x31b   :  { %4740 = vmatprep.subr.bf16.mxu0 %v7874_v12  ;;  %4772 = vmatprep.subr.bf16.mxu1 %v7875_v18  ;;  %v7882_v18 = vld [vmem:[#allocation99_spill] sm:$0xff] }
 0x31e   :  { %4742 = vmatpush1.bf16.msra.mxu0 %v7876_v7  ;;  %4774 = vmatpush1.bf16.msra.mxu1 %v7877_v11 }
 0x31f   :  { %4776 = vmatprep.subr.bf16.mxu0 %v7878_v2  ;;  %4808 = vmatprep.subr.bf16.mxu1 %v7879_v32 }
 0x3b4   :  { %v1164_v24 = vpop.f32.mrb[6].mxu0  ;;  %v1235_v40 = vpop.f32.mrb[6].mxu1 }
 0x3b5   :  { %v1240_v27 = vadd.f32 %v1164_v24, %v7880_v31  ;;  %v1166_v58 = vpop.f32.mrb[7].mxu0  ;;  %v1237_v36 = vpop.f32.mrb[7].mxu1  ;;  %v1242_v7 = vadd.f32 %v1235_v40, %v7882_v18 }
 0x3b6   :  { %v1241_v10 = vadd.f32 %v1166_v58, %v7881_v15  ;;  %v1269_v58 = vld [vmem:[#allocation6 + $0x40] sm:$0xff] }
 0x3b7   :  { %v4224_v55 = vmul.f32 -1.442695, %v1240_v27  ;;  %v1270_v27 = vld [vmem:[#allocation6 + $0x48] sm:$0xff] }
 0x3b8   :  { %v4225_v12 = vmul.f32 -1.442695, %v1241_v10 }
 0x3b9   :  { %5888 = vpow2.f32 %v4224_v55 }
 0x3ba   :  { %5890 = vpow2.f32 %v4225_v12 }
 0x3bb   :  { %5892 = vtanh.f32 %v1242_v7 }
 0x3c3   :  { %v5889_v1 = vpop.eup %5888 }
 0x3c4   :  { %v5891_v11 = vpop.eup %5890  ;;  %v1247_v46 = vadd.f32 1.0, %v5889_v1 }
 0x3c5   :  { %v1253_v2 = vadd.f32 1.0, %v5891_v11  ;;  %v5893_v32 = vpop.eup %5892 }
 0x3c6   :  { %5894 = vrcp.f32 %v1247_v46  ;;  %v1272_v46 = vld [vmem:[#allocation6 + $0x58] sm:$0xff] }
 0x3c7   :  { %5896 = vrcp.f32 %v1253_v2 }
 0x3d0   :  { %v5895_v62 = vpop.eup %5894 }
 0x3d1   :  { %v5897_v24 = vpop.eup %5896  ;;  %v1264_v31 = vmul.f32 %v5895_v62, %v5893_v32 }
 0x3d2   :  { %v1263_v42 = vmul.f32 %v5897_v24, %v6755_v21 }
 0x3d4   :  { %v6877_v10 = vadd.f32 %v1264_v31, %v1263_v42  ;;  %v1339_v55 = vpop.f32.mrb[8].mxu0  ;;  %v1410_v12 = vpop.f32.mrb[8].mxu1 }
 0x3d5   :  { %v1415_v40 = vadd.f32 %v1339_v55, %v1269_v58  ;;  %v1341_v18 = vpop.f32.mrb[9].mxu0  ;;  %v1412_v15 = vpop.f32.mrb[9].mxu1  ;;  %v1417_v32 = vadd.f32 %v1410_v12, %v1271_v52  ;;  %v1243_v52 = vadd.f32 %v1237_v36, %v6761_v19  ;;  %v7884_v36 = vld [vmem:[#allocation86_spill] sm:$0xff] }
 0x3d6   :  { %v1416_v1 = vadd.f32 %v1341_v18, %v1270_v27  ;;  %v1418_v2 = vadd.f32 %v1412_v15, %v1272_v46 }
 0x3d7   :  { %v4227_v7 = vmul.f32 -1.442695, %v1415_v40 }
 0x3d8   :  { %v4228_v11 = vmul.f32 -1.442695, %v1416_v1  ;;  %v4229_v62 = vmul.f32 -1.442695, %v1418_v2 }
 0x3d9   :  { %5898 = vpow2.f32 %v4227_v7 }
 0x3da   :  { %5900 = vpow2.f32 %v4228_v11  ;;  %v4226_v11 = vmul.f32 -1.442695, %v1243_v52  ;;  %v7894_v52 = vld [vmem:[#allocation28_spill] sm:$0xff] }
 0x3db   :  { %5902 = vpow2.f32 %v4229_v62  ;;  %v7885_v62 = vld [vmem:[#allocation96_spill] sm:$0xff] }
 0x3dc   :  { %5904 = vtanh.f32 %v1417_v32 }
 0x3e3   :  { %v5899_v21 = vpop.eup %5898 }
 0x3e4   :  { %v5901_v24 = vpop.eup %5900  ;;  %v1422_v30 = vadd.f32 1.0, %v5899_v21 }
 0x3e5   :  { %v1428_v42 = vadd.f32 1.0, %v5901_v24  ;;  %v5903_v31 = vpop.eup %5902 }
 0x3e6   :  { %5906 = vrcp.f32 %v1422_v30  ;;  %v5905_v58 = vpop.eup %5904  ;;  %v1435_v40 = vadd.f32 1.0, %v5903_v31  ;;  %v7887_v31 = vld [vmem:[#allocation26_spill] sm:$0xff] }
 0x3e7   :  { %5908 = vrcp.f32 %v1428_v42  ;;  %v7886_v42 = vld [vmem:[#allocation21_spill] sm:$0xff] }
 0x3e8   :  { %5910 = vrcp.f32 %v1435_v40  ;;  %v7892_v40 = vld [vmem:[#allocation27_spill] sm:$0xff] }
 0x3f0   :  { %v5907_v18 = vpop.eup %5906 }
 0x3f1   :  { %v5909_v27 = vpop.eup %5908  ;;  %v1439_v55 = vmul.f32 %v5907_v18, %v5905_v58  ;;  %v7888_v58 = vld [vmem:[#allocation22_spill] sm:$0xff]  ;;  %v7889_v18 = vld [vmem:[#allocation29_spill] sm:$0xff] }
 0x3f2   :  { %v1438_v1 = vmul.f32 %v5909_v27, %v6758_v57  ;;  %v5911_v12 = vpop.eup %5910  ;;  %v7883_v57 = vld [vmem:[#allocation85_spill] sm:$0xff]  ;;  %v7890_v27 = vld [vmem:[#allocation24_spill] sm:$0xff] }
 0x3f4   :  { %v6880_v15 = vadd.f32 %v1439_v55, %v1438_v1  ;;  %v7891_v55 = vld [vmem:[#allocation30_spill] sm:$0xff]  ;;  %v7893_v1 = vld [vmem:[#allocation33_spill] sm:$0xff] }
 0x3f6   :  { %5912 = vtanh.f32 %v6880_v15 }
 0x3f7   :  { %5914 = vpow2.f32 %v4226_v11  ;;  %v7897_v11 = vld [vmem:[#allocation37_spill] sm:$0xff] }
 0x3f8   :  { %5916 = vtanh.f32 %v6877_v10 }
 0x400   :  { %v5913_v7 = vpop.eup %5912 }
 0x401   :  { %v6884_v30 = vmul.f32 %v5913_v7, %v5911_v12  ;;  %v5915_v46 = vpop.eup %5914  ;;  %v7895_v12 = vld [vmem:[#allocation34_spill] sm:$0xff]  ;;  %v7896_v7 = vld [vmem:[#allocation31_spill] sm:$0xff] }
 0x402   :  { %v1260_v2 = vadd.f32 1.0, %v5915_v46  ;;  %v5917_v32 = vpop.eup %5916  ;;  %v7898_v46 = vld [vmem:[#allocation32_spill] sm:$0xff] }
 0x403   :  { %1508 = vmatmul.mubr.f32.vlgmr.msra.gmra.mrb[10].mxu0 %v6884_v30  ;;  %1579 = vmatmul.mubr.f32.vlgmr.msra.gmra.mrb[10].mxu1 %v6884_v30 }
 0x404   :  { %4778 = vmatpush1.bf16.msra.mxu0 %v7825_v13  ;;  %4810 = vmatpush1.bf16.msra.mxu1 %v7826_v49  ;;  %5918 = vrcp.f32 %v1260_v2  ;;  %v7899_v2 = vld [vmem:[#allocation38_spill] sm:$0xff] }
 0x405   :  { %4780 = vmatprep.subr.bf16.mxu0 %v7827_v60  ;;  %4812 = vmatprep.subr.bf16.mxu1 %v7828_v56 }
 0x406   :  { %1649 = vmatprep.mubr.f32.mxu0 %v7783_v34  ;;  %1720 = vmatprep.mubr.f32.mxu1 %v7783_v34 }
 0x408   :  { %4782 = vmatpush1.bf16.msra.mxu0 %v7829_v63  ;;  %4814 = vmatpush1.bf16.msra.mxu1 %v7830_v59 }
 0x409   :  { %4784 = vmatprep.subr.bf16.mxu0 %v7831_v28  ;;  %4816 = vmatprep.subr.bf16.mxu1 %v7883_v57 }
 0x40c   :  { %4786 = vmatpush1.bf16.msra.mxu0 %v7884_v36  ;;  %4818 = vmatpush1.bf16.msra.mxu1 %v7834_v53 }
 0x40d   :  { %4788 = vmatprep.subr.bf16.mxu0 %v7835_v47  ;;  %4820 = vmatprep.subr.bf16.mxu1 %v7836_v44 }
 0x40e   :  { %v5919_v21 = vpop.eup %5918 }
 0x40f   :  { %v1267_v24 = vmul.f32 %v5919_v21, %v5917_v32  ;;  %v7900_v32 = vld [vmem:[#allocation35_spill] sm:$0xff]  ;;  %v7901_v21 = vld [vmem:[#allocation40_spill] sm:$0xff] }
 0x410   :  { %4790 = vmatpush1.bf16.msra.mxu0 %v7837_v54  ;;  %4822 = vmatpush1.bf16.msra.mxu1 %v7838_v39 }
 0x411   :  { %4792 = vmatprep.subr.bf16.mxu0 %v7839_v20  ;;  %4824 = vmatprep.subr.bf16.mxu1 %v7840_v41 }
 0x414   :  { %4794 = vmatpush1.bf16.msra.mxu0 %v7841_v61  ;;  %4826 = vmatpush1.bf16.msra.mxu1 %v7842_v5 }
 0x415   :  { %4796 = vmatprep.subr.bf16.mxu0 %v7885_v62  ;;  %4828 = vmatprep.subr.bf16.mxu1 %v6636_v6 }
 0x418   :  { %4798 = vmatpush1.bf16.msra.mxu0 %v6640_v23  ;;  %4830 = vmatpush1.bf16.msra.mxu1 %v6642_v0 }
 0x419   :  { %4800 = vmatprep.subr.bf16.mxu0 %v6646_v35  ;;  %4832 = vmatprep.subr.bf16.mxu1 %v6648_v51 }
 0x41c   :  { %4802 = vmatpush1.bf16.msra.mxu0 %v6652_v50  ;;  %4834 = vmatpush1.bf16.msra.mxu1 %v6654_v16 }
 0x41d   :  { %4804 = vmatprep.subr.bf16.mxu0 %v6658_v3  ;;  %4836 = vmatprep.subr.bf16.mxu1 %v6660_v29 }
 0x420   :  { %4806 = vmatpush1.bf16.msra.mxu0 %v6664_v43  ;;  %4838 = vmatpush1.bf16.msra.mxu1 %v6666_v38 }
 0x421   :  { %4840 = vmatprep.subr.bf16.mxu0 %v6371_v4  ;;  %4872 = vmatprep.subr.bf16.mxu1 %v6384_v22 }
 0x423   :  { %1650 = vmatmul.mubr.f32.vlgmr.msra.gmra.mrb[10].mxu0 %v1267_v24  ;;  %1721 = vmatmul.mubr.f32.vlgmr.msra.gmra.mrb[10].mxu1 %v1267_v24  ;;  %v7902_v24 = vld [vmem:[#allocation36_spill] sm:$0xff] }
 0x424   :  { %4842 = vmatpush1.bf16.msra.mxu0 %v6373_v8  ;;  %4874 = vmatpush1.bf16.msra.mxu1 %v6386_v25 }
 0x425   :  { %4844 = vmatprep.subr.bf16.mxu0 %v6375_v9  ;;  %4876 = vmatprep.subr.bf16.mxu1 %v6396_v33 }
 0x426   :  { %1824 = vmatprep.mubr.f32.mxu0 %v7783_v34  ;;  %1895 = vmatprep.mubr.f32.mxu1 %v7783_v34 }
 0x428   :  { %4846 = vmatpush1.bf16.msra.mxu0 %v6379_v14  ;;  %4878 = vmatpush1.bf16.msra.mxu1 %v6398_v37 }
 0x429   :  { %4848 = vmatprep.subr.bf16.mxu0 %v6382_v17  ;;  %4880 = vmatprep.subr.bf16.mxu1 %v6404_v45 }
 0x42c   :  { %4850 = vmatpush1.bf16.msra.mxu0 %v6389_v26  ;;  %4882 = vmatpush1.bf16.msra.mxu1 %v6410_v48  ;;  %v1758_v26 = vld [vmem:[#allocation6 + $0x70] sm:$0xff] }
 0x42d   :  { %4852 = vmatprep.subr.bf16.mxu0 %v7886_v42  ;;  %4884 = vmatprep.subr.bf16.mxu1 %v7887_v31 }
 0x430   :  { %4854 = vmatpush1.bf16.msra.mxu0 %v7888_v58  ;;  %4886 = vmatpush1.bf16.msra.mxu1 %v7889_v18 }
 0x431   :  { %4856 = vmatprep.subr.bf16.mxu0 %v7890_v27  ;;  %4888 = vmatprep.subr.bf16.mxu1 %v7891_v55  ;;  %v7941_v27 = vld [vmem:[#allocation98_spill] sm:$0xff] }
 0x434   :  { %4858 = vmatpush1.bf16.msra.mxu0 %v7892_v40  ;;  %4890 = vmatpush1.bf16.msra.mxu1 %v7893_v1  ;;  %v7903_v40 = vld [vmem:[#allocation41_spill] sm:$0xff]  ;;  %v7904_v1 = vld [vmem:[#allocation39_spill] sm:$0xff] }
 0x435   :  { %4860 = vmatprep.subr.bf16.mxu0 %v7894_v52  ;;  %4892 = vmatprep.subr.bf16.mxu1 %v7895_v12  ;;  %v7905_v52 = vld [vmem:[#allocation42_spill] sm:$0xff]  ;;  %v7906_v12 = vld [vmem:[#allocation43_spill] sm:$0xff] }
 0x438   :  { %4862 = vmatpush1.bf16.msra.mxu0 %v7896_v7  ;;  %4894 = vmatpush1.bf16.msra.mxu1 %v7897_v11  ;;  %v7907_v7 = vld [vmem:[#allocation44_spill] sm:$0xff]  ;;  %v7940_v11 = vld [vmem:[#allocation97_spill] sm:$0xff] }
 0x439   :  { %4864 = vmatprep.subr.bf16.mxu0 %v7898_v46  ;;  %4896 = vmatprep.subr.bf16.mxu1 %v7899_v2  ;;  %v7908_v2 = vld [vmem:[#allocation45_spill] sm:$0xff]  ;;  %v7922_v46 = vld [vmem:[#allocation59_spill] sm:$0xff] }
 0x43c   :  { %4866 = vmatpush1.bf16.msra.mxu0 %v7900_v32  ;;  %4898 = vmatpush1.bf16.msra.mxu1 %v7901_v21  ;;  %v7909_v32 = vld [vmem:[#allocation46_spill] sm:$0xff]  ;;  %v7910_v21 = vld [vmem:[#allocation47_spill] sm:$0xff] }
 0x43d   :  { %4868 = vmatprep.subr.bf16.mxu0 %v7902_v24  ;;  %4900 = vmatprep.subr.bf16.mxu1 %v7903_v40  ;;  %v7911_v24 = vld [vmem:[#allocation48_spill] sm:$0xff]  ;;  %v7921_v40 = vld [vmem:[#allocation58_spill] sm:$0xff] }
 0x440   :  { %4870 = vmatpush1.bf16.msra.mxu0 %v7904_v1  ;;  %4902 = vmatpush1.bf16.msra.mxu1 %v7905_v52  ;;  %v7912_v52 = vld [vmem:[#allocation49_spill] sm:$0xff]  ;;  %v7915_v1 = vld [vmem:[#allocation52_spill] sm:$0xff] }
 0x441   :  { %4904 = vmatprep.subr.bf16.mxu0 %v7906_v12  ;;  %4936 = vmatprep.subr.bf16.mxu1 %v7907_v7  ;;  %v7913_v12 = vld [vmem:[#allocation50_spill] sm:$0xff]  ;;  %v7914_v7 = vld [vmem:[#allocation51_spill] sm:$0xff] }
 0x443   :  { %1825 = vmatmul.mubr.f32.vlgmr.msra.gmra.mrb[12].mxu0 %v6884_v30  ;;  %1896 = vmatmul.mubr.f32.vlgmr.msra.gmra.mrb[12].mxu1 %v6884_v30  ;;  %v7916_v30 = vld [vmem:[#allocation53_spill] sm:$0xff] }
 0x444   :  { %4906 = vmatpush1.bf16.msra.mxu0 %v7908_v2  ;;  %4938 = vmatpush1.bf16.msra.mxu1 %v7909_v32  ;;  %v7917_v2 = vld [vmem:[#allocation54_spill] sm:$0xff]  ;;  %v7918_v32 = vld [vmem:[#allocation55_spill] sm:$0xff] }
 0x445   :  { %4908 = vmatprep.subr.bf16.mxu0 %v7910_v21  ;;  %4940 = vmatprep.subr.bf16.mxu1 %v7911_v24  ;;  %v7919_v21 = vld [vmem:[#allocation56_spill] sm:$0xff]  ;;  %v7920_v24 = vld [vmem:[#allocation57_spill] sm:$0xff] }
 0x446   :  { %1994 = vmatprep.mubr.f32.mxu0 %v7783_v34  ;;  %2065 = vmatprep.mubr.f32.mxu1 %v7783_v34 }
 0x448   :  { %4910 = vmatpush1.bf16.msra.mxu0 %v7912_v52  ;;  %4942 = vmatpush1.bf16.msra.mxu1 %v7913_v12  ;;  %v7923_v52 = vld [vmem:[#allocation60_spill] sm:$0xff]  ;;  %v7924_v12 = vld [vmem:[#allocation61_spill] sm:$0xff] }
 0x449   :  { %4912 = vmatprep.subr.bf16.mxu0 %v7914_v7  ;;  %4944 = vmatprep.subr.bf16.mxu1 %v7915_v1  ;;  %v7925_v7 = vld [vmem:[#allocation62_spill] sm:$0xff]  ;;  %v7926_v1 = vld [vmem:[#allocation63_spill] sm:$0xff] }
 0x44c   :  { %4914 = vmatpush1.bf16.msra.mxu0 %v7916_v30  ;;  %4946 = vmatpush1.bf16.msra.mxu1 %v7917_v2  ;;  %v7927_v30 = vld [vmem:[#allocation64_spill] sm:$0xff]  ;;  %v7928_v2 = vld [vmem:[#allocation65_spill] sm:$0xff] }
 0x44d   :  { %4916 = vmatprep.subr.bf16.mxu0 %v7918_v32  ;;  %4948 = vmatprep.subr.bf16.mxu1 %v7919_v21  ;;  %v7929_v32 = vld [vmem:[#allocation66_spill] sm:$0xff]  ;;  %v7930_v21 = vld [vmem:[#allocation67_spill] sm:$0xff] }
 0x450   :  { %4918 = vmatpush1.bf16.msra.mxu0 %v7920_v24  ;;  %4950 = vmatpush1.bf16.msra.mxu1 %v7921_v40  ;;  %v7931_v24 = vld [vmem:[#allocation68_spill] sm:$0xff]  ;;  %v7932_v40 = vld [vmem:[#allocation69_spill] sm:$0xff] }
 0x451   :  { %4920 = vmatprep.subr.bf16.mxu0 %v7922_v46  ;;  %4952 = vmatprep.subr.bf16.mxu1 %v7923_v52  ;;  %v7933_v46 = vld [vmem:[#allocation70_spill] sm:$0xff]  ;;  %v7934_v52 = vld [vmem:[#allocation71_spill] sm:$0xff] }
 0x454   :  { %4922 = vmatpush1.bf16.msra.mxu0 %v7924_v12  ;;  %4954 = vmatpush1.bf16.msra.mxu1 %v7925_v7  ;;  %v7935_v12 = vld [vmem:[#allocation72_spill] sm:$0xff]  ;;  %v7936_v7 = vld [vmem:[#allocation73_spill] sm:$0xff] }
 0x455   :  { %4924 = vmatprep.subr.bf16.mxu0 %v7926_v1  ;;  %4956 = vmatprep.subr.bf16.mxu1 %v7927_v30  ;;  %v7937_v1 = vld [vmem:[#allocation74_spill] sm:$0xff]  ;;  %v7938_v30 = vld [vmem:[#allocation75_spill] sm:$0xff] }
 0x458   :  { %4926 = vmatpush1.bf16.msra.mxu0 %v7928_v2  ;;  %4958 = vmatpush1.bf16.msra.mxu1 %v7929_v32  ;;  %v7939_v2 = vld [vmem:[#allocation76_spill] sm:$0xff] }
 0x459   :  { %4928 = vmatprep.subr.bf16.mxu0 %v7930_v21  ;;  %4960 = vmatprep.subr.bf16.mxu1 %v7931_v24 }
 0x45c   :  { %4930 = vmatpush1.bf16.msra.mxu0 %v7932_v40  ;;  %4962 = vmatpush1.bf16.msra.mxu1 %v7933_v46 }
 0x45d   :  { %4932 = vmatprep.subr.bf16.mxu0 %v7934_v52  ;;  %4964 = vmatprep.subr.bf16.mxu1 %v7935_v12  ;;  %v7942_v12 = vld [vmem:[#allocation99_spill] sm:$0xff] }
 0x460   :  { %4934 = vmatpush1.bf16.msra.mxu0 %v7936_v7  ;;  %4966 = vmatpush1.bf16.msra.mxu1 %v7937_v1 }
 0x461   :  { %4968 = vmatprep.subr.bf16.mxu0 %v7938_v30  ;;  %5000 = vmatprep.subr.bf16.mxu1 %v7939_v2 }
 0x4f6   :  { %v1651_v32 = vpop.f32.mrb[10].mxu0  ;;  %v1722_v21 = vpop.f32.mrb[10].mxu1 }
 0x4f7   :  { %v1727_v24 = vadd.f32 %v1651_v32, %v7940_v11  ;;  %v1653_v55 = vpop.f32.mrb[11].mxu0  ;;  %v1724_v40 = vpop.f32.mrb[11].mxu1  ;;  %v1729_v7 = vadd.f32 %v1722_v21, %v7942_v12 }
 0x4f8   :  { %v1728_v46 = vadd.f32 %v1653_v55, %v7941_v27  ;;  %v1756_v27 = vld [vmem:[#allocation6 + $0x60] sm:$0xff]  ;;  %v1757_v55 = vld [vmem:[#allocation6 + $0x68] sm:$0xff] }
 0x4f9   :  { %v4230_v18 = vmul.f32 -1.442695, %v1727_v24 }
 0x4fa   :  { %v4231_v52 = vmul.f32 -1.442695, %v1728_v46 }
 0x4fb   :  { %5920 = vpow2.f32 %v4230_v18 }
 0x4fc   :  { %5922 = vpow2.f32 %v4231_v52 }
 0x4fd   :  { %5924 = vtanh.f32 %v1729_v7 }
 0x505   :  { %v5921_v58 = vpop.eup %5920 }
 0x506   :  { %v5923_v1 = vpop.eup %5922  ;;  %v1734_v31 = vadd.f32 1.0, %v5921_v58 }
 0x507   :  { %v1740_v30 = vadd.f32 1.0, %v5923_v1  ;;  %v5925_v2 = vpop.eup %5924 }
 0x508   :  { %5926 = vrcp.f32 %v1734_v31  ;;  %v1759_v31 = vld [vmem:[#allocation6 + $0x78] sm:$0xff] }
 0x509   :  { %5928 = vrcp.f32 %v1740_v30 }
 0x512   :  { %v5927_v42 = vpop.eup %5926 }
 0x513   :  { %v5929_v11 = vpop.eup %5928  ;;  %v1751_v32 = vmul.f32 %v5927_v42, %v5925_v2 }
 0x514   :  { %v1750_v48 = vmul.f32 %v5929_v11, %v6877_v10 }
 0x516   :  { %v6997_v46 = vadd.f32 %v1751_v32, %v1750_v48  ;;  %v1826_v18 = vpop.f32.mrb[12].mxu0  ;;  %v1897_v52 = vpop.f32.mrb[12].mxu1 }
 0x517   :  { %v1902_v12 = vadd.f32 %v1826_v18, %v1756_v27  ;;  %v1828_v21 = vpop.f32.mrb[13].mxu0  ;;  %v1899_v24 = vpop.f32.mrb[13].mxu1  ;;  %v1904_v2 = vadd.f32 %v1897_v52, %v1758_v26  ;;  %v1730_v26 = vadd.f32 %v1724_v40, %v6761_v19 }
 0x518   :  { %v1903_v58 = vadd.f32 %v1828_v21, %v1757_v55  ;;  %v1905_v30 = vadd.f32 %v1899_v24, %v1759_v31 }
 0x519   :  { %v4233_v7 = vmul.f32 -1.442695, %v1902_v12 }
 0x51a   :  { %v4234_v1 = vmul.f32 -1.442695, %v1903_v58  ;;  %v4235_v42 = vmul.f32 -1.442695, %v1905_v30 }
 0x51b   :  { %5930 = vpow2.f32 %v4233_v7 }
 0x51c   :  { %5932 = vpow2.f32 %v4234_v1  ;;  %v4232_v1 = vmul.f32 -1.442695, %v1730_v26  ;;  %v7955_v26 = vld [vmem:[#allocation34_spill] sm:$0xff] }
 0x51d   :  { %5934 = vpow2.f32 %v4235_v42  ;;  %v7943_v42 = vld [vmem:[#allocation23_spill] sm:$0xff] }
 0x51e   :  { %5936 = vtanh.f32 %v1904_v2  ;;  %v7944_v2 = vld [vmem:[#allocation20_spill] sm:$0xff] }
 0x525   :  { %v5931_v10 = vpop.eup %5930 }
 0x526   :  { %v5933_v11 = vpop.eup %5932  ;;  %v1909_v45 = vadd.f32 1.0, %v5931_v10  ;;  %v7945_v10 = vld [vmem:[#allocation25_spill] sm:$0xff] }
 0x527   :  { %v1915_v48 = vadd.f32 1.0, %v5933_v11  ;;  %v5935_v32 = vpop.eup %5934  ;;  %v7946_v11 = vld [vmem:[#allocation21_spill] sm:$0xff] }
 0x528   :  { %5938 = vrcp.f32 %v1909_v45  ;;  %v5937_v27 = vpop.eup %5936  ;;  %v1922_v21 = vadd.f32 1.0, %v5935_v32  ;;  %v7948_v32 = vld [vmem:[#allocation22_spill] sm:$0xff] }
 0x529   :  { %5940 = vrcp.f32 %v1915_v48  ;;  %v7947_v48 = vld [vmem:[#allocation26_spill] sm:$0xff] }
 0x52a   :  { %5942 = vrcp.f32 %v1922_v21  ;;  %v7953_v21 = vld [vmem:[#allocation33_spill] sm:$0xff] }
 0x532   :  { %v5939_v55 = vpop.eup %5938 }
 0x533   :  { %v5941_v18 = vpop.eup %5940  ;;  %v1926_v12 = vmul.f32 %v5939_v55, %v5937_v27  ;;  %v7949_v27 = vld [vmem:[#allocation29_spill] sm:$0xff]  ;;  %v7950_v55 = vld [vmem:[#allocation24_spill] sm:$0xff] }
 0x534   :  { %v1925_v58 = vmul.f32 %v5941_v18, %v6880_v15  ;;  %v5943_v52 = vpop.eup %5942  ;;  %v7951_v18 = vld [vmem:[#allocation30_spill] sm:$0xff] }
 0x536   :  { %v7000_v24 = vadd.f32 %v1926_v12, %v1925_v58  ;;  %v7952_v12 = vld [vmem:[#allocation27_spill] sm:$0xff]  ;;  %v7954_v58 = vld [vmem:[#allocation28_spill] sm:$0xff] }
 0x538   :  { %5944 = vtanh.f32 %v7000_v24 }
 0x539   :  { %5946 = vpow2.f32 %v4232_v1  ;;  %v7958_v1 = vld [vmem:[#allocation32_spill] sm:$0xff] }
 0x53a   :  { %5948 = vtanh.f32 %v6997_v46 }
 0x542   :  { %v5945_v7 = vpop.eup %5944 }
 0x543   :  { %v7004_v45 = vmul.f32 %v5945_v7, %v5943_v52  ;;  %v5947_v19 = vpop.eup %5946  ;;  %v7956_v52 = vld [vmem:[#allocation31_spill] sm:$0xff]  ;;  %v7957_v7 = vld [vmem:[#allocation37_spill] sm:$0xff] }
 0x544   :  { %v1747_v15 = vadd.f32 1.0, %v5947_v19  ;;  %v5949_v40 = vpop.eup %5948  ;;  %v7959_v19 = vld [vmem:[#allocation38_spill] sm:$0xff] }
 0x545   :  { %1995 = vmatmul.mubr.f32.vlgmr.msra.gmra.mrb[14].mxu0 %v7004_v45  ;;  %2066 = vmatmul.mubr.f32.vlgmr.msra.gmra.mrb[14].mxu1 %v7004_v45 }
 0x546   :  { %4970 = vmatpush1.bf16.msra.mxu0 %v7825_v13  ;;  %5002 = vmatpush1.bf16.msra.mxu1 %v7826_v49  ;;  %5950 = vrcp.f32 %v1747_v15  ;;  %v7960_v15 = vld [vmem:[#allocation35_spill] sm:$0xff] }
 0x547   :  { %4972 = vmatprep.subr.bf16.mxu0 %v7827_v60  ;;  %5004 = vmatprep.subr.bf16.mxu1 %v7828_v56 }
 0x548   :  { %2136 = vmatprep.mubr.f32.mxu0 %v7783_v34  ;;  %2207 = vmatprep.mubr.f32.mxu1 %v7783_v34 }
 0x54a   :  { %4974 = vmatpush1.bf16.msra.mxu0 %v7829_v63  ;;  %5006 = vmatpush1.bf16.msra.mxu1 %v7830_v59 }
 0x54b   :  { %4976 = vmatprep.subr.bf16.mxu0 %v7831_v28  ;;  %5008 = vmatprep.subr.bf16.mxu1 %v7883_v57 }
 0x54e   :  { %4978 = vmatpush1.bf16.msra.mxu0 %v7884_v36  ;;  %5010 = vmatpush1.bf16.msra.mxu1 %v7834_v53 }
 0x54f   :  { %4980 = vmatprep.subr.bf16.mxu0 %v7835_v47  ;;  %5012 = vmatprep.subr.bf16.mxu1 %v7836_v44 }
 0x550   :  { %v5951_v31 = vpop.eup %5950 }
 0x551   :  { %v1754_v30 = vmul.f32 %v5951_v31, %v5949_v40  ;;  %v7961_v40 = vld [vmem:[#allocation40_spill] sm:$0xff] }
 0x552   :  { %4982 = vmatpush1.bf16.msra.mxu0 %v7837_v54  ;;  %5014 = vmatpush1.bf16.msra.mxu1 %v7838_v39  ;;  %v7962_v31 = vld [vmem:[#allocation36_spill] sm:$0xff] }
 0x553   :  { %4984 = vmatprep.subr.bf16.mxu0 %v7839_v20  ;;  %5016 = vmatprep.subr.bf16.mxu1 %v7840_v41 }
 0x556   :  { %4986 = vmatpush1.bf16.msra.mxu0 %v7841_v61  ;;  %5018 = vmatpush1.bf16.msra.mxu1 %v7842_v5 }
 0x557   :  { %4988 = vmatprep.subr.bf16.mxu0 %v7885_v62  ;;  %5020 = vmatprep.subr.bf16.mxu1 %v6636_v6 }
 0x55a   :  { %4990 = vmatpush1.bf16.msra.mxu0 %v6640_v23  ;;  %5022 = vmatpush1.bf16.msra.mxu1 %v6642_v0 }
 0x55b   :  { %4992 = vmatprep.subr.bf16.mxu0 %v6646_v35  ;;  %5024 = vmatprep.subr.bf16.mxu1 %v6648_v51 }
 0x55e   :  { %4994 = vmatpush1.bf16.msra.mxu0 %v6652_v50  ;;  %5026 = vmatpush1.bf16.msra.mxu1 %v6654_v16 }
 0x55f   :  { %4996 = vmatprep.subr.bf16.mxu0 %v6658_v3  ;;  %5028 = vmatprep.subr.bf16.mxu1 %v6660_v29 }
 0x562   :  { %4998 = vmatpush1.bf16.msra.mxu0 %v6664_v43  ;;  %5030 = vmatpush1.bf16.msra.mxu1 %v6666_v38 }
 0x563   :  { %5032 = vmatprep.subr.bf16.mxu0 %v6371_v4  ;;  %5064 = vmatprep.subr.bf16.mxu1 %v6384_v22 }
 0x565   :  { %2137 = vmatmul.mubr.f32.vlgmr.msra.gmra.mrb[14].mxu0 %v1754_v30  ;;  %2208 = vmatmul.mubr.f32.vlgmr.msra.gmra.mrb[14].mxu1 %v1754_v30  ;;  %v7963_v30 = vld [vmem:[#allocation41_spill] sm:$0xff] }
 0x566   :  { %5034 = vmatpush1.bf16.msra.mxu0 %v6373_v8  ;;  %5066 = vmatpush1.bf16.msra.mxu1 %v6386_v25 }
 0x567   :  { %5036 = vmatprep.subr.bf16.mxu0 %v6375_v9  ;;  %5068 = vmatprep.subr.bf16.mxu1 %v6396_v33 }
 0x568   :  { %2311 = vmatprep.mubr.f32.mxu0 %v7783_v34  ;;  %2382 = vmatprep.mubr.f32.mxu1 %v7783_v34 }
 0x56a   :  { %5038 = vmatpush1.bf16.msra.mxu0 %v6379_v14  ;;  %5070 = vmatpush1.bf16.msra.mxu1 %v6398_v37 }
 0x56b   :  { %5040 = vmatprep.subr.bf16.mxu0 %v6382_v17  ;;  %5072 = vmatprep.subr.bf16.mxu1 %v7943_v42 }
 0x56e   :  { %5042 = vmatpush1.bf16.msra.mxu0 %v7944_v2  ;;  %5074 = vmatpush1.bf16.msra.mxu1 %v7945_v10  ;;  %v2245_v10 = vld [vmem:[#allocation6 + $0x90] sm:$0xff] }
 0x56f   :  { %5044 = vmatprep.subr.bf16.mxu0 %v7946_v11  ;;  %5076 = vmatprep.subr.bf16.mxu1 %v7947_v48 }
 0x572   :  { %5046 = vmatpush1.bf16.msra.mxu0 %v7948_v32  ;;  %5078 = vmatpush1.bf16.msra.mxu1 %v7949_v27 }
 0x573   :  { %5048 = vmatprep.subr.bf16.mxu0 %v7950_v55  ;;  %5080 = vmatprep.subr.bf16.mxu1 %v7951_v18 }
 0x576   :  { %5050 = vmatpush1.bf16.msra.mxu0 %v7952_v12  ;;  %5082 = vmatpush1.bf16.msra.mxu1 %v7953_v21  ;;  %v7964_v21 = vld [vmem:[#allocation39_spill] sm:$0xff]  ;;  %v7116_v12 = vld [vmem:[#allocation14 + $0x8] sm:$0xff] }
 0x577   :  { %5052 = vmatprep.subr.bf16.mxu0 %v7954_v58  ;;  %5084 = vmatprep.subr.bf16.mxu1 %v7955_v26  ;;  %v7965_v58 = vld [vmem:[#allocation42_spill] sm:$0xff]  ;;  %v7966_v26 = vld [vmem:[#allocation43_spill] sm:$0xff]  ;;  %8001 = vst [vmem:[#allocation78_spill] sm:$0xff] %v7116_v12 }
 0x57a   :  { %5054 = vmatpush1.bf16.msra.mxu0 %v7956_v52  ;;  %5086 = vmatpush1.bf16.msra.mxu1 %v7957_v7  ;;  %v7967_v52 = vld [vmem:[#allocation44_spill] sm:$0xff]  ;;  %v7113_v7 = vld [vmem:[#allocation14] sm:$0xff] }
 0x57b   :  { %5056 = vmatprep.subr.bf16.mxu0 %v7958_v1  ;;  %5088 = vmatprep.subr.bf16.mxu1 %v7959_v19  ;;  %v7968_v19 = vld [vmem:[#allocation45_spill] sm:$0xff]  ;;  %v7982_v1 = vld [vmem:[#allocation59_spill] sm:$0xff]  ;;  %8000 = vst [vmem:[#allocation77_spill] sm:$0xff] %v7113_v7 }
 0x57e   :  { %5058 = vmatpush1.bf16.msra.mxu0 %v7960_v15  ;;  %5090 = vmatpush1.bf16.msra.mxu1 %v7961_v40  ;;  %v7969_v15 = vld [vmem:[#allocation46_spill] sm:$0xff]  ;;  %v7970_v40 = vld [vmem:[#allocation47_spill] sm:$0xff] }
 0x57f   :  { %5060 = vmatprep.subr.bf16.mxu0 %v7962_v31  ;;  %5092 = vmatprep.subr.bf16.mxu1 %v7963_v30  ;;  %v7971_v31 = vld [vmem:[#allocation48_spill] sm:$0xff]  ;;  %v7981_v30 = vld [vmem:[#allocation58_spill] sm:$0xff] }
 0x582   :  { %5062 = vmatpush1.bf16.msra.mxu0 %v7964_v21  ;;  %5094 = vmatpush1.bf16.msra.mxu1 %v7965_v58  ;;  %v7972_v58 = vld [vmem:[#allocation49_spill] sm:$0xff]  ;;  %v7975_v21 = vld [vmem:[#allocation52_spill] sm:$0xff] }
 0x583   :  { %5096 = vmatprep.subr.bf16.mxu0 %v7966_v26  ;;  %5128 = vmatprep.subr.bf16.mxu1 %v7967_v52  ;;  %v7973_v26 = vld [vmem:[#allocation50_spill] sm:$0xff]  ;;  %v7974_v52 = vld [vmem:[#allocation51_spill] sm:$0xff] }
 0x585   :  { %2312 = vmatmul.mubr.f32.vlgmr.msra.gmra.mrb[16].mxu0 %v7004_v45  ;;  %2383 = vmatmul.mubr.f32.vlgmr.msra.gmra.mrb[16].mxu1 %v7004_v45  ;;  %v7976_v45 = vld [vmem:[#allocation53_spill] sm:$0xff] }
 0x586   :  { %5098 = vmatpush1.bf16.msra.mxu0 %v7968_v19  ;;  %5130 = vmatpush1.bf16.msra.mxu1 %v7969_v15  ;;  %v7977_v19 = vld [vmem:[#allocation54_spill] sm:$0xff]  ;;  %v7978_v15 = vld [vmem:[#allocation55_spill] sm:$0xff] }
 0x587   :  { %5100 = vmatprep.subr.bf16.mxu0 %v7970_v40  ;;  %5132 = vmatprep.subr.bf16.mxu1 %v7971_v31  ;;  %v7979_v40 = vld [vmem:[#allocation56_spill] sm:$0xff]  ;;  %v7980_v31 = vld [vmem:[#allocation57_spill] sm:$0xff] }
 0x588   :  { %2481 = vmatprep.mubr.f32.mxu0 %v7783_v34  ;;  %2552 = vmatprep.mubr.f32.mxu1 %v7783_v34 }
 0x58a   :  { %5102 = vmatpush1.bf16.msra.mxu0 %v7972_v58  ;;  %5134 = vmatpush1.bf16.msra.mxu1 %v7973_v26  ;;  %v7983_v58 = vld [vmem:[#allocation60_spill] sm:$0xff]  ;;  %v7984_v26 = vld [vmem:[#allocation61_spill] sm:$0xff] }
 0x58b   :  { %5104 = vmatprep.subr.bf16.mxu0 %v7974_v52  ;;  %5136 = vmatprep.subr.bf16.mxu1 %v7975_v21  ;;  %v7985_v52 = vld [vmem:[#allocation62_spill] sm:$0xff]  ;;  %v7986_v21 = vld [vmem:[#allocation63_spill] sm:$0xff] }
 0x58e   :  { %5106 = vmatpush1.bf16.msra.mxu0 %v7976_v45  ;;  %5138 = vmatpush1.bf16.msra.mxu1 %v7977_v19  ;;  %v7987_v45 = vld [vmem:[#allocation64_spill] sm:$0xff]  ;;  %v7988_v19 = vld [vmem:[#allocation65_spill] sm:$0xff] }
 0x58f   :  { %5108 = vmatprep.subr.bf16.mxu0 %v7978_v15  ;;  %5140 = vmatprep.subr.bf16.mxu1 %v7979_v40  ;;  %v7989_v15 = vld [vmem:[#allocation66_spill] sm:$0xff]  ;;  %v7990_v40 = vld [vmem:[#allocation67_spill] sm:$0xff] }
 0x592   :  { %5110 = vmatpush1.bf16.msra.mxu0 %v7980_v31  ;;  %5142 = vmatpush1.bf16.msra.mxu1 %v7981_v30  ;;  %v7991_v31 = vld [vmem:[#allocation68_spill] sm:$0xff]  ;;  %v7992_v30 = vld [vmem:[#allocation69_spill] sm:$0xff] }
 0x593   :  { %5112 = vmatprep.subr.bf16.mxu0 %v7982_v1  ;;  %5144 = vmatprep.subr.bf16.mxu1 %v7983_v58  ;;  %v7993_v1 = vld [vmem:[#allocation70_spill] sm:$0xff]  ;;  %v7994_v58 = vld [vmem:[#allocation71_spill] sm:$0xff] }
 0x596   :  { %5114 = vmatpush1.bf16.msra.mxu0 %v7984_v26  ;;  %5146 = vmatpush1.bf16.msra.mxu1 %v7985_v52  ;;  %v7995_v26 = vld [vmem:[#allocation72_spill] sm:$0xff]  ;;  %v7996_v52 = vld [vmem:[#allocation73_spill] sm:$0xff] }
 0x597   :  { %5116 = vmatprep.subr.bf16.mxu0 %v7986_v21  ;;  %5148 = vmatprep.subr.bf16.mxu1 %v7987_v45  ;;  %v7997_v21 = vld [vmem:[#allocation74_spill] sm:$0xff]  ;;  %v7998_v45 = vld [vmem:[#allocation75_spill] sm:$0xff] }
 0x59a   :  { %5118 = vmatpush1.bf16.msra.mxu0 %v7988_v19  ;;  %5150 = vmatpush1.bf16.msra.mxu1 %v7989_v15  ;;  %v7999_v19 = vld [vmem:[#allocation76_spill] sm:$0xff] }
 0x59b   :  { %5120 = vmatprep.subr.bf16.mxu0 %v7990_v40  ;;  %5152 = vmatprep.subr.bf16.mxu1 %v7991_v31 }
 0x59e   :  { %5122 = vmatpush1.bf16.msra.mxu0 %v7992_v30  ;;  %5154 = vmatpush1.bf16.msra.mxu1 %v7993_v1 }
 0x59f   :  { %5124 = vmatprep.subr.bf16.mxu0 %v7994_v58  ;;  %5156 = vmatprep.subr.bf16.mxu1 %v7995_v26 }
 0x5a2   :  { %5126 = vmatpush1.bf16.msra.mxu0 %v7996_v52  ;;  %5158 = vmatpush1.bf16.msra.mxu1 %v7997_v21  ;;  %v7119_v21 = vld [vmem:[#allocation14 + $0x10] sm:$0xff] }
 0x5a3   :  { %5160 = vmatprep.subr.bf16.mxu0 %v7998_v45  ;;  %5192 = vmatprep.subr.bf16.mxu1 %v7999_v19  ;;  %8002 = vst [vmem:[#allocation79_spill] sm:$0xff] %v7119_v21 }
 0x638   :  { %v2138_v15 = vpop.f32.mrb[14].mxu0  ;;  %v2209_v40 = vpop.f32.mrb[14].mxu1 }
 0x639   :  { %v2214_v30 = vadd.f32 %v7113_v7, %v2138_v15  ;;  %v2140_v31 = vpop.f32.mrb[15].mxu0  ;;  %v2211_v1 = vpop.f32.mrb[15].mxu1  ;;  %v2216_v19 = vadd.f32 %v7119_v21, %v2209_v40 }
 0x63a   :  { %v2215_v26 = vadd.f32 %v7116_v12, %v2140_v31 }
 0x63b   :  { %v4236_v58 = vmul.f32 -1.442695, %v2214_v30 }
 0x63c   :  { %v4237_v52 = vmul.f32 -1.442695, %v2215_v26  ;;  %v2243_v26 = vld [vmem:[#allocation6 + $0x80] sm:$0xff] }
 0x63d   :  { %5952 = vpow2.f32 %v4236_v58  ;;  %v2244_v58 = vld [vmem:[#allocation6 + $0x88] sm:$0xff] }
 0x63e   :  { %5954 = vpow2.f32 %v4237_v52 }
 0x63f   :  { %5956 = vtanh.f32 %v2216_v19 }
 0x647   :  { %v5953_v45 = vpop.eup %5952 }
 0x648   :  { %v5955_v18 = vpop.eup %5954  ;;  %v2221_v55 = vadd.f32 1.0, %v5953_v45 }
 0x649   :  { %v2227_v27 = vadd.f32 1.0, %v5955_v18  ;;  %v5957_v15 = vpop.eup %5956 }
 0x64a   :  { %5958 = vrcp.f32 %v2221_v55 }
 0x64b   :  { %5960 = vrcp.f32 %v2227_v27  ;;  %v2246_v27 = vld [vmem:[#allocation6 + $0x98] sm:$0xff] }
 0x654   :  { %v5959_v7 = vpop.eup %5958 }
 0x655   :  { %v5961_v32 = vpop.eup %5960  ;;  %v2238_v48 = vmul.f32 %v5959_v7, %v5957_v15 }
 0x656   :  { %v2237_v31 = vmul.f32 %v5961_v32, %v6997_v46 }
 0x658   :  { %v7123_v52 = vadd.f32 %v2238_v48, %v2237_v31  ;;  %v2313_v30 = vpop.f32.mrb[16].mxu0  ;;  %v2384_v12 = vpop.f32.mrb[16].mxu1 }
 0x659   :  { %v2389_v40 = vadd.f32 %v2313_v30, %v2243_v26  ;;  %v2315_v21 = vpop.f32.mrb[17].mxu0  ;;  %v2386_v11 = vpop.f32.mrb[17].mxu1  ;;  %v2391_v15 = vadd.f32 %v2384_v12, %v2245_v10  ;;  %v7129_v10 = vld [vmem:[#allocation14 + $0x18] sm:$0xff] }
 0x65a   :  { %v2390_v45 = vadd.f32 %v2315_v21, %v2244_v58  ;;  %v2392_v55 = vadd.f32 %v2386_v11, %v2246_v27  ;;  %v2217_v12 = vadd.f32 %v7129_v10, %v2211_v1 }
 0x65b   :  { %v4239_v19 = vmul.f32 -1.442695, %v2389_v40 }
 0x65c   :  { %v4240_v18 = vmul.f32 -1.442695, %v2390_v45  ;;  %v4241_v7 = vmul.f32 -1.442695, %v2392_v55 }
 0x65d   :  { %5962 = vpow2.f32 %v4239_v19 }
 0x65e   :  { %5964 = vpow2.f32 %v4240_v18  ;;  %v4238_v18 = vmul.f32 -1.442695, %v2217_v12  ;;  %v8013_v12 = vld [vmem:[#allocation28_spill] sm:$0xff] }
 0x65f   :  { %5966 = vpow2.f32 %v4241_v7 }
 0x660   :  { %5968 = vtanh.f32 %v2391_v15 }
 0x667   :  { %v5963_v46 = vpop.eup %5962 }
 0x668   :  { %v5965_v32 = vpop.eup %5964  ;;  %v2396_v2 = vadd.f32 1.0, %v5963_v46  ;;  %v8003_v46 = vld [vmem:[#allocation20_spill] sm:$0xff] }
 0x669   :  { %v2402_v48 = vadd.f32 1.0, %v5965_v32  ;;  %v5967_v31 = vpop.eup %5966  ;;  %v8004_v32 = vld [vmem:[#allocation25_spill] sm:$0xff] }
 0x66a   :  { %5970 = vrcp.f32 %v2396_v2  ;;  %v5969_v26 = vpop.eup %5968  ;;  %v2409_v40 = vadd.f32 1.0, %v5967_v31  ;;  %v8006_v31 = vld [vmem:[#allocation26_spill] sm:$0xff] }
 0x66b   :  { %5972 = vrcp.f32 %v2402_v48  ;;  %v8005_v48 = vld [vmem:[#allocation21_spill] sm:$0xff] }
 0x66c   :  { %5974 = vrcp.f32 %v2409_v40  ;;  %v8011_v40 = vld [vmem:[#allocation27_spill] sm:$0xff] }
 0x674   :  { %v5971_v21 = vpop.eup %5970 }
 0x675   :  { %v5973_v58 = vpop.eup %5972  ;;  %v2413_v30 = vmul.f32 %v5971_v21, %v5969_v26  ;;  %v8007_v26 = vld [vmem:[#allocation22_spill] sm:$0xff]  ;;  %v8008_v21 = vld [vmem:[#allocation29_spill] sm:$0xff] }
 0x676   :  { %v2412_v45 = vmul.f32 %v5973_v58, %v7000_v24  ;;  %v5975_v19 = vpop.eup %5974  ;;  %v8009_v58 = vld [vmem:[#allocation24_spill] sm:$0xff] }
 0x678   :  { %v7126_v11 = vadd.f32 %v2413_v30, %v2412_v45  ;;  %v8010_v30 = vld [vmem:[#allocation30_spill] sm:$0xff]  ;;  %v8012_v45 = vld [vmem:[#allocation33_spill] sm:$0xff] }
 0x67a   :  { %5976 = vtanh.f32 %v7126_v11 }
 0x67b   :  { %5978 = vpow2.f32 %v4238_v18  ;;  %v8016_v18 = vld [vmem:[#allocation37_spill] sm:$0xff] }
 0x67c   :  { %5980 = vtanh.f32 %v7123_v52 }
 0x684   :  { %v5977_v2 = vpop.eup %5976 }
 0x685   :  { %v7132_v27 = vmul.f32 %v5977_v2, %v5975_v19  ;;  %v5979_v24 = vpop.eup %5978  ;;  %v8014_v19 = vld [vmem:[#allocation34_spill] sm:$0xff]  ;;  %v8015_v2 = vld [vmem:[#allocation31_spill] sm:$0xff] }
 0x686   :  { %v2234_v1 = vadd.f32 1.0, %v5979_v24  ;;  %v5981_v55 = vpop.eup %5980  ;;  %v8017_v24 = vld [vmem:[#allocation32_spill] sm:$0xff] }
 0x687   :  { %2482 = vmatmul.mubr.f32.vlgmr.msra.gmra.mrb[18].mxu0 %v7132_v27  ;;  %2553 = vmatmul.mubr.f32.vlgmr.msra.gmra.mrb[18].mxu1 %v7132_v27 }
 0x688   :  { %5162 = vmatpush1.bf16.msra.mxu0 %v7825_v13  ;;  %5194 = vmatpush1.bf16.msra.mxu1 %v7826_v49  ;;  %5982 = vrcp.f32 %v2234_v1  ;;  %v8018_v1 = vld [vmem:[#allocation38_spill] sm:$0xff] }
 0x689   :  { %5164 = vmatprep.subr.bf16.mxu0 %v7827_v60  ;;  %5196 = vmatprep.subr.bf16.mxu1 %v7828_v56 }
 0x68a   :  { %2623 = vmatprep.mubr.f32.mxu0 %v7783_v34  ;;  %2694 = vmatprep.mubr.f32.mxu1 %v7783_v34 }
 0x68c   :  { %5166 = vmatpush1.bf16.msra.mxu0 %v7829_v63  ;;  %5198 = vmatpush1.bf16.msra.mxu1 %v7830_v59 }
 0x68d   :  { %5168 = vmatprep.subr.bf16.mxu0 %v7831_v28  ;;  %5200 = vmatprep.subr.bf16.mxu1 %v7883_v57 }
 0x690   :  { %5170 = vmatpush1.bf16.msra.mxu0 %v7884_v36  ;;  %5202 = vmatpush1.bf16.msra.mxu1 %v7834_v53 }
 0x691   :  { %5172 = vmatprep.subr.bf16.mxu0 %v7835_v47  ;;  %5204 = vmatprep.subr.bf16.mxu1 %v7836_v44 }
 0x692   :  { %v5983_v7 = vpop.eup %5982 }
 0x693   :  { %v2241_v15 = vmul.f32 %v5983_v7, %v5981_v55  ;;  %v8019_v55 = vld [vmem:[#allocation35_spill] sm:$0xff]  ;;  %v8020_v7 = vld [vmem:[#allocation40_spill] sm:$0xff] }
 0x694   :  { %5174 = vmatpush1.bf16.msra.mxu0 %v7837_v54  ;;  %5206 = vmatpush1.bf16.msra.mxu1 %v7838_v39 }
 0x695   :  { %5176 = vmatprep.subr.bf16.mxu0 %v7839_v20  ;;  %5208 = vmatprep.subr.bf16.mxu1 %v7840_v41 }
 0x698   :  { %5178 = vmatpush1.bf16.msra.mxu0 %v7841_v61  ;;  %5210 = vmatpush1.bf16.msra.mxu1 %v7842_v5 }
 0x699   :  { %5180 = vmatprep.subr.bf16.mxu0 %v7885_v62  ;;  %5212 = vmatprep.subr.bf16.mxu1 %v6636_v6 }
 0x69c   :  { %5182 = vmatpush1.bf16.msra.mxu0 %v6640_v23  ;;  %5214 = vmatpush1.bf16.msra.mxu1 %v6642_v0 }
 0x69d   :  { %5184 = vmatprep.subr.bf16.mxu0 %v6646_v35  ;;  %5216 = vmatprep.subr.bf16.mxu1 %v6648_v51 }
 0x6a0   :  { %5186 = vmatpush1.bf16.msra.mxu0 %v6652_v50  ;;  %5218 = vmatpush1.bf16.msra.mxu1 %v6654_v16 }
 0x6a1   :  { %5188 = vmatprep.subr.bf16.mxu0 %v6658_v3  ;;  %5220 = vmatprep.subr.bf16.mxu1 %v6660_v29 }
 0x6a4   :  { %5190 = vmatpush1.bf16.msra.mxu0 %v6664_v43  ;;  %5222 = vmatpush1.bf16.msra.mxu1 %v6666_v38 }
 0x6a5   :  { %5224 = vmatprep.subr.bf16.mxu0 %v6371_v4  ;;  %5256 = vmatprep.subr.bf16.mxu1 %v6384_v22 }
 0x6a7   :  { %2624 = vmatmul.mubr.f32.vlgmr.msra.gmra.mrb[18].mxu0 %v2241_v15  ;;  %2695 = vmatmul.mubr.f32.vlgmr.msra.gmra.mrb[18].mxu1 %v2241_v15  ;;  %v8021_v15 = vld [vmem:[#allocation36_spill] sm:$0xff] }
 0x6a8   :  { %5226 = vmatpush1.bf16.msra.mxu0 %v6373_v8  ;;  %5258 = vmatpush1.bf16.msra.mxu1 %v6386_v25 }
 0x6a9   :  { %5228 = vmatprep.subr.bf16.mxu0 %v6375_v9  ;;  %5260 = vmatprep.subr.bf16.mxu1 %v6396_v33 }
 0x6aa   :  { %2798 = vmatprep.mubr.f32.mxu0 %v7783_v34  ;;  %2869 = vmatprep.mubr.f32.mxu1 %v7783_v34 }
 0x6ac   :  { %5230 = vmatpush1.bf16.msra.mxu0 %v6379_v14  ;;  %5262 = vmatpush1.bf16.msra.mxu1 %v6398_v37 }
 0x6ad   :  { %5232 = vmatprep.subr.bf16.mxu0 %v6382_v17  ;;  %5264 = vmatprep.subr.bf16.mxu1 %v7943_v42 }
 0x6b0   :  { %5234 = vmatpush1.bf16.msra.mxu0 %v8003_v46  ;;  %5266 = vmatpush1.bf16.msra.mxu1 %v8004_v32  ;;  %v2732_v46 = vld [vmem:[#allocation6 + $0xb0] sm:$0xff] }
 0x6b1   :  { %5236 = vmatprep.subr.bf16.mxu0 %v8005_v48  ;;  %5268 = vmatprep.subr.bf16.mxu1 %v8006_v31 }
 0x6b4   :  { %5238 = vmatpush1.bf16.msra.mxu0 %v8007_v26  ;;  %5270 = vmatpush1.bf16.msra.mxu1 %v8008_v21 }
 0x6b5   :  { %5240 = vmatprep.subr.bf16.mxu0 %v8009_v58  ;;  %5272 = vmatprep.subr.bf16.mxu1 %v8010_v30  ;;  %v8060_v58 = vld [vmem:[#allocation78_spill] sm:$0xff] }
 0x6b8   :  { %5242 = vmatpush1.bf16.msra.mxu0 %v8011_v40  ;;  %5274 = vmatpush1.bf16.msra.mxu1 %v8012_v45  ;;  %v8022_v40 = vld [vmem:[#allocation41_spill] sm:$0xff]  ;;  %v8023_v45 = vld [vmem:[#allocation39_spill] sm:$0xff] }
 0x6b9   :  { %5244 = vmatprep.subr.bf16.mxu0 %v8013_v12  ;;  %5276 = vmatprep.subr.bf16.mxu1 %v8014_v19  ;;  %v8024_v12 = vld [vmem:[#allocation42_spill] sm:$0xff]  ;;  %v8025_v19 = vld [vmem:[#allocation43_spill] sm:$0xff] }
 0x6bc   :  { %5246 = vmatpush1.bf16.msra.mxu0 %v8015_v2  ;;  %5278 = vmatpush1.bf16.msra.mxu1 %v8016_v18  ;;  %v8026_v2 = vld [vmem:[#allocation44_spill] sm:$0xff]  ;;  %v8059_v18 = vld [vmem:[#allocation77_spill] sm:$0xff] }
 0x6bd   :  { %5248 = vmatprep.subr.bf16.mxu0 %v8017_v24  ;;  %5280 = vmatprep.subr.bf16.mxu1 %v8018_v1  ;;  %v8027_v1 = vld [vmem:[#allocation45_spill] sm:$0xff]  ;;  %v8041_v24 = vld [vmem:[#allocation59_spill] sm:$0xff] }
 0x6c0   :  { %5250 = vmatpush1.bf16.msra.mxu0 %v8019_v55  ;;  %5282 = vmatpush1.bf16.msra.mxu1 %v8020_v7  ;;  %v8028_v55 = vld [vmem:[#allocation46_spill] sm:$0xff]  ;;  %v8029_v7 = vld [vmem:[#allocation47_spill] sm:$0xff] }
 0x6c1   :  { %5252 = vmatprep.subr.bf16.mxu0 %v8021_v15  ;;  %5284 = vmatprep.subr.bf16.mxu1 %v8022_v40  ;;  %v8030_v15 = vld [vmem:[#allocation48_spill] sm:$0xff]  ;;  %v8040_v40 = vld [vmem:[#allocation58_spill] sm:$0xff] }
 0x6c4   :  { %5254 = vmatpush1.bf16.msra.mxu0 %v8023_v45  ;;  %5286 = vmatpush1.bf16.msra.mxu1 %v8024_v12  ;;  %v8031_v12 = vld [vmem:[#allocation49_spill] sm:$0xff]  ;;  %v8034_v45 = vld [vmem:[#allocation52_spill] sm:$0xff] }
 0x6c5   :  { %5288 = vmatprep.subr.bf16.mxu0 %v8025_v19  ;;  %5320 = vmatprep.subr.bf16.mxu1 %v8026_v2  ;;  %v8032_v19 = vld [vmem:[#allocation50_spill] sm:$0xff]  ;;  %v8033_v2 = vld [vmem:[#allocation51_spill] sm:$0xff] }
 0x6c7   :  { %2799 = vmatmul.mubr.f32.vlgmr.msra.gmra.mrb[20].mxu0 %v7132_v27  ;;  %2870 = vmatmul.mubr.f32.vlgmr.msra.gmra.mrb[20].mxu1 %v7132_v27  ;;  %v8035_v27 = vld [vmem:[#allocation53_spill] sm:$0xff] }
 0x6c8   :  { %5290 = vmatpush1.bf16.msra.mxu0 %v8027_v1  ;;  %5322 = vmatpush1.bf16.msra.mxu1 %v8028_v55  ;;  %v8036_v1 = vld [vmem:[#allocation54_spill] sm:$0xff]  ;;  %v8037_v55 = vld [vmem:[#allocation55_spill] sm:$0xff] }
 0x6c9   :  { %5292 = vmatprep.subr.bf16.mxu0 %v8029_v7  ;;  %5324 = vmatprep.subr.bf16.mxu1 %v8030_v15  ;;  %v8038_v7 = vld [vmem:[#allocation56_spill] sm:$0xff]  ;;  %v8039_v15 = vld [vmem:[#allocation57_spill] sm:$0xff] }
 0x6ca   :  { %2968 = vmatprep.mubr.f32.mxu0 %v7783_v34  ;;  %3039 = vmatprep.mubr.f32.mxu1 %v7783_v34 }
 0x6cc   :  { %5294 = vmatpush1.bf16.msra.mxu0 %v8031_v12  ;;  %5326 = vmatpush1.bf16.msra.mxu1 %v8032_v19  ;;  %v8042_v12 = vld [vmem:[#allocation60_spill] sm:$0xff]  ;;  %v8043_v19 = vld [vmem:[#allocation61_spill] sm:$0xff] }
 0x6cd   :  { %5296 = vmatprep.subr.bf16.mxu0 %v8033_v2  ;;  %5328 = vmatprep.subr.bf16.mxu1 %v8034_v45  ;;  %v8044_v2 = vld [vmem:[#allocation62_spill] sm:$0xff]  ;;  %v8045_v45 = vld [vmem:[#allocation63_spill] sm:$0xff] }
 0x6d0   :  { %5298 = vmatpush1.bf16.msra.mxu0 %v8035_v27  ;;  %5330 = vmatpush1.bf16.msra.mxu1 %v8036_v1  ;;  %v8046_v27 = vld [vmem:[#allocation64_spill] sm:$0xff]  ;;  %v8047_v1 = vld [vmem:[#allocation65_spill] sm:$0xff] }
 0x6d1   :  { %5300 = vmatprep.subr.bf16.mxu0 %v8037_v55  ;;  %5332 = vmatprep.subr.bf16.mxu1 %v8038_v7  ;;  %v8048_v55 = vld [vmem:[#allocation66_spill] sm:$0xff]  ;;  %v8049_v7 = vld [vmem:[#allocation67_spill] sm:$0xff] }
 0x6d4   :  { %5302 = vmatpush1.bf16.msra.mxu0 %v8039_v15  ;;  %5334 = vmatpush1.bf16.msra.mxu1 %v8040_v40  ;;  %v8050_v15 = vld [vmem:[#allocation68_spill] sm:$0xff]  ;;  %v8051_v40 = vld [vmem:[#allocation69_spill] sm:$0xff] }
 0x6d5   :  { %5304 = vmatprep.subr.bf16.mxu0 %v8041_v24  ;;  %5336 = vmatprep.subr.bf16.mxu1 %v8042_v12  ;;  %v8052_v24 = vld [vmem:[#allocation70_spill] sm:$0xff]  ;;  %v8053_v12 = vld [vmem:[#allocation71_spill] sm:$0xff] }
 0x6d8   :  { %5306 = vmatpush1.bf16.msra.mxu0 %v8043_v19  ;;  %5338 = vmatpush1.bf16.msra.mxu1 %v8044_v2  ;;  %v8054_v19 = vld [vmem:[#allocation72_spill] sm:$0xff]  ;;  %v8055_v2 = vld [vmem:[#allocation73_spill] sm:$0xff] }
 0x6d9   :  { %5308 = vmatprep.subr.bf16.mxu0 %v8045_v45  ;;  %5340 = vmatprep.subr.bf16.mxu1 %v8046_v27  ;;  %v8056_v45 = vld [vmem:[#allocation74_spill] sm:$0xff]  ;;  %v8057_v27 = vld [vmem:[#allocation75_spill] sm:$0xff] }
 0x6dc   :  { %5310 = vmatpush1.bf16.msra.mxu0 %v8047_v1  ;;  %5342 = vmatpush1.bf16.msra.mxu1 %v8048_v55  ;;  %v8058_v1 = vld [vmem:[#allocation76_spill] sm:$0xff] }
 0x6dd   :  { %5312 = vmatprep.subr.bf16.mxu0 %v8049_v7  ;;  %5344 = vmatprep.subr.bf16.mxu1 %v8050_v15 }
 0x6e0   :  { %5314 = vmatpush1.bf16.msra.mxu0 %v8051_v40  ;;  %5346 = vmatpush1.bf16.msra.mxu1 %v8052_v24 }
 0x6e1   :  { %5316 = vmatprep.subr.bf16.mxu0 %v8053_v12  ;;  %5348 = vmatprep.subr.bf16.mxu1 %v8054_v19  ;;  %v8061_v19 = vld [vmem:[#allocation79_spill] sm:$0xff] }
 0x6e4   :  { %5318 = vmatpush1.bf16.msra.mxu0 %v8055_v2  ;;  %5350 = vmatpush1.bf16.msra.mxu1 %v8056_v45 }
 0x6e5   :  { %5352 = vmatprep.subr.bf16.mxu0 %v8057_v27  ;;  %5384 = vmatprep.subr.bf16.mxu1 %v8058_v1 }
 0x77a   :  { %v2625_v55 = vpop.f32.mrb[18].mxu0  ;;  %v2696_v7 = vpop.f32.mrb[18].mxu1 }
 0x77b   :  { %v2701_v15 = vadd.f32 %v8059_v18, %v2625_v55  ;;  %v2627_v30 = vpop.f32.mrb[19].mxu0  ;;  %v2698_v40 = vpop.f32.mrb[19].mxu1  ;;  %v2703_v2 = vadd.f32 %v8061_v19, %v2696_v7 }
 0x77c   :  { %v2702_v24 = vadd.f32 %v8060_v58, %v2627_v30  ;;  %v2730_v30 = vld [vmem:[#allocation6 + $0xa0] sm:$0xff] }
 0x77d   :  { %v4242_v21 = vmul.f32 -1.442695, %v2701_v15  ;;  %v2731_v15 = vld [vmem:[#allocation6 + $0xa8] sm:$0xff] }
 0x77e   :  { %v4243_v12 = vmul.f32 -1.442695, %v2702_v24 }
 0x77f   :  { %5984 = vpow2.f32 %v4242_v21 }
 0x780   :  { %5986 = vpow2.f32 %v4243_v12 }
 0x781   :  { %5988 = vtanh.f32 %v2703_v2 }
 0x789   :  { %v5985_v26 = vpop.eup %5984 }
 0x78a   :  { %v5987_v45 = vpop.eup %5986  ;;  %v2708_v31 = vadd.f32 1.0, %v5985_v26 }
 0x78b   :  { %v2714_v27 = vadd.f32 1.0, %v5987_v45  ;;  %v5989_v1 = vpop.eup %5988 }
 0x78c   :  { %5990 = vrcp.f32 %v2708_v31  ;;  %v2733_v31 = vld [vmem:[#allocation6 + $0xb8] sm:$0xff] }
 0x78d   :  { %5992 = vrcp.f32 %v2714_v27 }
 0x796   :  { %v5991_v48 = vpop.eup %5990 }
 0x797   :  { %v5993_v55 = vpop.eup %5992  ;;  %v2725_v18 = vmul.f32 %v5991_v48, %v5989_v1 }
 0x798   :  { %v2724_v32 = vmul.f32 %v5993_v55, %v7123_v52 }
 0x79a   :  { %v7245_v24 = vadd.f32 %v2725_v18, %v2724_v32  ;;  %v2800_v21 = vpop.f32.mrb[20].mxu0  ;;  %v2871_v12 = vpop.f32.mrb[20].mxu1 }
 0x79b   :  { %v2876_v7 = vadd.f32 %v2800_v21, %v2730_v30  ;;  %v2802_v19 = vpop.f32.mrb[21].mxu0  ;;  %v2873_v58 = vpop.f32.mrb[21].mxu1  ;;  %v2878_v1 = vadd.f32 %v2871_v12, %v2732_v46  ;;  %v2704_v46 = vadd.f32 %v7129_v10, %v2698_v40 }
 0x79c   :  { %v2877_v26 = vadd.f32 %v2802_v19, %v2731_v15  ;;  %v2879_v27 = vadd.f32 %v2873_v58, %v2733_v31 }
 0x79d   :  { %v4245_v2 = vmul.f32 -1.442695, %v2876_v7 }
 0x79e   :  { %v4246_v45 = vmul.f32 -1.442695, %v2877_v26  ;;  %v4247_v48 = vmul.f32 -1.442695, %v2879_v27 }
 0x79f   :  { %5994 = vpow2.f32 %v4245_v2 }
 0x7a0   :  { %5996 = vpow2.f32 %v4246_v45  ;;  %v4244_v45 = vmul.f32 -1.442695, %v2704_v46  ;;  %v8073_v46 = vld [vmem:[#allocation28_spill] sm:$0xff] }
 0x7a1   :  { %5998 = vpow2.f32 %v4247_v48 }
 0x7a2   :  { %6000 = vtanh.f32 %v2878_v1  ;;  %v8062_v1 = vld [vmem:[#allocation23_spill] sm:$0xff] }
 0x7a9   :  { %v5995_v52 = vpop.eup %5994 }
 0x7aa   :  { %v5997_v55 = vpop.eup %5996  ;;  %v2883_v42 = vadd.f32 1.0, %v5995_v52  ;;  %v8063_v52 = vld [vmem:[#allocation20_spill] sm:$0xff] }
 0x7ab   :  { %v2889_v32 = vadd.f32 1.0, %v5997_v55  ;;  %v5999_v18 = vpop.eup %5998  ;;  %v8064_v55 = vld [vmem:[#allocation25_spill] sm:$0xff] }
 0x7ac   :  { %6002 = vrcp.f32 %v2883_v42  ;;  %v6001_v30 = vpop.eup %6000  ;;  %v2896_v7 = vadd.f32 1.0, %v5999_v18  ;;  %v8066_v18 = vld [vmem:[#allocation26_spill] sm:$0xff] }
 0x7ad   :  { %6004 = vrcp.f32 %v2889_v32  ;;  %v8065_v32 = vld [vmem:[#allocation21_spill] sm:$0xff] }
 0x7ae   :  { %6006 = vrcp.f32 %v2896_v7  ;;  %v8071_v7 = vld [vmem:[#allocation27_spill] sm:$0xff] }
 0x7b6   :  { %v6003_v19 = vpop.eup %6002 }
 0x7b7   :  { %v6005_v15 = vpop.eup %6004  ;;  %v2900_v21 = vmul.f32 %v6003_v19, %v6001_v30  ;;  %v8067_v30 = vld [vmem:[#allocation22_spill] sm:$0xff]  ;;  %v8068_v19 = vld [vmem:[#allocation29_spill] sm:$0xff] }
 0x7b8   :  { %v2899_v26 = vmul.f32 %v6005_v15, %v7126_v11  ;;  %v6007_v12 = vpop.eup %6006  ;;  %v8069_v15 = vld [vmem:[#allocation24_spill] sm:$0xff] }
 0x7ba   :  { %v7248_v58 = vadd.f32 %v2900_v21, %v2899_v26  ;;  %v8070_v21 = vld [vmem:[#allocation30_spill] sm:$0xff]  ;;  %v8072_v26 = vld [vmem:[#allocation33_spill] sm:$0xff] }
 0x7bc   :  { %6008 = vtanh.f32 %v7248_v58 }
 0x7bd   :  { %6010 = vpow2.f32 %v4244_v45  ;;  %v8076_v45 = vld [vmem:[#allocation37_spill] sm:$0xff] }
 0x7be   :  { %6012 = vtanh.f32 %v7245_v24 }
 0x7c6   :  { %v6009_v2 = vpop.eup %6008 }
 0x7c7   :  { %v7252_v42 = vmul.f32 %v6009_v2, %v6007_v12  ;;  %v6011_v11 = vpop.eup %6010  ;;  %v8074_v12 = vld [vmem:[#allocation34_spill] sm:$0xff]  ;;  %v8075_v2 = vld [vmem:[#allocation31_spill] sm:$0xff] }
 0x7c8   :  { %v2721_v40 = vadd.f32 1.0, %v6011_v11  ;;  %v6013_v31 = vpop.eup %6012  ;;  %v8077_v11 = vld [vmem:[#allocation32_spill] sm:$0xff] }
 0x7c9   :  { %2969 = vmatmul.mubr.f32.vlgmr.msra.gmra.mrb[22].mxu0 %v7252_v42  ;;  %3040 = vmatmul.mubr.f32.vlgmr.msra.gmra.mrb[22].mxu1 %v7252_v42 }
 0x7ca   :  { %5354 = vmatpush1.bf16.msra.mxu0 %v7825_v13  ;;  %5386 = vmatpush1.bf16.msra.mxu1 %v7826_v49  ;;  %6014 = vrcp.f32 %v2721_v40  ;;  %v8078_v40 = vld [vmem:[#allocation38_spill] sm:$0xff] }
 0x7cb   :  { %5356 = vmatprep.subr.bf16.mxu0 %v7827_v60  ;;  %5388 = vmatprep.subr.bf16.mxu1 %v7828_v56 }
 0x7cc   :  { %3110 = vmatprep.mubr.f32.mxu0 %v7783_v34  ;;  %3181 = vmatprep.mubr.f32.mxu1 %v7783_v34 }
 0x7ce   :  { %5358 = vmatpush1.bf16.msra.mxu0 %v7829_v63  ;;  %5390 = vmatpush1.bf16.msra.mxu1 %v7830_v59 }
 0x7cf   :  { %5360 = vmatprep.subr.bf16.mxu0 %v7831_v28  ;;  %5392 = vmatprep.subr.bf16.mxu1 %v7883_v57 }
 0x7d2   :  { %5362 = vmatpush1.bf16.msra.mxu0 %v7884_v36  ;;  %5394 = vmatpush1.bf16.msra.mxu1 %v7834_v53 }
 0x7d3   :  { %5364 = vmatprep.subr.bf16.mxu0 %v7835_v47  ;;  %5396 = vmatprep.subr.bf16.mxu1 %v7836_v44 }
 0x7d4   :  { %v6015_v27 = vpop.eup %6014 }
 0x7d5   :  { %v2728_v48 = vmul.f32 %v6015_v27, %v6013_v31  ;;  %v8079_v31 = vld [vmem:[#allocation35_spill] sm:$0xff]  ;;  %v8080_v27 = vld [vmem:[#allocation40_spill] sm:$0xff] }
 0x7d6   :  { %5366 = vmatpush1.bf16.msra.mxu0 %v7837_v54  ;;  %5398 = vmatpush1.bf16.msra.mxu1 %v7838_v39 }
 0x7d7   :  { %5368 = vmatprep.subr.bf16.mxu0 %v7839_v20  ;;  %5400 = vmatprep.subr.bf16.mxu1 %v7840_v41 }
 0x7da   :  { %5370 = vmatpush1.bf16.msra.mxu0 %v7841_v61  ;;  %5402 = vmatpush1.bf16.msra.mxu1 %v7842_v5 }
 0x7db   :  { %5372 = vmatprep.subr.bf16.mxu0 %v7885_v62  ;;  %5404 = vmatprep.subr.bf16.mxu1 %v6636_v6 }
 0x7de   :  { %5374 = vmatpush1.bf16.msra.mxu0 %v6640_v23  ;;  %5406 = vmatpush1.bf16.msra.mxu1 %v6642_v0 }
 0x7df   :  { %5376 = vmatprep.subr.bf16.mxu0 %v6646_v35  ;;  %5408 = vmatprep.subr.bf16.mxu1 %v6648_v51 }
 0x7e2   :  { %5378 = vmatpush1.bf16.msra.mxu0 %v6652_v50  ;;  %5410 = vmatpush1.bf16.msra.mxu1 %v6654_v16 }
 0x7e3   :  { %5380 = vmatprep.subr.bf16.mxu0 %v6658_v3  ;;  %5412 = vmatprep.subr.bf16.mxu1 %v6660_v29 }
 0x7e6   :  { %5382 = vmatpush1.bf16.msra.mxu0 %v6664_v43  ;;  %5414 = vmatpush1.bf16.msra.mxu1 %v6666_v38 }
 0x7e7   :  { %5416 = vmatprep.subr.bf16.mxu0 %v6371_v4  ;;  %5448 = vmatprep.subr.bf16.mxu1 %v6384_v22 }
 0x7e9   :  { %3111 = vmatmul.mubr.f32.vlgmr.msra.gmra.mrb[22].mxu0 %v2728_v48  ;;  %3182 = vmatmul.mubr.f32.vlgmr.msra.gmra.mrb[22].mxu1 %v2728_v48  ;;  %v8081_v48 = vld [vmem:[#allocation36_spill] sm:$0xff] }
 0x7ea   :  { %5418 = vmatpush1.bf16.msra.mxu0 %v6373_v8  ;;  %5450 = vmatpush1.bf16.msra.mxu1 %v6386_v25 }
 0x7eb   :  { %5420 = vmatprep.subr.bf16.mxu0 %v6375_v9  ;;  %5452 = vmatprep.subr.bf16.mxu1 %v6396_v33 }
 0x7ec   :  { %3285 = vmatprep.mubr.f32.mxu0 %v7783_v34  ;;  %3356 = vmatprep.mubr.f32.mxu1 %v7783_v34 }
 0x7ee   :  { %5422 = vmatpush1.bf16.msra.mxu0 %v6379_v14  ;;  %5454 = vmatpush1.bf16.msra.mxu1 %v6398_v37 }
 0x7ef   :  { %5424 = vmatprep.subr.bf16.mxu0 %v6382_v17  ;;  %5456 = vmatprep.subr.bf16.mxu1 %v8062_v1 }
 0x7f2   :  { %5426 = vmatpush1.bf16.msra.mxu0 %v8063_v52  ;;  %5458 = vmatpush1.bf16.msra.mxu1 %v8064_v55  ;;  %v3219_v52 = vld [vmem:[#allocation6 + $0xd0] sm:$0xff] }
 0x7f3   :  { %5428 = vmatprep.subr.bf16.mxu0 %v8065_v32  ;;  %5460 = vmatprep.subr.bf16.mxu1 %v8066_v18 }
 0x7f6   :  { %5430 = vmatpush1.bf16.msra.mxu0 %v8067_v30  ;;  %5462 = vmatpush1.bf16.msra.mxu1 %v8068_v19 }
 0x7f7   :  { %5432 = vmatprep.subr.bf16.mxu0 %v8069_v15  ;;  %5464 = vmatprep.subr.bf16.mxu1 %v8070_v21  ;;  %v8120_v15 = vld [vmem:[#allocation78_spill] sm:$0xff] }
 0x7fa   :  { %5434 = vmatpush1.bf16.msra.mxu0 %v8071_v7  ;;  %5466 = vmatpush1.bf16.msra.mxu1 %v8072_v26  ;;  %v8082_v7 = vld [vmem:[#allocation41_spill] sm:$0xff]  ;;  %v8083_v26 = vld [vmem:[#allocation39_spill] sm:$0xff] }
 0x7fb   :  { %5436 = vmatprep.subr.bf16.mxu0 %v8073_v46  ;;  %5468 = vmatprep.subr.bf16.mxu1 %v8074_v12  ;;  %v8084_v46 = vld [vmem:[#allocation42_spill] sm:$0xff]  ;;  %v8085_v12 = vld [vmem:[#allocation43_spill] sm:$0xff] }
 0x7fe   :  { %5438 = vmatpush1.bf16.msra.mxu0 %v8075_v2  ;;  %5470 = vmatpush1.bf16.msra.mxu1 %v8076_v45  ;;  %v8086_v2 = vld [vmem:[#allocation44_spill] sm:$0xff]  ;;  %v8119_v45 = vld [vmem:[#allocation77_spill] sm:$0xff] }
 0x7ff   :  { %5440 = vmatprep.subr.bf16.mxu0 %v8077_v11  ;;  %5472 = vmatprep.subr.bf16.mxu1 %v8078_v40  ;;  %v8087_v40 = vld [vmem:[#allocation45_spill] sm:$0xff]  ;;  %v8101_v11 = vld [vmem:[#allocation59_spill] sm:$0xff] }
 0x802   :  { %5442 = vmatpush1.bf16.msra.mxu0 %v8079_v31  ;;  %5474 = vmatpush1.bf16.msra.mxu1 %v8080_v27  ;;  %v8088_v31 = vld [vmem:[#allocation46_spill] sm:$0xff]  ;;  %v8089_v27 = vld [vmem:[#allocation47_spill] sm:$0xff] }
 0x803   :  { %5444 = vmatprep.subr.bf16.mxu0 %v8081_v48  ;;  %5476 = vmatprep.subr.bf16.mxu1 %v8082_v7  ;;  %v8090_v48 = vld [vmem:[#allocation48_spill] sm:$0xff]  ;;  %v8100_v7 = vld [vmem:[#allocation58_spill] sm:$0xff] }
 0x806   :  { %5446 = vmatpush1.bf16.msra.mxu0 %v8083_v26  ;;  %5478 = vmatpush1.bf16.msra.mxu1 %v8084_v46  ;;  %v8091_v46 = vld [vmem:[#allocation49_spill] sm:$0xff]  ;;  %v8094_v26 = vld [vmem:[#allocation52_spill] sm:$0xff] }
 0x807   :  { %5480 = vmatprep.subr.bf16.mxu0 %v8085_v12  ;;  %5512 = vmatprep.subr.bf16.mxu1 %v8086_v2  ;;  %v8092_v12 = vld [vmem:[#allocation50_spill] sm:$0xff]  ;;  %v8093_v2 = vld [vmem:[#allocation51_spill] sm:$0xff] }
 0x809   :  { %3286 = vmatmul.mubr.f32.vlgmr.msra.gmra.mrb[24].mxu0 %v7252_v42  ;;  %3357 = vmatmul.mubr.f32.vlgmr.msra.gmra.mrb[24].mxu1 %v7252_v42  ;;  %v8095_v42 = vld [vmem:[#allocation53_spill] sm:$0xff] }
 0x80a   :  { %5482 = vmatpush1.bf16.msra.mxu0 %v8087_v40  ;;  %5514 = vmatpush1.bf16.msra.mxu1 %v8088_v31  ;;  %v8096_v40 = vld [vmem:[#allocation54_spill] sm:$0xff]  ;;  %v8097_v31 = vld [vmem:[#allocation55_spill] sm:$0xff] }
 0x80b   :  { %5484 = vmatprep.subr.bf16.mxu0 %v8089_v27  ;;  %5516 = vmatprep.subr.bf16.mxu1 %v8090_v48  ;;  %v8098_v27 = vld [vmem:[#allocation56_spill] sm:$0xff]  ;;  %v8099_v48 = vld [vmem:[#allocation57_spill] sm:$0xff] }
 0x80c   :  { %3455 = vmatprep.mubr.f32.mxu0 %v7783_v34  ;;  %3526 = vmatprep.mubr.f32.mxu1 %v7783_v34 }
 0x80e   :  { %5486 = vmatpush1.bf16.msra.mxu0 %v8091_v46  ;;  %5518 = vmatpush1.bf16.msra.mxu1 %v8092_v12  ;;  %v8102_v46 = vld [vmem:[#allocation60_spill] sm:$0xff]  ;;  %v8103_v12 = vld [vmem:[#allocation61_spill] sm:$0xff] }
 0x80f   :  { %5488 = vmatprep.subr.bf16.mxu0 %v8093_v2  ;;  %5520 = vmatprep.subr.bf16.mxu1 %v8094_v26  ;;  %v8104_v2 = vld [vmem:[#allocation62_spill] sm:$0xff]  ;;  %v8105_v26 = vld [vmem:[#allocation63_spill] sm:$0xff] }
 0x812   :  { %5490 = vmatpush1.bf16.msra.mxu0 %v8095_v42  ;;  %5522 = vmatpush1.bf16.msra.mxu1 %v8096_v40  ;;  %v8106_v42 = vld [vmem:[#allocation64_spill] sm:$0xff]  ;;  %v8107_v40 = vld [vmem:[#allocation65_spill] sm:$0xff] }
 0x813   :  { %5492 = vmatprep.subr.bf16.mxu0 %v8097_v31  ;;  %5524 = vmatprep.subr.bf16.mxu1 %v8098_v27  ;;  %v8108_v31 = vld [vmem:[#allocation66_spill] sm:$0xff]  ;;  %v8109_v27 = vld [vmem:[#allocation67_spill] sm:$0xff] }
 0x816   :  { %5494 = vmatpush1.bf16.msra.mxu0 %v8099_v48  ;;  %5526 = vmatpush1.bf16.msra.mxu1 %v8100_v7  ;;  %v8110_v48 = vld [vmem:[#allocation68_spill] sm:$0xff]  ;;  %v8111_v7 = vld [vmem:[#allocation69_spill] sm:$0xff] }
 0x817   :  { %5496 = vmatprep.subr.bf16.mxu0 %v8101_v11  ;;  %5528 = vmatprep.subr.bf16.mxu1 %v8102_v46  ;;  %v8112_v11 = vld [vmem:[#allocation70_spill] sm:$0xff]  ;;  %v8113_v46 = vld [vmem:[#allocation71_spill] sm:$0xff] }
 0x81a   :  { %5498 = vmatpush1.bf16.msra.mxu0 %v8103_v12  ;;  %5530 = vmatpush1.bf16.msra.mxu1 %v8104_v2  ;;  %v8114_v12 = vld [vmem:[#allocation72_spill] sm:$0xff]  ;;  %v8115_v2 = vld [vmem:[#allocation73_spill] sm:$0xff] }
 0x81b   :  { %5500 = vmatprep.subr.bf16.mxu0 %v8105_v26  ;;  %5532 = vmatprep.subr.bf16.mxu1 %v8106_v42  ;;  %v8116_v26 = vld [vmem:[#allocation74_spill] sm:$0xff]  ;;  %v8117_v42 = vld [vmem:[#allocation75_spill] sm:$0xff] }
 0x81e   :  { %5502 = vmatpush1.bf16.msra.mxu0 %v8107_v40  ;;  %5534 = vmatpush1.bf16.msra.mxu1 %v8108_v31  ;;  %v8118_v40 = vld [vmem:[#allocation76_spill] sm:$0xff] }
 0x81f   :  { %5504 = vmatprep.subr.bf16.mxu0 %v8109_v27  ;;  %5536 = vmatprep.subr.bf16.mxu1 %v8110_v48 }
 0x822   :  { %5506 = vmatpush1.bf16.msra.mxu0 %v8111_v7  ;;  %5538 = vmatpush1.bf16.msra.mxu1 %v8112_v11 }
 0x823   :  { %5508 = vmatprep.subr.bf16.mxu0 %v8113_v46  ;;  %5540 = vmatprep.subr.bf16.mxu1 %v8114_v12  ;;  %v8121_v12 = vld [vmem:[#allocation79_spill] sm:$0xff] }
 0x826   :  { %5510 = vmatpush1.bf16.msra.mxu0 %v8115_v2  ;;  %5542 = vmatpush1.bf16.msra.mxu1 %v8116_v26 }
 0x827   :  { %5544 = vmatprep.subr.bf16.mxu0 %v8117_v42  ;;  %5576 = vmatprep.subr.bf16.mxu1 %v8118_v40 }
 0x8bc   :  { %v3112_v31 = vpop.f32.mrb[22].mxu0  ;;  %v3183_v27 = vpop.f32.mrb[22].mxu1 }
 0x8bd   :  { %v3188_v48 = vadd.f32 %v8119_v45, %v3112_v31  ;;  %v3114_v21 = vpop.f32.mrb[23].mxu0  ;;  %v3185_v7 = vpop.f32.mrb[23].mxu1  ;;  %v3190_v2 = vadd.f32 %v8121_v12, %v3183_v27 }
 0x8be   :  { %v3189_v11 = vadd.f32 %v8120_v15, %v3114_v21  ;;  %v3217_v15 = vld [vmem:[#allocation6 + $0xc0] sm:$0xff]  ;;  %v3218_v21 = vld [vmem:[#allocation6 + $0xc8] sm:$0xff] }
 0x8bf   :  { %v4248_v19 = vmul.f32 -1.442695, %v3188_v48 }
 0x8c0   :  { %v4249_v46 = vmul.f32 -1.442695, %v3189_v11 }
 0x8c1   :  { %6016 = vpow2.f32 %v4248_v19 }
 0x8c2   :  { %6018 = vpow2.f32 %v4249_v46 }
 0x8c3   :  { %6020 = vtanh.f32 %v3190_v2 }
 0x8cb   :  { %v6017_v30 = vpop.eup %6016 }
 0x8cc   :  { %v6019_v26 = vpop.eup %6018  ;;  %v3195_v18 = vadd.f32 1.0, %v6017_v30 }
 0x8cd   :  { %v3201_v42 = vadd.f32 1.0, %v6019_v26  ;;  %v6021_v40 = vpop.eup %6020 }
 0x8ce   :  { %6022 = vrcp.f32 %v3195_v18  ;;  %v3220_v18 = vld [vmem:[#allocation6 + $0xd8] sm:$0xff] }
 0x8cf   :  { %6024 = vrcp.f32 %v3201_v42 }
 0x8d8   :  { %v6023_v32 = vpop.eup %6022 }
 0x8d9   :  { %v6025_v45 = vpop.eup %6024  ;;  %v3212_v31 = vmul.f32 %v6023_v32, %v6021_v40 }
 0x8da   :  { %v3211_v55 = vmul.f32 %v6025_v45, %v7245_v24 }
 0x8dc   :  { %v7365_v11 = vadd.f32 %v3212_v31, %v3211_v55  ;;  %v3287_v19 = vpop.f32.mrb[24].mxu0  ;;  %v3358_v46 = vpop.f32.mrb[24].mxu1 }
 0x8dd   :  { %v3363_v12 = vadd.f32 %v3287_v19, %v3217_v15  ;;  %v3289_v27 = vpop.f32.mrb[25].mxu0  ;;  %v3360_v48 = vpop.f32.mrb[25].mxu1  ;;  %v3365_v40 = vadd.f32 %v3358_v46, %v3219_v52  ;;  %v3191_v52 = vadd.f32 %v7129_v10, %v3185_v7 }
 0x8de   :  { %v3364_v30 = vadd.f32 %v3289_v27, %v3218_v21  ;;  %v3366_v42 = vadd.f32 %v3360_v48, %v3220_v18 }
 0x8df   :  { %v4251_v2 = vmul.f32 -1.442695, %v3363_v12 }
 0x8e0   :  { %v4252_v26 = vmul.f32 -1.442695, %v3364_v30  ;;  %v4253_v32 = vmul.f32 -1.442695, %v3366_v42 }
 0x8e1   :  { %6026 = vpow2.f32 %v4251_v2 }
 0x8e2   :  { %6028 = vpow2.f32 %v4252_v26  ;;  %v4250_v26 = vmul.f32 -1.442695, %v3191_v52  ;;  %v8143_v52 = vld [vmem:[#allocation39_spill] sm:$0xff] }
 0x8e3   :  { %6030 = vpow2.f32 %v4253_v32  ;;  %v8128_v32 = vld [vmem:[#allocation29_spill] sm:$0xff] }
 0x8e4   :  { %6032 = vtanh.f32 %v3365_v40  ;;  %v8129_v40 = vld [vmem:[#allocation24_spill] sm:$0xff] }
 0x8eb   :  { %v6027_v24 = vpop.eup %6026 }
 0x8ec   :  { %v6029_v45 = vpop.eup %6028  ;;  %v3370_v1 = vadd.f32 1.0, %v6027_v24  ;;  %v8133_v24 = vld [vmem:[#allocation28_spill] sm:$0xff] }
 0x8ed   :  { %v3376_v55 = vadd.f32 1.0, %v6029_v45  ;;  %v6031_v31 = vpop.eup %6030  ;;  %v8134_v45 = vld [vmem:[#allocation34_spill] sm:$0xff] }
 0x8ee   :  { %6034 = vrcp.f32 %v3370_v1  ;;  %v6033_v15 = vpop.eup %6032  ;;  %v3383_v27 = vadd.f32 1.0, %v6031_v31  ;;  %v8136_v31 = vld [vmem:[#allocation37_spill] sm:$0xff] }
 0x8ef   :  { %6036 = vrcp.f32 %v3376_v55  ;;  %v8135_v55 = vld [vmem:[#allocation31_spill] sm:$0xff] }
 0x8f0   :  { %6038 = vrcp.f32 %v3383_v27  ;;  %v8141_v27 = vld [vmem:[#allocation36_spill] sm:$0xff] }
 0x8f8   :  { %v6035_v21 = vpop.eup %6034 }
 0x8f9   :  { %v6037_v19 = vpop.eup %6036  ;;  %v3387_v12 = vmul.f32 %v6035_v21, %v6033_v15  ;;  %v8137_v15 = vld [vmem:[#allocation32_spill] sm:$0xff]  ;;  %v8138_v21 = vld [vmem:[#allocation38_spill] sm:$0xff] }
 0x8fa   :  { %v3386_v30 = vmul.f32 %v6037_v19, %v7248_v58  ;;  %v6039_v46 = vpop.eup %6038  ;;  %v8139_v19 = vld [vmem:[#allocation35_spill] sm:$0xff] }
 0x8fc   :  { %v7368_v48 = vadd.f32 %v3387_v12, %v3386_v30  ;;  %v8140_v12 = vld [vmem:[#allocation40_spill] sm:$0xff]  ;;  %v8142_v30 = vld [vmem:[#allocation41_spill] sm:$0xff] }
 0x8fe   :  { %6040 = vtanh.f32 %v7368_v48 }
 0x8ff   :  { %6042 = vpow2.f32 %v4250_v26  ;;  %v8146_v26 = vld [vmem:[#allocation44_spill] sm:$0xff] }
 0x900   :  { %6044 = vtanh.f32 %v7365_v11 }
 0x908   :  { %v6041_v2 = vpop.eup %6040 }
 0x909   :  { %v7372_v1 = vmul.f32 %v6041_v2, %v6039_v46  ;;  %v6043_v10 = vpop.eup %6042  ;;  %v8144_v46 = vld [vmem:[#allocation42_spill] sm:$0xff]  ;;  %v8145_v2 = vld [vmem:[#allocation43_spill] sm:$0xff] }
 0x90a   :  { %v3208_v58 = vadd.f32 1.0, %v6043_v10  ;;  %v6045_v7 = vpop.eup %6044  ;;  %v8147_v10 = vld [vmem:[#allocation45_spill] sm:$0xff] }
 0x90b   :  { %3456 = vmatmul.mubr.f32.vlgmr.msra.gmra.mrb[26].mxu0 %v7372_v1  ;;  %3527 = vmatmul.mubr.f32.vlgmr.msra.gmra.mrb[26].mxu1 %v7372_v1 }
 0x90c   :  { %5546 = vmatpush1.bf16.msra.mxu0 %v7825_v13  ;;  %5578 = vmatpush1.bf16.msra.mxu1 %v7826_v49  ;;  %6046 = vrcp.f32 %v3208_v58  ;;  %v8148_v58 = vld [vmem:[#allocation46_spill] sm:$0xff] }
 0x90d   :  { %5548 = vmatprep.subr.bf16.mxu0 %v7827_v60  ;;  %5580 = vmatprep.subr.bf16.mxu1 %v7828_v56 }
 0x90e   :  { %3597 = vmatprep.mubr.f32.mxu0 %v7783_v34  ;;  %3668 = vmatprep.mubr.f32.mxu1 %v7783_v34 }
 0x910   :  { %5550 = vmatpush1.bf16.msra.mxu0 %v7829_v63  ;;  %5582 = vmatpush1.bf16.msra.mxu1 %v7830_v59 }
 0x911   :  { %5552 = vmatprep.subr.bf16.mxu0 %v7831_v28  ;;  %5584 = vmatprep.subr.bf16.mxu1 %v7883_v57 }
 0x914   :  { %5554 = vmatpush1.bf16.msra.mxu0 %v7884_v36  ;;  %5586 = vmatpush1.bf16.msra.mxu1 %v7834_v53 }
 0x915   :  { %5556 = vmatprep.subr.bf16.mxu0 %v7835_v47  ;;  %5588 = vmatprep.subr.bf16.mxu1 %v7836_v44 }
 0x916   :  { %v6047_v18 = vpop.eup %6046 }
 0x917   :  { %v3215_v42 = vmul.f32 %v6047_v18, %v6045_v7  ;;  %v8149_v7 = vld [vmem:[#allocation47_spill] sm:$0xff]  ;;  %v8150_v18 = vld [vmem:[#allocation48_spill] sm:$0xff] }
 0x918   :  { %5558 = vmatpush1.bf16.msra.mxu0 %v7837_v54  ;;  %5590 = vmatpush1.bf16.msra.mxu1 %v7838_v39 }
 0x919   :  { %5560 = vmatprep.subr.bf16.mxu0 %v7839_v20  ;;  %5592 = vmatprep.subr.bf16.mxu1 %v7840_v41 }
 0x91c   :  { %5562 = vmatpush1.bf16.msra.mxu0 %v7841_v61  ;;  %5594 = vmatpush1.bf16.msra.mxu1 %v7842_v5 }
 0x91d   :  { %5564 = vmatprep.subr.bf16.mxu0 %v7885_v62  ;;  %5596 = vmatprep.subr.bf16.mxu1 %v6636_v6 }
 0x920   :  { %5566 = vmatpush1.bf16.msra.mxu0 %v6640_v23  ;;  %5598 = vmatpush1.bf16.msra.mxu1 %v6642_v0 }
 0x921   :  { %5568 = vmatprep.subr.bf16.mxu0 %v6646_v35  ;;  %5600 = vmatprep.subr.bf16.mxu1 %v6648_v51 }
 0x924   :  { %5570 = vmatpush1.bf16.msra.mxu0 %v6652_v50  ;;  %5602 = vmatpush1.bf16.msra.mxu1 %v6654_v16 }
 0x925   :  { %5572 = vmatprep.subr.bf16.mxu0 %v6658_v3  ;;  %5604 = vmatprep.subr.bf16.mxu1 %v6660_v29 }
 0x928   :  { %5574 = vmatpush1.bf16.msra.mxu0 %v6664_v43  ;;  %5606 = vmatpush1.bf16.msra.mxu1 %v6666_v38 }
 0x929   :  { %5608 = vmatprep.subr.bf16.mxu0 %v6371_v4  ;;  %5640 = vmatprep.subr.bf16.mxu1 %v6384_v22  ;;  %v8122_v4 = vld [vmem:[#allocation23_spill] sm:$0xff]  ;;  %v8123_v22 = vld [vmem:[#allocation20_spill] sm:$0xff] }
 0x92b   :  { %3598 = vmatmul.mubr.f32.vlgmr.msra.gmra.mrb[26].mxu0 %v3215_v42  ;;  %3669 = vmatmul.mubr.f32.vlgmr.msra.gmra.mrb[26].mxu1 %v3215_v42  ;;  %v8151_v42 = vld [vmem:[#allocation49_spill] sm:$0xff] }
 0x92c   :  { %5610 = vmatpush1.bf16.msra.mxu0 %v6373_v8  ;;  %5642 = vmatpush1.bf16.msra.mxu1 %v6386_v25  ;;  %v8124_v8 = vld [vmem:[#allocation25_spill] sm:$0xff] }
 0x92d   :  { %5612 = vmatprep.subr.bf16.mxu0 %v6375_v9  ;;  %5644 = vmatprep.subr.bf16.mxu1 %v6396_v33  ;;  %v8125_v25 = vld [vmem:[#allocation21_spill] sm:$0xff]  ;;  %v8126_v9 = vld [vmem:[#allocation26_spill] sm:$0xff] }
 0x92e   :  { %3772 = vmatprep.mubr.f32.mxu0 %v7783_v34  ;;  %3843 = vmatprep.mubr.f32.mxu1 %v7783_v34  ;;  %v8127_v33 = vld [vmem:[#allocation22_spill] sm:$0xff] }
 0x930   :  { %5614 = vmatpush1.bf16.msra.mxu0 %v6379_v14  ;;  %5646 = vmatpush1.bf16.msra.mxu1 %v6398_v37  ;;  %v8130_v14 = vld [vmem:[#allocation30_spill] sm:$0xff]  ;;  %v8131_v37 = vld [vmem:[#allocation27_spill] sm:$0xff] }
 0x931   :  { %5616 = vmatprep.subr.bf16.mxu0 %v6382_v17  ;;  %5648 = vmatprep.subr.bf16.mxu1 %v8122_v4  ;;  %v8132_v17 = vld [vmem:[#allocation33_spill] sm:$0xff]  ;;  %v8152_v4 = vld [vmem:[#allocation50_spill] sm:$0xff] }
 0x934   :  { %5618 = vmatpush1.bf16.msra.mxu0 %v8123_v22  ;;  %5650 = vmatpush1.bf16.msra.mxu1 %v8124_v8  ;;  %v8153_v22 = vld [vmem:[#allocation51_spill] sm:$0xff]  ;;  %v8154_v8 = vld [vmem:[#allocation52_spill] sm:$0xff] }
 0x935   :  { %5620 = vmatprep.subr.bf16.mxu0 %v8125_v25  ;;  %5652 = vmatprep.subr.bf16.mxu1 %v8126_v9  ;;  %v8156_v25 = vld [vmem:[#allocation54_spill] sm:$0xff]  ;;  %v8157_v9 = vld [vmem:[#allocation55_spill] sm:$0xff] }
 0x938   :  { %5622 = vmatpush1.bf16.msra.mxu0 %v8127_v33  ;;  %5654 = vmatpush1.bf16.msra.mxu1 %v8128_v32  ;;  %v8158_v33 = vld [vmem:[#allocation56_spill] sm:$0xff]  ;;  %v8159_v32 = vld [vmem:[#allocation57_spill] sm:$0xff] }
 0x939   :  { %5624 = vmatprep.subr.bf16.mxu0 %v8129_v40  ;;  %5656 = vmatprep.subr.bf16.mxu1 %v8130_v14  ;;  %v8160_v40 = vld [vmem:[#allocation58_spill] sm:$0xff]  ;;  %v8161_v14 = vld [vmem:[#allocation59_spill] sm:$0xff] }
 0x93c   :  { %5626 = vmatpush1.bf16.msra.mxu0 %v8131_v37  ;;  %5658 = vmatpush1.bf16.msra.mxu1 %v8132_v17  ;;  %v8162_v37 = vld [vmem:[#allocation60_spill] sm:$0xff]  ;;  %v8163_v17 = vld [vmem:[#allocation61_spill] sm:$0xff] }
 0x93d   :  { %5628 = vmatprep.subr.bf16.mxu0 %v8133_v24  ;;  %5660 = vmatprep.subr.bf16.mxu1 %v8134_v45  ;;  %v8164_v24 = vld [vmem:[#allocation62_spill] sm:$0xff]  ;;  %v8165_v45 = vld [vmem:[#allocation63_spill] sm:$0xff] }
 0x940   :  { %5630 = vmatpush1.bf16.msra.mxu0 %v8135_v55  ;;  %5662 = vmatpush1.bf16.msra.mxu1 %v8136_v31  ;;  %v8166_v55 = vld [vmem:[#allocation64_spill] sm:$0xff]  ;;  %v8167_v31 = vld [vmem:[#allocation65_spill] sm:$0xff] }
 0x941   :  { %5632 = vmatprep.subr.bf16.mxu0 %v8137_v15  ;;  %5664 = vmatprep.subr.bf16.mxu1 %v8138_v21  ;;  %v8168_v15 = vld [vmem:[#allocation66_spill] sm:$0xff]  ;;  %v8169_v21 = vld [vmem:[#allocation67_spill] sm:$0xff] }
 0x944   :  { %5634 = vmatpush1.bf16.msra.mxu0 %v8139_v19  ;;  %5666 = vmatpush1.bf16.msra.mxu1 %v8140_v12  ;;  %v8170_v19 = vld [vmem:[#allocation68_spill] sm:$0xff]  ;;  %v8171_v12 = vld [vmem:[#allocation69_spill] sm:$0xff] }
 0x945   :  { %5636 = vmatprep.subr.bf16.mxu0 %v8141_v27  ;;  %5668 = vmatprep.subr.bf16.mxu1 %v8142_v30  ;;  %v8172_v27 = vld [vmem:[#allocation70_spill] sm:$0xff]  ;;  %v8173_v30 = vld [vmem:[#allocation71_spill] sm:$0xff] }
 0x948   :  { %5638 = vmatpush1.bf16.msra.mxu0 %v8143_v52  ;;  %5670 = vmatpush1.bf16.msra.mxu1 %v8144_v46  ;;  %v8174_v52 = vld [vmem:[#allocation72_spill] sm:$0xff]  ;;  %v8175_v46 = vld [vmem:[#allocation73_spill] sm:$0xff] }
 0x949   :  { %5672 = vmatprep.subr.bf16.mxu0 %v8145_v2  ;;  %5704 = vmatprep.subr.bf16.mxu1 %v8146_v26  ;;  %v8176_v2 = vld [vmem:[#allocation74_spill] sm:$0xff]  ;;  %v8177_v26 = vld [vmem:[#allocation75_spill] sm:$0xff] }
 0x94b   :  { %3773 = vmatmul.mubr.f32.vlgmr.msra.gmra.mrb[28].mxu0 %v7372_v1  ;;  %3844 = vmatmul.mubr.f32.vlgmr.msra.gmra.mrb[28].mxu1 %v7372_v1  ;;  %v8155_v1 = vld [vmem:[#allocation53_spill] sm:$0xff] }
 0x94c   :  { %5674 = vmatpush1.bf16.msra.mxu0 %v8147_v10  ;;  %5706 = vmatpush1.bf16.msra.mxu1 %v8148_v58  ;;  %v8178_v10 = vld [vmem:[#allocation76_spill] sm:$0xff] }
 0x94d   :  { %5676 = vmatprep.subr.bf16.mxu0 %v8149_v7  ;;  %5708 = vmatprep.subr.bf16.mxu1 %v8150_v18  ;;  %v7481_v18 = vld [vmem:[#allocation14] sm:$0xff] }
 0x94e   :  { %3942 = vmatprep.mubr.f32.mxu0 %v7783_v34  ;;  %4013 = vmatprep.mubr.f32.mxu1 %v7783_v34 }
 0x950   :  { %5678 = vmatpush1.bf16.msra.mxu0 %v8151_v42  ;;  %5710 = vmatpush1.bf16.msra.mxu1 %v8152_v4 }
 0x951   :  { %5680 = vmatprep.subr.bf16.mxu0 %v8153_v22  ;;  %5712 = vmatprep.subr.bf16.mxu1 %v8154_v8  ;;  %v7484_v8 = vld [vmem:[#allocation14 + $0x8] sm:$0xff] }
 0x954   :  { %5682 = vmatpush1.bf16.msra.mxu0 %v8155_v1  ;;  %5714 = vmatpush1.bf16.msra.mxu1 %v8156_v25 }
 0x955   :  { %5684 = vmatprep.subr.bf16.mxu0 %v8157_v9  ;;  %5716 = vmatprep.subr.bf16.mxu1 %v8158_v33  ;;  %v7487_v33 = vld [vmem:[#allocation14 + $0x10] sm:$0xff] }
 0x958   :  { %5686 = vmatpush1.bf16.msra.mxu0 %v8159_v32  ;;  %5718 = vmatpush1.bf16.msra.mxu1 %v8160_v40 }
 0x959   :  { %5688 = vmatprep.subr.bf16.mxu0 %v8161_v14  ;;  %5720 = vmatprep.subr.bf16.mxu1 %v8162_v37 }
 0x95c   :  { %5690 = vmatpush1.bf16.msra.mxu0 %v8163_v17  ;;  %5722 = vmatpush1.bf16.msra.mxu1 %v8164_v24 }
 0x95d   :  { %5692 = vmatprep.subr.bf16.mxu0 %v8165_v45  ;;  %5724 = vmatprep.subr.bf16.mxu1 %v8166_v55 }
 0x960   :  { %5694 = vmatpush1.bf16.msra.mxu0 %v8167_v31  ;;  %5726 = vmatpush1.bf16.msra.mxu1 %v8168_v15 }
 0x961   :  { %5696 = vmatprep.subr.bf16.mxu0 %v8169_v21  ;;  %5728 = vmatprep.subr.bf16.mxu1 %v8170_v19  ;;  %v3704_v21 = vld [vmem:[#allocation6 + $0xe0] sm:$0xff]  ;;  %v3705_v19 = vld [vmem:[#allocation6 + $0xe8] sm:$0xff] }
 0x964   :  { %5698 = vmatpush1.bf16.msra.mxu0 %v8171_v12  ;;  %5730 = vmatpush1.bf16.msra.mxu1 %v8172_v27 }
 0x965   :  { %5700 = vmatprep.subr.bf16.mxu0 %v8173_v30  ;;  %5732 = vmatprep.subr.bf16.mxu1 %v8174_v52 }
 0x968   :  { %5702 = vmatpush1.bf16.msra.mxu0 %v8175_v46  ;;  %5734 = vmatpush1.bf16.msra.mxu1 %v8176_v2 }
 0x969   :  { %5736 = vmatprep.subr.bf16.mxu0 %v8177_v26  ;;  %5768 = vmatprep.subr.bf16.mxu1 %v8178_v10 }
 0x9fe   :  { %v3599_v58 = vpop.f32.mrb[26].mxu0  ;;  %v3670_v7 = vpop.f32.mrb[26].mxu1 }
 0x9ff   :  { %v3675_v42 = vadd.f32 %v7481_v18, %v3599_v58  ;;  %v3601_v4 = vpop.f32.mrb[27].mxu0  ;;  %v3672_v22 = vpop.f32.mrb[27].mxu1  ;;  %v3677_v32 = vadd.f32 %v7487_v33, %v3670_v7  ;;  %v3707_v7 = vld [vmem:[#allocation6 + $0xf8] sm:$0xff] }
 0xa00   :  { %v3676_v1 = vadd.f32 %v7484_v8, %v3601_v4  ;;  %v3706_v4 = vld [vmem:[#allocation6 + $0xf0] sm:$0xff] }
 0xa01   :  { %v4254_v25 = vmul.f32 -1.442695, %v3675_v42 }
 0xa02   :  { %v4255_v9 = vmul.f32 -1.442695, %v3676_v1 }
 0xa03   :  { %6048 = vpow2.f32 %v4254_v25 }
 0xa04   :  { %6050 = vpow2.f32 %v4255_v9 }
 0xa05   :  { %6052 = vtanh.f32 %v3677_v32 }
 0xa0d   :  { %v6049_v40 = vpop.eup %6048 }
 0xa0e   :  { %v6051_v14 = vpop.eup %6050  ;;  %v3682_v37 = vadd.f32 1.0, %v6049_v40 }
 0xa0f   :  { %v3688_v17 = vadd.f32 1.0, %v6051_v14  ;;  %v6053_v24 = vpop.eup %6052 }
 0xa10   :  { %6054 = vrcp.f32 %v3682_v37 }
 0xa11   :  { %6056 = vrcp.f32 %v3688_v17 }
 0xa1a   :  { %v6055_v45 = vpop.eup %6054 }
 0xa1b   :  { %v6057_v55 = vpop.eup %6056  ;;  %v3699_v31 = vmul.f32 %v6055_v45, %v6053_v24 }
 0xa1c   :  { %v3698_v15 = vmul.f32 %v6057_v55, %v7365_v11 }
 0xa1e   :  { %v7491_v12 = vadd.f32 %v3699_v31, %v3698_v15  ;;  %v3774_v27 = vpop.f32.mrb[28].mxu0  ;;  %v3845_v30 = vpop.f32.mrb[28].mxu1 }
 0xa1f   :  { %v3850_v52 = vadd.f32 %v3774_v27, %v3704_v21  ;;  %v3776_v46 = vpop.f32.mrb[29].mxu0  ;;  %v3847_v2 = vpop.f32.mrb[29].mxu1  ;;  %v3852_v25 = vadd.f32 %v3845_v30, %v3706_v4  ;;  %v6103_v21 = vld [vmem:[#allocation14 + $0x18] sm:$0xff] }
 0xa20   :  { %v3851_v26 = vadd.f32 %v3776_v46, %v3705_v19  ;;  %v3853_v42 = vadd.f32 %v3847_v2, %v3707_v7  ;;  %v3678_v19 = vadd.f32 %v6103_v21, %v3672_v22 }
 0xa21   :  { %v4257_v10 = vmul.f32 -1.442695, %v3850_v52 }
 0xa22   :  { %v4258_v58 = vmul.f32 -1.442695, %v3851_v26  ;;  %v4259_v1 = vmul.f32 -1.442695, %v3853_v42  ;;  %v4256_v52 = vmul.f32 -1.442695, %v3678_v19 }
 0xa23   :  { %6058 = vpow2.f32 %v4257_v10 }
 0xa24   :  { %6060 = vpow2.f32 %v4258_v58 }
 0xa25   :  { %6062 = vpow2.f32 %v4259_v1 }
 0xa26   :  { %6064 = vtanh.f32 %v3852_v25 }
 0xa2d   :  { %v6059_v11 = vpop.eup %6058 }
 0xa2e   :  { %v6061_v9 = vpop.eup %6060  ;;  %v3857_v32 = vadd.f32 1.0, %v6059_v11 }
 0xa2f   :  { %v3863_v40 = vadd.f32 1.0, %v6061_v9  ;;  %v6063_v14 = vpop.eup %6062 }
 0xa30   :  { %6066 = vrcp.f32 %v3857_v32  ;;  %v6065_v37 = vpop.eup %6064  ;;  %v3870_v55 = vadd.f32 1.0, %v6063_v14 }
 0xa31   :  { %6068 = vrcp.f32 %v3863_v40 }
 0xa32   :  { %6070 = vrcp.f32 %v3870_v55 }
 0xa3a   :  { %v6067_v17 = vpop.eup %6066 }
 0xa3b   :  { %v6069_v24 = vpop.eup %6068  ;;  %v3874_v45 = vmul.f32 %v6067_v17, %v6065_v37 }
 0xa3c   :  { %v3873_v31 = vmul.f32 %v6069_v24, %v7368_v48  ;;  %v6071_v27 = vpop.eup %6070 }
 0xa3e   :  { %v3875_v15 = vadd.f32 %v3874_v45, %v3873_v31 }
 0xa40   :  { %6072 = vtanh.f32 %v3875_v15 }
 0xa41   :  { %6074 = vpow2.f32 %v4256_v52 }
 0xa42   :  { %6076 = vtanh.f32 %v7491_v12 }
 0xa4a   :  { %v6073_v30 = vpop.eup %6072 }
 0xa4b   :  { %v3877_v46 = vmul.f32 %v6073_v30, %v6071_v27 }
 0xa4d   :  { %3943 = vmatmul.mubr.f32.vlgmr.msra.gmra.mrb[30].mxu0 %v3877_v46  ;;  %4014 = vmatmul.mubr.f32.vlgmr.msra.gmra.mrb[30].mxu1 %v3877_v46 }
 0xa4e   :  { %5738 = vmatpush1.bf16.msra.mxu0 %v7825_v13  ;;  %5770 = vmatpush1.bf16.msra.mxu1 %v7826_v49  ;;  %v6075_v13 = vpop.eup %6074 }
 0xa4f   :  { %5740 = vmatprep.subr.bf16.mxu0 %v7827_v60  ;;  %5772 = vmatprep.subr.bf16.mxu1 %v7828_v56  ;;  %v6077_v49 = vpop.eup %6076 }
 0xa50   :  { %4084 = vmatprep.mubr.f32.mxu0 %v7783_v34  ;;  %4155 = vmatprep.mubr.f32.mxu1 %v7783_v34  ;;  %v3695_v34 = vadd.f32 1.0, %v6075_v13 }
 0xa52   :  { %5742 = vmatpush1.bf16.msra.mxu0 %v7829_v63  ;;  %5774 = vmatpush1.bf16.msra.mxu1 %v7830_v59  ;;  %6078 = vrcp.f32 %v3695_v34 }
 0xa53   :  { %5744 = vmatprep.subr.bf16.mxu0 %v7831_v28  ;;  %5776 = vmatprep.subr.bf16.mxu1 %v7883_v57 }
 0xa56   :  { %5746 = vmatpush1.bf16.msra.mxu0 %v7884_v36  ;;  %5778 = vmatpush1.bf16.msra.mxu1 %v7834_v53 }
 0xa57   :  { %5748 = vmatprep.subr.bf16.mxu0 %v7835_v47  ;;  %5780 = vmatprep.subr.bf16.mxu1 %v7836_v44 }
 0xa5a   :  { %5750 = vmatpush1.bf16.msra.mxu0 %v7837_v54  ;;  %5782 = vmatpush1.bf16.msra.mxu1 %v7838_v39 }
 0xa5b   :  { %5752 = vmatprep.subr.bf16.mxu0 %v7839_v20  ;;  %5784 = vmatprep.subr.bf16.mxu1 %v7840_v41 }
 0xa5c   :  { %v6079_v60 = vpop.eup %6078 }
 0xa5e   :  { %5754 = vmatpush1.bf16.msra.mxu0 %v7841_v61  ;;  %5786 = vmatpush1.bf16.msra.mxu1 %v7842_v5 }
 0xa5f   :  { %5756 = vmatprep.subr.bf16.mxu0 %v7885_v62  ;;  %5788 = vmatprep.subr.bf16.mxu1 %v6636_v6  ;;  %v3702_v6 = vmul.f32 %v6079_v60, %v6077_v49 }
 0xa62   :  { %5758 = vmatpush1.bf16.msra.mxu0 %v6640_v23  ;;  %5790 = vmatpush1.bf16.msra.mxu1 %v6642_v0 }
 0xa63   :  { %5760 = vmatprep.subr.bf16.mxu0 %v6646_v35  ;;  %5792 = vmatprep.subr.bf16.mxu1 %v6648_v51 }
 0xa66   :  { %5762 = vmatpush1.bf16.msra.mxu0 %v6652_v50  ;;  %5794 = vmatpush1.bf16.msra.mxu1 %v6654_v16 }
 0xa67   :  { %5764 = vmatprep.subr.bf16.mxu0 %v6658_v3  ;;  %5796 = vmatprep.subr.bf16.mxu1 %v6660_v29 }
 0xa6a   :  { %5766 = vmatpush1.bf16.msra.mxu0 %v6664_v43  ;;  %5798 = vmatpush1.bf16.msra.mxu1 %v6666_v38 }
 0xa6d   :  { %4085 = vmatmul.mubr.f32.vlgmr.msra.gmra.mrb[30].mxu0 %v3702_v6  ;;  %4156 = vmatmul.mubr.f32.vlgmr.msra.gmra.mrb[30].mxu1 %v3702_v6 }
 0xb40   :  { %v4086_v23 = vpop.f32.mrb[30].mxu0  ;;  %v4157_v0 = vpop.f32.mrb[30].mxu1 }
 0xb41   :  { %v4162_v35 = vadd.f32 %v7481_v18, %v4086_v23  ;;  %v4088_v51 = vpop.f32.mrb[31].mxu0  ;;  %v4159_v50 = vpop.f32.mrb[31].mxu1  ;;  %v4164_v43 = vadd.f32 %v7487_v33, %v4157_v0 }
 0xb42   :  { %v4163_v16 = vadd.f32 %v7484_v8, %v4088_v51  ;;  %v4165_v29 = vadd.f32 %v6103_v21, %v4159_v50 }
 0xb43   :  { %v4260_v3 = vmul.f32 -1.442695, %v4162_v35 }
 0xb44   :  { %v4261_v56 = vmul.f32 -1.442695, %v4163_v16  ;;  %v4262_v63 = vmul.f32 -1.442695, %v4165_v29 }
 0xb45   :  { %6080 = vpow2.f32 %v4260_v3 }
 0xb46   :  { %6082 = vpow2.f32 %v4261_v56 }
 0xb47   :  { %6084 = vpow2.f32 %v4262_v63 }
 0xb48   :  { %6086 = vtanh.f32 %v4164_v43 }
 0xb4f   :  { %v6081_v38 = vpop.eup %6080 }
 0xb50   :  { %v6083_v59 = vpop.eup %6082  ;;  %v4169_v28 = vadd.f32 1.0, %v6081_v38 }
 0xb51   :  { %v4175_v61 = vadd.f32 1.0, %v6083_v59  ;;  %v6085_v5 = vpop.eup %6084 }
 0xb52   :  { %6088 = vrcp.f32 %v4169_v28  ;;  %v6087_v53 = vpop.eup %6086  ;;  %v4182_v39 = vadd.f32 1.0, %v6085_v5 }
 0xb53   :  { %6090 = vrcp.f32 %v4175_v61 }
 0xb54   :  { %6092 = vrcp.f32 %v4182_v39 }
 0xb5c   :  { %v6089_v47 = vpop.eup %6088 }
 0xb5d   :  { %v6091_v44 = vpop.eup %6090  ;;  %v4186_v54 = vmul.f32 %v6089_v47, %v6087_v53 }
 0xb5e   :  { %v4185_v20 = vmul.f32 %v6091_v44, %v7491_v12  ;;  %v6093_v57 = vpop.eup %6092 }
 0xb60   :  { %v4187_v41 = vadd.f32 %v4186_v54, %v4185_v20 }
 0xb62   :  { %6094 = vtanh.f32 %v4187_v41 }
 0xb6c   :  { %v6095_v36 = vpop.eup %6094 }
 0xb6d   :  { %v4189_v62 = vmul.f32 %v6095_v36, %v6093_v57 }
 0xb6f   :  { %4197 = vst [vmem:[#allocation15] sm:$0xff] %v4189_v62 }
 0xb70   :  { %6225 = shalt.err (!%p6222_p2)
}
 0xb71   :  { %s6226_s3 = scalar_lea.hbm %s7548_s5, 128 }
 0xb72   :  { %p6227_p3 = scmp.ne.s32.totalorder %s7548_s5, %s6226_s3  ;;  %p6230_p4 = scmp.lt.u32.totalorder %s6226_s3, %s7548_s5 }
 0xb74   :  { %p6232_p5 = pnand %p6230_p4, %p6227_p3 }
 0xb76   :  { %6235 = shalt.err (!%p6232_p5)
}
 0xb77   :  { %4207 = dma.vmem_to_hbm [thread:$0]  %s4205_s6, 128, %s7548_s5, [#allocation8]  }
 0xb78   :  { %6242 = dma.done.wait [#allocation8], 128  }
 0xb79   :  { %6243 = vsyncadd [#allocation8], 4294967168 }
 0xb7a   :  { %4211 = vsyncpa [#allocation7], 1 }
 0xb7b   :  { %4212 = vsyncpa [#allocation10], 1 }
 0xb7c   :  { %4213 = vsyncpa [#allocation13], 1 }
 0xb7d   :  { %4214 = vsyncpa [#allocation8], 1 }

// kernel: tpu_custom_call.1
= control target key start
LH: loop header
LB: loop body
LE: loop exit
PB: predicated region body
PF: predicated region fallthrough
CT: control target
= control target key end

     0   :  { %10 = vsyncpa [#allocation7], 0  ;;  %s7543_s0 = inlined_call_operand.hbm [shape: f32[8,8,512], index: 0, kind: input, shape index: {}]   ;;  %s7544_s1 = inlined_call_operand.hbm [shape: f32[128,512], index: 1, kind: input, shape index: {}]   ;;  %s7545_s2 = inlined_call_operand.hbm [shape: f32[128,512], index: 2, kind: input, shape index: {}]   ;;  %s7546_s3 = inlined_call_operand.hbm [shape: f32[128,512], index: 3, kind: input, shape index: {}]   ;;  %s7547_s4 = inlined_call_operand.hbm [shape: f32[8,512], index: 4, kind: input, shape index: {}]   ;;  %s7548_s5 = inlined_call_operand.hbm [shape: f32[8,128], index: 5, kind: output, shape index: {}]  }
   0x1   :  { %11 = vsyncpa [#allocation10], 0 }
   0x2   :  { %12 = vsyncpa [#allocation13], 0 }
   0x3   :  { %13 = vsyncpa [#allocation8], 0  ;;  %s6244_s18 = smov [#allocation9]   ;;  %s6245_s20 = smov [#allocation12]  }
   0x4   :  { %s31_s19 = sshll.u32 %s6244_s18, 4  ;;  %s55_s21 = sshll.u32 %s6245_s20, 4  ;;  %s32_s19 = int_to_ptr.vmem [resolvable:$true] %s31_s19  ;;  %s6283_s21 = int_to_ptr.vmem [resolvable:$true] %s55_s21 }
   0x5   :  { %s6104_s24 = scalar_lea.hbm %s7544_s1, 8192 }
   0x6   :  { %p6105_p0 = scmp.ne.s32.totalorder %s7544_s1, %s6104_s24  ;;  %p6108_p1 = scmp.lt.u32.totalorder %s6104_s24, %s7544_s1 }
   0x8   :  { %p6110_p2 = pnand %p6108_p1, %p6105_p0 }
   0xa   :  { %6113 = shalt.err (!%p6110_p2)
}
   0xb   :  { %s6114_s29 = scalar_lea.vmem %s32_s19, 8192  ;;  %p6119_p4 = scmp.lt.s32.totalorder %s32_s19, %s32_s19 }
   0xc   :  { %p6115_p3 = scmp.ne.s32.totalorder %s32_s19, %s6114_s29  ;;  %p6120_p5 = scmp.lt.s32.totalorder %s6114_s29, %s6114_s29 }
   0xe   :  { %p6121_p6 = por %p6120_p5, %p6119_p4 }
  0x10   :  { %p6122_p7 = pnand %p6121_p6, %p6115_p3 }
  0x12   :  { %6125 = shalt.err (!%p6122_p7)
}
  0x13   :  { %s6246_s30 = smov 512   ;;  %s6247_s6 = smov 32  }
  0x14   :  { %37 = dma.hbm_to_vmem [thread:$0]  %s7544_s1, 8192, %s32_s19, [#allocation10], %s6246_s30, %s6246_s30, %s6247_s6  }
  0x15   :  { %s6126_s11 = scalar_lea.hbm %s7546_s3, 8192 }
  0x16   :  { %p6127_p8 = scmp.ne.s32.totalorder %s7546_s3, %s6126_s11  ;;  %p6130_p9 = scmp.lt.u32.totalorder %s6126_s11, %s7546_s3 }
  0x18   :  { %p6132_p10 = pnand %p6130_p9, %p6127_p8 }
  0x1a   :  { %6135 = shalt.err (!%p6132_p10)
}
  0x1b   :  { %s6136_s16 = scalar_lea.vmem %s6283_s21, 8192  ;;  %p6141_p12 = scmp.lt.s32.totalorder %s6283_s21, %s6283_s21 }
  0x1c   :  { %p6137_p11 = scmp.ne.s32.totalorder %s6283_s21, %s6136_s16  ;;  %p6142_p13 = scmp.lt.s32.totalorder %s6136_s16, %s6136_s16 }
  0x1e   :  { %p6143_p0 = por %p6142_p13, %p6141_p12 }
  0x20   :  { %p6144_p1 = pnand %p6143_p0, %p6137_p11 }
  0x22   :  { %6147 = shalt.err (!%p6144_p1)
}
  0x23   :  { %61 = dma.hbm_to_vmem [thread:$0]  %s7546_s3, 8192, %s6283_s21, [#allocation13], %s6246_s30, %s6246_s30, %s6247_s6  }
  0x24   :  { %s6248_s18 = smov [#allocation6]   ;;  %s6249_s20 = smov [#allocation11]  }
  0x25   :  { %s19_s19 = sshll.u32 %s6248_s18, 4  ;;  %s43_s22 = sshll.u32 %s6249_s20, 4  ;;  %s20_s19 = int_to_ptr.vmem [resolvable:$true] %s19_s19  ;;  %s6320_s22 = int_to_ptr.vmem [resolvable:$true] %s43_s22 }
  0x26   :  { %s6148_s25 = scalar_lea.hbm %s7543_s0, 4096 }
  0x27   :  { %p6149_p2 = scmp.ne.s32.totalorder %s7543_s0, %s6148_s25  ;;  %p6152_p3 = scmp.lt.u32.totalorder %s6148_s25, %s7543_s0 }
  0x29   :  { %p6154_p4 = pnand %p6152_p3, %p6149_p2 }
  0x2b   :  { %6157 = shalt.err (!%p6154_p4)
}
  0x2c   :  { %s6158_s3 = scalar_lea.vmem %s20_s19, 4096  ;;  %p6163_p6 = scmp.lt.s32.totalorder %s20_s19, %s20_s19 }
  0x2d   :  { %p6159_p5 = scmp.ne.s32.totalorder %s20_s19, %s6158_s3  ;;  %p6164_p7 = scmp.lt.s32.totalorder %s6158_s3, %s6158_s3 }
  0x2f   :  { %p6165_p8 = por %p6164_p7, %p6163_p6 }
  0x31   :  { %p6166_p9 = pnand %p6165_p8, %p6159_p5 }
  0x33   :  { %6169 = shalt.err (!%p6166_p9)
}
  0x34   :  { %25 = dma.hbm_to_vmem [thread:$0]  %s7543_s0, 4096, %s20_s19, [#allocation7], %s6246_s30, %s6246_s30, %s6247_s6  }
  0x35   :  { %s6170_s10 = scalar_lea.hbm %s7545_s2, 8192 }
  0x36   :  { %p6171_p10 = scmp.ne.s32.totalorder %s7545_s2, %s6170_s10  ;;  %p6174_p11 = scmp.lt.u32.totalorder %s6170_s10, %s7545_s2 }
  0x38   :  { %p6176_p12 = pnand %p6174_p11, %p6171_p10 }
  0x3a   :  { %6179 = shalt.err (!%p6176_p12)
}
  0x3b   :  { %s6180_s15 = scalar_lea.vmem %s6320_s22, 8192  ;;  %p6185_p0 = scmp.lt.s32.totalorder %s6320_s22, %s6320_s22 }
  0x3c   :  { %p6181_p13 = scmp.ne.s32.totalorder %s6320_s22, %s6180_s15  ;;  %p6186_p1 = scmp.lt.s32.totalorder %s6180_s15, %s6180_s15 }
  0x3e   :  { %p6187_p2 = por %p6186_p1, %p6185_p0 }
  0x40   :  { %p6188_p3 = pnand %p6187_p2, %p6181_p13 }
  0x42   :  { %6191 = shalt.err (!%p6188_p3)
}
  0x43   :  { %49 = dma.hbm_to_vmem [thread:$0]  %s7545_s2, 8192, %s6320_s22, [#allocation10], %s6246_s30, %s6246_s30, %s6247_s6  }
  0x44   :  { %s6250_s1 = smov [#allocation14]   ;;  %s6192_s20 = scalar_lea.hbm %s7547_s4, 512 }
  0x45   :  { %s68_s17 = sshll.u32 %s6250_s1, 4  ;;  %p6193_p4 = scmp.ne.s32.totalorder %s7547_s4, %s6192_s20  ;;  %s69_s17 = int_to_ptr.vmem [resolvable:$true] %s68_s17 }
  0x46   :  { %p6196_p5 = scmp.lt.u32.totalorder %s6192_s20, %s7547_s4 }
  0x48   :  { %p6198_p6 = pnand %p6196_p5, %p6193_p4 }
  0x4a   :  { %6201 = shalt.err (!%p6198_p6)
}
  0x4b   :  { %s6202_s27 = scalar_lea.vmem %s69_s17, 512  ;;  %p6207_p8 = scmp.lt.s32.totalorder %s69_s17, %s69_s17 }
  0x4c   :  { %p6203_p7 = scmp.ne.s32.totalorder %s69_s17, %s6202_s27  ;;  %p6208_p9 = scmp.lt.s32.totalorder %s6202_s27, %s6202_s27 }
  0x4e   :  { %p6209_p10 = por %p6208_p9, %p6207_p8 }
  0x50   :  { %p6210_p11 = pnand %p6209_p10, %p6203_p7 }
  0x52   :  { %6213 = shalt.err (!%p6210_p11)
}
  0x53   :  { %71 = dma.hbm_to_vmem [thread:$0]  %s7547_s4, 512, %s69_s17, [#allocation13]  }
  0x54   :  { %6236 = dma.done.wait [#allocation7], 4096  }
  0x55   :  { %6237 = vsyncadd [#allocation7], 4294963200 }
  0x56   :  { %6238 = dma.done.wait [#allocation10], 16384  }
  0x57   :  { %6239 = vsyncadd [#allocation10], 4294950912 }
  0x58   :  { %6240 = dma.done.wait [#allocation13], 8704  }
  0x59   :  { %6241 = vsyncadd [#allocation13], 4294958592  ;;  %v7549_v0 = vmov 0.0   ;;  %v96_v1 = vld [vmem:[#allocation9 + $0x8] sm:$0xff]  ;;  %v95_v3 = vld [vmem:[#allocation9] sm:$0xff]  ;;  %s6252_s4 = smov [#allocation15]  }
  0x5a   :  { %363 = vmatprep.mubr.f32.mxu0 %v7549_v0  ;;  %434 = vmatprep.mubr.f32.mxu1 %v7549_v0  ;;  %v100_v2 = vld [vmem:[#allocation9 + $0x28] sm:$0xff]  ;;  %v99_v5 = vld [vmem:[#allocation9 + $0x20] sm:$0xff]  ;;  %v98_v19 = vld [vmem:[#allocation9 + $0x18] sm:$0xff]  ;;  %s4204_s6 = sshll.u32 %s6252_s4, 4  ;;  %s4205_s6 = int_to_ptr.vmem [resolvable:$true] %s4204_s6 }
  0x5b   :  { %v6371_v4 = vpack.c.bf16 %v100_v2, %v96_v1  ;;  %v104_v6 = vld [vmem:[#allocation9 + $0x48] sm:$0xff]  ;;  %v6373_v8 = vpack.c.bf16 %v99_v5, %v95_v3  ;;  %v103_v10 = vld [vmem:[#allocation9 + $0x40] sm:$0xff]  ;;  %v102_v20 = vld [vmem:[#allocation9 + $0x38] sm:$0xff]  ;;  %s6214_s22 = scalar_lea.vmem %s4205_s6, 128  ;;  %p6219_p13 = scmp.lt.s32.totalorder %s4205_s6, %s4205_s6 }
  0x5c   :  { %v108_v7 = vld [vmem:[#allocation9 + $0x68] sm:$0xff]  ;;  %v107_v11 = vld [vmem:[#allocation9 + $0x60] sm:$0xff]  ;;  %v6384_v22 = vpack.c.bf16 %v102_v20, %v98_v19  ;;  %v97_v23 = vld [vmem:[#allocation9 + $0x10] sm:$0xff]  ;;  %p6215_p12 = scmp.ne.s32.totalorder %s4205_s6, %s6214_s22  ;;  %p6220_p0 = scmp.lt.s32.totalorder %s6214_s22, %s6214_s22 }
  0x5d   :  { %v6375_v9 = vpack.c.bf16 %v108_v7, %v104_v6  ;;  %v112_v12 = vld [vmem:[#allocation9 + $0x88] sm:$0xff]  ;;  %4264 = vmatprep.subr.bf16.mxu0 %v6371_v4  ;;  %v6379_v14 = vpack.c.bf16 %v107_v11, %v103_v10  ;;  %v111_v15 = vld [vmem:[#allocation9 + $0x80] sm:$0xff]  ;;  %v101_v24 = vld [vmem:[#allocation9 + $0x30] sm:$0xff] }
  0x5e   :  { %v116_v13 = vld [vmem:[#allocation9 + $0xa8] sm:$0xff]  ;;  %4266 = vmatpush1.bf16.msra.mxu0 %v6373_v8  ;;  %v115_v16 = vld [vmem:[#allocation9 + $0xa0] sm:$0xff]  ;;  %v6386_v25 = vpack.c.bf16 %v101_v24, %v97_v23  ;;  %4296 = vmatprep.subr.bf16.mxu1 %v6384_v22  ;;  %v106_v27 = vld [vmem:[#allocation9 + $0x58] sm:$0xff]  ;;  %p6221_p1 = por %p6220_p0, %p6219_p13 }
  0x5f   :  { %4268 = vmatprep.subr.bf16.mxu0 %v6375_v9  ;;  %v6382_v17 = vpack.c.bf16 %v116_v13, %v112_v12  ;;  %v120_v18 = vld [vmem:[#allocation9 + $0xc8] sm:$0xff]  ;;  %v6389_v26 = vpack.c.bf16 %v115_v16, %v111_v15  ;;  %v110_v28 = vld [vmem:[#allocation9 + $0x78] sm:$0xff]  ;;  %v105_v29 = vld [vmem:[#allocation9 + $0x50] sm:$0xff] }
  0x60   :  { %v124_v21 = vld [vmem:[#allocation9 + $0xe8] sm:$0xff]  ;;  %v119_v31 = vld [vmem:[#allocation9 + $0xc0] sm:$0xff]  ;;  %4298 = vmatpush1.bf16.msra.mxu1 %v6386_v25  ;;  %v6396_v33 = vpack.c.bf16 %v110_v28, %v106_v27  ;;  %v109_v34 = vld [vmem:[#allocation9 + $0x70] sm:$0xff]  ;;  %p6222_p2 = pnand %p6221_p1, %p6215_p12 }
  0x61   :  { %7717 = vst [vmem:[#allocation20_spill] sm:$0xff] %v6389_v26  ;;  %v6393_v30 = vpack.c.bf16 %v124_v21, %v120_v18  ;;  %v123_v32 = vld [vmem:[#allocation9 + $0xe0] sm:$0xff]  ;;  %v128_v35 = vld [vmem:[#allocation9 + $0x108] sm:$0xff]  ;;  %v6398_v37 = vpack.c.bf16 %v109_v34, %v105_v29  ;;  %v114_v38 = vld [vmem:[#allocation9 + $0x98] sm:$0xff] }
  0x62   :  { %4270 = vmatpush1.bf16.msra.mxu0 %v6379_v14  ;;  %v132_v36 = vld [vmem:[#allocation9 + $0x128] sm:$0xff]  ;;  %4300 = vmatprep.subr.bf16.mxu1 %v6396_v33  ;;  %v118_v39 = vld [vmem:[#allocation9 + $0xb8] sm:$0xff]  ;;  %v113_v40 = vld [vmem:[#allocation9 + $0x90] sm:$0xff]  ;;  %v6402_v42 = vpack.c.bf16 %v123_v32, %v119_v31 }
  0x63   :  { %4272 = vmatprep.subr.bf16.mxu0 %v6382_v17  ;;  %7718 = vst [vmem:[#allocation21_spill] sm:$0xff] %v6393_v30  ;;  %v117_v41 = vld [vmem:[#allocation9 + $0xb0] sm:$0xff]  ;;  %v127_v43 = vld [vmem:[#allocation9 + $0x100] sm:$0xff]  ;;  %v6404_v45 = vpack.c.bf16 %v118_v39, %v114_v38  ;;  %v6407_v46 = vpack.c.bf16 %v132_v36, %v128_v35  ;;  %v136_v47 = vld [vmem:[#allocation9 + $0x148] sm:$0xff] }
  0x64   :  { %7719 = vst [vmem:[#allocation22_spill] sm:$0xff] %v6402_v42  ;;  %v131_v44 = vld [vmem:[#allocation9 + $0x120] sm:$0xff]  ;;  %4302 = vmatpush1.bf16.msra.mxu1 %v6398_v37  ;;  %v6410_v48 = vpack.c.bf16 %v117_v41, %v113_v40  ;;  %v122_v49 = vld [vmem:[#allocation9 + $0xd8] sm:$0xff]  ;;  %v140_v51 = vld [vmem:[#allocation9 + $0x168] sm:$0xff] }
  0x65   :  { %7720 = vst [vmem:[#allocation23_spill] sm:$0xff] %v6404_v45  ;;  %7721 = vst [vmem:[#allocation24_spill] sm:$0xff] %v6407_v46  ;;  %v126_v50 = vld [vmem:[#allocation9 + $0xf8] sm:$0xff]  ;;  %4304 = vmatprep.subr.bf16.mxu1 %v6404_v45  ;;  %v121_v53 = vld [vmem:[#allocation9 + $0xd0] sm:$0xff]  ;;  %v6416_v55 = vpack.c.bf16 %v131_v44, %v127_v43  ;;  %v6419_v58 = vpack.c.bf16 %v140_v51, %v136_v47 }
  0x66   :  { %4274 = vmatpush1.bf16.msra.mxu0 %v6389_v26  ;;  %7722 = vst [vmem:[#allocation25_spill] sm:$0xff] %v6410_v48  ;;  %v6413_v52 = vpack.c.bf16 %v126_v50, %v122_v49  ;;  %v125_v54 = vld [vmem:[#allocation9 + $0xf0] sm:$0xff]  ;;  %v130_v56 = vld [vmem:[#allocation9 + $0x118] sm:$0xff]  ;;  %v135_v59 = vld [vmem:[#allocation9 + $0x140] sm:$0xff] }
  0x67   :  { %4276 = vmatprep.subr.bf16.mxu0 %v6393_v30  ;;  %7724 = vst [vmem:[#allocation27_spill] sm:$0xff] %v6416_v55  ;;  %v134_v57 = vld [vmem:[#allocation9 + $0x138] sm:$0xff]  ;;  %7725 = vst [vmem:[#allocation28_spill] sm:$0xff] %v6419_v58  ;;  %v139_v60 = vld [vmem:[#allocation9 + $0x160] sm:$0xff]  ;;  %v6422_v62 = vpack.c.bf16 %v125_v54, %v121_v53 }
  0x68   :  { %7723 = vst [vmem:[#allocation26_spill] sm:$0xff] %v6413_v52  ;;  %4306 = vmatpush1.bf16.msra.mxu1 %v6410_v48  ;;  %v144_v61 = vld [vmem:[#allocation9 + $0x188] sm:$0xff]  ;;  %v6425_v1 = vpack.c.bf16 %v134_v57, %v130_v56  ;;  %v129_v2 = vld [vmem:[#allocation9 + $0x110] sm:$0xff]  ;;  %v138_v5 = vld [vmem:[#allocation9 + $0x158] sm:$0xff]  ;;  %v6428_v7 = vpack.c.bf16 %v139_v60, %v135_v59 }
  0x69   :  { %7726 = vst [vmem:[#allocation29_spill] sm:$0xff] %v6422_v62  ;;  %v148_v63 = vld [vmem:[#allocation9 + $0x1a8] sm:$0xff]  ;;  %4308 = vmatprep.subr.bf16.mxu1 %v6413_v52  ;;  %v133_v3 = vld [vmem:[#allocation9 + $0x130] sm:$0xff]  ;;  %v142_v6 = vld [vmem:[#allocation9 + $0x178] sm:$0xff] }
  0x6a   :  { %4278 = vmatpush1.bf16.msra.mxu0 %v6402_v42  ;;  %7727 = vst [vmem:[#allocation30_spill] sm:$0xff] %v6425_v1  ;;  %7728 = vst [vmem:[#allocation31_spill] sm:$0xff] %v6428_v7  ;;  %v6431_v10 = vpack.c.bf16 %v148_v63, %v144_v61  ;;  %v143_v11 = vld [vmem:[#allocation9 + $0x180] sm:$0xff]  ;;  %v152_v13 = vld [vmem:[#allocation9 + $0x1c8] sm:$0xff]  ;;  %v6434_v15 = vpack.c.bf16 %v133_v3, %v129_v2  ;;  %v6437_v18 = vpack.c.bf16 %v142_v6, %v138_v5 }
  0x6b   :  { %4280 = vmatprep.subr.bf16.mxu0 %v6407_v46  ;;  %v147_v12 = vld [vmem:[#allocation9 + $0x1a0] sm:$0xff]  ;;  %v156_v16 = vld [vmem:[#allocation9 + $0x1e8] sm:$0xff]  ;;  %v137_v19 = vld [vmem:[#allocation9 + $0x150] sm:$0xff] }
  0x6c   :  { %7729 = vst [vmem:[#allocation32_spill] sm:$0xff] %v6431_v10  ;;  %4310 = vmatpush1.bf16.msra.mxu1 %v6422_v62  ;;  %7730 = vst [vmem:[#allocation33_spill] sm:$0xff] %v6434_v15  ;;  %v141_v20 = vld [vmem:[#allocation9 + $0x170] sm:$0xff]  ;;  %v146_v21 = vld [vmem:[#allocation9 + $0x198] sm:$0xff]  ;;  %v6440_v24 = vpack.c.bf16 %v147_v12, %v143_v11  ;;  %v6443_v27 = vpack.c.bf16 %v156_v16, %v152_v13 }
  0x6d   :  { %4312 = vmatprep.subr.bf16.mxu1 %v6425_v1  ;;  %7731 = vst [vmem:[#allocation34_spill] sm:$0xff] %v6437_v18  ;;  %v150_v23 = vld [vmem:[#allocation9 + $0x1b8] sm:$0xff]  ;;  %v151_v28 = vld [vmem:[#allocation9 + $0x1c0] sm:$0xff]  ;;  %v6446_v31 = vpack.c.bf16 %v141_v20, %v137_v19  ;;  %v145_v34 = vld [vmem:[#allocation9 + $0x190] sm:$0xff] }
  0x6e   :  { %4282 = vmatpush1.bf16.msra.mxu0 %v6416_v55  ;;  %7732 = vst [vmem:[#allocation35_spill] sm:$0xff] %v6440_v24  ;;  %7733 = vst [vmem:[#allocation36_spill] sm:$0xff] %v6443_v27  ;;  %v155_v29 = vld [vmem:[#allocation9 + $0x1e0] sm:$0xff]  ;;  %v6449_v32 = vpack.c.bf16 %v150_v23, %v146_v21  ;;  %v149_v35 = vld [vmem:[#allocation9 + $0x1b0] sm:$0xff] }
  0x6f   :  { %4284 = vmatprep.subr.bf16.mxu0 %v6419_v58  ;;  %7734 = vst [vmem:[#allocation37_spill] sm:$0xff] %v6446_v31  ;;  %v154_v36 = vld [vmem:[#allocation9 + $0x1d8] sm:$0xff]  ;;  %v6452_v39 = vpack.c.bf16 %v155_v29, %v151_v28  ;;  %v6456_v40 = vpack.c.bf16 %v149_v35, %v145_v34  ;;  %v153_v43 = vld [vmem:[#allocation9 + $0x1d0] sm:$0xff]  ;;  %v160_v49 = vld [vmem:[#allocation11 + $0x8] sm:$0xff] }
  0x70   :  { %4314 = vmatpush1.bf16.msra.mxu1 %v6434_v15  ;;  %7735 = vst [vmem:[#allocation38_spill] sm:$0xff] %v6449_v32  ;;  %v158_v38 = vld [vmem:[#allocation9 + $0x1f8] sm:$0xff]  ;;  %v157_v44 = vld [vmem:[#allocation9 + $0x1f0] sm:$0xff]  ;;  %v164_v50 = vld [vmem:[#allocation11 + $0x28] sm:$0xff] }
  0x71   :  { %4316 = vmatprep.subr.bf16.mxu1 %v6437_v18  ;;  %7736 = vst [vmem:[#allocation39_spill] sm:$0xff] %v6452_v39  ;;  %7737 = vst [vmem:[#allocation40_spill] sm:$0xff] %v6456_v40  ;;  %v6459_v41 = vpack.c.bf16 %v158_v38, %v154_v36  ;;  %v6463_v47 = vpack.c.bf16 %v157_v44, %v153_v43  ;;  %v162_v51 = vld [vmem:[#allocation11 + $0x18] sm:$0xff]  ;;  %v6471_v53 = vpack.c.bf16 %v164_v50, %v160_v49  ;;  %v159_v56 = vld [vmem:[#allocation11] sm:$0xff] }
  0x72   :  { %4286 = vmatpush1.bf16.msra.mxu0 %v6428_v7  ;;  %v166_v54 = vld [vmem:[#allocation11 + $0x38] sm:$0xff]  ;;  %v163_v57 = vld [vmem:[#allocation11 + $0x20] sm:$0xff]  ;;  %v161_v61 = vld [vmem:[#allocation11 + $0x10] sm:$0xff] }
  0x73   :  { %4288 = vmatprep.subr.bf16.mxu0 %v6431_v10  ;;  %7738 = vst [vmem:[#allocation41_spill] sm:$0xff] %v6459_v41  ;;  %7739 = vst [vmem:[#allocation42_spill] sm:$0xff] %v6463_v47  ;;  %v6473_v59 = vpack.c.bf16 %v166_v54, %v162_v51  ;;  %v6475_v60 = vpack.c.bf16 %v163_v57, %v159_v56  ;;  %v165_v63 = vld [vmem:[#allocation11 + $0x30] sm:$0xff]  ;;  %v168_v3 = vld [vmem:[#allocation11 + $0x48] sm:$0xff] }
  0x74   :  { %4318 = vmatpush1.bf16.msra.mxu1 %v6446_v31  ;;  %7740 = vst [vmem:[#allocation43_spill] sm:$0xff] %v6471_v53  ;;  %v6478_v2 = vpack.c.bf16 %v165_v63, %v161_v61  ;;  %v172_v5 = vld [vmem:[#allocation11 + $0x68] sm:$0xff]  ;;  %v170_v6 = vld [vmem:[#allocation11 + $0x58] sm:$0xff]  ;;  %v167_v16 = vld [vmem:[#allocation11 + $0x40] sm:$0xff] }
  0x75   :  { %4320 = vmatprep.subr.bf16.mxu1 %v6449_v32  ;;  %7741 = vst [vmem:[#allocation44_spill] sm:$0xff] %v6473_v59  ;;  %7742 = vst [vmem:[#allocation45_spill] sm:$0xff] %v6475_v60  ;;  %v174_v11 = vld [vmem:[#allocation11 + $0x78] sm:$0xff]  ;;  %v6483_v12 = vpack.c.bf16 %v172_v5, %v168_v3  ;;  %v171_v19 = vld [vmem:[#allocation11 + $0x60] sm:$0xff] }
  0x76   :  { %4290 = vmatpush1.bf16.msra.mxu0 %v6440_v24  ;;  %7743 = vst [vmem:[#allocation46_spill] sm:$0xff] %v6478_v2  ;;  %v6485_v13 = vpack.c.bf16 %v174_v11, %v170_v6  ;;  %v169_v20 = vld [vmem:[#allocation11 + $0x50] sm:$0xff]  ;;  %v6487_v21 = vpack.c.bf16 %v171_v19, %v167_v16  ;;  %v176_v29 = vld [vmem:[#allocation11 + $0x88] sm:$0xff]  ;;  %v178_v35 = vld [vmem:[#allocation11 + $0x98] sm:$0xff] }
  0x77   :  { %4292 = vmatprep.subr.bf16.mxu0 %v6443_v27  ;;  %7744 = vst [vmem:[#allocation47_spill] sm:$0xff] %v6483_v12  ;;  %v173_v23 = vld [vmem:[#allocation11 + $0x70] sm:$0xff]  ;;  %v180_v34 = vld [vmem:[#allocation11 + $0xa8] sm:$0xff]  ;;  %v182_v38 = vld [vmem:[#allocation11 + $0xb8] sm:$0xff] }
  0x78   :  { %4322 = vmatpush1.bf16.msra.mxu1 %v6456_v40  ;;  %7745 = vst [vmem:[#allocation48_spill] sm:$0xff] %v6485_v13  ;;  %7746 = vst [vmem:[#allocation49_spill] sm:$0xff] %v6487_v21  ;;  %v6491_v28 = vpack.c.bf16 %v173_v23, %v169_v20  ;;  %v6494_v36 = vpack.c.bf16 %v180_v34, %v176_v29  ;;  %v175_v43 = vld [vmem:[#allocation11 + $0x80] sm:$0xff]  ;;  %v6497_v49 = vpack.c.bf16 %v182_v38, %v178_v35  ;;  %v177_v51 = vld [vmem:[#allocation11 + $0x90] sm:$0xff] }
  0x79   :  { %4324 = vmatprep.subr.bf16.mxu1 %v6459_v41  ;;  %v179_v44 = vld [vmem:[#allocation11 + $0xa0] sm:$0xff]  ;;  %v181_v54 = vld [vmem:[#allocation11 + $0xb0] sm:$0xff]  ;;  %v184_v57 = vld [vmem:[#allocation11 + $0xc8] sm:$0xff] }
  0x7a   :  { %4294 = vmatpush1.bf16.msra.mxu0 %v6452_v39  ;;  %7747 = vst [vmem:[#allocation50_spill] sm:$0xff] %v6491_v28  ;;  %7748 = vst [vmem:[#allocation51_spill] sm:$0xff] %v6494_v36  ;;  %v6499_v50 = vpack.c.bf16 %v179_v44, %v175_v43  ;;  %v6502_v56 = vpack.c.bf16 %v181_v54, %v177_v51  ;;  %v188_v61 = vld [vmem:[#allocation11 + $0xe8] sm:$0xff]  ;;  %v186_v63 = vld [vmem:[#allocation11 + $0xd8] sm:$0xff] }
  0x7b   :  { %4328 = vmatprep.subr.bf16.mxu0 %v6471_v53  ;;  %7749 = vst [vmem:[#allocation52_spill] sm:$0xff] %v6497_v49  ;;  %v6506_v3 = vpack.c.bf16 %v188_v61, %v184_v57  ;;  %v190_v5 = vld [vmem:[#allocation11 + $0xf8] sm:$0xff]  ;;  %v183_v6 = vld [vmem:[#allocation11 + $0xc0] sm:$0xff]  ;;  %v185_v20 = vld [vmem:[#allocation11 + $0xd0] sm:$0xff] }
  0x7c   :  { %4326 = vmatpush1.bf16.msra.mxu1 %v6463_v47  ;;  %7750 = vst [vmem:[#allocation53_spill] sm:$0xff] %v6499_v50  ;;  %7751 = vst [vmem:[#allocation54_spill] sm:$0xff] %v6502_v56  ;;  %v187_v11 = vld [vmem:[#allocation11 + $0xe0] sm:$0xff]  ;;  %v6509_v16 = vpack.c.bf16 %v190_v5, %v186_v63  ;;  %v189_v23 = vld [vmem:[#allocation11 + $0xf0] sm:$0xff] }
  0x7d   :  { %364 = vmatmul.mubr.f32.vlgmr.msra.gmra.mrb[0].mxu0 %v7549_v0  ;;  %4360 = vmatprep.subr.bf16.mxu1 %v6473_v59  ;;  %7752 = vst [vmem:[#allocation55_spill] sm:$0xff] %v6506_v3  ;;  %v6511_v19 = vpack.c.bf16 %v187_v11, %v183_v6  ;;  %v6514_v29 = vpack.c.bf16 %v189_v23, %v185_v20  ;;  %v192_v34 = vld [vmem:[#allocation11 + $0x108] sm:$0xff]  ;;  %v194_v38 = vld [vmem:[#allocation11 + $0x118] sm:$0xff]  ;;  %v191_v51 = vld [vmem:[#allocation11 + $0x100] sm:$0xff] }
  0x7e   :  { %533 = vmatprep.mubr.f32.mxu0 %v7549_v0  ;;  %4330 = vmatpush1.bf16.msra.mxu0 %v6475_v60  ;;  %7753 = vst [vmem:[#allocation56_spill] sm:$0xff] %v6509_v16  ;;  %v196_v35 = vld [vmem:[#allocation11 + $0x128] sm:$0xff]  ;;  %v198_v44 = vld [vmem:[#allocation11 + $0x138] sm:$0xff]  ;;  %v195_v54 = vld [vmem:[#allocation11 + $0x120] sm:$0xff] }
  0x7f   :  { %435 = vmatmul.mubr.f32.vlgmr.msra.gmra.mrb[0].mxu1 %v7549_v0  ;;  %4332 = vmatprep.subr.bf16.mxu0 %v6483_v12  ;;  %7754 = vst [vmem:[#allocation57_spill] sm:$0xff] %v6511_v19  ;;  %7755 = vst [vmem:[#allocation58_spill] sm:$0xff] %v6514_v29  ;;  %v6518_v43 = vpack.c.bf16 %v196_v35, %v192_v34  ;;  %v6521_v57 = vpack.c.bf16 %v198_v44, %v194_v38  ;;  %v193_v63 = vld [vmem:[#allocation11 + $0x110] sm:$0xff]  ;;  %v200_v11 = vld [vmem:[#allocation11 + $0x148] sm:$0xff] }
  0x80   :  { %604 = vmatprep.mubr.f32.mxu1 %v7549_v0  ;;  %4362 = vmatpush1.bf16.msra.mxu1 %v6478_v2  ;;  %v6523_v61 = vpack.c.bf16 %v195_v54, %v191_v51  ;;  %v197_v5 = vld [vmem:[#allocation11 + $0x130] sm:$0xff]  ;;  %v204_v20 = vld [vmem:[#allocation11 + $0x168] sm:$0xff]  ;;  %v202_v23 = vld [vmem:[#allocation11 + $0x158] sm:$0xff] }
  0x81   :  { %4364 = vmatprep.subr.bf16.mxu1 %v6485_v13  ;;  %7756 = vst [vmem:[#allocation59_spill] sm:$0xff] %v6518_v43  ;;  %7757 = vst [vmem:[#allocation60_spill] sm:$0xff] %v6521_v57  ;;  %v6526_v6 = vpack.c.bf16 %v197_v5, %v193_v63  ;;  %v6530_v34 = vpack.c.bf16 %v204_v20, %v200_v11  ;;  %v206_v35 = vld [vmem:[#allocation11 + $0x178] sm:$0xff]  ;;  %v199_v38 = vld [vmem:[#allocation11 + $0x140] sm:$0xff] }
  0x82   :  { %4334 = vmatpush1.bf16.msra.mxu0 %v6487_v21  ;;  %7758 = vst [vmem:[#allocation61_spill] sm:$0xff] %v6523_v61  ;;  %v203_v44 = vld [vmem:[#allocation11 + $0x160] sm:$0xff]  ;;  %v6533_v51 = vpack.c.bf16 %v206_v35, %v202_v23  ;;  %v201_v63 = vld [vmem:[#allocation11 + $0x150] sm:$0xff]  ;;  %v214_v20 = vld [vmem:[#allocation11 + $0x1b8] sm:$0xff] }
  0x83   :  { %4336 = vmatprep.subr.bf16.mxu0 %v6494_v36  ;;  %7759 = vst [vmem:[#allocation62_spill] sm:$0xff] %v6526_v6  ;;  %7760 = vst [vmem:[#allocation63_spill] sm:$0xff] %v6530_v34  ;;  %v6535_v54 = vpack.c.bf16 %v203_v44, %v199_v38  ;;  %v205_v5 = vld [vmem:[#allocation11 + $0x170] sm:$0xff]  ;;  %v258_v36 = vld [vmem:[#allocation12 + $0x118] sm:$0xff] }
  0x84   :  { %4366 = vmatpush1.bf16.msra.mxu1 %v6491_v28  ;;  %7761 = vst [vmem:[#allocation64_spill] sm:$0xff] %v6533_v51  ;;  %v6538_v0 = vpack.c.bf16 %v205_v5, %v201_v63  ;;  %v209_v38 = vld [vmem:[#allocation11 + $0x190] sm:$0xff]  ;;  %v216_v63 = vld [vmem:[#allocation11 + $0x1c8] sm:$0xff] }
  0x85   :  { %4368 = vmatprep.subr.bf16.mxu1 %v6497_v49  ;;  %7762 = vst [vmem:[#allocation65_spill] sm:$0xff] %v6535_v54  ;;  %v213_v44 = vld [vmem:[#allocation11 + $0x1b0] sm:$0xff]  ;;  %v246_v49 = vld [vmem:[#allocation12 + $0xb8] sm:$0xff] }
  0x86   :  { %4338 = vmatpush1.bf16.msra.mxu0 %v6499_v50  ;;  %7763 = vst [vmem:[#allocation66_spill] sm:$0xff] %v6538_v0  ;;  %v6550_v5 = vpack.c.bf16 %v213_v44, %v209_v38  ;;  %v226_v38 = vld [vmem:[#allocation12 + $0x18] sm:$0xff] }
  0x87   :  { %4340 = vmatprep.subr.bf16.mxu0 %v6506_v3  ;;  %v230_v44 = vld [vmem:[#allocation12 + $0x38] sm:$0xff]  ;;  %v240_v3 = vld [vmem:[#allocation12 + $0x88] sm:$0xff] }
  0x88   :  { %4370 = vmatpush1.bf16.msra.mxu1 %v6502_v56  ;;  %7767 = vst [vmem:[#allocation70_spill] sm:$0xff] %v6550_v5  ;;  %v244_v56 = vld [vmem:[#allocation12 + $0xa8] sm:$0xff]  ;;  %v242_v50 = vld [vmem:[#allocation12 + $0x98] sm:$0xff] }
  0x89   :  { %4372 = vmatprep.subr.bf16.mxu1 %v6509_v16  ;;  %v228_v16 = vld [vmem:[#allocation12 + $0x28] sm:$0xff] }
  0x8a   :  { %4342 = vmatpush1.bf16.msra.mxu0 %v6511_v19  ;;  %v224_v19 = vld [vmem:[#allocation12 + $0x8] sm:$0xff] }
  0x8b   :  { %4344 = vmatprep.subr.bf16.mxu0 %v6518_v43  ;;  %v212_v43 = vld [vmem:[#allocation11 + $0x1a8] sm:$0xff] }
  0x8c   :  { %4374 = vmatpush1.bf16.msra.mxu1 %v6514_v29  ;;  %v207_v29 = vld [vmem:[#allocation11 + $0x180] sm:$0xff] }
  0x8d   :  { %4376 = vmatprep.subr.bf16.mxu1 %v6521_v57  ;;  %v208_v57 = vld [vmem:[#allocation11 + $0x188] sm:$0xff] }
  0x8e   :  { %4346 = vmatpush1.bf16.msra.mxu0 %v6523_v61  ;;  %v210_v61 = vld [vmem:[#allocation11 + $0x198] sm:$0xff]  ;;  %v6541_v11 = vpack.c.bf16 %v212_v43, %v208_v57  ;;  %v220_v43 = vld [vmem:[#allocation11 + $0x1e8] sm:$0xff] }
  0x8f   :  { %4348 = vmatprep.subr.bf16.mxu0 %v6530_v34  ;;  %v6544_v23 = vpack.c.bf16 %v214_v20, %v210_v61  ;;  %v218_v57 = vld [vmem:[#allocation11 + $0x1d8] sm:$0xff]  ;;  %v6553_v34 = vpack.c.bf16 %v220_v43, %v216_v63  ;;  %v217_v20 = vld [vmem:[#allocation11 + $0x1d0] sm:$0xff]  ;;  %v6567_v43 = vpack.c.bf16 %v230_v44, %v226_v38 }
  0x90   :  { %4378 = vmatpush1.bf16.msra.mxu1 %v6526_v6  ;;  %7764 = vst [vmem:[#allocation67_spill] sm:$0xff] %v6541_v11  ;;  %v211_v6 = vld [vmem:[#allocation11 + $0x1a0] sm:$0xff] }
  0x91   :  { %4380 = vmatprep.subr.bf16.mxu1 %v6533_v51  ;;  %7765 = vst [vmem:[#allocation68_spill] sm:$0xff] %v6544_v23  ;;  %v6546_v35 = vpack.c.bf16 %v211_v6, %v207_v29  ;;  %v222_v51 = vld [vmem:[#allocation11 + $0x1f8] sm:$0xff]  ;;  %7768 = vst [vmem:[#allocation71_spill] sm:$0xff] %v6553_v34  ;;  %v215_v29 = vld [vmem:[#allocation11 + $0x1c0] sm:$0xff] }
  0x92   :  { %4350 = vmatpush1.bf16.msra.mxu0 %v6535_v54  ;;  %v6555_v61 = vpack.c.bf16 %v222_v51, %v218_v57  ;;  %v219_v6 = vld [vmem:[#allocation11 + $0x1e0] sm:$0xff]  ;;  %v221_v54 = vld [vmem:[#allocation11 + $0x1f0] sm:$0xff]  ;;  %v6564_v51 = vpack.c.bf16 %v228_v16, %v224_v19  ;;  %7773 = vst [vmem:[#allocation76_spill] sm:$0xff] %v6567_v43 }
  0x93   :  { %7766 = vst [vmem:[#allocation69_spill] sm:$0xff] %v6546_v35  ;;  %4352 = vmatprep.subr.bf16.mxu0 %v6541_v11  ;;  %v6558_v11 = vpack.c.bf16 %v219_v6, %v215_v29  ;;  %v6562_v63 = vpack.c.bf16 %v221_v54, %v217_v20  ;;  %v295_v57 = vld [vmem:[#allocation6] sm:$0xff]  ;;  %v296_v29 = vld [vmem:[#allocation6 + $0x8] sm:$0xff] }
  0x94   :  { %4382 = vmatpush1.bf16.msra.mxu1 %v6538_v0  ;;  %7769 = vst [vmem:[#allocation72_spill] sm:$0xff] %v6555_v61  ;;  %7772 = vst [vmem:[#allocation75_spill] sm:$0xff] %v6564_v51 }
  0x95   :  { %4384 = vmatprep.subr.bf16.mxu1 %v6544_v23  ;;  %7770 = vst [vmem:[#allocation73_spill] sm:$0xff] %v6558_v11  ;;  %7771 = vst [vmem:[#allocation74_spill] sm:$0xff] %v6562_v63 }
  0x96   :  { %4354 = vmatpush1.bf16.msra.mxu0 %v6546_v35 }
  0x97   :  { %4356 = vmatprep.subr.bf16.mxu0 %v6553_v34 }
  0x98   :  { %4386 = vmatpush1.bf16.msra.mxu1 %v6550_v5  ;;  %v298_v5 = vld [vmem:[#allocation6 + $0x18] sm:$0xff] }
  0x99   :  { %4388 = vmatprep.subr.bf16.mxu1 %v6555_v61  ;;  %v297_v61 = vld [vmem:[#allocation6 + $0x10] sm:$0xff] }
  0x9a   :  { %4358 = vmatpush1.bf16.msra.mxu0 %v6558_v11 }
  0x9b   :  { %4392 = vmatprep.subr.bf16.mxu0 %v6564_v51 }
  0x9c   :  { %4390 = vmatpush1.bf16.msra.mxu1 %v6562_v63 }
  0x9d   :  { %4424 = vmatprep.subr.bf16.mxu1 %v6567_v43 }
 0x150   :  { %v365_v6 = vpop.f32.mrb[0].mxu0 }
 0x151   :  { %v441_v34 = vadd.f32 %v365_v6, %v295_v57  ;;  %v367_v54 = vpop.f32.mrb[1].mxu0 }
 0x152   :  { %v442_v20 = vadd.f32 %v367_v54, %v296_v29  ;;  %v436_v38 = vpop.f32.mrb[0].mxu1 }
 0x153   :  { %v4215_v16 = vmul.f32 -1.442695, %v441_v34  ;;  %v438_v44 = vpop.f32.mrb[1].mxu1  ;;  %v443_v35 = vadd.f32 %v436_v38, %v297_v61  ;;  %v225_v61 = vld [vmem:[#allocation12 + $0x10] sm:$0xff] }
 0x154   :  { %v4216_v19 = vmul.f32 -1.442695, %v442_v20  ;;  %v444_v11 = vadd.f32 %v438_v44, %v298_v5  ;;  %v227_v5 = vld [vmem:[#allocation12 + $0x20] sm:$0xff] }
 0x155   :  { %5840 = vpow2.f32 %v4215_v16 }
 0x156   :  { %5842 = vpow2.f32 %v4216_v19  ;;  %v4217_v63 = vmul.f32 -1.442695, %v444_v11  ;;  %v223_v11 = vld [vmem:[#allocation12] sm:$0xff] }
 0x157   :  { %v6576_v44 = vpack.c.bf16 %v227_v5, %v223_v11 }
 0x158   :  { %5844 = vpow2.f32 %v4217_v63  ;;  %v229_v63 = vld [vmem:[#allocation12 + $0x30] sm:$0xff] }
 0x159   :  { %5846 = vtanh.f32 %v443_v35  ;;  %v232_v35 = vld [vmem:[#allocation12 + $0x48] sm:$0xff]  ;;  %7775 = vst [vmem:[#allocation78_spill] sm:$0xff] %v6576_v44 }
 0x15f   :  { %v5841_v51 = vpop.eup %5840 }
 0x160   :  { %v5843_v43 = vpop.eup %5842  ;;  %v448_v23 = vadd.f32 1.0, %v5841_v51 }
 0x161   :  { %v454_v0 = vadd.f32 1.0, %v5843_v43  ;;  %v238_v43 = vld [vmem:[#allocation12 + $0x78] sm:$0xff] }
 0x162   :  { %5848 = vrcp.f32 %v448_v23  ;;  %v5845_v57 = vpop.eup %5844  ;;  %v236_v23 = vld [vmem:[#allocation12 + $0x68] sm:$0xff] }
 0x163   :  { %5850 = vrcp.f32 %v454_v0  ;;  %v5847_v34 = vpop.eup %5846  ;;  %v461_v6 = vadd.f32 1.0, %v5845_v57  ;;  %v234_v0 = vld [vmem:[#allocation12 + $0x58] sm:$0xff]  ;;  %v6578_v57 = vpack.c.bf16 %v229_v63, %v225_v61  ;;  %v239_v61 = vld [vmem:[#allocation12 + $0x80] sm:$0xff] }
 0x164   :  { %v243_v63 = vld [vmem:[#allocation12 + $0xa0] sm:$0xff] }
 0x165   :  { %5852 = vrcp.f32 %v461_v6  ;;  %7776 = vst [vmem:[#allocation79_spill] sm:$0xff] %v6578_v57  ;;  %v6582_v6 = vpack.c.bf16 %v236_v23, %v232_v35  ;;  %v6596_v35 = vpack.c.bf16 %v244_v56, %v240_v3  ;;  %v241_v23 = vld [vmem:[#allocation12 + $0x90] sm:$0xff] }
 0x167   :  { %7777 = vst [vmem:[#allocation80_spill] sm:$0xff] %v6582_v6  ;;  %7781 = vst [vmem:[#allocation84_spill] sm:$0xff] %v6596_v35 }
 0x16c   :  { %v5849_v29 = vpop.eup %5848 }
 0x16d   :  { %v5851_v54 = vpop.eup %5850  ;;  %v465_v20 = vmul.f32 %v5849_v29, %v5847_v34  ;;  %v231_v34 = vld [vmem:[#allocation12 + $0x40] sm:$0xff] }
 0x16e   :  { %v464_v16 = vmul.f32 0.0, %v5851_v54  ;;  %v235_v29 = vld [vmem:[#allocation12 + $0x60] sm:$0xff] }
 0x16f   :  { %v5853_v51 = vpop.eup %5852  ;;  %v6590_v11 = vpack.c.bf16 %v235_v29, %v231_v34  ;;  %v7783_v34 = vmov 0.0  }
 0x170   :  { %v6573_v19 = vadd.f32 %v465_v20, %v464_v16  ;;  %v6584_v20 = vpack.c.bf16 %v238_v43, %v234_v0  ;;  %v233_v16 = vld [vmem:[#allocation12 + $0x50] sm:$0xff]  ;;  %v248_v43 = vld [vmem:[#allocation12 + $0xc8] sm:$0xff] }
 0x171   :  { %7779 = vst [vmem:[#allocation82_spill] sm:$0xff] %v6590_v11  ;;  %v245_v0 = vld [vmem:[#allocation12 + $0xb0] sm:$0xff] }
 0x172   :  { %7774 = vst [vmem:[#allocation77_spill] sm:$0xff] %v6573_v19  ;;  %5854 = vtanh.f32 %v6573_v19  ;;  %7778 = vst [vmem:[#allocation81_spill] sm:$0xff] %v6584_v20  ;;  %v237_v19 = vld [vmem:[#allocation12 + $0x70] sm:$0xff]  ;;  %v6606_v56 = vpack.c.bf16 %v245_v0, %v241_v23  ;;  %v255_v23 = vld [vmem:[#allocation12 + $0x100] sm:$0xff] }
 0x173   :  { %v6592_v5 = vpack.c.bf16 %v237_v19, %v233_v16  ;;  %v6604_v19 = vpack.c.bf16 %v243_v63, %v239_v61  ;;  %v249_v16 = vld [vmem:[#allocation12 + $0xd0] sm:$0xff]  ;;  %v259_v0 = vld [vmem:[#allocation12 + $0x120] sm:$0xff] }
 0x174   :  { %7785 = vst [vmem:[#allocation87_spill] sm:$0xff] %v6606_v56 }
 0x175   :  { %7780 = vst [vmem:[#allocation83_spill] sm:$0xff] %v6592_v5  ;;  %7784 = vst [vmem:[#allocation86_spill] sm:$0xff] %v6604_v19 }
 0x17c   :  { %v5855_v38 = vpop.eup %5854 }
 0x17d   :  { %v6580_v54 = vmul.f32 %v5855_v38, %v5853_v51  ;;  %v6598_v51 = vpack.c.bf16 %v246_v49, %v242_v50  ;;  %v252_v38 = vld [vmem:[#allocation12 + $0xe8] sm:$0xff]  ;;  %v247_v49 = vld [vmem:[#allocation12 + $0xc0] sm:$0xff] }
 0x17e   :  { %v251_v50 = vld [vmem:[#allocation12 + $0xe0] sm:$0xff]  ;;  %v6610_v3 = vpack.c.bf16 %v252_v38, %v248_v43  ;;  %v257_v43 = vld [vmem:[#allocation12 + $0x110] sm:$0xff] }
 0x17f   :  { %534 = vmatmul.mubr.f32.vlgmr.msra.gmra.mrb[2].mxu0 %v6580_v54  ;;  %605 = vmatmul.mubr.f32.vlgmr.msra.gmra.mrb[2].mxu1 %v6580_v54  ;;  %7782 = vst [vmem:[#allocation85_spill] sm:$0xff] %v6598_v51  ;;  %v6616_v61 = vpack.c.bf16 %v251_v50, %v247_v49  ;;  %v261_v38 = vld [vmem:[#allocation12 + $0x130] sm:$0xff]  ;;  %v263_v50 = vld [vmem:[#allocation12 + $0x140] sm:$0xff] }
 0x180   :  { %4394 = vmatpush1.bf16.msra.mxu0 %v6576_v44  ;;  %4426 = vmatpush1.bf16.msra.mxu1 %v6578_v57  ;;  %v250_v44 = vld [vmem:[#allocation12 + $0xd8] sm:$0xff]  ;;  %7786 = vst [vmem:[#allocation88_spill] sm:$0xff] %v6610_v3  ;;  %v6630_v49 = vpack.c.bf16 %v261_v38, %v257_v43  ;;  %v271_v43 = vld [vmem:[#allocation12 + $0x180] sm:$0xff] }
 0x181   :  { %4396 = vmatprep.subr.bf16.mxu0 %v6582_v6  ;;  %4428 = vmatprep.subr.bf16.mxu1 %v6584_v20  ;;  %v254_v57 = vld [vmem:[#allocation12 + $0xf8] sm:$0xff]  ;;  %v253_v20 = vld [vmem:[#allocation12 + $0xf0] sm:$0xff]  ;;  %v256_v6 = vld [vmem:[#allocation12 + $0x108] sm:$0xff]  ;;  %7788 = vst [vmem:[#allocation90_spill] sm:$0xff] %v6616_v61 }
 0x182   :  { %675 = vmatprep.mubr.f32.mxu0 %v7783_v34  ;;  %746 = vmatprep.mubr.f32.mxu1 %v7783_v34  ;;  %v6612_v29 = vpack.c.bf16 %v254_v57, %v250_v44  ;;  %v6618_v63 = vpack.c.bf16 %v253_v20, %v249_v16  ;;  %v6628_v20 = vpack.c.bf16 %v259_v0, %v255_v23  ;;  %v267_v16 = vld [vmem:[#allocation12 + $0x160] sm:$0xff] }
 0x183   :  { %7793 = vst [vmem:[#allocation95_spill] sm:$0xff] %v6630_v49  ;;  %v6640_v23 = vpack.c.bf16 %v267_v16, %v263_v50  ;;  %v275_v38 = vld [vmem:[#allocation12 + $0x1a0] sm:$0xff] }
 0x184   :  { %4398 = vmatpush1.bf16.msra.mxu0 %v6590_v11  ;;  %4430 = vmatpush1.bf16.msra.mxu1 %v6592_v5  ;;  %7787 = vst [vmem:[#allocation89_spill] sm:$0xff] %v6612_v29  ;;  %v260_v11 = vld [vmem:[#allocation12 + $0x128] sm:$0xff]  ;;  %v262_v5 = vld [vmem:[#allocation12 + $0x138] sm:$0xff]  ;;  %7789 = vst [vmem:[#allocation91_spill] sm:$0xff] %v6618_v63  ;;  %v6652_v50 = vpack.c.bf16 %v275_v38, %v271_v43 }
 0x185   :  { %4400 = vmatprep.subr.bf16.mxu0 %v6596_v35  ;;  %4432 = vmatprep.subr.bf16.mxu1 %v6598_v51  ;;  %v6622_v44 = vpack.c.bf16 %v260_v11, %v256_v6  ;;  %v6624_v57 = vpack.c.bf16 %v262_v5, %v258_v36  ;;  %v264_v51 = vld [vmem:[#allocation12 + $0x148] sm:$0xff]  ;;  %v266_v35 = vld [vmem:[#allocation12 + $0x158] sm:$0xff]  ;;  %7792 = vst [vmem:[#allocation94_spill] sm:$0xff] %v6628_v20  ;;  %v265_v11 = vld [vmem:[#allocation12 + $0x150] sm:$0xff] }
 0x186   :  { %v269_v5 = vld [vmem:[#allocation12 + $0x170] sm:$0xff] }
 0x187   :  { %7790 = vst [vmem:[#allocation92_spill] sm:$0xff] %v6622_v44  ;;  %7791 = vst [vmem:[#allocation93_spill] sm:$0xff] %v6624_v57  ;;  %v6642_v0 = vpack.c.bf16 %v269_v5, %v265_v11  ;;  %v279_v11 = vld [vmem:[#allocation12 + $0x1c0] sm:$0xff]  ;;  %v285_v5 = vld [vmem:[#allocation12 + $0x1f0] sm:$0xff] }
 0x188   :  { %4402 = vmatpush1.bf16.msra.mxu0 %v6604_v19  ;;  %4434 = vmatpush1.bf16.msra.mxu1 %v6606_v56  ;;  %v268_v19 = vld [vmem:[#allocation12 + $0x168] sm:$0xff]  ;;  %v270_v56 = vld [vmem:[#allocation12 + $0x178] sm:$0xff] }
 0x189   :  { %4404 = vmatprep.subr.bf16.mxu0 %v6610_v3  ;;  %4436 = vmatprep.subr.bf16.mxu1 %v6612_v29  ;;  %v6634_v36 = vpack.c.bf16 %v268_v19, %v264_v51  ;;  %v6636_v6 = vpack.c.bf16 %v270_v56, %v266_v35  ;;  %v272_v29 = vld [vmem:[#allocation12 + $0x188] sm:$0xff]  ;;  %v274_v3 = vld [vmem:[#allocation12 + $0x198] sm:$0xff]  ;;  %v273_v19 = vld [vmem:[#allocation12 + $0x190] sm:$0xff] }
 0x18a   :  { %v277_v56 = vld [vmem:[#allocation12 + $0x1b0] sm:$0xff] }
 0x18b   :  { %7794 = vst [vmem:[#allocation96_spill] sm:$0xff] %v6634_v36  ;;  %v6654_v16 = vpack.c.bf16 %v277_v56, %v273_v19  ;;  %v7800_v19 = vld [vmem:[#allocation56_spill] sm:$0xff]  ;;  %v7801_v56 = vld [vmem:[#allocation57_spill] sm:$0xff] }
 0x18c   :  { %4406 = vmatpush1.bf16.msra.mxu0 %v6616_v61  ;;  %4438 = vmatpush1.bf16.msra.mxu1 %v6618_v63  ;;  %v276_v61 = vld [vmem:[#allocation12 + $0x1a8] sm:$0xff]  ;;  %v278_v63 = vld [vmem:[#allocation12 + $0x1b8] sm:$0xff] }
 0x18d   :  { %4408 = vmatprep.subr.bf16.mxu0 %v6622_v44  ;;  %4440 = vmatprep.subr.bf16.mxu1 %v6624_v57  ;;  %v6646_v35 = vpack.c.bf16 %v276_v61, %v272_v29  ;;  %v6648_v51 = vpack.c.bf16 %v278_v63, %v274_v3  ;;  %v280_v57 = vld [vmem:[#allocation12 + $0x1c8] sm:$0xff]  ;;  %v282_v44 = vld [vmem:[#allocation12 + $0x1d8] sm:$0xff]  ;;  %v283_v61 = vld [vmem:[#allocation12 + $0x1e0] sm:$0xff] }
 0x18e   :  { %v281_v63 = vld [vmem:[#allocation12 + $0x1d0] sm:$0xff]  ;;  %v6664_v43 = vpack.c.bf16 %v283_v61, %v279_v11  ;;  %v7802_v11 = vld [vmem:[#allocation58_spill] sm:$0xff]  ;;  %v7803_v61 = vld [vmem:[#allocation59_spill] sm:$0xff] }
 0x18f   :  { %v6666_v38 = vpack.c.bf16 %v285_v5, %v281_v63  ;;  %v7804_v63 = vld [vmem:[#allocation60_spill] sm:$0xff]  ;;  %v7805_v5 = vld [vmem:[#allocation61_spill] sm:$0xff] }
 0x190   :  { %4410 = vmatpush1.bf16.msra.mxu0 %v6628_v20  ;;  %4442 = vmatpush1.bf16.msra.mxu1 %v6630_v49  ;;  %v284_v20 = vld [vmem:[#allocation12 + $0x1e8] sm:$0xff]  ;;  %v286_v49 = vld [vmem:[#allocation12 + $0x1f8] sm:$0xff] }
 0x191   :  { %4412 = vmatprep.subr.bf16.mxu0 %v6634_v36  ;;  %4444 = vmatprep.subr.bf16.mxu1 %v6636_v6  ;;  %v6658_v3 = vpack.c.bf16 %v284_v20, %v280_v57  ;;  %v6660_v29 = vpack.c.bf16 %v286_v49, %v282_v44  ;;  %v7795_v44 = vld [vmem:[#allocation51_spill] sm:$0xff]  ;;  %v7796_v57 = vld [vmem:[#allocation52_spill] sm:$0xff]  ;;  %v7798_v20 = vld [vmem:[#allocation54_spill] sm:$0xff] }
 0x192   :  { %v7799_v49 = vld [vmem:[#allocation55_spill] sm:$0xff] }
 0x194   :  { %4414 = vmatpush1.bf16.msra.mxu0 %v6640_v23  ;;  %4446 = vmatpush1.bf16.msra.mxu1 %v6642_v0 }
 0x195   :  { %4416 = vmatprep.subr.bf16.mxu0 %v6646_v35  ;;  %4448 = vmatprep.subr.bf16.mxu1 %v6648_v51 }
 0x198   :  { %4418 = vmatpush1.bf16.msra.mxu0 %v6652_v50  ;;  %4450 = vmatpush1.bf16.msra.mxu1 %v6654_v16 }
 0x199   :  { %4420 = vmatprep.subr.bf16.mxu0 %v6658_v3  ;;  %4452 = vmatprep.subr.bf16.mxu1 %v6660_v29 }
 0x19c   :  { %4422 = vmatpush1.bf16.msra.mxu0 %v6664_v43  ;;  %4454 = vmatpush1.bf16.msra.mxu1 %v6666_v38 }
 0x19d   :  { %4456 = vmatprep.subr.bf16.mxu0 %v6371_v4  ;;  %4488 = vmatprep.subr.bf16.mxu1 %v6384_v22 }
 0x19f   :  { %676 = vmatmul.mubr.f32.vlgmr.msra.gmra.mrb[2].mxu0 %v7783_v34  ;;  %747 = vmatmul.mubr.f32.vlgmr.msra.gmra.mrb[2].mxu1 %v7783_v34 }
 0x1a0   :  { %4458 = vmatpush1.bf16.msra.mxu0 %v6373_v8  ;;  %4490 = vmatpush1.bf16.msra.mxu1 %v6386_v25 }
 0x1a1   :  { %4460 = vmatprep.subr.bf16.mxu0 %v6375_v9  ;;  %4492 = vmatprep.subr.bf16.mxu1 %v6396_v33 }
 0x1a2   :  { %850 = vmatprep.mubr.f32.mxu0 %v7783_v34  ;;  %921 = vmatprep.mubr.f32.mxu1 %v7783_v34 }
 0x1a4   :  { %4462 = vmatpush1.bf16.msra.mxu0 %v6379_v14  ;;  %4494 = vmatpush1.bf16.msra.mxu1 %v6398_v37 }
 0x1a5   :  { %4464 = vmatprep.subr.bf16.mxu0 %v6382_v17  ;;  %4496 = vmatprep.subr.bf16.mxu1 %v6404_v45 }
 0x1a8   :  { %4466 = vmatpush1.bf16.msra.mxu0 %v6389_v26  ;;  %4498 = vmatpush1.bf16.msra.mxu1 %v6410_v48 }
 0x1a9   :  { %4468 = vmatprep.subr.bf16.mxu0 %v6393_v30  ;;  %4500 = vmatprep.subr.bf16.mxu1 %v6413_v52 }
 0x1ac   :  { %4470 = vmatpush1.bf16.msra.mxu0 %v6402_v42  ;;  %4502 = vmatpush1.bf16.msra.mxu1 %v6422_v62 }
 0x1ad   :  { %4472 = vmatprep.subr.bf16.mxu0 %v6407_v46  ;;  %4504 = vmatprep.subr.bf16.mxu1 %v6425_v1 }
 0x1b0   :  { %4474 = vmatpush1.bf16.msra.mxu0 %v6416_v55  ;;  %4506 = vmatpush1.bf16.msra.mxu1 %v6434_v15 }
 0x1b1   :  { %4476 = vmatprep.subr.bf16.mxu0 %v6419_v58  ;;  %4508 = vmatprep.subr.bf16.mxu1 %v6437_v18 }
 0x1b4   :  { %4478 = vmatpush1.bf16.msra.mxu0 %v6428_v7  ;;  %4510 = vmatpush1.bf16.msra.mxu1 %v6446_v31 }
 0x1b5   :  { %4480 = vmatprep.subr.bf16.mxu0 %v6431_v10  ;;  %4512 = vmatprep.subr.bf16.mxu1 %v6449_v32 }
 0x1b8   :  { %4482 = vmatpush1.bf16.msra.mxu0 %v6440_v24  ;;  %4514 = vmatpush1.bf16.msra.mxu1 %v6456_v40 }
 0x1b9   :  { %4484 = vmatprep.subr.bf16.mxu0 %v6443_v27  ;;  %4516 = vmatprep.subr.bf16.mxu1 %v6459_v41 }
 0x1bc   :  { %4486 = vmatpush1.bf16.msra.mxu0 %v6452_v39  ;;  %4518 = vmatpush1.bf16.msra.mxu1 %v6463_v47 }
 0x1bd   :  { %4520 = vmatprep.subr.bf16.mxu0 %v6471_v53  ;;  %4552 = vmatprep.subr.bf16.mxu1 %v6473_v59 }
 0x1bf   :  { %851 = vmatmul.mubr.f32.vlgmr.msra.gmra.mrb[4].mxu0 %v6580_v54  ;;  %922 = vmatmul.mubr.f32.vlgmr.msra.gmra.mrb[4].mxu1 %v6580_v54  ;;  %v7797_v54 = vld [vmem:[#allocation53_spill] sm:$0xff] }
 0x1c0   :  { %4522 = vmatpush1.bf16.msra.mxu0 %v6475_v60  ;;  %4554 = vmatpush1.bf16.msra.mxu1 %v6478_v2 }
 0x1c1   :  { %4524 = vmatprep.subr.bf16.mxu0 %v6483_v12  ;;  %4556 = vmatprep.subr.bf16.mxu1 %v6485_v13 }
 0x1c2   :  { %1020 = vmatprep.mubr.f32.mxu0 %v7783_v34  ;;  %1091 = vmatprep.mubr.f32.mxu1 %v7783_v34 }
 0x1c4   :  { %4526 = vmatpush1.bf16.msra.mxu0 %v6487_v21  ;;  %4558 = vmatpush1.bf16.msra.mxu1 %v6491_v28 }
 0x1c5   :  { %4528 = vmatprep.subr.bf16.mxu0 %v7795_v44  ;;  %4560 = vmatprep.subr.bf16.mxu1 %v7796_v57  ;;  %v7806_v44 = vld [vmem:[#allocation62_spill] sm:$0xff]  ;;  %v7807_v57 = vld [vmem:[#allocation63_spill] sm:$0xff] }
 0x1c8   :  { %4530 = vmatpush1.bf16.msra.mxu0 %v7797_v54  ;;  %4562 = vmatpush1.bf16.msra.mxu1 %v7798_v20  ;;  %v7808_v54 = vld [vmem:[#allocation64_spill] sm:$0xff]  ;;  %v7809_v20 = vld [vmem:[#allocation65_spill] sm:$0xff] }
 0x1c9   :  { %4532 = vmatprep.subr.bf16.mxu0 %v7799_v49  ;;  %4564 = vmatprep.subr.bf16.mxu1 %v7800_v19  ;;  %v7810_v49 = vld [vmem:[#allocation66_spill] sm:$0xff]  ;;  %v7811_v19 = vld [vmem:[#allocation67_spill] sm:$0xff] }
 0x1cc   :  { %4534 = vmatpush1.bf16.msra.mxu0 %v7801_v56  ;;  %4566 = vmatpush1.bf16.msra.mxu1 %v7802_v11  ;;  %v7812_v56 = vld [vmem:[#allocation68_spill] sm:$0xff]  ;;  %v7813_v11 = vld [vmem:[#allocation69_spill] sm:$0xff] }
 0x1cd   :  { %4536 = vmatprep.subr.bf16.mxu0 %v7803_v61  ;;  %4568 = vmatprep.subr.bf16.mxu1 %v7804_v63  ;;  %v7814_v61 = vld [vmem:[#allocation70_spill] sm:$0xff]  ;;  %v7815_v63 = vld [vmem:[#allocation71_spill] sm:$0xff] }
 0x1d0   :  { %4538 = vmatpush1.bf16.msra.mxu0 %v7805_v5  ;;  %4570 = vmatpush1.bf16.msra.mxu1 %v7806_v44  ;;  %v7816_v5 = vld [vmem:[#allocation72_spill] sm:$0xff]  ;;  %v7817_v44 = vld [vmem:[#allocation73_spill] sm:$0xff] }
 0x1d1   :  { %4540 = vmatprep.subr.bf16.mxu0 %v7807_v57  ;;  %4572 = vmatprep.subr.bf16.mxu1 %v7808_v54  ;;  %v7818_v57 = vld [vmem:[#allocation74_spill] sm:$0xff]  ;;  %v7819_v54 = vld [vmem:[#allocation75_spill] sm:$0xff] }
 0x1d4   :  { %4542 = vmatpush1.bf16.msra.mxu0 %v7809_v20  ;;  %4574 = vmatpush1.bf16.msra.mxu1 %v7810_v49  ;;  %v7820_v20 = vld [vmem:[#allocation76_spill] sm:$0xff]  ;;  %v6746_v49 = vld [vmem:[#allocation14] sm:$0xff] }
 0x1d5   :  { %4544 = vmatprep.subr.bf16.mxu0 %v7811_v19  ;;  %4576 = vmatprep.subr.bf16.mxu1 %v7812_v56  ;;  %7821 = vst [vmem:[#allocation97_spill] sm:$0xff] %v6746_v49  ;;  %v6748_v19 = vld [vmem:[#allocation14 + $0x8] sm:$0xff] }
 0x1d6   :  { %7822 = vst [vmem:[#allocation98_spill] sm:$0xff] %v6748_v19 }
 0x1d8   :  { %4546 = vmatpush1.bf16.msra.mxu0 %v7813_v11  ;;  %4578 = vmatpush1.bf16.msra.mxu1 %v7814_v61 }
 0x1d9   :  { %4548 = vmatprep.subr.bf16.mxu0 %v7815_v63  ;;  %4580 = vmatprep.subr.bf16.mxu1 %v7816_v5 }
 0x1dc   :  { %4550 = vmatpush1.bf16.msra.mxu0 %v7817_v44  ;;  %4582 = vmatpush1.bf16.msra.mxu1 %v7818_v57  ;;  %v6752_v57 = vld [vmem:[#allocation14 + $0x10] sm:$0xff] }
 0x1dd   :  { %4584 = vmatprep.subr.bf16.mxu0 %v7819_v54  ;;  %4616 = vmatprep.subr.bf16.mxu1 %v7820_v20  ;;  %7823 = vst [vmem:[#allocation99_spill] sm:$0xff] %v6752_v57 }
 0x272   :  { %v677_v56 = vpop.f32.mrb[2].mxu0  ;;  %v748_v11 = vpop.f32.mrb[2].mxu1 }
 0x273   :  { %v753_v61 = vadd.f32 %v677_v56, %v6746_v49  ;;  %v679_v28 = vpop.f32.mrb[3].mxu0  ;;  %v750_v63 = vpop.f32.mrb[3].mxu1  ;;  %v755_v20 = vadd.f32 %v748_v11, %v6752_v57 }
 0x274   :  { %v754_v5 = vadd.f32 %v679_v28, %v6748_v19 }
 0x275   :  { %v4218_v21 = vmul.f32 -1.442695, %v753_v61  ;;  %v782_v61 = vld [vmem:[#allocation6 + $0x20] sm:$0xff] }
 0x276   :  { %v4219_v44 = vmul.f32 -1.442695, %v754_v5  ;;  %v783_v5 = vld [vmem:[#allocation6 + $0x28] sm:$0xff] }
 0x277   :  { %5856 = vpow2.f32 %v4218_v21 }
 0x278   :  { %5858 = vpow2.f32 %v4219_v44 }
 0x279   :  { %5860 = vtanh.f32 %v755_v20 }
 0x281   :  { %v5857_v54 = vpop.eup %5856 }
 0x282   :  { %v5859_v13 = vpop.eup %5858  ;;  %v760_v12 = vadd.f32 1.0, %v5857_v54 }
 0x283   :  { %v766_v2 = vadd.f32 1.0, %v5859_v13  ;;  %v5861_v56 = vpop.eup %5860  ;;  %v784_v13 = vld [vmem:[#allocation6 + $0x30] sm:$0xff] }
 0x284   :  { %5862 = vrcp.f32 %v760_v12  ;;  %v785_v12 = vld [vmem:[#allocation6 + $0x38] sm:$0xff] }
 0x285   :  { %5864 = vrcp.f32 %v766_v2 }
 0x28e   :  { %v5863_v49 = vpop.eup %5862 }
 0x28f   :  { %v5865_v60 = vpop.eup %5864  ;;  %v777_v59 = vmul.f32 %v5863_v49, %v5861_v56 }
 0x290   :  { %v776_v28 = vmul.f32 0.0, %v5865_v60 }
 0x292   :  { %v6755_v21 = vadd.f32 %v777_v59, %v776_v28  ;;  %v852_v44 = vpop.f32.mrb[4].mxu0  ;;  %v923_v19 = vpop.f32.mrb[4].mxu1 }
 0x293   :  { %v928_v53 = vadd.f32 %v852_v44, %v782_v61  ;;  %v854_v11 = vpop.f32.mrb[5].mxu0  ;;  %v925_v57 = vpop.f32.mrb[5].mxu1  ;;  %v930_v49 = vadd.f32 %v923_v19, %v784_v13  ;;  %v6761_v19 = vld [vmem:[#allocation14 + $0x18] sm:$0xff] }
 0x294   :  { %v929_v47 = vadd.f32 %v854_v11, %v783_v5  ;;  %v931_v2 = vadd.f32 %v925_v57, %v785_v12  ;;  %v7824_v11 = vld [vmem:[#allocation77_spill] sm:$0xff]  ;;  %v7825_v13 = vld [vmem:[#allocation78_spill] sm:$0xff] }
 0x295   :  { %v4221_v54 = vmul.f32 -1.442695, %v928_v53 }
 0x296   :  { %v4222_v20 = vmul.f32 -1.442695, %v929_v47  ;;  %v4223_v39 = vmul.f32 -1.442695, %v931_v2 }
 0x297   :  { %5866 = vpow2.f32 %v4221_v54 }
 0x298   :  { %5868 = vpow2.f32 %v4222_v20 }
 0x299   :  { %5870 = vpow2.f32 %v4223_v39  ;;  %v756_v39 = vadd.f32 %v750_v63, %v6761_v19  ;;  %v7829_v63 = vld [vmem:[#allocation82_spill] sm:$0xff] }
 0x29a   :  { %5872 = vtanh.f32 %v930_v49  ;;  %v7826_v49 = vld [vmem:[#allocation79_spill] sm:$0xff] }
 0x29b   :  { %v4220_v12 = vmul.f32 -1.442695, %v756_v39  ;;  %v7838_v39 = vld [vmem:[#allocation91_spill] sm:$0xff] }
 0x2a1   :  { %v5867_v60 = vpop.eup %5866 }
 0x2a2   :  { %v5869_v56 = vpop.eup %5868  ;;  %v935_v41 = vadd.f32 1.0, %v5867_v60  ;;  %v7827_v60 = vld [vmem:[#allocation80_spill] sm:$0xff] }
 0x2a3   :  { %v941_v59 = vadd.f32 1.0, %v5869_v56  ;;  %v5871_v28 = vpop.eup %5870  ;;  %v7828_v56 = vld [vmem:[#allocation81_spill] sm:$0xff] }
 0x2a4   :  { %5874 = vrcp.f32 %v935_v41  ;;  %v5873_v61 = vpop.eup %5872  ;;  %v948_v44 = vadd.f32 1.0, %v5871_v28  ;;  %v7831_v28 = vld [vmem:[#allocation84_spill] sm:$0xff] }
 0x2a5   :  { %5876 = vrcp.f32 %v941_v59  ;;  %v7830_v59 = vld [vmem:[#allocation83_spill] sm:$0xff] }
 0x2a6   :  { %5878 = vrcp.f32 %v948_v44  ;;  %v7836_v44 = vld [vmem:[#allocation89_spill] sm:$0xff] }
 0x2ae   :  { %v5875_v5 = vpop.eup %5874 }
 0x2af   :  { %v5877_v53 = vpop.eup %5876  ;;  %v952_v47 = vmul.f32 %v5875_v5, %v5873_v61  ;;  %v7832_v61 = vld [vmem:[#allocation85_spill] sm:$0xff]  ;;  %v7833_v5 = vld [vmem:[#allocation86_spill] sm:$0xff] }
 0x2b0   :  { %v951_v54 = vmul.f32 %v5877_v53, %v7824_v11  ;;  %v5879_v20 = vpop.eup %5878  ;;  %v7834_v53 = vld [vmem:[#allocation87_spill] sm:$0xff] }
 0x2b2   :  { %v6758_v57 = vadd.f32 %v952_v47, %v951_v54  ;;  %v7835_v47 = vld [vmem:[#allocation88_spill] sm:$0xff]  ;;  %v7837_v54 = vld [vmem:[#allocation90_spill] sm:$0xff] }
 0x2b4   :  { %5880 = vtanh.f32 %v6758_v57 }
 0x2b5   :  { %5882 = vpow2.f32 %v4220_v12 }
 0x2b6   :  { %5884 = vtanh.f32 %v6755_v21 }
 0x2be   :  { %v5881_v41 = vpop.eup %5880 }
 0x2bf   :  { %v6764_v2 = vmul.f32 %v5881_v41, %v5879_v20  ;;  %v5883_v11 = vpop.eup %5882  ;;  %v7839_v20 = vld [vmem:[#allocation92_spill] sm:$0xff]  ;;  %v7840_v41 = vld [vmem:[#allocation93_spill] sm:$0xff] }
 0x2c0   :  { %v773_v12 = vadd.f32 1.0, %v5883_v11  ;;  %v5885_v11 = vpop.eup %5884 }
 0x2c1   :  { %1021 = vmatmul.mubr.f32.vlgmr.msra.gmra.mrb[6].mxu0 %v6764_v2  ;;  %1092 = vmatmul.mubr.f32.vlgmr.msra.gmra.mrb[6].mxu1 %v6764_v2 }
 0x2c2   :  { %4586 = vmatpush1.bf16.msra.mxu0 %v7825_v13  ;;  %4618 = vmatpush1.bf16.msra.mxu1 %v7826_v49  ;;  %5886 = vrcp.f32 %v773_v12 }
 0x2c3   :  { %4588 = vmatprep.subr.bf16.mxu0 %v7827_v60  ;;  %4620 = vmatprep.subr.bf16.mxu1 %v7828_v56 }
 0x2c4   :  { %1162 = vmatprep.mubr.f32.mxu0 %v7783_v34  ;;  %1233 = vmatprep.mubr.f32.mxu1 %v7783_v34 }
 0x2c6   :  { %4590 = vmatpush1.bf16.msra.mxu0 %v7829_v63  ;;  %4622 = vmatpush1.bf16.msra.mxu1 %v7830_v59 }
 0x2c7   :  { %4592 = vmatprep.subr.bf16.mxu0 %v7831_v28  ;;  %4624 = vmatprep.subr.bf16.mxu1 %v7832_v61  ;;  %v7841_v61 = vld [vmem:[#allocation94_spill] sm:$0xff] }
 0x2ca   :  { %4594 = vmatpush1.bf16.msra.mxu0 %v7833_v5  ;;  %4626 = vmatpush1.bf16.msra.mxu1 %v7834_v53  ;;  %v7842_v5 = vld [vmem:[#allocation95_spill] sm:$0xff] }
 0x2cb   :  { %4596 = vmatprep.subr.bf16.mxu0 %v7835_v47  ;;  %4628 = vmatprep.subr.bf16.mxu1 %v7836_v44 }
 0x2ce   :  { %4598 = vmatpush1.bf16.msra.mxu0 %v7837_v54  ;;  %4630 = vmatpush1.bf16.msra.mxu1 %v7838_v39 }
 0x2cf   :  { %4600 = vmatprep.subr.bf16.mxu0 %v7839_v20  ;;  %4632 = vmatprep.subr.bf16.mxu1 %v7840_v41 }
 0x2d2   :  { %4602 = vmatpush1.bf16.msra.mxu0 %v7841_v61  ;;  %4634 = vmatpush1.bf16.msra.mxu1 %v7842_v5 }
 0x2d3   :  { %4604 = vmatprep.subr.bf16.mxu0 %v6634_v36  ;;  %4636 = vmatprep.subr.bf16.mxu1 %v6636_v6  ;;  %v5887_v36 = vpop.eup %5886 }
 0x2d4   :  { %v780_v12 = vmul.f32 %v5887_v36, %v5885_v11  ;;  %v7843_v36 = vld [vmem:[#allocation41_spill] sm:$0xff]  ;;  %v7844_v11 = vld [vmem:[#allocation39_spill] sm:$0xff] }
 0x2d6   :  { %4606 = vmatpush1.bf16.msra.mxu0 %v6640_v23  ;;  %4638 = vmatpush1.bf16.msra.mxu1 %v6642_v0 }
 0x2d7   :  { %4608 = vmatprep.subr.bf16.mxu0 %v6646_v35  ;;  %4640 = vmatprep.subr.bf16.mxu1 %v6648_v51 }
 0x2da   :  { %4610 = vmatpush1.bf16.msra.mxu0 %v6652_v50  ;;  %4642 = vmatpush1.bf16.msra.mxu1 %v6654_v16 }
 0x2db   :  { %4612 = vmatprep.subr.bf16.mxu0 %v6658_v3  ;;  %4644 = vmatprep.subr.bf16.mxu1 %v6660_v29 }
 0x2de   :  { %4614 = vmatpush1.bf16.msra.mxu0 %v6664_v43  ;;  %4646 = vmatpush1.bf16.msra.mxu1 %v6666_v38 }
 0x2df   :  { %4648 = vmatprep.subr.bf16.mxu0 %v6371_v4  ;;  %4680 = vmatprep.subr.bf16.mxu1 %v6384_v22 }
 0x2e1   :  { %1163 = vmatmul.mubr.f32.vlgmr.msra.gmra.mrb[6].mxu0 %v780_v12  ;;  %1234 = vmatmul.mubr.f32.vlgmr.msra.gmra.mrb[6].mxu1 %v780_v12  ;;  %v7845_v12 = vld [vmem:[#allocation42_spill] sm:$0xff] }
 0x2e2   :  { %4650 = vmatpush1.bf16.msra.mxu0 %v6373_v8  ;;  %4682 = vmatpush1.bf16.msra.mxu1 %v6386_v25 }
 0x2e3   :  { %4652 = vmatprep.subr.bf16.mxu0 %v6375_v9  ;;  %4684 = vmatprep.subr.bf16.mxu1 %v6396_v33 }
 0x2e4   :  { %1337 = vmatprep.mubr.f32.mxu0 %v7783_v34  ;;  %1408 = vmatprep.mubr.f32.mxu1 %v7783_v34 }
 0x2e6   :  { %4654 = vmatpush1.bf16.msra.mxu0 %v6379_v14  ;;  %4686 = vmatpush1.bf16.msra.mxu1 %v6398_v37 }
 0x2e7   :  { %4656 = vmatprep.subr.bf16.mxu0 %v6382_v17  ;;  %4688 = vmatprep.subr.bf16.mxu1 %v6404_v45 }
 0x2ea   :  { %4658 = vmatpush1.bf16.msra.mxu0 %v6389_v26  ;;  %4690 = vmatpush1.bf16.msra.mxu1 %v6410_v48 }
 0x2eb   :  { %4660 = vmatprep.subr.bf16.mxu0 %v6393_v30  ;;  %4692 = vmatprep.subr.bf16.mxu1 %v6413_v52  ;;  %v1271_v52 = vld [vmem:[#allocation6 + $0x50] sm:$0xff] }
 0x2ee   :  { %4662 = vmatpush1.bf16.msra.mxu0 %v6402_v42  ;;  %4694 = vmatpush1.bf16.msra.mxu1 %v6422_v62 }
 0x2ef   :  { %4664 = vmatprep.subr.bf16.mxu0 %v6407_v46  ;;  %4696 = vmatprep.subr.bf16.mxu1 %v6425_v1 }
 0x2f2   :  { %4666 = vmatpush1.bf16.msra.mxu0 %v6416_v55  ;;  %4698 = vmatpush1.bf16.msra.mxu1 %v6434_v15  ;;  %v7881_v15 = vld [vmem:[#allocation98_spill] sm:$0xff] }
 0x2f3   :  { %4668 = vmatprep.subr.bf16.mxu0 %v6419_v58  ;;  %4700 = vmatprep.subr.bf16.mxu1 %v6437_v18  ;;  %v7846_v18 = vld [vmem:[#allocation43_spill] sm:$0xff] }
 0x2f6   :  { %4670 = vmatpush1.bf16.msra.mxu0 %v6428_v7  ;;  %4702 = vmatpush1.bf16.msra.mxu1 %v6446_v31  ;;  %v7847_v7 = vld [vmem:[#allocation44_spill] sm:$0xff]  ;;  %v7880_v31 = vld [vmem:[#allocation97_spill] sm:$0xff] }
 0x2f7   :  { %4672 = vmatprep.subr.bf16.mxu0 %v6431_v10  ;;  %4704 = vmatprep.subr.bf16.mxu1 %v6449_v32  ;;  %v7848_v32 = vld [vmem:[#allocation45_spill] sm:$0xff]  ;;  %v7862_v10 = vld [vmem:[#allocation59_spill] sm:$0xff] }
 0x2fa   :  { %4674 = vmatpush1.bf16.msra.mxu0 %v6440_v24  ;;  %4706 = vmatpush1.bf16.msra.mxu1 %v6456_v40  ;;  %v7849_v24 = vld [vmem:[#allocation46_spill] sm:$0xff]  ;;  %v7850_v40 = vld [vmem:[#allocation47_spill] sm:$0xff] }
 0x2fb   :  { %4676 = vmatprep.subr.bf16.mxu0 %v6443_v27  ;;  %4708 = vmatprep.subr.bf16.mxu1 %v7843_v36  ;;  %v7851_v27 = vld [vmem:[#allocation48_spill] sm:$0xff]  ;;  %v7861_v36 = vld [vmem:[#allocation58_spill] sm:$0xff] }
 0x2fe   :  { %4678 = vmatpush1.bf16.msra.mxu0 %v7844_v11  ;;  %4710 = vmatpush1.bf16.msra.mxu1 %v7845_v12  ;;  %v7852_v12 = vld [vmem:[#allocation49_spill] sm:$0xff]  ;;  %v7855_v11 = vld [vmem:[#allocation52_spill] sm:$0xff] }
 0x2ff   :  { %4712 = vmatprep.subr.bf16.mxu0 %v7846_v18  ;;  %4744 = vmatprep.subr.bf16.mxu1 %v7847_v7  ;;  %v7853_v18 = vld [vmem:[#allocation50_spill] sm:$0xff]  ;;  %v7854_v7 = vld [vmem:[#allocation51_spill] sm:$0xff] }
 0x301   :  { %1338 = vmatmul.mubr.f32.vlgmr.msra.gmra.mrb[8].mxu0 %v6764_v2  ;;  %1409 = vmatmul.mubr.f32.vlgmr.msra.gmra.mrb[8].mxu1 %v6764_v2  ;;  %v7856_v2 = vld [vmem:[#allocation53_spill] sm:$0xff] }
 0x302   :  { %4714 = vmatpush1.bf16.msra.mxu0 %v7848_v32  ;;  %4746 = vmatpush1.bf16.msra.mxu1 %v7849_v24  ;;  %v7857_v32 = vld [vmem:[#allocation54_spill] sm:$0xff]  ;;  %v7858_v24 = vld [vmem:[#allocation55_spill] sm:$0xff] }
 0x303   :  { %4716 = vmatprep.subr.bf16.mxu0 %v7850_v40  ;;  %4748 = vmatprep.subr.bf16.mxu1 %v7851_v27  ;;  %v7859_v40 = vld [vmem:[#allocation56_spill] sm:$0xff]  ;;  %v7860_v27 = vld [vmem:[#allocation57_spill] sm:$0xff] }
 0x304   :  { %1507 = vmatprep.mubr.f32.mxu0 %v7783_v34  ;;  %1578 = vmatprep.mubr.f32.mxu1 %v7783_v34 }
 0x306   :  { %4718 = vmatpush1.bf16.msra.mxu0 %v7852_v12  ;;  %4750 = vmatpush1.bf16.msra.mxu1 %v7853_v18  ;;  %v7863_v12 = vld [vmem:[#allocation60_spill] sm:$0xff]  ;;  %v7864_v18 = vld [vmem:[#allocation61_spill] sm:$0xff] }
 0x307   :  { %4720 = vmatprep.subr.bf16.mxu0 %v7854_v7  ;;  %4752 = vmatprep.subr.bf16.mxu1 %v7855_v11  ;;  %v7865_v7 = vld [vmem:[#allocation62_spill] sm:$0xff]  ;;  %v7866_v11 = vld [vmem:[#allocation63_spill] sm:$0xff] }
 0x30a   :  { %4722 = vmatpush1.bf16.msra.mxu0 %v7856_v2  ;;  %4754 = vmatpush1.bf16.msra.mxu1 %v7857_v32  ;;  %v7867_v2 = vld [vmem:[#allocation64_spill] sm:$0xff]  ;;  %v7868_v32 = vld [vmem:[#allocation65_spill] sm:$0xff] }
 0x30b   :  { %4724 = vmatprep.subr.bf16.mxu0 %v7858_v24  ;;  %4756 = vmatprep.subr.bf16.mxu1 %v7859_v40  ;;  %v7869_v24 = vld [vmem:[#allocation66_spill] sm:$0xff]  ;;  %v7870_v40 = vld [vmem:[#allocation67_spill] sm:$0xff] }
 0x30e   :  { %4726 = vmatpush1.bf16.msra.mxu0 %v7860_v27  ;;  %4758 = vmatpush1.bf16.msra.mxu1 %v7861_v36  ;;  %v7871_v27 = vld [vmem:[#allocation68_spill] sm:$0xff]  ;;  %v7872_v36 = vld [vmem:[#allocation69_spill] sm:$0xff] }
 0x30f   :  { %4728 = vmatprep.subr.bf16.mxu0 %v7862_v10  ;;  %4760 = vmatprep.subr.bf16.mxu1 %v7863_v12  ;;  %v7873_v10 = vld [vmem:[#allocation70_spill] sm:$0xff]  ;;  %v7874_v12 = vld [vmem:[#allocation71_spill] sm:$0xff] }
 0x312   :  { %4730 = vmatpush1.bf16.msra.mxu0 %v7864_v18  ;;  %4762 = vmatpush1.bf16.msra.mxu1 %v7865_v7  ;;  %v7875_v18 = vld [vmem:[#allocation72_spill] sm:$0xff]  ;;  %v7876_v7 = vld [vmem:[#allocation73_spill] sm:$0xff] }
 0x313   :  { %4732 = vmatprep.subr.bf16.mxu0 %v7866_v11  ;;  %4764 = vmatprep.subr.bf16.mxu1 %v7867_v2  ;;  %v7877_v11 = vld [vmem:[#allocation74_spill] sm:$0xff]  ;;  %v7878_v2 = vld [vmem:[#allocation75_spill] sm:$0xff] }
 0x316   :  { %4734 = vmatpush1.bf16.msra.mxu0 %v7868_v32  ;;  %4766 = vmatpush1.bf16.msra.mxu1 %v7869_v24  ;;  %v7879_v32 = vld [vmem:[#allocation76_spill] sm:$0xff] }
 0x317   :  { %4736 = vmatprep.subr.bf16.mxu0 %v7870_v40  ;;  %4768 = vmatprep.subr.bf16.mxu1 %v7871_v27 }
 0x31a   :  { %4738 = vmatpush1.bf16.msra.mxu0 %v7872_v36  ;;  %4770 = vmatpush1.bf16.msra.mxu1 %v7873_v10 }
 0x31b   :  { %4740 = vmatprep.subr.bf16.mxu0 %v7874_v12  ;;  %4772 = vmatprep.subr.bf16.mxu1 %v7875_v18  ;;  %v7882_v18 = vld [vmem:[#allocation99_spill] sm:$0xff] }
 0x31e   :  { %4742 = vmatpush1.bf16.msra.mxu0 %v7876_v7  ;;  %4774 = vmatpush1.bf16.msra.mxu1 %v7877_v11 }
 0x31f   :  { %4776 = vmatprep.subr.bf16.mxu0 %v7878_v2  ;;  %4808 = vmatprep.subr.bf16.mxu1 %v7879_v32 }
 0x3b4   :  { %v1164_v24 = vpop.f32.mrb[6].mxu0  ;;  %v1235_v40 = vpop.f32.mrb[6].mxu1 }
 0x3b5   :  { %v1240_v27 = vadd.f32 %v1164_v24, %v7880_v31  ;;  %v1166_v58 = vpop.f32.mrb[7].mxu0  ;;  %v1237_v36 = vpop.f32.mrb[7].mxu1  ;;  %v1242_v7 = vadd.f32 %v1235_v40, %v7882_v18 }
 0x3b6   :  { %v1241_v10 = vadd.f32 %v1166_v58, %v7881_v15  ;;  %v1269_v58 = vld [vmem:[#allocation6 + $0x40] sm:$0xff] }
 0x3b7   :  { %v4224_v55 = vmul.f32 -1.442695, %v1240_v27  ;;  %v1270_v27 = vld [vmem:[#allocation6 + $0x48] sm:$0xff] }
 0x3b8   :  { %v4225_v12 = vmul.f32 -1.442695, %v1241_v10 }
 0x3b9   :  { %5888 = vpow2.f32 %v4224_v55 }
 0x3ba   :  { %5890 = vpow2.f32 %v4225_v12 }
 0x3bb   :  { %5892 = vtanh.f32 %v1242_v7 }
 0x3c3   :  { %v5889_v1 = vpop.eup %5888 }
 0x3c4   :  { %v5891_v11 = vpop.eup %5890  ;;  %v1247_v46 = vadd.f32 1.0, %v5889_v1 }
 0x3c5   :  { %v1253_v2 = vadd.f32 1.0, %v5891_v11  ;;  %v5893_v32 = vpop.eup %5892 }
 0x3c6   :  { %5894 = vrcp.f32 %v1247_v46  ;;  %v1272_v46 = vld [vmem:[#allocation6 + $0x58] sm:$0xff] }
 0x3c7   :  { %5896 = vrcp.f32 %v1253_v2 }
 0x3d0   :  { %v5895_v62 = vpop.eup %5894 }
 0x3d1   :  { %v5897_v24 = vpop.eup %5896  ;;  %v1264_v31 = vmul.f32 %v5895_v62, %v5893_v32 }
 0x3d2   :  { %v1263_v42 = vmul.f32 %v5897_v24, %v6755_v21 }
 0x3d4   :  { %v6877_v10 = vadd.f32 %v1264_v31, %v1263_v42  ;;  %v1339_v55 = vpop.f32.mrb[8].mxu0  ;;  %v1410_v12 = vpop.f32.mrb[8].mxu1 }
 0x3d5   :  { %v1415_v40 = vadd.f32 %v1339_v55, %v1269_v58  ;;  %v1341_v18 = vpop.f32.mrb[9].mxu0  ;;  %v1412_v15 = vpop.f32.mrb[9].mxu1  ;;  %v1417_v32 = vadd.f32 %v1410_v12, %v1271_v52  ;;  %v1243_v52 = vadd.f32 %v1237_v36, %v6761_v19  ;;  %v7884_v36 = vld [vmem:[#allocation86_spill] sm:$0xff] }
 0x3d6   :  { %v1416_v1 = vadd.f32 %v1341_v18, %v1270_v27  ;;  %v1418_v2 = vadd.f32 %v1412_v15, %v1272_v46 }
 0x3d7   :  { %v4227_v7 = vmul.f32 -1.442695, %v1415_v40 }
 0x3d8   :  { %v4228_v11 = vmul.f32 -1.442695, %v1416_v1  ;;  %v4229_v62 = vmul.f32 -1.442695, %v1418_v2 }
 0x3d9   :  { %5898 = vpow2.f32 %v4227_v7 }
 0x3da   :  { %5900 = vpow2.f32 %v4228_v11  ;;  %v4226_v11 = vmul.f32 -1.442695, %v1243_v52  ;;  %v7894_v52 = vld [vmem:[#allocation28_spill] sm:$0xff] }
 0x3db   :  { %5902 = vpow2.f32 %v4229_v62  ;;  %v7885_v62 = vld [vmem:[#allocation96_spill] sm:$0xff] }
 0x3dc   :  { %5904 = vtanh.f32 %v1417_v32 }
 0x3e3   :  { %v5899_v21 = vpop.eup %5898 }
 0x3e4   :  { %v5901_v24 = vpop.eup %5900  ;;  %v1422_v30 = vadd.f32 1.0, %v5899_v21 }
 0x3e5   :  { %v1428_v42 = vadd.f32 1.0, %v5901_v24  ;;  %v5903_v31 = vpop.eup %5902 }
 0x3e6   :  { %5906 = vrcp.f32 %v1422_v30  ;;  %v5905_v58 = vpop.eup %5904  ;;  %v1435_v40 = vadd.f32 1.0, %v5903_v31  ;;  %v7887_v31 = vld [vmem:[#allocation26_spill] sm:$0xff] }
 0x3e7   :  { %5908 = vrcp.f32 %v1428_v42  ;;  %v7886_v42 = vld [vmem:[#allocation21_spill] sm:$0xff] }
 0x3e8   :  { %5910 = vrcp.f32 %v1435_v40  ;;  %v7892_v40 = vld [vmem:[#allocation27_spill] sm:$0xff] }
 0x3f0   :  { %v5907_v18 = vpop.eup %5906 }
 0x3f1   :  { %v5909_v27 = vpop.eup %5908  ;;  %v1439_v55 = vmul.f32 %v5907_v18, %v5905_v58  ;;  %v7888_v58 = vld [vmem:[#allocation22_spill] sm:$0xff]  ;;  %v7889_v18 = vld [vmem:[#allocation29_spill] sm:$0xff] }
 0x3f2   :  { %v1438_v1 = vmul.f32 %v5909_v27, %v6758_v57  ;;  %v5911_v12 = vpop.eup %5910  ;;  %v7883_v57 = vld [vmem:[#allocation85_spill] sm:$0xff]  ;;  %v7890_v27 = vld [vmem:[#allocation24_spill] sm:$0xff] }
 0x3f4   :  { %v6880_v15 = vadd.f32 %v1439_v55, %v1438_v1  ;;  %v7891_v55 = vld [vmem:[#allocation30_spill] sm:$0xff]  ;;  %v7893_v1 = vld [vmem:[#allocation33_spill] sm:$0xff] }
 0x3f6   :  { %5912 = vtanh.f32 %v6880_v15 }
 0x3f7   :  { %5914 = vpow2.f32 %v4226_v11  ;;  %v7897_v11 = vld [vmem:[#allocation37_spill] sm:$0xff] }
 0x3f8   :  { %5916 = vtanh.f32 %v6877_v10 }
 0x400   :  { %v5913_v7 = vpop.eup %5912 }
 0x401   :  { %v6884_v30 = vmul.f32 %v5913_v7, %v5911_v12  ;;  %v5915_v46 = vpop.eup %5914  ;;  %v7895_v12 = vld [vmem:[#allocation34_spill] sm:$0xff]  ;;  %v7896_v7 = vld [vmem:[#allocation31_spill] sm:$0xff] }
 0x402   :  { %v1260_v2 = vadd.f32 1.0, %v5915_v46  ;;  %v5917_v32 = vpop.eup %5916  ;;  %v7898_v46 = vld [vmem:[#allocation32_spill] sm:$0xff] }
 0x403   :  { %1508 = vmatmul.mubr.f32.vlgmr.msra.gmra.mrb[10].mxu0 %v6884_v30  ;;  %1579 = vmatmul.mubr.f32.vlgmr.msra.gmra.mrb[10].mxu1 %v6884_v30 }
 0x404   :  { %4778 = vmatpush1.bf16.msra.mxu0 %v7825_v13  ;;  %4810 = vmatpush1.bf16.msra.mxu1 %v7826_v49  ;;  %5918 = vrcp.f32 %v1260_v2  ;;  %v7899_v2 = vld [vmem:[#allocation38_spill] sm:$0xff] }
 0x405   :  { %4780 = vmatprep.subr.bf16.mxu0 %v7827_v60  ;;  %4812 = vmatprep.subr.bf16.mxu1 %v7828_v56 }
 0x406   :  { %1649 = vmatprep.mubr.f32.mxu0 %v7783_v34  ;;  %1720 = vmatprep.mubr.f32.mxu1 %v7783_v34 }
 0x408   :  { %4782 = vmatpush1.bf16.msra.mxu0 %v7829_v63  ;;  %4814 = vmatpush1.bf16.msra.mxu1 %v7830_v59 }
 0x409   :  { %4784 = vmatprep.subr.bf16.mxu0 %v7831_v28  ;;  %4816 = vmatprep.subr.bf16.mxu1 %v7883_v57 }
 0x40c   :  { %4786 = vmatpush1.bf16.msra.mxu0 %v7884_v36  ;;  %4818 = vmatpush1.bf16.msra.mxu1 %v7834_v53 }
 0x40d   :  { %4788 = vmatprep.subr.bf16.mxu0 %v7835_v47  ;;  %4820 = vmatprep.subr.bf16.mxu1 %v7836_v44 }
 0x40e   :  { %v5919_v21 = vpop.eup %5918 }
 0x40f   :  { %v1267_v24 = vmul.f32 %v5919_v21, %v5917_v32  ;;  %v7900_v32 = vld [vmem:[#allocation35_spill] sm:$0xff]  ;;  %v7901_v21 = vld [vmem:[#allocation40_spill] sm:$0xff] }
 0x410   :  { %4790 = vmatpush1.bf16.msra.mxu0 %v7837_v54  ;;  %4822 = vmatpush1.bf16.msra.mxu1 %v7838_v39 }
 0x411   :  { %4792 = vmatprep.subr.bf16.mxu0 %v7839_v20  ;;  %4824 = vmatprep.subr.bf16.mxu1 %v7840_v41 }
 0x414   :  { %4794 = vmatpush1.bf16.msra.mxu0 %v7841_v61  ;;  %4826 = vmatpush1.bf16.msra.mxu1 %v7842_v5 }
 0x415   :  { %4796 = vmatprep.subr.bf16.mxu0 %v7885_v62  ;;  %4828 = vmatprep.subr.bf16.mxu1 %v6636_v6 }
 0x418   :  { %4798 = vmatpush1.bf16.msra.mxu0 %v6640_v23  ;;  %4830 = vmatpush1.bf16.msra.mxu1 %v6642_v0 }
 0x419   :  { %4800 = vmatprep.subr.bf16.mxu0 %v6646_v35  ;;  %4832 = vmatprep.subr.bf16.mxu1 %v6648_v51 }
 0x41c   :  { %4802 = vmatpush1.bf16.msra.mxu0 %v6652_v50  ;;  %4834 = vmatpush1.bf16.msra.mxu1 %v6654_v16 }
 0x41d   :  { %4804 = vmatprep.subr.bf16.mxu0 %v6658_v3  ;;  %4836 = vmatprep.subr.bf16.mxu1 %v6660_v29 }
 0x420   :  { %4806 = vmatpush1.bf16.msra.mxu0 %v6664_v43  ;;  %4838 = vmatpush1.bf16.msra.mxu1 %v6666_v38 }
 0x421   :  { %4840 = vmatprep.subr.bf16.mxu0 %v6371_v4  ;;  %4872 = vmatprep.subr.bf16.mxu1 %v6384_v22 }
 0x423   :  { %1650 = vmatmul.mubr.f32.vlgmr.msra.gmra.mrb[10].mxu0 %v1267_v24  ;;  %1721 = vmatmul.mubr.f32.vlgmr.msra.gmra.mrb[10].mxu1 %v1267_v24  ;;  %v7902_v24 = vld [vmem:[#allocation36_spill] sm:$0xff] }
 0x424   :  { %4842 = vmatpush1.bf16.msra.mxu0 %v6373_v8  ;;  %4874 = vmatpush1.bf16.msra.mxu1 %v6386_v25 }
 0x425   :  { %4844 = vmatprep.subr.bf16.mxu0 %v6375_v9  ;;  %4876 = vmatprep.subr.bf16.mxu1 %v6396_v33 }
 0x426   :  { %1824 = vmatprep.mubr.f32.mxu0 %v7783_v34  ;;  %1895 = vmatprep.mubr.f32.mxu1 %v7783_v34 }
 0x428   :  { %4846 = vmatpush1.bf16.msra.mxu0 %v6379_v14  ;;  %4878 = vmatpush1.bf16.msra.mxu1 %v6398_v37 }
 0x429   :  { %4848 = vmatprep.subr.bf16.mxu0 %v6382_v17  ;;  %4880 = vmatprep.subr.bf16.mxu1 %v6404_v45 }
 0x42c   :  { %4850 = vmatpush1.bf16.msra.mxu0 %v6389_v26  ;;  %4882 = vmatpush1.bf16.msra.mxu1 %v6410_v48  ;;  %v1758_v26 = vld [vmem:[#allocation6 + $0x70] sm:$0xff] }
 0x42d   :  { %4852 = vmatprep.subr.bf16.mxu0 %v7886_v42  ;;  %4884 = vmatprep.subr.bf16.mxu1 %v7887_v31 }
 0x430   :  { %4854 = vmatpush1.bf16.msra.mxu0 %v7888_v58  ;;  %4886 = vmatpush1.bf16.msra.mxu1 %v7889_v18 }
 0x431   :  { %4856 = vmatprep.subr.bf16.mxu0 %v7890_v27  ;;  %4888 = vmatprep.subr.bf16.mxu1 %v7891_v55  ;;  %v7941_v27 = vld [vmem:[#allocation98_spill] sm:$0xff] }
 0x434   :  { %4858 = vmatpush1.bf16.msra.mxu0 %v7892_v40  ;;  %4890 = vmatpush1.bf16.msra.mxu1 %v7893_v1  ;;  %v7903_v40 = vld [vmem:[#allocation41_spill] sm:$0xff]  ;;  %v7904_v1 = vld [vmem:[#allocation39_spill] sm:$0xff] }
 0x435   :  { %4860 = vmatprep.subr.bf16.mxu0 %v7894_v52  ;;  %4892 = vmatprep.subr.bf16.mxu1 %v7895_v12  ;;  %v7905_v52 = vld [vmem:[#allocation42_spill] sm:$0xff]  ;;  %v7906_v12 = vld [vmem:[#allocation43_spill] sm:$0xff] }
 0x438   :  { %4862 = vmatpush1.bf16.msra.mxu0 %v7896_v7  ;;  %4894 = vmatpush1.bf16.msra.mxu1 %v7897_v11  ;;  %v7907_v7 = vld [vmem:[#allocation44_spill] sm:$0xff]  ;;  %v7940_v11 = vld [vmem:[#allocation97_spill] sm:$0xff] }
 0x439   :  { %4864 = vmatprep.subr.bf16.mxu0 %v7898_v46  ;;  %4896 = vmatprep.subr.bf16.mxu1 %v7899_v2  ;;  %v7908_v2 = vld [vmem:[#allocation45_spill] sm:$0xff]  ;;  %v7922_v46 = vld [vmem:[#allocation59_spill] sm:$0xff] }
 0x43c   :  { %4866 = vmatpush1.bf16.msra.mxu0 %v7900_v32  ;;  %4898 = vmatpush1.bf16.msra.mxu1 %v7901_v21  ;;  %v7909_v32 = vld [vmem:[#allocation46_spill] sm:$0xff]  ;;  %v7910_v21 = vld [vmem:[#allocation47_spill] sm:$0xff] }
 0x43d   :  { %4868 = vmatprep.subr.bf16.mxu0 %v7902_v24  ;;  %4900 = vmatprep.subr.bf16.mxu1 %v7903_v40  ;;  %v7911_v24 = vld [vmem:[#allocation48_spill] sm:$0xff]  ;;  %v7921_v40 = vld [vmem:[#allocation58_spill] sm:$0xff] }
 0x440   :  { %4870 = vmatpush1.bf16.msra.mxu0 %v7904_v1  ;;  %4902 = vmatpush1.bf16.msra.mxu1 %v7905_v52  ;;  %v7912_v52 = vld [vmem:[#allocation49_spill] sm:$0xff]  ;;  %v7915_v1 = vld [vmem:[#allocation52_spill] sm:$0xff] }
 0x441   :  { %4904 = vmatprep.subr.bf16.mxu0 %v7906_v12  ;;  %4936 = vmatprep.subr.bf16.mxu1 %v7907_v7  ;;  %v7913_v12 = vld [vmem:[#allocation50_spill] sm:$0xff]  ;;  %v7914_v7 = vld [vmem:[#allocation51_spill] sm:$0xff] }
 0x443   :  { %1825 = vmatmul.mubr.f32.vlgmr.msra.gmra.mrb[12].mxu0 %v6884_v30  ;;  %1896 = vmatmul.mubr.f32.vlgmr.msra.gmra.mrb[12].mxu1 %v6884_v30  ;;  %v7916_v30 = vld [vmem:[#allocation53_spill] sm:$0xff] }
 0x444   :  { %4906 = vmatpush1.bf16.msra.mxu0 %v7908_v2  ;;  %4938 = vmatpush1.bf16.msra.mxu1 %v7909_v32  ;;  %v7917_v2 = vld [vmem:[#allocation54_spill] sm:$0xff]  ;;  %v7918_v32 = vld [vmem:[#allocation55_spill] sm:$0xff] }
 0x445   :  { %4908 = vmatprep.subr.bf16.mxu0 %v7910_v21  ;;  %4940 = vmatprep.subr.bf16.mxu1 %v7911_v24  ;;  %v7919_v21 = vld [vmem:[#allocation56_spill] sm:$0xff]  ;;  %v7920_v24 = vld [vmem:[#allocation57_spill] sm:$0xff] }
 0x446   :  { %1994 = vmatprep.mubr.f32.mxu0 %v7783_v34  ;;  %2065 = vmatprep.mubr.f32.mxu1 %v7783_v34 }
 0x448   :  { %4910 = vmatpush1.bf16.msra.mxu0 %v7912_v52  ;;  %4942 = vmatpush1.bf16.msra.mxu1 %v7913_v12  ;;  %v7923_v52 = vld [vmem:[#allocation60_spill] sm:$0xff]  ;;  %v7924_v12 = vld [vmem:[#allocation61_spill] sm:$0xff] }
 0x449   :  { %4912 = vmatprep.subr.bf16.mxu0 %v7914_v7  ;;  %4944 = vmatprep.subr.bf16.mxu1 %v7915_v1  ;;  %v7925_v7 = vld [vmem:[#allocation62_spill] sm:$0xff]  ;;  %v7926_v1 = vld [vmem:[#allocation63_spill] sm:$0xff] }
 0x44c   :  { %4914 = vmatpush1.bf16.msra.mxu0 %v7916_v30  ;;  %4946 = vmatpush1.bf16.msra.mxu1 %v7917_v2  ;;  %v7927_v30 = vld [vmem:[#allocation64_spill] sm:$0xff]  ;;  %v7928_v2 = vld [vmem:[#allocation65_spill] sm:$0xff] }
 0x44d   :  { %4916 = vmatprep.subr.bf16.mxu0 %v7918_v32  ;;  %4948 = vmatprep.subr.bf16.mxu1 %v7919_v21  ;;  %v7929_v32 = vld [vmem:[#allocation66_spill] sm:$0xff]  ;;  %v7930_v21 = vld [vmem:[#allocation67_spill] sm:$0xff] }
 0x450   :  { %4918 = vmatpush1.bf16.msra.mxu0 %v7920_v24  ;;  %4950 = vmatpush1.bf16.msra.mxu1 %v7921_v40  ;;  %v7931_v24 = vld [vmem:[#allocation68_spill] sm:$0xff]  ;;  %v7932_v40 = vld [vmem:[#allocation69_spill] sm:$0xff] }
 0x451   :  { %4920 = vmatprep.subr.bf16.mxu0 %v7922_v46  ;;  %4952 = vmatprep.subr.bf16.mxu1 %v7923_v52  ;;  %v7933_v46 = vld [vmem:[#allocation70_spill] sm:$0xff]  ;;  %v7934_v52 = vld [vmem:[#allocation71_spill] sm:$0xff] }
 0x454   :  { %4922 = vmatpush1.bf16.msra.mxu0 %v7924_v12  ;;  %4954 = vmatpush1.bf16.msra.mxu1 %v7925_v7  ;;  %v7935_v12 = vld [vmem:[#allocation72_spill] sm:$0xff]  ;;  %v7936_v7 = vld [vmem:[#allocation73_spill] sm:$0xff] }
 0x455   :  { %4924 = vmatprep.subr.bf16.mxu0 %v7926_v1  ;;  %4956 = vmatprep.subr.bf16.mxu1 %v7927_v30  ;;  %v7937_v1 = vld [vmem:[#allocation74_spill] sm:$0xff]  ;;  %v7938_v30 = vld [vmem:[#allocation75_spill] sm:$0xff] }
 0x458   :  { %4926 = vmatpush1.bf16.msra.mxu0 %v7928_v2  ;;  %4958 = vmatpush1.bf16.msra.mxu1 %v7929_v32  ;;  %v7939_v2 = vld [vmem:[#allocation76_spill] sm:$0xff] }
 0x459   :  { %4928 = vmatprep.subr.bf16.mxu0 %v7930_v21  ;;  %4960 = vmatprep.subr.bf16.mxu1 %v7931_v24 }
 0x45c   :  { %4930 = vmatpush1.bf16.msra.mxu0 %v7932_v40  ;;  %4962 = vmatpush1.bf16.msra.mxu1 %v7933_v46 }
 0x45d   :  { %4932 = vmatprep.subr.bf16.mxu0 %v7934_v52  ;;  %4964 = vmatprep.subr.bf16.mxu1 %v7935_v12  ;;  %v7942_v12 = vld [vmem:[#allocation99_spill] sm:$0xff] }
 0x460   :  { %4934 = vmatpush1.bf16.msra.mxu0 %v7936_v7  ;;  %4966 = vmatpush1.bf16.msra.mxu1 %v7937_v1 }
 0x461   :  { %4968 = vmatprep.subr.bf16.mxu0 %v7938_v30  ;;  %5000 = vmatprep.subr.bf16.mxu1 %v7939_v2 }
 0x4f6   :  { %v1651_v32 = vpop.f32.mrb[10].mxu0  ;;  %v1722_v21 = vpop.f32.mrb[10].mxu1 }
 0x4f7   :  { %v1727_v24 = vadd.f32 %v1651_v32, %v7940_v11  ;;  %v1653_v55 = vpop.f32.mrb[11].mxu0  ;;  %v1724_v40 = vpop.f32.mrb[11].mxu1  ;;  %v1729_v7 = vadd.f32 %v1722_v21, %v7942_v12 }
 0x4f8   :  { %v1728_v46 = vadd.f32 %v1653_v55, %v7941_v27  ;;  %v1756_v27 = vld [vmem:[#allocation6 + $0x60] sm:$0xff]  ;;  %v1757_v55 = vld [vmem:[#allocation6 + $0x68] sm:$0xff] }
 0x4f9   :  { %v4230_v18 = vmul.f32 -1.442695, %v1727_v24 }
 0x4fa   :  { %v4231_v52 = vmul.f32 -1.442695, %v1728_v46 }
 0x4fb   :  { %5920 = vpow2.f32 %v4230_v18 }
 0x4fc   :  { %5922 = vpow2.f32 %v4231_v52 }
 0x4fd   :  { %5924 = vtanh.f32 %v1729_v7 }
 0x505   :  { %v5921_v58 = vpop.eup %5920 }
 0x506   :  { %v5923_v1 = vpop.eup %5922  ;;  %v1734_v31 = vadd.f32 1.0, %v5921_v58 }
 0x507   :  { %v1740_v30 = vadd.f32 1.0, %v5923_v1  ;;  %v5925_v2 = vpop.eup %5924 }
 0x508   :  { %5926 = vrcp.f32 %v1734_v31  ;;  %v1759_v31 = vld [vmem:[#allocation6 + $0x78] sm:$0xff] }
 0x509   :  { %5928 = vrcp.f32 %v1740_v30 }
 0x512   :  { %v5927_v42 = vpop.eup %5926 }
 0x513   :  { %v5929_v11 = vpop.eup %5928  ;;  %v1751_v32 = vmul.f32 %v5927_v42, %v5925_v2 }
 0x514   :  { %v1750_v48 = vmul.f32 %v5929_v11, %v6877_v10 }
 0x516   :  { %v6997_v46 = vadd.f32 %v1751_v32, %v1750_v48  ;;  %v1826_v18 = vpop.f32.mrb[12].mxu0  ;;  %v1897_v52 = vpop.f32.mrb[12].mxu1 }
 0x517   :  { %v1902_v12 = vadd.f32 %v1826_v18, %v1756_v27  ;;  %v1828_v21 = vpop.f32.mrb[13].mxu0  ;;  %v1899_v24 = vpop.f32.mrb[13].mxu1  ;;  %v1904_v2 = vadd.f32 %v1897_v52, %v1758_v26  ;;  %v1730_v26 = vadd.f32 %v1724_v40, %v6761_v19 }
 0x518   :  { %v1903_v58 = vadd.f32 %v1828_v21, %v1757_v55  ;;  %v1905_v30 = vadd.f32 %v1899_v24, %v1759_v31 }
 0x519   :  { %v4233_v7 = vmul.f32 -1.442695, %v1902_v12 }
 0x51a   :  { %v4234_v1 = vmul.f32 -1.442695, %v1903_v58  ;;  %v4235_v42 = vmul.f32 -1.442695, %v1905_v30 }
 0x51b   :  { %5930 = vpow2.f32 %v4233_v7 }
 0x51c   :  { %5932 = vpow2.f32 %v4234_v1  ;;  %v4232_v1 = vmul.f32 -1.442695, %v1730_v26  ;;  %v7955_v26 = vld [vmem:[#allocation34_spill] sm:$0xff] }
 0x51d   :  { %5934 = vpow2.f32 %v4235_v42  ;;  %v7943_v42 = vld [vmem:[#allocation23_spill] sm:$0xff] }
 0x51e   :  { %5936 = vtanh.f32 %v1904_v2  ;;  %v7944_v2 = vld [vmem:[#allocation20_spill] sm:$0xff] }
 0x525   :  { %v5931_v10 = vpop.eup %5930 }
 0x526   :  { %v5933_v11 = vpop.eup %5932  ;;  %v1909_v45 = vadd.f32 1.0, %v5931_v10  ;;  %v7945_v10 = vld [vmem:[#allocation25_spill] sm:$0xff] }
 0x527   :  { %v1915_v48 = vadd.f32 1.0, %v5933_v11  ;;  %v5935_v32 = vpop.eup %5934  ;;  %v7946_v11 = vld [vmem:[#allocation21_spill] sm:$0xff] }
 0x528   :  { %5938 = vrcp.f32 %v1909_v45  ;;  %v5937_v27 = vpop.eup %5936  ;;  %v1922_v21 = vadd.f32 1.0, %v5935_v32  ;;  %v7948_v32 = vld [vmem:[#allocation22_spill] sm:$0xff] }
 0x529   :  { %5940 = vrcp.f32 %v1915_v48  ;;  %v7947_v48 = vld [vmem:[#allocation26_spill] sm:$0xff] }
 0x52a   :  { %5942 = vrcp.f32 %v1922_v21  ;;  %v7953_v21 = vld [vmem:[#allocation33_spill] sm:$0xff] }
 0x532   :  { %v5939_v55 = vpop.eup %5938 }
 0x533   :  { %v5941_v18 = vpop.eup %5940  ;;  %v1926_v12 = vmul.f32 %v5939_v55, %v5937_v27  ;;  %v7949_v27 = vld [vmem:[#allocation29_spill] sm:$0xff]  ;;  %v7950_v55 = vld [vmem:[#allocation24_spill] sm:$0xff] }
 0x534   :  { %v1925_v58 = vmul.f32 %v5941_v18, %v6880_v15  ;;  %v5943_v52 = vpop.eup %5942  ;;  %v7951_v18 = vld [vmem:[#allocation30_spill] sm:$0xff] }
 0x536   :  { %v7000_v24 = vadd.f32 %v1926_v12, %v1925_v58  ;;  %v7952_v12 = vld [vmem:[#allocation27_spill] sm:$0xff]  ;;  %v7954_v58 = vld [vmem:[#allocation28_spill] sm:$0xff] }
 0x538   :  { %5944 = vtanh.f32 %v7000_v24 }
 0x539   :  { %5946 = vpow2.f32 %v4232_v1  ;;  %v7958_v1 = vld [vmem:[#allocation32_spill] sm:$0xff] }
 0x53a   :  { %5948 = vtanh.f32 %v6997_v46 }
 0x542   :  { %v5945_v7 = vpop.eup %5944 }
 0x543   :  { %v7004_v45 = vmul.f32 %v5945_v7, %v5943_v52  ;;  %v5947_v19 = vpop.eup %5946  ;;  %v7956_v52 = vld [vmem:[#allocation31_spill] sm:$0xff]  ;;  %v7957_v7 = vld [vmem:[#allocation37_spill] sm:$0xff] }
 0x544   :  { %v1747_v15 = vadd.f32 1.0, %v5947_v19  ;;  %v5949_v40 = vpop.eup %5948  ;;  %v7959_v19 = vld [vmem:[#allocation38_spill] sm:$0xff] }
 0x545   :  { %1995 = vmatmul.mubr.f32.vlgmr.msra.gmra.mrb[14].mxu0 %v7004_v45  ;;  %2066 = vmatmul.mubr.f32.vlgmr.msra.gmra.mrb[14].mxu1 %v7004_v45 }
 0x546   :  { %4970 = vmatpush1.bf16.msra.mxu0 %v7825_v13  ;;  %5002 = vmatpush1.bf16.msra.mxu1 %v7826_v49  ;;  %5950 = vrcp.f32 %v1747_v15  ;;  %v7960_v15 = vld [vmem:[#allocation35_spill] sm:$0xff] }
 0x547   :  { %4972 = vmatprep.subr.bf16.mxu0 %v7827_v60  ;;  %5004 = vmatprep.subr.bf16.mxu1 %v7828_v56 }
 0x548   :  { %2136 = vmatprep.mubr.f32.mxu0 %v7783_v34  ;;  %2207 = vmatprep.mubr.f32.mxu1 %v7783_v34 }
 0x54a   :  { %4974 = vmatpush1.bf16.msra.mxu0 %v7829_v63  ;;  %5006 = vmatpush1.bf16.msra.mxu1 %v7830_v59 }
 0x54b   :  { %4976 = vmatprep.subr.bf16.mxu0 %v7831_v28  ;;  %5008 = vmatprep.subr.bf16.mxu1 %v7883_v57 }
 0x54e   :  { %4978 = vmatpush1.bf16.msra.mxu0 %v7884_v36  ;;  %5010 = vmatpush1.bf16.msra.mxu1 %v7834_v53 }
 0x54f   :  { %4980 = vmatprep.subr.bf16.mxu0 %v7835_v47  ;;  %5012 = vmatprep.subr.bf16.mxu1 %v7836_v44 }
 0x550   :  { %v5951_v31 = vpop.eup %5950 }
 0x551   :  { %v1754_v30 = vmul.f32 %v5951_v31, %v5949_v40  ;;  %v7961_v40 = vld [vmem:[#allocation40_spill] sm:$0xff] }
 0x552   :  { %4982 = vmatpush1.bf16.msra.mxu0 %v7837_v54  ;;  %5014 = vmatpush1.bf16.msra.mxu1 %v7838_v39  ;;  %v7962_v31 = vld [vmem:[#allocation36_spill] sm:$0xff] }
 0x553   :  { %4984 = vmatprep.subr.bf16.mxu0 %v7839_v20  ;;  %5016 = vmatprep.subr.bf16.mxu1 %v7840_v41 }
 0x556   :  { %4986 = vmatpush1.bf16.msra.mxu0 %v7841_v61  ;;  %5018 = vmatpush1.bf16.msra.mxu1 %v7842_v5 }
 0x557   :  { %4988 = vmatprep.subr.bf16.mxu0 %v7885_v62  ;;  %5020 = vmatprep.subr.bf16.mxu1 %v6636_v6 }
 0x55a   :  { %4990 = vmatpush1.bf16.msra.mxu0 %v6640_v23  ;;  %5022 = vmatpush1.bf16.msra.mxu1 %v6642_v0 }
 0x55b   :  { %4992 = vmatprep.subr.bf16.mxu0 %v6646_v35  ;;  %5024 = vmatprep.subr.bf16.mxu1 %v6648_v51 }
 0x55e   :  { %4994 = vmatpush1.bf16.msra.mxu0 %v6652_v50  ;;  %5026 = vmatpush1.bf16.msra.mxu1 %v6654_v16 }
 0x55f   :  { %4996 = vmatprep.subr.bf16.mxu0 %v6658_v3  ;;  %5028 = vmatprep.subr.bf16.mxu1 %v6660_v29 }
 0x562   :  { %4998 = vmatpush1.bf16.msra.mxu0 %v6664_v43  ;;  %5030 = vmatpush1.bf16.msra.mxu1 %v6666_v38 }
 0x563   :  { %5032 = vmatprep.subr.bf16.mxu0 %v6371_v4  ;;  %5064 = vmatprep.subr.bf16.mxu1 %v6384_v22 }
 0x565   :  { %2137 = vmatmul.mubr.f32.vlgmr.msra.gmra.mrb[14].mxu0 %v1754_v30  ;;  %2208 = vmatmul.mubr.f32.vlgmr.msra.gmra.mrb[14].mxu1 %v1754_v30  ;;  %v7963_v30 = vld [vmem:[#allocation41_spill] sm:$0xff] }
 0x566   :  { %5034 = vmatpush1.bf16.msra.mxu0 %v6373_v8  ;;  %5066 = vmatpush1.bf16.msra.mxu1 %v6386_v25 }
 0x567   :  { %5036 = vmatprep.subr.bf16.mxu0 %v6375_v9  ;;  %5068 = vmatprep.subr.bf16.mxu1 %v6396_v33 }
 0x568   :  { %2311 = vmatprep.mubr.f32.mxu0 %v7783_v34  ;;  %2382 = vmatprep.mubr.f32.mxu1 %v7783_v34 }
 0x56a   :  { %5038 = vmatpush1.bf16.msra.mxu0 %v6379_v14  ;;  %5070 = vmatpush1.bf16.msra.mxu1 %v6398_v37 }
 0x56b   :  { %5040 = vmatprep.subr.bf16.mxu0 %v6382_v17  ;;  %5072 = vmatprep.subr.bf16.mxu1 %v7943_v42 }
 0x56e   :  { %5042 = vmatpush1.bf16.msra.mxu0 %v7944_v2  ;;  %5074 = vmatpush1.bf16.msra.mxu1 %v7945_v10  ;;  %v2245_v10 = vld [vmem:[#allocation6 + $0x90] sm:$0xff] }
 0x56f   :  { %5044 = vmatprep.subr.bf16.mxu0 %v7946_v11  ;;  %5076 = vmatprep.subr.bf16.mxu1 %v7947_v48 }
 0x572   :  { %5046 = vmatpush1.bf16.msra.mxu0 %v7948_v32  ;;  %5078 = vmatpush1.bf16.msra.mxu1 %v7949_v27 }
 0x573   :  { %5048 = vmatprep.subr.bf16.mxu0 %v7950_v55  ;;  %5080 = vmatprep.subr.bf16.mxu1 %v7951_v18 }
 0x576   :  { %5050 = vmatpush1.bf16.msra.mxu0 %v7952_v12  ;;  %5082 = vmatpush1.bf16.msra.mxu1 %v7953_v21  ;;  %v7964_v21 = vld [vmem:[#allocation39_spill] sm:$0xff]  ;;  %v7116_v12 = vld [vmem:[#allocation14 + $0x8] sm:$0xff] }
 0x577   :  { %5052 = vmatprep.subr.bf16.mxu0 %v7954_v58  ;;  %5084 = vmatprep.subr.bf16.mxu1 %v7955_v26  ;;  %v7965_v58 = vld [vmem:[#allocation42_spill] sm:$0xff]  ;;  %v7966_v26 = vld [vmem:[#allocation43_spill] sm:$0xff]  ;;  %8001 = vst [vmem:[#allocation78_spill] sm:$0xff] %v7116_v12 }
 0x57a   :  { %5054 = vmatpush1.bf16.msra.mxu0 %v7956_v52  ;;  %5086 = vmatpush1.bf16.msra.mxu1 %v7957_v7  ;;  %v7967_v52 = vld [vmem:[#allocation44_spill] sm:$0xff]  ;;  %v7113_v7 = vld [vmem:[#allocation14] sm:$0xff] }
 0x57b   :  { %5056 = vmatprep.subr.bf16.mxu0 %v7958_v1  ;;  %5088 = vmatprep.subr.bf16.mxu1 %v7959_v19  ;;  %v7968_v19 = vld [vmem:[#allocation45_spill] sm:$0xff]  ;;  %v7982_v1 = vld [vmem:[#allocation59_spill] sm:$0xff]  ;;  %8000 = vst [vmem:[#allocation77_spill] sm:$0xff] %v7113_v7 }
 0x57e   :  { %5058 = vmatpush1.bf16.msra.mxu0 %v7960_v15  ;;  %5090 = vmatpush1.bf16.msra.mxu1 %v7961_v40  ;;  %v7969_v15 = vld [vmem:[#allocation46_spill] sm:$0xff]  ;;  %v7970_v40 = vld [vmem:[#allocation47_spill] sm:$0xff] }
 0x57f   :  { %5060 = vmatprep.subr.bf16.mxu0 %v7962_v31  ;;  %5092 = vmatprep.subr.bf16.mxu1 %v7963_v30  ;;  %v7971_v31 = vld [vmem:[#allocation48_spill] sm:$0xff]  ;;  %v7981_v30 = vld [vmem:[#allocation58_spill] sm:$0xff] }
 0x582   :  { %5062 = vmatpush1.bf16.msra.mxu0 %v7964_v21  ;;  %5094 = vmatpush1.bf16.msra.mxu1 %v7965_v58  ;;  %v7972_v58 = vld [vmem:[#allocation49_spill] sm:$0xff]  ;;  %v7975_v21 = vld [vmem:[#allocation52_spill] sm:$0xff] }
 0x583   :  { %5096 = vmatprep.subr.bf16.mxu0 %v7966_v26  ;;  %5128 = vmatprep.subr.bf16.mxu1 %v7967_v52  ;;  %v7973_v26 = vld [vmem:[#allocation50_spill] sm:$0xff]  ;;  %v7974_v52 = vld [vmem:[#allocation51_spill] sm:$0xff] }
 0x585   :  { %2312 = vmatmul.mubr.f32.vlgmr.msra.gmra.mrb[16].mxu0 %v7004_v45  ;;  %2383 = vmatmul.mubr.f32.vlgmr.msra.gmra.mrb[16].mxu1 %v7004_v45  ;;  %v7976_v45 = vld [vmem:[#allocation53_spill] sm:$0xff] }
 0x586   :  { %5098 = vmatpush1.bf16.msra.mxu0 %v7968_v19  ;;  %5130 = vmatpush1.bf16.msra.mxu1 %v7969_v15  ;;  %v7977_v19 = vld [vmem:[#allocation54_spill] sm:$0xff]  ;;  %v7978_v15 = vld [vmem:[#allocation55_spill] sm:$0xff] }
 0x587   :  { %5100 = vmatprep.subr.bf16.mxu0 %v7970_v40  ;;  %5132 = vmatprep.subr.bf16.mxu1 %v7971_v31  ;;  %v7979_v40 = vld [vmem:[#allocation56_spill] sm:$0xff]  ;;  %v7980_v31 = vld [vmem:[#allocation57_spill] sm:$0xff] }
 0x588   :  { %2481 = vmatprep.mubr.f32.mxu0 %v7783_v34  ;;  %2552 = vmatprep.mubr.f32.mxu1 %v7783_v34 }
 0x58a   :  { %5102 = vmatpush1.bf16.msra.mxu0 %v7972_v58  ;;  %5134 = vmatpush1.bf16.msra.mxu1 %v7973_v26  ;;  %v7983_v58 = vld [vmem:[#allocation60_spill] sm:$0xff]  ;;  %v7984_v26 = vld [vmem:[#allocation61_spill] sm:$0xff] }
 0x58b   :  { %5104 = vmatprep.subr.bf16.mxu0 %v7974_v52  ;;  %5136 = vmatprep.subr.bf16.mxu1 %v7975_v21  ;;  %v7985_v52 = vld [vmem:[#allocation62_spill] sm:$0xff]  ;;  %v7986_v21 = vld [vmem:[#allocation63_spill] sm:$0xff] }
 0x58e   :  { %5106 = vmatpush1.bf16.msra.mxu0 %v7976_v45  ;;  %5138 = vmatpush1.bf16.msra.mxu1 %v7977_v19  ;;  %v7987_v45 = vld [vmem:[#allocation64_spill] sm:$0xff]  ;;  %v7988_v19 = vld [vmem:[#allocation65_spill] sm:$0xff] }
 0x58f   :  { %5108 = vmatprep.subr.bf16.mxu0 %v7978_v15  ;;  %5140 = vmatprep.subr.bf16.mxu1 %v7979_v40  ;;  %v7989_v15 = vld [vmem:[#allocation66_spill] sm:$0xff]  ;;  %v7990_v40 = vld [vmem:[#allocation67_spill] sm:$0xff] }
 0x592   :  { %5110 = vmatpush1.bf16.msra.mxu0 %v7980_v31  ;;  %5142 = vmatpush1.bf16.msra.mxu1 %v7981_v30  ;;  %v7991_v31 = vld [vmem:[#allocation68_spill] sm:$0xff]  ;;  %v7992_v30 = vld [vmem:[#allocation69_spill] sm:$0xff] }
 0x593   :  { %5112 = vmatprep.subr.bf16.mxu0 %v7982_v1  ;;  %5144 = vmatprep.subr.bf16.mxu1 %v7983_v58  ;;  %v7993_v1 = vld [vmem:[#allocation70_spill] sm:$0xff]  ;;  %v7994_v58 = vld [vmem:[#allocation71_spill] sm:$0xff] }
 0x596   :  { %5114 = vmatpush1.bf16.msra.mxu0 %v7984_v26  ;;  %5146 = vmatpush1.bf16.msra.mxu1 %v7985_v52  ;;  %v7995_v26 = vld [vmem:[#allocation72_spill] sm:$0xff]  ;;  %v7996_v52 = vld [vmem:[#allocation73_spill] sm:$0xff] }
 0x597   :  { %5116 = vmatprep.subr.bf16.mxu0 %v7986_v21  ;;  %5148 = vmatprep.subr.bf16.mxu1 %v7987_v45  ;;  %v7997_v21 = vld [vmem:[#allocation74_spill] sm:$0xff]  ;;  %v7998_v45 = vld [vmem:[#allocation75_spill] sm:$0xff] }
 0x59a   :  { %5118 = vmatpush1.bf16.msra.mxu0 %v7988_v19  ;;  %5150 = vmatpush1.bf16.msra.mxu1 %v7989_v15  ;;  %v7999_v19 = vld [vmem:[#allocation76_spill] sm:$0xff] }
 0x59b   :  { %5120 = vmatprep.subr.bf16.mxu0 %v7990_v40  ;;  %5152 = vmatprep.subr.bf16.mxu1 %v7991_v31 }
 0x59e   :  { %5122 = vmatpush1.bf16.msra.mxu0 %v7992_v30  ;;  %5154 = vmatpush1.bf16.msra.mxu1 %v7993_v1 }
 0x59f   :  { %5124 = vmatprep.subr.bf16.mxu0 %v7994_v58  ;;  %5156 = vmatprep.subr.bf16.mxu1 %v7995_v26 }
 0x5a2   :  { %5126 = vmatpush1.bf16.msra.mxu0 %v7996_v52  ;;  %5158 = vmatpush1.bf16.msra.mxu1 %v7997_v21  ;;  %v7119_v21 = vld [vmem:[#allocation14 + $0x10] sm:$0xff] }
 0x5a3   :  { %5160 = vmatprep.subr.bf16.mxu0 %v7998_v45  ;;  %5192 = vmatprep.subr.bf16.mxu1 %v7999_v19  ;;  %8002 = vst [vmem:[#allocation79_spill] sm:$0xff] %v7119_v21 }
 0x638   :  { %v2138_v15 = vpop.f32.mrb[14].mxu0  ;;  %v2209_v40 = vpop.f32.mrb[14].mxu1 }
 0x639   :  { %v2214_v30 = vadd.f32 %v7113_v7, %v2138_v15  ;;  %v2140_v31 = vpop.f32.mrb[15].mxu0  ;;  %v2211_v1 = vpop.f32.mrb[15].mxu1  ;;  %v2216_v19 = vadd.f32 %v7119_v21, %v2209_v40 }
 0x63a   :  { %v2215_v26 = vadd.f32 %v7116_v12, %v2140_v31 }
 0x63b   :  { %v4236_v58 = vmul.f32 -1.442695, %v2214_v30 }
 0x63c   :  { %v4237_v52 = vmul.f32 -1.442695, %v2215_v26  ;;  %v2243_v26 = vld [vmem:[#allocation6 + $0x80] sm:$0xff] }
 0x63d   :  { %5952 = vpow2.f32 %v4236_v58  ;;  %v2244_v58 = vld [vmem:[#allocation6 + $0x88] sm:$0xff] }
 0x63e   :  { %5954 = vpow2.f32 %v4237_v52 }
 0x63f   :  { %5956 = vtanh.f32 %v2216_v19 }
 0x647   :  { %v5953_v45 = vpop.eup %5952 }
 0x648   :  { %v5955_v18 = vpop.eup %5954  ;;  %v2221_v55 = vadd.f32 1.0, %v5953_v45 }
 0x649   :  { %v2227_v27 = vadd.f32 1.0, %v5955_v18  ;;  %v5957_v15 = vpop.eup %5956 }
 0x64a   :  { %5958 = vrcp.f32 %v2221_v55 }
 0x64b   :  { %5960 = vrcp.f32 %v2227_v27  ;;  %v2246_v27 = vld [vmem:[#allocation6 + $0x98] sm:$0xff] }
 0x654   :  { %v5959_v7 = vpop.eup %5958 }
 0x655   :  { %v5961_v32 = vpop.eup %5960  ;;  %v2238_v48 = vmul.f32 %v5959_v7, %v5957_v15 }
 0x656   :  { %v2237_v31 = vmul.f32 %v5961_v32, %v6997_v46 }
 0x658   :  { %v7123_v52 = vadd.f32 %v2238_v48, %v2237_v31  ;;  %v2313_v30 = vpop.f32.mrb[16].mxu0  ;;  %v2384_v12 = vpop.f32.mrb[16].mxu1 }
 0x659   :  { %v2389_v40 = vadd.f32 %v2313_v30, %v2243_v26  ;;  %v2315_v21 = vpop.f32.mrb[17].mxu0  ;;  %v2386_v11 = vpop.f32.mrb[17].mxu1  ;;  %v2391_v15 = vadd.f32 %v2384_v12, %v2245_v10  ;;  %v7129_v10 = vld [vmem:[#allocation14 + $0x18] sm:$0xff] }
 0x65a   :  { %v2390_v45 = vadd.f32 %v2315_v21, %v2244_v58  ;;  %v2392_v55 = vadd.f32 %v2386_v11, %v2246_v27  ;;  %v2217_v12 = vadd.f32 %v7129_v10, %v2211_v1 }
 0x65b   :  { %v4239_v19 = vmul.f32 -1.442695, %v2389_v40 }
 0x65c   :  { %v4240_v18 = vmul.f32 -1.442695, %v2390_v45  ;;  %v4241_v7 = vmul.f32 -1.442695, %v2392_v55 }
 0x65d   :  { %5962 = vpow2.f32 %v4239_v19 }
 0x65e   :  { %5964 = vpow2.f32 %v4240_v18  ;;  %v4238_v18 = vmul.f32 -1.442695, %v2217_v12  ;;  %v8013_v12 = vld [vmem:[#allocation28_spill] sm:$0xff] }
 0x65f   :  { %5966 = vpow2.f32 %v4241_v7 }
 0x660   :  { %5968 = vtanh.f32 %v2391_v15 }
 0x667   :  { %v5963_v46 = vpop.eup %5962 }
 0x668   :  { %v5965_v32 = vpop.eup %5964  ;;  %v2396_v2 = vadd.f32 1.0, %v5963_v46  ;;  %v8003_v46 = vld [vmem:[#allocation20_spill] sm:$0xff] }
 0x669   :  { %v2402_v48 = vadd.f32 1.0, %v5965_v32  ;;  %v5967_v31 = vpop.eup %5966  ;;  %v8004_v32 = vld [vmem:[#allocation25_spill] sm:$0xff] }
 0x66a   :  { %5970 = vrcp.f32 %v2396_v2  ;;  %v5969_v26 = vpop.eup %5968  ;;  %v2409_v40 = vadd.f32 1.0, %v5967_v31  ;;  %v8006_v31 = vld [vmem:[#allocation26_spill] sm:$0xff] }
 0x66b   :  { %5972 = vrcp.f32 %v2402_v48  ;;  %v8005_v48 = vld [vmem:[#allocation21_spill] sm:$0xff] }
 0x66c   :  { %5974 = vrcp.f32 %v2409_v40  ;;  %v8011_v40 = vld [vmem:[#allocation27_spill] sm:$0xff] }
 0x674   :  { %v5971_v21 = vpop.eup %5970 }
 0x675   :  { %v5973_v58 = vpop.eup %5972  ;;  %v2413_v30 = vmul.f32 %v5971_v21, %v5969_v26  ;;  %v8007_v26 = vld [vmem:[#allocation22_spill] sm:$0xff]  ;;  %v8008_v21 = vld [vmem:[#allocation29_spill] sm:$0xff] }
 0x676   :  { %v2412_v45 = vmul.f32 %v5973_v58, %v7000_v24  ;;  %v5975_v19 = vpop.eup %5974  ;;  %v8009_v58 = vld [vmem:[#allocation24_spill] sm:$0xff] }
 0x678   :  { %v7126_v11 = vadd.f32 %v2413_v30, %v2412_v45  ;;  %v8010_v30 = vld [vmem:[#allocation30_spill] sm:$0xff]  ;;  %v8012_v45 = vld [vmem:[#allocation33_spill] sm:$0xff] }
 0x67a   :  { %5976 = vtanh.f32 %v7126_v11 }
 0x67b   :  { %5978 = vpow2.f32 %v4238_v18  ;;  %v8016_v18 = vld [vmem:[#allocation37_spill] sm:$0xff] }
 0x67c   :  { %5980 = vtanh.f32 %v7123_v52 }
 0x684   :  { %v5977_v2 = vpop.eup %5976 }
 0x685   :  { %v7132_v27 = vmul.f32 %v5977_v2, %v5975_v19  ;;  %v5979_v24 = vpop.eup %5978  ;;  %v8014_v19 = vld [vmem:[#allocation34_spill] sm:$0xff]  ;;  %v8015_v2 = vld [vmem:[#allocation31_spill] sm:$0xff] }
 0x686   :  { %v2234_v1 = vadd.f32 1.0, %v5979_v24  ;;  %v5981_v55 = vpop.eup %5980  ;;  %v8017_v24 = vld [vmem:[#allocation32_spill] sm:$0xff] }
 0x687   :  { %2482 = vmatmul.mubr.f32.vlgmr.msra.gmra.mrb[18].mxu0 %v7132_v27  ;;  %2553 = vmatmul.mubr.f32.vlgmr.msra.gmra.mrb[18].mxu1 %v7132_v27 }
 0x688   :  { %5162 = vmatpush1.bf16.msra.mxu0 %v7825_v13  ;;  %5194 = vmatpush1.bf16.msra.mxu1 %v7826_v49  ;;  %5982 = vrcp.f32 %v2234_v1  ;;  %v8018_v1 = vld [vmem:[#allocation38_spill] sm:$0xff] }
 0x689   :  { %5164 = vmatprep.subr.bf16.mxu0 %v7827_v60  ;;  %5196 = vmatprep.subr.bf16.mxu1 %v7828_v56 }
 0x68a   :  { %2623 = vmatprep.mubr.f32.mxu0 %v7783_v34  ;;  %2694 = vmatprep.mubr.f32.mxu1 %v7783_v34 }
 0x68c   :  { %5166 = vmatpush1.bf16.msra.mxu0 %v7829_v63  ;;  %5198 = vmatpush1.bf16.msra.mxu1 %v7830_v59 }
 0x68d   :  { %5168 = vmatprep.subr.bf16.mxu0 %v7831_v28  ;;  %5200 = vmatprep.subr.bf16.mxu1 %v7883_v57 }
 0x690   :  { %5170 = vmatpush1.bf16.msra.mxu0 %v7884_v36  ;;  %5202 = vmatpush1.bf16.msra.mxu1 %v7834_v53 }
 0x691   :  { %5172 = vmatprep.subr.bf16.mxu0 %v7835_v47  ;;  %5204 = vmatprep.subr.bf16.mxu1 %v7836_v44 }
 0x692   :  { %v5983_v7 = vpop.eup %5982 }
 0x693   :  { %v2241_v15 = vmul.f32 %v5983_v7, %v5981_v55  ;;  %v8019_v55 = vld [vmem:[#allocation35_spill] sm:$0xff]  ;;  %v8020_v7 = vld [vmem:[#allocation40_spill] sm:$0xff] }
 0x694   :  { %5174 = vmatpush1.bf16.msra.mxu0 %v7837_v54  ;;  %5206 = vmatpush1.bf16.msra.mxu1 %v7838_v39 }
 0x695   :  { %5176 = vmatprep.subr.bf16.mxu0 %v7839_v20  ;;  %5208 = vmatprep.subr.bf16.mxu1 %v7840_v41 }
 0x698   :  { %5178 = vmatpush1.bf16.msra.mxu0 %v7841_v61  ;;  %5210 = vmatpush1.bf16.msra.mxu1 %v7842_v5 }
 0x699   :  { %5180 = vmatprep.subr.bf16.mxu0 %v7885_v62  ;;  %5212 = vmatprep.subr.bf16.mxu1 %v6636_v6 }
 0x69c   :  { %5182 = vmatpush1.bf16.msra.mxu0 %v6640_v23  ;;  %5214 = vmatpush1.bf16.msra.mxu1 %v6642_v0 }
 0x69d   :  { %5184 = vmatprep.subr.bf16.mxu0 %v6646_v35  ;;  %5216 = vmatprep.subr.bf16.mxu1 %v6648_v51 }
 0x6a0   :  { %5186 = vmatpush1.bf16.msra.mxu0 %v6652_v50  ;;  %5218 = vmatpush1.bf16.msra.mxu1 %v6654_v16 }
 0x6a1   :  { %5188 = vmatprep.subr.bf16.mxu0 %v6658_v3  ;;  %5220 = vmatprep.subr.bf16.mxu1 %v6660_v29 }
 0x6a4   :  { %5190 = vmatpush1.bf16.msra.mxu0 %v6664_v43  ;;  %5222 = vmatpush1.bf16.msra.mxu1 %v6666_v38 }
 0x6a5   :  { %5224 = vmatprep.subr.bf16.mxu0 %v6371_v4  ;;  %5256 = vmatprep.subr.bf16.mxu1 %v6384_v22 }
 0x6a7   :  { %2624 = vmatmul.mubr.f32.vlgmr.msra.gmra.mrb[18].mxu0 %v2241_v15  ;;  %2695 = vmatmul.mubr.f32.vlgmr.msra.gmra.mrb[18].mxu1 %v2241_v15  ;;  %v8021_v15 = vld [vmem:[#allocation36_spill] sm:$0xff] }
 0x6a8   :  { %5226 = vmatpush1.bf16.msra.mxu0 %v6373_v8  ;;  %5258 = vmatpush1.bf16.msra.mxu1 %v6386_v25 }
 0x6a9   :  { %5228 = vmatprep.subr.bf16.mxu0 %v6375_v9  ;;  %5260 = vmatprep.subr.bf16.mxu1 %v6396_v33 }
 0x6aa   :  { %2798 = vmatprep.mubr.f32.mxu0 %v7783_v34  ;;  %2869 = vmatprep.mubr.f32.mxu1 %v7783_v34 }
 0x6ac   :  { %5230 = vmatpush1.bf16.msra.mxu0 %v6379_v14  ;;  %5262 = vmatpush1.bf16.msra.mxu1 %v6398_v37 }
 0x6ad   :  { %5232 = vmatprep.subr.bf16.mxu0 %v6382_v17  ;;  %5264 = vmatprep.subr.bf16.mxu1 %v7943_v42 }
 0x6b0   :  { %5234 = vmatpush1.bf16.msra.mxu0 %v8003_v46  ;;  %5266 = vmatpush1.bf16.msra.mxu1 %v8004_v32  ;;  %v2732_v46 = vld [vmem:[#allocation6 + $0xb0] sm:$0xff] }
 0x6b1   :  { %5236 = vmatprep.subr.bf16.mxu0 %v8005_v48  ;;  %5268 = vmatprep.subr.bf16.mxu1 %v8006_v31 }
 0x6b4   :  { %5238 = vmatpush1.bf16.msra.mxu0 %v8007_v26  ;;  %5270 = vmatpush1.bf16.msra.mxu1 %v8008_v21 }
 0x6b5   :  { %5240 = vmatprep.subr.bf16.mxu0 %v8009_v58  ;;  %5272 = vmatprep.subr.bf16.mxu1 %v8010_v30  ;;  %v8060_v58 = vld [vmem:[#allocation78_spill] sm:$0xff] }
 0x6b8   :  { %5242 = vmatpush1.bf16.msra.mxu0 %v8011_v40  ;;  %5274 = vmatpush1.bf16.msra.mxu1 %v8012_v45  ;;  %v8022_v40 = vld [vmem:[#allocation41_spill] sm:$0xff]  ;;  %v8023_v45 = vld [vmem:[#allocation39_spill] sm:$0xff] }
 0x6b9   :  { %5244 = vmatprep.subr.bf16.mxu0 %v8013_v12  ;;  %5276 = vmatprep.subr.bf16.mxu1 %v8014_v19  ;;  %v8024_v12 = vld [vmem:[#allocation42_spill] sm:$0xff]  ;;  %v8025_v19 = vld [vmem:[#allocation43_spill] sm:$0xff] }
 0x6bc   :  { %5246 = vmatpush1.bf16.msra.mxu0 %v8015_v2  ;;  %5278 = vmatpush1.bf16.msra.mxu1 %v8016_v18  ;;  %v8026_v2 = vld [vmem:[#allocation44_spill] sm:$0xff]  ;;  %v8059_v18 = vld [vmem:[#allocation77_spill] sm:$0xff] }
 0x6bd   :  { %5248 = vmatprep.subr.bf16.mxu0 %v8017_v24  ;;  %5280 = vmatprep.subr.bf16.mxu1 %v8018_v1  ;;  %v8027_v1 = vld [vmem:[#allocation45_spill] sm:$0xff]  ;;  %v8041_v24 = vld [vmem:[#allocation59_spill] sm:$0xff] }
 0x6c0   :  { %5250 = vmatpush1.bf16.msra.mxu0 %v8019_v55  ;;  %5282 = vmatpush1.bf16.msra.mxu1 %v8020_v7  ;;  %v8028_v55 = vld [vmem:[#allocation46_spill] sm:$0xff]  ;;  %v8029_v7 = vld [vmem:[#allocation47_spill] sm:$0xff] }
 0x6c1   :  { %5252 = vmatprep.subr.bf16.mxu0 %v8021_v15  ;;  %5284 = vmatprep.subr.bf16.mxu1 %v8022_v40  ;;  %v8030_v15 = vld [vmem:[#allocation48_spill] sm:$0xff]  ;;  %v8040_v40 = vld [vmem:[#allocation58_spill] sm:$0xff] }
 0x6c4   :  { %5254 = vmatpush1.bf16.msra.mxu0 %v8023_v45  ;;  %5286 = vmatpush1.bf16.msra.mxu1 %v8024_v12  ;;  %v8031_v12 = vld [vmem:[#allocation49_spill] sm:$0xff]  ;;  %v8034_v45 = vld [vmem:[#allocation52_spill] sm:$0xff] }
 0x6c5   :  { %5288 = vmatprep.subr.bf16.mxu0 %v8025_v19  ;;  %5320 = vmatprep.subr.bf16.mxu1 %v8026_v2  ;;  %v8032_v19 = vld [vmem:[#allocation50_spill] sm:$0xff]  ;;  %v8033_v2 = vld [vmem:[#allocation51_spill] sm:$0xff] }
 0x6c7   :  { %2799 = vmatmul.mubr.f32.vlgmr.msra.gmra.mrb[20].mxu0 %v7132_v27  ;;  %2870 = vmatmul.mubr.f32.vlgmr.msra.gmra.mrb[20].mxu1 %v7132_v27  ;;  %v8035_v27 = vld [vmem:[#allocation53_spill] sm:$0xff] }
 0x6c8   :  { %5290 = vmatpush1.bf16.msra.mxu0 %v8027_v1  ;;  %5322 = vmatpush1.bf16.msra.mxu1 %v8028_v55  ;;  %v8036_v1 = vld [vmem:[#allocation54_spill] sm:$0xff]  ;;  %v8037_v55 = vld [vmem:[#allocation55_spill] sm:$0xff] }
 0x6c9   :  { %5292 = vmatprep.subr.bf16.mxu0 %v8029_v7  ;;  %5324 = vmatprep.subr.bf16.mxu1 %v8030_v15  ;;  %v8038_v7 = vld [vmem:[#allocation56_spill] sm:$0xff]  ;;  %v8039_v15 = vld [vmem:[#allocation57_spill] sm:$0xff] }
 0x6ca   :  { %2968 = vmatprep.mubr.f32.mxu0 %v7783_v34  ;;  %3039 = vmatprep.mubr.f32.mxu1 %v7783_v34 }
 0x6cc   :  { %5294 = vmatpush1.bf16.msra.mxu0 %v8031_v12  ;;  %5326 = vmatpush1.bf16.msra.mxu1 %v8032_v19  ;;  %v8042_v12 = vld [vmem:[#allocation60_spill] sm:$0xff]  ;;  %v8043_v19 = vld [vmem:[#allocation61_spill] sm:$0xff] }
 0x6cd   :  { %5296 = vmatprep.subr.bf16.mxu0 %v8033_v2  ;;  %5328 = vmatprep.subr.bf16.mxu1 %v8034_v45  ;;  %v8044_v2 = vld [vmem:[#allocation62_spill] sm:$0xff]  ;;  %v8045_v45 = vld [vmem:[#allocation63_spill] sm:$0xff] }
 0x6d0   :  { %5298 = vmatpush1.bf16.msra.mxu0 %v8035_v27  ;;  %5330 = vmatpush1.bf16.msra.mxu1 %v8036_v1  ;;  %v8046_v27 = vld [vmem:[#allocation64_spill] sm:$0xff]  ;;  %v8047_v1 = vld [vmem:[#allocation65_spill] sm:$0xff] }
 0x6d1   :  { %5300 = vmatprep.subr.bf16.mxu0 %v8037_v55  ;;  %5332 = vmatprep.subr.bf16.mxu1 %v8038_v7  ;;  %v8048_v55 = vld [vmem:[#allocation66_spill] sm:$0xff]  ;;  %v8049_v7 = vld [vmem:[#allocation67_spill] sm:$0xff] }
 0x6d4   :  { %5302 = vmatpush1.bf16.msra.mxu0 %v8039_v15  ;;  %5334 = vmatpush1.bf16.msra.mxu1 %v8040_v40  ;;  %v8050_v15 = vld [vmem:[#allocation68_spill] sm:$0xff]  ;;  %v8051_v40 = vld [vmem:[#allocation69_spill] sm:$0xff] }
 0x6d5   :  { %5304 = vmatprep.subr.bf16.mxu0 %v8041_v24  ;;  %5336 = vmatprep.subr.bf16.mxu1 %v8042_v12  ;;  %v8052_v24 = vld [vmem:[#allocation70_spill] sm:$0xff]  ;;  %v8053_v12 = vld [vmem:[#allocation71_spill] sm:$0xff] }
 0x6d8   :  { %5306 = vmatpush1.bf16.msra.mxu0 %v8043_v19  ;;  %5338 = vmatpush1.bf16.msra.mxu1 %v8044_v2  ;;  %v8054_v19 = vld [vmem:[#allocation72_spill] sm:$0xff]  ;;  %v8055_v2 = vld [vmem:[#allocation73_spill] sm:$0xff] }
 0x6d9   :  { %5308 = vmatprep.subr.bf16.mxu0 %v8045_v45  ;;  %5340 = vmatprep.subr.bf16.mxu1 %v8046_v27  ;;  %v8056_v45 = vld [vmem:[#allocation74_spill] sm:$0xff]  ;;  %v8057_v27 = vld [vmem:[#allocation75_spill] sm:$0xff] }
 0x6dc   :  { %5310 = vmatpush1.bf16.msra.mxu0 %v8047_v1  ;;  %5342 = vmatpush1.bf16.msra.mxu1 %v8048_v55  ;;  %v8058_v1 = vld [vmem:[#allocation76_spill] sm:$0xff] }
 0x6dd   :  { %5312 = vmatprep.subr.bf16.mxu0 %v8049_v7  ;;  %5344 = vmatprep.subr.bf16.mxu1 %v8050_v15 }
 0x6e0   :  { %5314 = vmatpush1.bf16.msra.mxu0 %v8051_v40  ;;  %5346 = vmatpush1.bf16.msra.mxu1 %v8052_v24 }
 0x6e1   :  { %5316 = vmatprep.subr.bf16.mxu0 %v8053_v12  ;;  %5348 = vmatprep.subr.bf16.mxu1 %v8054_v19  ;;  %v8061_v19 = vld [vmem:[#allocation79_spill] sm:$0xff] }
 0x6e4   :  { %5318 = vmatpush1.bf16.msra.mxu0 %v8055_v2  ;;  %5350 = vmatpush1.bf16.msra.mxu1 %v8056_v45 }
 0x6e5   :  { %5352 = vmatprep.subr.bf16.mxu0 %v8057_v27  ;;  %5384 = vmatprep.subr.bf16.mxu1 %v8058_v1 }
 0x77a   :  { %v2625_v55 = vpop.f32.mrb[18].mxu0  ;;  %v2696_v7 = vpop.f32.mrb[18].mxu1 }
 0x77b   :  { %v2701_v15 = vadd.f32 %v8059_v18, %v2625_v55  ;;  %v2627_v30 = vpop.f32.mrb[19].mxu0  ;;  %v2698_v40 = vpop.f32.mrb[19].mxu1  ;;  %v2703_v2 = vadd.f32 %v8061_v19, %v2696_v7 }
 0x77c   :  { %v2702_v24 = vadd.f32 %v8060_v58, %v2627_v30  ;;  %v2730_v30 = vld [vmem:[#allocation6 + $0xa0] sm:$0xff] }
 0x77d   :  { %v4242_v21 = vmul.f32 -1.442695, %v2701_v15  ;;  %v2731_v15 = vld [vmem:[#allocation6 + $0xa8] sm:$0xff] }
 0x77e   :  { %v4243_v12 = vmul.f32 -1.442695, %v2702_v24 }
 0x77f   :  { %5984 = vpow2.f32 %v4242_v21 }
 0x780   :  { %5986 = vpow2.f32 %v4243_v12 }
 0x781   :  { %5988 = vtanh.f32 %v2703_v2 }
 0x789   :  { %v5985_v26 = vpop.eup %5984 }
 0x78a   :  { %v5987_v45 = vpop.eup %5986  ;;  %v2708_v31 = vadd.f32 1.0, %v5985_v26 }
 0x78b   :  { %v2714_v27 = vadd.f32 1.0, %v5987_v45  ;;  %v5989_v1 = vpop.eup %5988 }
 0x78c   :  { %5990 = vrcp.f32 %v2708_v31  ;;  %v2733_v31 = vld [vmem:[#allocation6 + $0xb8] sm:$0xff] }
 0x78d   :  { %5992 = vrcp.f32 %v2714_v27 }
 0x796   :  { %v5991_v48 = vpop.eup %5990 }
 0x797   :  { %v5993_v55 = vpop.eup %5992  ;;  %v2725_v18 = vmul.f32 %v5991_v48, %v5989_v1 }
 0x798   :  { %v2724_v32 = vmul.f32 %v5993_v55, %v7123_v52 }
 0x79a   :  { %v7245_v24 = vadd.f32 %v2725_v18, %v2724_v32  ;;  %v2800_v21 = vpop.f32.mrb[20].mxu0  ;;  %v2871_v12 = vpop.f32.mrb[20].mxu1 }
 0x79b   :  { %v2876_v7 = vadd.f32 %v2800_v21, %v2730_v30  ;;  %v2802_v19 = vpop.f32.mrb[21].mxu0  ;;  %v2873_v58 = vpop.f32.mrb[21].mxu1  ;;  %v2878_v1 = vadd.f32 %v2871_v12, %v2732_v46  ;;  %v2704_v46 = vadd.f32 %v7129_v10, %v2698_v40 }
 0x79c   :  { %v2877_v26 = vadd.f32 %v2802_v19, %v2731_v15  ;;  %v2879_v27 = vadd.f32 %v2873_v58, %v2733_v31 }
 0x79d   :  { %v4245_v2 = vmul.f32 -1.442695, %v2876_v7 }
 0x79e   :  { %v4246_v45 = vmul.f32 -1.442695, %v2877_v26  ;;  %v4247_v48 = vmul.f32 -1.442695, %v2879_v27 }
 0x79f   :  { %5994 = vpow2.f32 %v4245_v2 }
 0x7a0   :  { %5996 = vpow2.f32 %v4246_v45  ;;  %v4244_v45 = vmul.f32 -1.442695, %v2704_v46  ;;  %v8073_v46 = vld [vmem:[#allocation28_spill] sm:$0xff] }
 0x7a1   :  { %5998 = vpow2.f32 %v4247_v48 }
 0x7a2   :  { %6000 = vtanh.f32 %v2878_v1  ;;  %v8062_v1 = vld [vmem:[#allocation23_spill] sm:$0xff] }
 0x7a9   :  { %v5995_v52 = vpop.eup %5994 }
 0x7aa   :  { %v5997_v55 = vpop.eup %5996  ;;  %v2883_v42 = vadd.f32 1.0, %v5995_v52  ;;  %v8063_v52 = vld [vmem:[#allocation20_spill] sm:$0xff] }
 0x7ab   :  { %v2889_v32 = vadd.f32 1.0, %v5997_v55  ;;  %v5999_v18 = vpop.eup %5998  ;;  %v8064_v55 = vld [vmem:[#allocation25_spill] sm:$0xff] }
 0x7ac   :  { %6002 = vrcp.f32 %v2883_v42  ;;  %v6001_v30 = vpop.eup %6000  ;;  %v2896_v7 = vadd.f32 1.0, %v5999_v18  ;;  %v8066_v18 = vld [vmem:[#allocation26_spill] sm:$0xff] }
 0x7ad   :  { %6004 = vrcp.f32 %v2889_v32  ;;  %v8065_v32 = vld [vmem:[#allocation21_spill] sm:$0xff] }
 0x7ae   :  { %6006 = vrcp.f32 %v2896_v7  ;;  %v8071_v7 = vld [vmem:[#allocation27_spill] sm:$0xff] }
 0x7b6   :  { %v6003_v19 = vpop.eup %6002 }
 0x7b7   :  { %v6005_v15 = vpop.eup %6004  ;;  %v2900_v21 = vmul.f32 %v6003_v19, %v6001_v30  ;;  %v8067_v30 = vld [vmem:[#allocation22_spill] sm:$0xff]  ;;  %v8068_v19 = vld [vmem:[#allocation29_spill] sm:$0xff] }
 0x7b8   :  { %v2899_v26 = vmul.f32 %v6005_v15, %v7126_v11  ;;  %v6007_v12 = vpop.eup %6006  ;;  %v8069_v15 = vld [vmem:[#allocation24_spill] sm:$0xff] }
 0x7ba   :  { %v7248_v58 = vadd.f32 %v2900_v21, %v2899_v26  ;;  %v8070_v21 = vld [vmem:[#allocation30_spill] sm:$0xff]  ;;  %v8072_v26 = vld [vmem:[#allocation33_spill] sm:$0xff] }
 0x7bc   :  { %6008 = vtanh.f32 %v7248_v58 }
 0x7bd   :  { %6010 = vpow2.f32 %v4244_v45  ;;  %v8076_v45 = vld [vmem:[#allocation37_spill] sm:$0xff] }
 0x7be   :  { %6012 = vtanh.f32 %v7245_v24 }
 0x7c6   :  { %v6009_v2 = vpop.eup %6008 }
 0x7c7   :  { %v7252_v42 = vmul.f32 %v6009_v2, %v6007_v12  ;;  %v6011_v11 = vpop.eup %6010  ;;  %v8074_v12 = vld [vmem:[#allocation34_spill] sm:$0xff]  ;;  %v8075_v2 = vld [vmem:[#allocation31_spill] sm:$0xff] }
 0x7c8   :  { %v2721_v40 = vadd.f32 1.0, %v6011_v11  ;;  %v6013_v31 = vpop.eup %6012  ;;  %v8077_v11 = vld [vmem:[#allocation32_spill] sm:$0xff] }
 0x7c9   :  { %2969 = vmatmul.mubr.f32.vlgmr.msra.gmra.mrb[22].mxu0 %v7252_v42  ;;  %3040 = vmatmul.mubr.f32.vlgmr.msra.gmra.mrb[22].mxu1 %v7252_v42 }
 0x7ca   :  { %5354 = vmatpush1.bf16.msra.mxu0 %v7825_v13  ;;  %5386 = vmatpush1.bf16.msra.mxu1 %v7826_v49  ;;  %6014 = vrcp.f32 %v2721_v40  ;;  %v8078_v40 = vld [vmem:[#allocation38_spill] sm:$0xff] }
 0x7cb   :  { %5356 = vmatprep.subr.bf16.mxu0 %v7827_v60  ;;  %5388 = vmatprep.subr.bf16.mxu1 %v7828_v56 }
 0x7cc   :  { %3110 = vmatprep.mubr.f32.mxu0 %v7783_v34  ;;  %3181 = vmatprep.mubr.f32.mxu1 %v7783_v34 }
 0x7ce   :  { %5358 = vmatpush1.bf16.msra.mxu0 %v7829_v63  ;;  %5390 = vmatpush1.bf16.msra.mxu1 %v7830_v59 }
 0x7cf   :  { %5360 = vmatprep.subr.bf16.mxu0 %v7831_v28  ;;  %5392 = vmatprep.subr.bf16.mxu1 %v7883_v57 }
 0x7d2   :  { %5362 = vmatpush1.bf16.msra.mxu0 %v7884_v36  ;;  %5394 = vmatpush1.bf16.msra.mxu1 %v7834_v53 }
 0x7d3   :  { %5364 = vmatprep.subr.bf16.mxu0 %v7835_v47  ;;  %5396 = vmatprep.subr.bf16.mxu1 %v7836_v44 }
 0x7d4   :  { %v6015_v27 = vpop.eup %6014 }
 0x7d5   :  { %v2728_v48 = vmul.f32 %v6015_v27, %v6013_v31  ;;  %v8079_v31 = vld [vmem:[#allocation35_spill] sm:$0xff]  ;;  %v8080_v27 = vld [vmem:[#allocation40_spill] sm:$0xff] }
 0x7d6   :  { %5366 = vmatpush1.bf16.msra.mxu0 %v7837_v54  ;;  %5398 = vmatpush1.bf16.msra.mxu1 %v7838_v39 }
 0x7d7   :  { %5368 = vmatprep.subr.bf16.mxu0 %v7839_v20  ;;  %5400 = vmatprep.subr.bf16.mxu1 %v7840_v41 }
 0x7da   :  { %5370 = vmatpush1.bf16.msra.mxu0 %v7841_v61  ;;  %5402 = vmatpush1.bf16.msra.mxu1 %v7842_v5 }
 0x7db   :  { %5372 = vmatprep.subr.bf16.mxu0 %v7885_v62  ;;  %5404 = vmatprep.subr.bf16.mxu1 %v6636_v6 }
 0x7de   :  { %5374 = vmatpush1.bf16.msra.mxu0 %v6640_v23  ;;  %5406 = vmatpush1.bf16.msra.mxu1 %v6642_v0 }
 0x7df   :  { %5376 = vmatprep.subr.bf16.mxu0 %v6646_v35  ;;  %5408 = vmatprep.subr.bf16.mxu1 %v6648_v51 }
 0x7e2   :  { %5378 = vmatpush1.bf16.msra.mxu0 %v6652_v50  ;;  %5410 = vmatpush1.bf16.msra.mxu1 %v6654_v16 }
 0x7e3   :  { %5380 = vmatprep.subr.bf16.mxu0 %v6658_v3  ;;  %5412 = vmatprep.subr.bf16.mxu1 %v6660_v29 }
 0x7e6   :  { %5382 = vmatpush1.bf16.msra.mxu0 %v6664_v43  ;;  %5414 = vmatpush1.bf16.msra.mxu1 %v6666_v38 }
 0x7e7   :  { %5416 = vmatprep.subr.bf16.mxu0 %v6371_v4  ;;  %5448 = vmatprep.subr.bf16.mxu1 %v6384_v22 }
 0x7e9   :  { %3111 = vmatmul.mubr.f32.vlgmr.msra.gmra.mrb[22].mxu0 %v2728_v48  ;;  %3182 = vmatmul.mubr.f32.vlgmr.msra.gmra.mrb[22].mxu1 %v2728_v48  ;;  %v8081_v48 = vld [vmem:[#allocation36_spill] sm:$0xff] }
 0x7ea   :  { %5418 = vmatpush1.bf16.msra.mxu0 %v6373_v8  ;;  %5450 = vmatpush1.bf16.msra.mxu1 %v6386_v25 }
 0x7eb   :  { %5420 = vmatprep.subr.bf16.mxu0 %v6375_v9  ;;  %5452 = vmatprep.subr.bf16.mxu1 %v6396_v33 }
 0x7ec   :  { %3285 = vmatprep.mubr.f32.mxu0 %v7783_v34  ;;  %3356 = vmatprep.mubr.f32.mxu1 %v7783_v34 }
 0x7ee   :  { %5422 = vmatpush1.bf16.msra.mxu0 %v6379_v14  ;;  %5454 = vmatpush1.bf16.msra.mxu1 %v6398_v37 }
 0x7ef   :  { %5424 = vmatprep.subr.bf16.mxu0 %v6382_v17  ;;  %5456 = vmatprep.subr.bf16.mxu1 %v8062_v1 }
 0x7f2   :  { %5426 = vmatpush1.bf16.msra.mxu0 %v8063_v52  ;;  %5458 = vmatpush1.bf16.msra.mxu1 %v8064_v55  ;;  %v3219_v52 = vld [vmem:[#allocation6 + $0xd0] sm:$0xff] }
 0x7f3   :  { %5428 = vmatprep.subr.bf16.mxu0 %v8065_v32  ;;  %5460 = vmatprep.subr.bf16.mxu1 %v8066_v18 }
 0x7f6   :  { %5430 = vmatpush1.bf16.msra.mxu0 %v8067_v30  ;;  %5462 = vmatpush1.bf16.msra.mxu1 %v8068_v19 }
 0x7f7   :  { %5432 = vmatprep.subr.bf16.mxu0 %v8069_v15  ;;  %5464 = vmatprep.subr.bf16.mxu1 %v8070_v21  ;;  %v8120_v15 = vld [vmem:[#allocation78_spill] sm:$0xff] }
 0x7fa   :  { %5434 = vmatpush1.bf16.msra.mxu0 %v8071_v7  ;;  %5466 = vmatpush1.bf16.msra.mxu1 %v8072_v26  ;;  %v8082_v7 = vld [vmem:[#allocation41_spill] sm:$0xff]  ;;  %v8083_v26 = vld [vmem:[#allocation39_spill] sm:$0xff] }
 0x7fb   :  { %5436 = vmatprep.subr.bf16.mxu0 %v8073_v46  ;;  %5468 = vmatprep.subr.bf16.mxu1 %v8074_v12  ;;  %v8084_v46 = vld [vmem:[#allocation42_spill] sm:$0xff]  ;;  %v8085_v12 = vld [vmem:[#allocation43_spill] sm:$0xff] }
 0x7fe   :  { %5438 = vmatpush1.bf16.msra.mxu0 %v8075_v2  ;;  %5470 = vmatpush1.bf16.msra.mxu1 %v8076_v45  ;;  %v8086_v2 = vld [vmem:[#allocation44_spill] sm:$0xff]  ;;  %v8119_v45 = vld [vmem:[#allocation77_spill] sm:$0xff] }
 0x7ff   :  { %5440 = vmatprep.subr.bf16.mxu0 %v8077_v11  ;;  %5472 = vmatprep.subr.bf16.mxu1 %v8078_v40  ;;  %v8087_v40 = vld [vmem:[#allocation45_spill] sm:$0xff]  ;;  %v8101_v11 = vld [vmem:[#allocation59_spill] sm:$0xff] }
 0x802   :  { %5442 = vmatpush1.bf16.msra.mxu0 %v8079_v31  ;;  %5474 = vmatpush1.bf16.msra.mxu1 %v8080_v27  ;;  %v8088_v31 = vld [vmem:[#allocation46_spill] sm:$0xff]  ;;  %v8089_v27 = vld [vmem:[#allocation47_spill] sm:$0xff] }
 0x803   :  { %5444 = vmatprep.subr.bf16.mxu0 %v8081_v48  ;;  %5476 = vmatprep.subr.bf16.mxu1 %v8082_v7  ;;  %v8090_v48 = vld [vmem:[#allocation48_spill] sm:$0xff]  ;;  %v8100_v7 = vld [vmem:[#allocation58_spill] sm:$0xff] }
 0x806   :  { %5446 = vmatpush1.bf16.msra.mxu0 %v8083_v26  ;;  %5478 = vmatpush1.bf16.msra.mxu1 %v8084_v46  ;;  %v8091_v46 = vld [vmem:[#allocation49_spill] sm:$0xff]  ;;  %v8094_v26 = vld [vmem:[#allocation52_spill] sm:$0xff] }
 0x807   :  { %5480 = vmatprep.subr.bf16.mxu0 %v8085_v12  ;;  %5512 = vmatprep.subr.bf16.mxu1 %v8086_v2  ;;  %v8092_v12 = vld [vmem:[#allocation50_spill] sm:$0xff]  ;;  %v8093_v2 = vld [vmem:[#allocation51_spill] sm:$0xff] }
 0x809   :  { %3286 = vmatmul.mubr.f32.vlgmr.msra.gmra.mrb[24].mxu0 %v7252_v42  ;;  %3357 = vmatmul.mubr.f32.vlgmr.msra.gmra.mrb[24].mxu1 %v7252_v42  ;;  %v8095_v42 = vld [vmem:[#allocation53_spill] sm:$0xff] }
 0x80a   :  { %5482 = vmatpush1.bf16.msra.mxu0 %v8087_v40  ;;  %5514 = vmatpush1.bf16.msra.mxu1 %v8088_v31  ;;  %v8096_v40 = vld [vmem:[#allocation54_spill] sm:$0xff]  ;;  %v8097_v31 = vld [vmem:[#allocation55_spill] sm:$0xff] }
 0x80b   :  { %5484 = vmatprep.subr.bf16.mxu0 %v8089_v27  ;;  %5516 = vmatprep.subr.bf16.mxu1 %v8090_v48  ;;  %v8098_v27 = vld [vmem:[#allocation56_spill] sm:$0xff]  ;;  %v8099_v48 = vld [vmem:[#allocation57_spill] sm:$0xff] }
 0x80c   :  { %3455 = vmatprep.mubr.f32.mxu0 %v7783_v34  ;;  %3526 = vmatprep.mubr.f32.mxu1 %v7783_v34 }
 0x80e   :  { %5486 = vmatpush1.bf16.msra.mxu0 %v8091_v46  ;;  %5518 = vmatpush1.bf16.msra.mxu1 %v8092_v12  ;;  %v8102_v46 = vld [vmem:[#allocation60_spill] sm:$0xff]  ;;  %v8103_v12 = vld [vmem:[#allocation61_spill] sm:$0xff] }
 0x80f   :  { %5488 = vmatprep.subr.bf16.mxu0 %v8093_v2  ;;  %5520 = vmatprep.subr.bf16.mxu1 %v8094_v26  ;;  %v8104_v2 = vld [vmem:[#allocation62_spill] sm:$0xff]  ;;  %v8105_v26 = vld [vmem:[#allocation63_spill] sm:$0xff] }
 0x812   :  { %5490 = vmatpush1.bf16.msra.mxu0 %v8095_v42  ;;  %5522 = vmatpush1.bf16.msra.mxu1 %v8096_v40  ;;  %v8106_v42 = vld [vmem:[#allocation64_spill] sm:$0xff]  ;;  %v8107_v40 = vld [vmem:[#allocation65_spill] sm:$0xff] }
 0x813   :  { %5492 = vmatprep.subr.bf16.mxu0 %v8097_v31  ;;  %5524 = vmatprep.subr.bf16.mxu1 %v8098_v27  ;;  %v8108_v31 = vld [vmem:[#allocation66_spill] sm:$0xff]  ;;  %v8109_v27 = vld [vmem:[#allocation67_spill] sm:$0xff] }
 0x816   :  { %5494 = vmatpush1.bf16.msra.mxu0 %v8099_v48  ;;  %5526 = vmatpush1.bf16.msra.mxu1 %v8100_v7  ;;  %v8110_v48 = vld [vmem:[#allocation68_spill] sm:$0xff]  ;;  %v8111_v7 = vld [vmem:[#allocation69_spill] sm:$0xff] }
 0x817   :  { %5496 = vmatprep.subr.bf16.mxu0 %v8101_v11  ;;  %5528 = vmatprep.subr.bf16.mxu1 %v8102_v46  ;;  %v8112_v11 = vld [vmem:[#allocation70_spill] sm:$0xff]  ;;  %v8113_v46 = vld [vmem:[#allocation71_spill] sm:$0xff] }
 0x81a   :  { %5498 = vmatpush1.bf16.msra.mxu0 %v8103_v12  ;;  %5530 = vmatpush1.bf16.msra.mxu1 %v8104_v2  ;;  %v8114_v12 = vld [vmem:[#allocation72_spill] sm:$0xff]  ;;  %v8115_v2 = vld [vmem:[#allocation73_spill] sm:$0xff] }
 0x81b   :  { %5500 = vmatprep.subr.bf16.mxu0 %v8105_v26  ;;  %5532 = vmatprep.subr.bf16.mxu1 %v8106_v42  ;;  %v8116_v26 = vld [vmem:[#allocation74_spill] sm:$0xff]  ;;  %v8117_v42 = vld [vmem:[#allocation75_spill] sm:$0xff] }
 0x81e   :  { %5502 = vmatpush1.bf16.msra.mxu0 %v8107_v40  ;;  %5534 = vmatpush1.bf16.msra.mxu1 %v8108_v31  ;;  %v8118_v40 = vld [vmem:[#allocation76_spill] sm:$0xff] }
 0x81f   :  { %5504 = vmatprep.subr.bf16.mxu0 %v8109_v27  ;;  %5536 = vmatprep.subr.bf16.mxu1 %v8110_v48 }
 0x822   :  { %5506 = vmatpush1.bf16.msra.mxu0 %v8111_v7  ;;  %5538 = vmatpush1.bf16.msra.mxu1 %v8112_v11 }
 0x823   :  { %5508 = vmatprep.subr.bf16.mxu0 %v8113_v46  ;;  %5540 = vmatprep.subr.bf16.mxu1 %v8114_v12  ;;  %v8121_v12 = vld [vmem:[#allocation79_spill] sm:$0xff] }
 0x826   :  { %5510 = vmatpush1.bf16.msra.mxu0 %v8115_v2  ;;  %5542 = vmatpush1.bf16.msra.mxu1 %v8116_v26 }
 0x827   :  { %5544 = vmatprep.subr.bf16.mxu0 %v8117_v42  ;;  %5576 = vmatprep.subr.bf16.mxu1 %v8118_v40 }
 0x8bc   :  { %v3112_v31 = vpop.f32.mrb[22].mxu0  ;;  %v3183_v27 = vpop.f32.mrb[22].mxu1 }
 0x8bd   :  { %v3188_v48 = vadd.f32 %v8119_v45, %v3112_v31  ;;  %v3114_v21 = vpop.f32.mrb[23].mxu0  ;;  %v3185_v7 = vpop.f32.mrb[23].mxu1  ;;  %v3190_v2 = vadd.f32 %v8121_v12, %v3183_v27 }
 0x8be   :  { %v3189_v11 = vadd.f32 %v8120_v15, %v3114_v21  ;;  %v3217_v15 = vld [vmem:[#allocation6 + $0xc0] sm:$0xff]  ;;  %v3218_v21 = vld [vmem:[#allocation6 + $0xc8] sm:$0xff] }
 0x8bf   :  { %v4248_v19 = vmul.f32 -1.442695, %v3188_v48 }
 0x8c0   :  { %v4249_v46 = vmul.f32 -1.442695, %v3189_v11 }
 0x8c1   :  { %6016 = vpow2.f32 %v4248_v19 }
 0x8c2   :  { %6018 = vpow2.f32 %v4249_v46 }
 0x8c3   :  { %6020 = vtanh.f32 %v3190_v2 }
 0x8cb   :  { %v6017_v30 = vpop.eup %6016 }
 0x8cc   :  { %v6019_v26 = vpop.eup %6018  ;;  %v3195_v18 = vadd.f32 1.0, %v6017_v30 }
 0x8cd   :  { %v3201_v42 = vadd.f32 1.0, %v6019_v26  ;;  %v6021_v40 = vpop.eup %6020 }
 0x8ce   :  { %6022 = vrcp.f32 %v3195_v18  ;;  %v3220_v18 = vld [vmem:[#allocation6 + $0xd8] sm:$0xff] }
 0x8cf   :  { %6024 = vrcp.f32 %v3201_v42 }
 0x8d8   :  { %v6023_v32 = vpop.eup %6022 }
 0x8d9   :  { %v6025_v45 = vpop.eup %6024  ;;  %v3212_v31 = vmul.f32 %v6023_v32, %v6021_v40 }
 0x8da   :  { %v3211_v55 = vmul.f32 %v6025_v45, %v7245_v24 }
 0x8dc   :  { %v7365_v11 = vadd.f32 %v3212_v31, %v3211_v55  ;;  %v3287_v19 = vpop.f32.mrb[24].mxu0  ;;  %v3358_v46 = vpop.f32.mrb[24].mxu1 }
 0x8dd   :  { %v3363_v12 = vadd.f32 %v3287_v19, %v3217_v15  ;;  %v3289_v27 = vpop.f32.mrb[25].mxu0  ;;  %v3360_v48 = vpop.f32.mrb[25].mxu1  ;;  %v3365_v40 = vadd.f32 %v3358_v46, %v3219_v52  ;;  %v3191_v52 = vadd.f32 %v7129_v10, %v3185_v7 }
 0x8de   :  { %v3364_v30 = vadd.f32 %v3289_v27, %v3218_v21  ;;  %v3366_v42 = vadd.f32 %v3360_v48, %v3220_v18 }
 0x8df   :  { %v4251_v2 = vmul.f32 -1.442695, %v3363_v12 }
 0x8e0   :  { %v4252_v26 = vmul.f32 -1.442695, %v3364_v30  ;;  %v4253_v32 = vmul.f32 -1.442695, %v3366_v42 }
 0x8e1   :  { %6026 = vpow2.f32 %v4251_v2 }
 0x8e2   :  { %6028 = vpow2.f32 %v4252_v26  ;;  %v4250_v26 = vmul.f32 -1.442695, %v3191_v52  ;;  %v8143_v52 = vld [vmem:[#allocation39_spill] sm:$0xff] }
 0x8e3   :  { %6030 = vpow2.f32 %v4253_v32  ;;  %v8128_v32 = vld [vmem:[#allocation29_spill] sm:$0xff] }
 0x8e4   :  { %6032 = vtanh.f32 %v3365_v40  ;;  %v8129_v40 = vld [vmem:[#allocation24_spill] sm:$0xff] }
 0x8eb   :  { %v6027_v24 = vpop.eup %6026 }
 0x8ec   :  { %v6029_v45 = vpop.eup %6028  ;;  %v3370_v1 = vadd.f32 1.0, %v6027_v24  ;;  %v8133_v24 = vld [vmem:[#allocation28_spill] sm:$0xff] }
 0x8ed   :  { %v3376_v55 = vadd.f32 1.0, %v6029_v45  ;;  %v6031_v31 = vpop.eup %6030  ;;  %v8134_v45 = vld [vmem:[#allocation34_spill] sm:$0xff] }
 0x8ee   :  { %6034 = vrcp.f32 %v3370_v1  ;;  %v6033_v15 = vpop.eup %6032  ;;  %v3383_v27 = vadd.f32 1.0, %v6031_v31  ;;  %v8136_v31 = vld [vmem:[#allocation37_spill] sm:$0xff] }
 0x8ef   :  { %6036 = vrcp.f32 %v3376_v55  ;;  %v8135_v55 = vld [vmem:[#allocation31_spill] sm:$0xff] }
 0x8f0   :  { %6038 = vrcp.f32 %v3383_v27  ;;  %v8141_v27 = vld [vmem:[#allocation36_spill] sm:$0xff] }
 0x8f8   :  { %v6035_v21 = vpop.eup %6034 }
 0x8f9   :  { %v6037_v19 = vpop.eup %6036  ;;  %v3387_v12 = vmul.f32 %v6035_v21, %v6033_v15  ;;  %v8137_v15 = vld [vmem:[#allocation32_spill] sm:$0xff]  ;;  %v8138_v21 = vld [vmem:[#allocation38_spill] sm:$0xff] }
 0x8fa   :  { %v3386_v30 = vmul.f32 %v6037_v19, %v7248_v58  ;;  %v6039_v46 = vpop.eup %6038  ;;  %v8139_v19 = vld [vmem:[#allocation35_spill] sm:$0xff] }
 0x8fc   :  { %v7368_v48 = vadd.f32 %v3387_v12, %v3386_v30  ;;  %v8140_v12 = vld [vmem:[#allocation40_spill] sm:$0xff]  ;;  %v8142_v30 = vld [vmem:[#allocation41_spill] sm:$0xff] }
 0x8fe   :  { %6040 = vtanh.f32 %v7368_v48 }
 0x8ff   :  { %6042 = vpow2.f32 %v4250_v26  ;;  %v8146_v26 = vld [vmem:[#allocation44_spill] sm:$0xff] }
 0x900   :  { %6044 = vtanh.f32 %v7365_v11 }
 0x908   :  { %v6041_v2 = vpop.eup %6040 }
 0x909   :  { %v7372_v1 = vmul.f32 %v6041_v2, %v6039_v46  ;;  %v6043_v10 = vpop.eup %6042  ;;  %v8144_v46 = vld [vmem:[#allocation42_spill] sm:$0xff]  ;;  %v8145_v2 = vld [vmem:[#allocation43_spill] sm:$0xff] }
 0x90a   :  { %v3208_v58 = vadd.f32 1.0, %v6043_v10  ;;  %v6045_v7 = vpop.eup %6044  ;;  %v8147_v10 = vld [vmem:[#allocation45_spill] sm:$0xff] }
 0x90b   :  { %3456 = vmatmul.mubr.f32.vlgmr.msra.gmra.mrb[26].mxu0 %v7372_v1  ;;  %3527 = vmatmul.mubr.f32.vlgmr.msra.gmra.mrb[26].mxu1 %v7372_v1 }
 0x90c   :  { %5546 = vmatpush1.bf16.msra.mxu0 %v7825_v13  ;;  %5578 = vmatpush1.bf16.msra.mxu1 %v7826_v49  ;;  %6046 = vrcp.f32 %v3208_v58  ;;  %v8148_v58 = vld [vmem:[#allocation46_spill] sm:$0xff] }
 0x90d   :  { %5548 = vmatprep.subr.bf16.mxu0 %v7827_v60  ;;  %5580 = vmatprep.subr.bf16.mxu1 %v7828_v56 }
 0x90e   :  { %3597 = vmatprep.mubr.f32.mxu0 %v7783_v34  ;;  %3668 = vmatprep.mubr.f32.mxu1 %v7783_v34 }
 0x910   :  { %5550 = vmatpush1.bf16.msra.mxu0 %v7829_v63  ;;  %5582 = vmatpush1.bf16.msra.mxu1 %v7830_v59 }
 0x911   :  { %5552 = vmatprep.subr.bf16.mxu0 %v7831_v28  ;;  %5584 = vmatprep.subr.bf16.mxu1 %v7883_v57 }
 0x914   :  { %5554 = vmatpush1.bf16.msra.mxu0 %v7884_v36  ;;  %5586 = vmatpush1.bf16.msra.mxu1 %v7834_v53 }
 0x915   :  { %5556 = vmatprep.subr.bf16.mxu0 %v7835_v47  ;;  %5588 = vmatprep.subr.bf16.mxu1 %v7836_v44 }
 0x916   :  { %v6047_v18 = vpop.eup %6046 }
 0x917   :  { %v3215_v42 = vmul.f32 %v6047_v18, %v6045_v7  ;;  %v8149_v7 = vld [vmem:[#allocation47_spill] sm:$0xff]  ;;  %v8150_v18 = vld [vmem:[#allocation48_spill] sm:$0xff] }
 0x918   :  { %5558 = vmatpush1.bf16.msra.mxu0 %v7837_v54  ;;  %5590 = vmatpush1.bf16.msra.mxu1 %v7838_v39 }
 0x919   :  { %5560 = vmatprep.subr.bf16.mxu0 %v7839_v20  ;;  %5592 = vmatprep.subr.bf16.mxu1 %v7840_v41 }
 0x91c   :  { %5562 = vmatpush1.bf16.msra.mxu0 %v7841_v61  ;;  %5594 = vmatpush1.bf16.msra.mxu1 %v7842_v5 }
 0x91d   :  { %5564 = vmatprep.subr.bf16.mxu0 %v7885_v62  ;;  %5596 = vmatprep.subr.bf16.mxu1 %v6636_v6 }
 0x920   :  { %5566 = vmatpush1.bf16.msra.mxu0 %v6640_v23  ;;  %5598 = vmatpush1.bf16.msra.mxu1 %v6642_v0 }
 0x921   :  { %5568 = vmatprep.subr.bf16.mxu0 %v6646_v35  ;;  %5600 = vmatprep.subr.bf16.mxu1 %v6648_v51 }
 0x924   :  { %5570 = vmatpush1.bf16.msra.mxu0 %v6652_v50  ;;  %5602 = vmatpush1.bf16.msra.mxu1 %v6654_v16 }
 0x925   :  { %5572 = vmatprep.subr.bf16.mxu0 %v6658_v3  ;;  %5604 = vmatprep.subr.bf16.mxu1 %v6660_v29 }
 0x928   :  { %5574 = vmatpush1.bf16.msra.mxu0 %v6664_v43  ;;  %5606 = vmatpush1.bf16.msra.mxu1 %v6666_v38 }
 0x929   :  { %5608 = vmatprep.subr.bf16.mxu0 %v6371_v4  ;;  %5640 = vmatprep.subr.bf16.mxu1 %v6384_v22  ;;  %v8122_v4 = vld [vmem:[#allocation23_spill] sm:$0xff]  ;;  %v8123_v22 = vld [vmem:[#allocation20_spill] sm:$0xff] }
 0x92b   :  { %3598 = vmatmul.mubr.f32.vlgmr.msra.gmra.mrb[26].mxu0 %v3215_v42  ;;  %3669 = vmatmul.mubr.f32.vlgmr.msra.gmra.mrb[26].mxu1 %v3215_v42  ;;  %v8151_v42 = vld [vmem:[#allocation49_spill] sm:$0xff] }
 0x92c   :  { %5610 = vmatpush1.bf16.msra.mxu0 %v6373_v8  ;;  %5642 = vmatpush1.bf16.msra.mxu1 %v6386_v25  ;;  %v8124_v8 = vld [vmem:[#allocation25_spill] sm:$0xff] }
 0x92d   :  { %5612 = vmatprep.subr.bf16.mxu0 %v6375_v9  ;;  %5644 = vmatprep.subr.bf16.mxu1 %v6396_v33  ;;  %v8125_v25 = vld [vmem:[#allocation21_spill] sm:$0xff]  ;;  %v8126_v9 = vld [vmem:[#allocation26_spill] sm:$0xff] }
 0x92e   :  { %3772 = vmatprep.mubr.f32.mxu0 %v7783_v34  ;;  %3843 = vmatprep.mubr.f32.mxu1 %v7783_v34  ;;  %v8127_v33 = vld [vmem:[#allocation22_spill] sm:$0xff] }
 0x930   :  { %5614 = vmatpush1.bf16.msra.mxu0 %v6379_v14  ;;  %5646 = vmatpush1.bf16.msra.mxu1 %v6398_v37  ;;  %v8130_v14 = vld [vmem:[#allocation30_spill] sm:$0xff]  ;;  %v8131_v37 = vld [vmem:[#allocation27_spill] sm:$0xff] }
 0x931   :  { %5616 = vmatprep.subr.bf16.mxu0 %v6382_v17  ;;  %5648 = vmatprep.subr.bf16.mxu1 %v8122_v4  ;;  %v8132_v17 = vld [vmem:[#allocation33_spill] sm:$0xff]  ;;  %v8152_v4 = vld [vmem:[#allocation50_spill] sm:$0xff] }
 0x934   :  { %5618 = vmatpush1.bf16.msra.mxu0 %v8123_v22  ;;  %5650 = vmatpush1.bf16.msra.mxu1 %v8124_v8  ;;  %v8153_v22 = vld [vmem:[#allocation51_spill] sm:$0xff]  ;;  %v8154_v8 = vld [vmem:[#allocation52_spill] sm:$0xff] }
 0x935   :  { %5620 = vmatprep.subr.bf16.mxu0 %v8125_v25  ;;  %5652 = vmatprep.subr.bf16.mxu1 %v8126_v9  ;;  %v8156_v25 = vld [vmem:[#allocation54_spill] sm:$0xff]  ;;  %v8157_v9 = vld [vmem:[#allocation55_spill] sm:$0xff] }
 0x938   :  { %5622 = vmatpush1.bf16.msra.mxu0 %v8127_v33  ;;  %5654 = vmatpush1.bf16.msra.mxu1 %v8128_v32  ;;  %v8158_v33 = vld [vmem:[#allocation56_spill] sm:$0xff]  ;;  %v8159_v32 = vld [vmem:[#allocation57_spill] sm:$0xff] }
 0x939   :  { %5624 = vmatprep.subr.bf16.mxu0 %v8129_v40  ;;  %5656 = vmatprep.subr.bf16.mxu1 %v8130_v14  ;;  %v8160_v40 = vld [vmem:[#allocation58_spill] sm:$0xff]  ;;  %v8161_v14 = vld [vmem:[#allocation59_spill] sm:$0xff] }
 0x93c   :  { %5626 = vmatpush1.bf16.msra.mxu0 %v8131_v37  ;;  %5658 = vmatpush1.bf16.msra.mxu1 %v8132_v17  ;;  %v8162_v37 = vld [vmem:[#allocation60_spill] sm:$0xff]  ;;  %v8163_v17 = vld [vmem:[#allocation61_spill] sm:$0xff] }
 0x93d   :  { %5628 = vmatprep.subr.bf16.mxu0 %v8133_v24  ;;  %5660 = vmatprep.subr.bf16.mxu1 %v8134_v45  ;;  %v8164_v24 = vld [vmem:[#allocation62_spill] sm:$0xff]  ;;  %v8165_v45 = vld [vmem:[#allocation63_spill] sm:$0xff] }
 0x940   :  { %5630 = vmatpush1.bf16.msra.mxu0 %v8135_v55  ;;  %5662 = vmatpush1.bf16.msra.mxu1 %v8136_v31  ;;  %v8166_v55 = vld [vmem:[#allocation64_spill] sm:$0xff]  ;;  %v8167_v31 = vld [vmem:[#allocation65_spill] sm:$0xff] }
 0x941   :  { %5632 = vmatprep.subr.bf16.mxu0 %v8137_v15  ;;  %5664 = vmatprep.subr.bf16.mxu1 %v8138_v21  ;;  %v8168_v15 = vld [vmem:[#allocation66_spill] sm:$0xff]  ;;  %v8169_v21 = vld [vmem:[#allocation67_spill] sm:$0xff] }
 0x944   :  { %5634 = vmatpush1.bf16.msra.mxu0 %v8139_v19  ;;  %5666 = vmatpush1.bf16.msra.mxu1 %v8140_v12  ;;  %v8170_v19 = vld [vmem:[#allocation68_spill] sm:$0xff]  ;;  %v8171_v12 = vld [vmem:[#allocation69_spill] sm:$0xff] }
 0x945   :  { %5636 = vmatprep.subr.bf16.mxu0 %v8141_v27  ;;  %5668 = vmatprep.subr.bf16.mxu1 %v8142_v30  ;;  %v8172_v27 = vld [vmem:[#allocation70_spill] sm:$0xff]  ;;  %v8173_v30 = vld [vmem:[#allocation71_spill] sm:$0xff] }
 0x948   :  { %5638 = vmatpush1.bf16.msra.mxu0 %v8143_v52  ;;  %5670 = vmatpush1.bf16.msra.mxu1 %v8144_v46  ;;  %v8174_v52 = vld [vmem:[#allocation72_spill] sm:$0xff]  ;;  %v8175_v46 = vld [vmem:[#allocation73_spill] sm:$0xff] }
 0x949   :  { %5672 = vmatprep.subr.bf16.mxu0 %v8145_v2  ;;  %5704 = vmatprep.subr.bf16.mxu1 %v8146_v26  ;;  %v8176_v2 = vld [vmem:[#allocation74_spill] sm:$0xff]  ;;  %v8177_v26 = vld [vmem:[#allocation75_spill] sm:$0xff] }
 0x94b   :  { %3773 = vmatmul.mubr.f32.vlgmr.msra.gmra.mrb[28].mxu0 %v7372_v1  ;;  %3844 = vmatmul.mubr.f32.vlgmr.msra.gmra.mrb[28].mxu1 %v7372_v1  ;;  %v8155_v1 = vld [vmem:[#allocation53_spill] sm:$0xff] }
 0x94c   :  { %5674 = vmatpush1.bf16.msra.mxu0 %v8147_v10  ;;  %5706 = vmatpush1.bf16.msra.mxu1 %v8148_v58  ;;  %v8178_v10 = vld [vmem:[#allocation76_spill] sm:$0xff] }
 0x94d   :  { %5676 = vmatprep.subr.bf16.mxu0 %v8149_v7  ;;  %5708 = vmatprep.subr.bf16.mxu1 %v8150_v18  ;;  %v7481_v18 = vld [vmem:[#allocation14] sm:$0xff] }
 0x94e   :  { %3942 = vmatprep.mubr.f32.mxu0 %v7783_v34  ;;  %4013 = vmatprep.mubr.f32.mxu1 %v7783_v34 }
 0x950   :  { %5678 = vmatpush1.bf16.msra.mxu0 %v8151_v42  ;;  %5710 = vmatpush1.bf16.msra.mxu1 %v8152_v4 }
 0x951   :  { %5680 = vmatprep.subr.bf16.mxu0 %v8153_v22  ;;  %5712 = vmatprep.subr.bf16.mxu1 %v8154_v8  ;;  %v7484_v8 = vld [vmem:[#allocation14 + $0x8] sm:$0xff] }
 0x954   :  { %5682 = vmatpush1.bf16.msra.mxu0 %v8155_v1  ;;  %5714 = vmatpush1.bf16.msra.mxu1 %v8156_v25 }
 0x955   :  { %5684 = vmatprep.subr.bf16.mxu0 %v8157_v9  ;;  %5716 = vmatprep.subr.bf16.mxu1 %v8158_v33  ;;  %v7487_v33 = vld [vmem:[#allocation14 + $0x10] sm:$0xff] }
 0x958   :  { %5686 = vmatpush1.bf16.msra.mxu0 %v8159_v32  ;;  %5718 = vmatpush1.bf16.msra.mxu1 %v8160_v40 }
 0x959   :  { %5688 = vmatprep.subr.bf16.mxu0 %v8161_v14  ;;  %5720 = vmatprep.subr.bf16.mxu1 %v8162_v37 }
 0x95c   :  { %5690 = vmatpush1.bf16.msra.mxu0 %v8163_v17  ;;  %5722 = vmatpush1.bf16.msra.mxu1 %v8164_v24 }
 0x95d   :  { %5692 = vmatprep.subr.bf16.mxu0 %v8165_v45  ;;  %5724 = vmatprep.subr.bf16.mxu1 %v8166_v55 }
 0x960   :  { %5694 = vmatpush1.bf16.msra.mxu0 %v8167_v31  ;;  %5726 = vmatpush1.bf16.msra.mxu1 %v8168_v15 }
 0x961   :  { %5696 = vmatprep.subr.bf16.mxu0 %v8169_v21  ;;  %5728 = vmatprep.subr.bf16.mxu1 %v8170_v19  ;;  %v3704_v21 = vld [vmem:[#allocation6 + $0xe0] sm:$0xff]  ;;  %v3705_v19 = vld [vmem:[#allocation6 + $0xe8] sm:$0xff] }
 0x964   :  { %5698 = vmatpush1.bf16.msra.mxu0 %v8171_v12  ;;  %5730 = vmatpush1.bf16.msra.mxu1 %v8172_v27 }
 0x965   :  { %5700 = vmatprep.subr.bf16.mxu0 %v8173_v30  ;;  %5732 = vmatprep.subr.bf16.mxu1 %v8174_v52 }
 0x968   :  { %5702 = vmatpush1.bf16.msra.mxu0 %v8175_v46  ;;  %5734 = vmatpush1.bf16.msra.mxu1 %v8176_v2 }
 0x969   :  { %5736 = vmatprep.subr.bf16.mxu0 %v8177_v26  ;;  %5768 = vmatprep.subr.bf16.mxu1 %v8178_v10 }
 0x9fe   :  { %v3599_v58 = vpop.f32.mrb[26].mxu0  ;;  %v3670_v7 = vpop.f32.mrb[26].mxu1 }
 0x9ff   :  { %v3675_v42 = vadd.f32 %v7481_v18, %v3599_v58  ;;  %v3601_v4 = vpop.f32.mrb[27].mxu0  ;;  %v3672_v22 = vpop.f32.mrb[27].mxu1  ;;  %v3677_v32 = vadd.f32 %v7487_v33, %v3670_v7  ;;  %v3707_v7 = vld [vmem:[#allocation6 + $0xf8] sm:$0xff] }
 0xa00   :  { %v3676_v1 = vadd.f32 %v7484_v8, %v3601_v4  ;;  %v3706_v4 = vld [vmem:[#allocation6 + $0xf0] sm:$0xff] }
 0xa01   :  { %v4254_v25 = vmul.f32 -1.442695, %v3675_v42 }
 0xa02   :  { %v4255_v9 = vmul.f32 -1.442695, %v3676_v1 }
 0xa03   :  { %6048 = vpow2.f32 %v4254_v25 }
 0xa04   :  { %6050 = vpow2.f32 %v4255_v9 }
 0xa05   :  { %6052 = vtanh.f32 %v3677_v32 }
 0xa0d   :  { %v6049_v40 = vpop.eup %6048 }
 0xa0e   :  { %v6051_v14 = vpop.eup %6050  ;;  %v3682_v37 = vadd.f32 1.0, %v6049_v40 }
 0xa0f   :  { %v3688_v17 = vadd.f32 1.0, %v6051_v14  ;;  %v6053_v24 = vpop.eup %6052 }
 0xa10   :  { %6054 = vrcp.f32 %v3682_v37 }
 0xa11   :  { %6056 = vrcp.f32 %v3688_v17 }
 0xa1a   :  { %v6055_v45 = vpop.eup %6054 }
 0xa1b   :  { %v6057_v55 = vpop.eup %6056  ;;  %v3699_v31 = vmul.f32 %v6055_v45, %v6053_v24 }
 0xa1c   :  { %v3698_v15 = vmul.f32 %v6057_v55, %v7365_v11 }
 0xa1e   :  { %v7491_v12 = vadd.f32 %v3699_v31, %v3698_v15  ;;  %v3774_v27 = vpop.f32.mrb[28].mxu0  ;;  %v3845_v30 = vpop.f32.mrb[28].mxu1 }
 0xa1f   :  { %v3850_v52 = vadd.f32 %v3774_v27, %v3704_v21  ;;  %v3776_v46 = vpop.f32.mrb[29].mxu0  ;;  %v3847_v2 = vpop.f32.mrb[29].mxu1  ;;  %v3852_v25 = vadd.f32 %v3845_v30, %v3706_v4  ;;  %v6103_v21 = vld [vmem:[#allocation14 + $0x18] sm:$0xff] }
 0xa20   :  { %v3851_v26 = vadd.f32 %v3776_v46, %v3705_v19  ;;  %v3853_v42 = vadd.f32 %v3847_v2, %v3707_v7  ;;  %v3678_v19 = vadd.f32 %v6103_v21, %v3672_v22 }
 0xa21   :  { %v4257_v10 = vmul.f32 -1.442695, %v3850_v52 }
 0xa22   :  { %v4258_v58 = vmul.f32 -1.442695, %v3851_v26  ;;  %v4259_v1 = vmul.f32 -1.442695, %v3853_v42  ;;  %v4256_v52 = vmul.f32 -1.442695, %v3678_v19 }
 0xa23   :  { %6058 = vpow2.f32 %v4257_v10 }
 0xa24   :  { %6060 = vpow2.f32 %v4258_v58 }
 0xa25   :  { %6062 = vpow2.f32 %v4259_v1 }
 0xa26   :  { %6064 = vtanh.f32 %v3852_v25 }
 0xa2d   :  { %v6059_v11 = vpop.eup %6058 }
 0xa2e   :  { %v6061_v9 = vpop.eup %6060  ;;  %v3857_v32 = vadd.f32 1.0, %v6059_v11 }
 0xa2f   :  { %v3863_v40 = vadd.f32 1.0, %v6061_v9  ;;  %v6063_v14 = vpop.eup %6062 }
 0xa30   :  { %6066 = vrcp.f32 %v3857_v32  ;;  %v6065_v37 = vpop.eup %6064  ;;  %v3870_v55 = vadd.f32 1.0, %v6063_v14 }
 0xa31   :  { %6068 = vrcp.f32 %v3863_v40 }
 0xa32   :  { %6070 = vrcp.f32 %v3870_v55 }
 0xa3a   :  { %v6067_v17 = vpop.eup %6066 }
 0xa3b   :  { %v6069_v24 = vpop.eup %6068  ;;  %v3874_v45 = vmul.f32 %v6067_v17, %v6065_v37 }
 0xa3c   :  { %v3873_v31 = vmul.f32 %v6069_v24, %v7368_v48  ;;  %v6071_v27 = vpop.eup %6070 }
 0xa3e   :  { %v3875_v15 = vadd.f32 %v3874_v45, %v3873_v31 }
 0xa40   :  { %6072 = vtanh.f32 %v3875_v15 }
 0xa41   :  { %6074 = vpow2.f32 %v4256_v52 }
 0xa42   :  { %6076 = vtanh.f32 %v7491_v12 }
 0xa4a   :  { %v6073_v30 = vpop.eup %6072 }
 0xa4b   :  { %v3877_v46 = vmul.f32 %v6073_v30, %v6071_v27 }
 0xa4d   :  { %3943 = vmatmul.mubr.f32.vlgmr.msra.gmra.mrb[30].mxu0 %v3877_v46  ;;  %4014 = vmatmul.mubr.f32.vlgmr.msra.gmra.mrb[30].mxu1 %v3877_v46 }
 0xa4e   :  { %5738 = vmatpush1.bf16.msra.mxu0 %v7825_v13  ;;  %5770 = vmatpush1.bf16.msra.mxu1 %v7826_v49  ;;  %v6075_v13 = vpop.eup %6074 }
 0xa4f   :  { %5740 = vmatprep.subr.bf16.mxu0 %v7827_v60  ;;  %5772 = vmatprep.subr.bf16.mxu1 %v7828_v56  ;;  %v6077_v49 = vpop.eup %6076 }
 0xa50   :  { %4084 = vmatprep.mubr.f32.mxu0 %v7783_v34  ;;  %4155 = vmatprep.mubr.f32.mxu1 %v7783_v34  ;;  %v3695_v34 = vadd.f32 1.0, %v6075_v13 }
 0xa52   :  { %5742 = vmatpush1.bf16.msra.mxu0 %v7829_v63  ;;  %5774 = vmatpush1.bf16.msra.mxu1 %v7830_v59  ;;  %6078 = vrcp.f32 %v3695_v34 }
 0xa53   :  { %5744 = vmatprep.subr.bf16.mxu0 %v7831_v28  ;;  %5776 = vmatprep.subr.bf16.mxu1 %v7883_v57 }
 0xa56   :  { %5746 = vmatpush1.bf16.msra.mxu0 %v7884_v36  ;;  %5778 = vmatpush1.bf16.msra.mxu1 %v7834_v53 }
 0xa57   :  { %5748 = vmatprep.subr.bf16.mxu0 %v7835_v47  ;;  %5780 = vmatprep.subr.bf16.mxu1 %v7836_v44 }
 0xa5a   :  { %5750 = vmatpush1.bf16.msra.mxu0 %v7837_v54  ;;  %5782 = vmatpush1.bf16.msra.mxu1 %v7838_v39 }
 0xa5b   :  { %5752 = vmatprep.subr.bf16.mxu0 %v7839_v20  ;;  %5784 = vmatprep.subr.bf16.mxu1 %v7840_v41 }
 0xa5c   :  { %v6079_v60 = vpop.eup %6078 }
 0xa5e   :  { %5754 = vmatpush1.bf16.msra.mxu0 %v7841_v61  ;;  %5786 = vmatpush1.bf16.msra.mxu1 %v7842_v5 }
 0xa5f   :  { %5756 = vmatprep.subr.bf16.mxu0 %v7885_v62  ;;  %5788 = vmatprep.subr.bf16.mxu1 %v6636_v6  ;;  %v3702_v6 = vmul.f32 %v6079_v60, %v6077_v49 }
 0xa62   :  { %5758 = vmatpush1.bf16.msra.mxu0 %v6640_v23  ;;  %5790 = vmatpush1.bf16.msra.mxu1 %v6642_v0 }
 0xa63   :  { %5760 = vmatprep.subr.bf16.mxu0 %v6646_v35  ;;  %5792 = vmatprep.subr.bf16.mxu1 %v6648_v51 }
 0xa66   :  { %5762 = vmatpush1.bf16.msra.mxu0 %v6652_v50  ;;  %5794 = vmatpush1.bf16.msra.mxu1 %v6654_v16 }
 0xa67   :  { %5764 = vmatprep.subr.bf16.mxu0 %v6658_v3  ;;  %5796 = vmatprep.subr.bf16.mxu1 %v6660_v29 }
 0xa6a   :  { %5766 = vmatpush1.bf16.msra.mxu0 %v6664_v43  ;;  %5798 = vmatpush1.bf16.msra.mxu1 %v6666_v38 }
 0xa6d   :  { %4085 = vmatmul.mubr.f32.vlgmr.msra.gmra.mrb[30].mxu0 %v3702_v6  ;;  %4156 = vmatmul.mubr.f32.vlgmr.msra.gmra.mrb[30].mxu1 %v3702_v6 }
 0xb40   :  { %v4086_v23 = vpop.f32.mrb[30].mxu0  ;;  %v4157_v0 = vpop.f32.mrb[30].mxu1 }
 0xb41   :  { %v4162_v35 = vadd.f32 %v7481_v18, %v4086_v23  ;;  %v4088_v51 = vpop.f32.mrb[31].mxu0  ;;  %v4159_v50 = vpop.f32.mrb[31].mxu1  ;;  %v4164_v43 = vadd.f32 %v7487_v33, %v4157_v0 }
 0xb42   :  { %v4163_v16 = vadd.f32 %v7484_v8, %v4088_v51  ;;  %v4165_v29 = vadd.f32 %v6103_v21, %v4159_v50 }
 0xb43   :  { %v4260_v3 = vmul.f32 -1.442695, %v4162_v35 }
 0xb44   :  { %v4261_v56 = vmul.f32 -1.442695, %v4163_v16  ;;  %v4262_v63 = vmul.f32 -1.442695, %v4165_v29 }
 0xb45   :  { %6080 = vpow2.f32 %v4260_v3 }
 0xb46   :  { %6082 = vpow2.f32 %v4261_v56 }
 0xb47   :  { %6084 = vpow2.f32 %v4262_v63 }
 0xb48   :  { %6086 = vtanh.f32 %v4164_v43 }
 0xb4f   :  { %v6081_v38 = vpop.eup %6080 }
 0xb50   :  { %v6083_v59 = vpop.eup %6082  ;;  %v4169_v28 = vadd.f32 1.0, %v6081_v38 }
 0xb51   :  { %v4175_v61 = vadd.f32 1.0, %v6083_v59  ;;  %v6085_v5 = vpop.eup %6084 }
 0xb52   :  { %6088 = vrcp.f32 %v4169_v28  ;;  %v6087_v53 = vpop.eup %6086  ;;  %v4182_v39 = vadd.f32 1.0, %v6085_v5 }
 0xb53   :  { %6090 = vrcp.f32 %v4175_v61 }
 0xb54   :  { %6092 = vrcp.f32 %v4182_v39 }
 0xb5c   :  { %v6089_v47 = vpop.eup %6088 }
 0xb5d   :  { %v6091_v44 = vpop.eup %6090  ;;  %v4186_v54 = vmul.f32 %v6089_v47, %v6087_v53 }
 0xb5e   :  { %v4185_v20 = vmul.f32 %v6091_v44, %v7491_v12  ;;  %v6093_v57 = vpop.eup %6092 }
 0xb60   :  { %v4187_v41 = vadd.f32 %v4186_v54, %v4185_v20 }
 0xb62   :  { %6094 = vtanh.f32 %v4187_v41 }
 0xb6c   :  { %v6095_v36 = vpop.eup %6094 }
 0xb6d   :  { %v4189_v62 = vmul.f32 %v6095_v36, %v6093_v57 }
 0xb6f   :  { %4197 = vst [vmem:[#allocation15] sm:$0xff] %v4189_v62 }
 0xb70   :  { %6225 = shalt.err (!%p6222_p2)
}
 0xb71   :  { %s6226_s3 = scalar_lea.hbm %s7548_s5, 128 }
 0xb72   :  { %p6227_p3 = scmp.ne.s32.totalorder %s7548_s5, %s6226_s3  ;;  %p6230_p4 = scmp.lt.u32.totalorder %s6226_s3, %s7548_s5 }
 0xb74   :  { %p6232_p5 = pnand %p6230_p4, %p6227_p3 }
 0xb76   :  { %6235 = shalt.err (!%p6232_p5)
}
 0xb77   :  { %4207 = dma.vmem_to_hbm [thread:$0]  %s4205_s6, 128, %s7548_s5, [#allocation8]  }
 0xb78   :  { %6242 = dma.done.wait [#allocation8], 128  }
 0xb79   :  { %6243 = vsyncadd [#allocation8], 4294967168 }
 0xb7a   :  { %4211 = vsyncpa [#allocation7], 1 }
 0xb7b   :  { %4212 = vsyncpa [#allocation10], 1 }
 0xb7c   :  { %4213 = vsyncpa [#allocation13], 1 }
 0xb7d   :  { %4214 = vsyncpa [#allocation8], 1 }

</bundles_post_ra>
